<compile_context>
chip_gen: v7x
topology: tpu7x:2x2x1
jax: 0.10.0
libtpu: 0.0.40
codegen_flags: <defaults>
</compile_context>

<pallas_src>
import jax
import jax.numpy as jnp
from jax.experimental import pallas as pl
from jax.experimental.pallas import tpu as pltpu


def _round_up(x, m):
    return (x + m - 1) // m * m


# ----------------------------------------------------------------------------
# Pallas kernel: full multi-layer LSTM, single invocation (no grid)
# ----------------------------------------------------------------------------
def _encoder_lstm_kernel(x_ref, w_ref, b_ref, h_n_ref, c_n_ref, act_sc):
    """Fused multi-layer LSTM over a padded, time-major sequence.

    x_ref   : (T, Bp, Dmax)       padded embedded inputs (f32, VMEM)
    w_ref   : (L, Dmax+Hp, 4*Hp)  per-layer fused [W_ih^T ; W_hh^T]; each gate
                                  occupies its own 128-lane-aligned Hp slot
    b_ref   : (L, 1, 4*Hp)        per-layer fused bias (b_ih + b_hh), padded
    h_n_ref : (L, Bp, Hp)         final hidden state per layer
    c_n_ref : (L, Bp, Hp)         final cell state per layer
    act_sc  : (T, Bp, Dmax)       VMEM scratch: current layer's input sequence,
                                  overwritten in place with the layer's output
                                  to feed the next layer (no HBM round-trip)
    """
    n_layers = w_ref.shape[0]
    T, Bp, Dmax = x_ref.shape
    Hp = h_n_ref.shape[2]

    # Layer-0 input = embedded tokens.
    act_sc[...] = x_ref[...]

    for l in range(n_layers):  # static unroll over layers (n_layers is small)
        # Bias broadcast hoisted out of the time loop (JAX does not CSE it).
        bias = jnp.broadcast_to(b_ref[l], (Bp, 4 * Hp))

        def step(t, carry, l=l, bias=bias):
            h, c = carry
            x_t = act_sc[t]                                   # (Bp, Dmax)
            xh = jnp.concatenate([x_t, h], axis=-1)           # (Bp, Dmax+Hp)
            # Single fused MXU matmul per time step.
            gates = jnp.dot(xh, w_ref[l],
                            preferred_element_type=jnp.float32) + bias
            i_g = jax.nn.sigmoid(gates[:, 0 * Hp:1 * Hp])     # input gate
            f_g = jax.nn.sigmoid(gates[:, 1 * Hp:2 * Hp])     # forget gate
            g_g = jnp.tanh(gates[:, 2 * Hp:3 * Hp])           # cell candidate
            o_g = jax.nn.sigmoid(gates[:, 3 * Hp:4 * Hp])     # output gate
            c_new = f_g * c + i_g * g_g
            h_new = o_g * jnp.tanh(c_new)
            # Overwrite this step's input slab with the layer output so the
            # next layer reads it straight from VMEM.
            if Dmax > Hp:
                act_sc[t] = jnp.concatenate(
                    [h_new, jnp.zeros((Bp, Dmax - Hp), jnp.float32)], axis=-1)
            else:
                act_sc[t] = h_new
            return (h_new, c_new)

        h0 = jnp.zeros((Bp, Hp), jnp.float32)   # PyTorch default: zero init
        c0 = jnp.zeros((Bp, Hp), jnp.float32)
        # Short fixed trip count -> full unroll gives the scheduler visibility
        # across time steps.
        h_fin, c_fin = jax.lax.fori_loop(0, T, step, (h0, c0),
                                         unroll=(T <= 32))
        # Final states written once per layer (not every time step).
        h_n_ref[l] = h_fin
        c_n_ref[l] = c_fin


# ----------------------------------------------------------------------------
# Host-side weight packing: PyTorch layout -> fused, lane-padded layout
# ----------------------------------------------------------------------------
def _pack_lstm_params(lstm_layers, embedding_size, hidden_size):
    H = hidden_size
    Hp = _round_up(H, 128)
    Ep = _round_up(embedding_size, 128)
    Dmax = max(Ep, Hp)

    ws, bs = [], []
    for l, layer in enumerate(lstm_layers):
        din = embedding_size if l == 0 else H
        wih_t = layer["w_ih"].T.astype(jnp.float32)            # (din, 4H)
        whh_t = layer["w_hh"].T.astype(jnp.float32)            # (H,   4H)
        b = (layer["b_ih"] + layer["b_hh"]).astype(jnp.float32)  # (4H,)

        wc = jnp.zeros((Dmax + Hp, 4 * Hp), jnp.float32)
        bc = jnp.zeros((4 * Hp,), jnp.float32)
        for g in range(4):  # PyTorch gate order: i, f, g, o
            wc = wc.at[:din, g * Hp:g * Hp + H].set(
                wih_t[:, g * H:(g + 1) * H])
            wc = wc.at[Dmax:Dmax + H, g * Hp:g * Hp + H].set(
                whh_t[:, g * H:(g + 1) * H])
            bc = bc.at[g * Hp:g * Hp + H].set(b[g * H:(g + 1) * H])
        ws.append(wc)
        bs.append(bc.reshape(1, 4 * Hp))
    return jnp.stack(ws), jnp.stack(bs), Hp, Dmax


# ----------------------------------------------------------------------------
# Encoder: parameters + forward
# ----------------------------------------------------------------------------
def init_encoder_params(key, input_size, embedding_size, hidden_size, n_layers):
    """Deterministic synthetic parameters matching nn.Embedding / nn.LSTM shapes."""
    keys = jax.random.split(key, 1 + 4 * n_layers)
    params = {
        "embedding": jax.random.normal(
            keys[0], (input_size, embedding_size), dtype=jnp.float32)
    }
    k = 1.0 / jnp.sqrt(jnp.float32(hidden_size))
    layers = []
    for l in range(n_layers):
        din = embedding_size if l == 0 else hidden_size
        kw = keys[1 + 4 * l: 1 + 4 * (l + 1)]
        layers.append({
            "w_ih": jax.random.uniform(kw[0], (4 * hidden_size, din),
                                       minval=-k, maxval=k, dtype=jnp.float32),
            "w_hh": jax.random.uniform(kw[1], (4 * hidden_size, hidden_size),
                                       minval=-k, maxval=k, dtype=jnp.float32),
            "b_ih": jax.random.uniform(kw[2], (4 * hidden_size,),
                                       minval=-k, maxval=k, dtype=jnp.float32),
            "b_hh": jax.random.uniform(kw[3], (4 * hidden_size,),
                                       minval=-k, maxval=k, dtype=jnp.float32),
        })
    params["lstm"] = layers
    return params


@jax.jit
def encoder_forward(params, x_tokens):
    """x_tokens: (T, B) int32 token ids (time-major, like nn.LSTM default).
    Returns (h_n, c_n), each (n_layers, B, H) — matches the module's output."""
    emb = jnp.take(params["embedding"], x_tokens, axis=0)   # (T, B, E) gather
    # nn.Dropout in eval / inference mode is the identity.
    # TODO(synk): training-mode dropout mask (p=pr_dropout) not implemented.

    T, B, E = emb.shape
    n_layers = len(params["lstm"])
    H = params["lstm"][0]["w_hh"].shape[1]

    W, bias, Hp, Dmax = _pack_lstm_params(params["lstm"], E, H)
    Bp = _round_up(B, 8)

    x_pad = jnp.zeros((T, Bp, Dmax), jnp.float32)
    x_pad = x_pad.at[:, :B, :E].set(emb.astype(jnp.float32))

    h_n_p, c_n_p = pl.pallas_call(
        _encoder_lstm_kernel,
        out_shape=(
            jax.ShapeDtypeStruct((n_layers, Bp, Hp), jnp.float32),
            jax.ShapeDtypeStruct((n_layers, Bp, Hp), jnp.float32),
        ),
        in_specs=[
            pl.BlockSpec(memory_space=pltpu.MemorySpace.VMEM),   # x_pad
            pl.BlockSpec(memory_space=pltpu.MemorySpace.VMEM),   # fused weights
            pl.BlockSpec(memory_space=pltpu.MemorySpace.VMEM),   # fused bias
        ],
        out_specs=(
            pl.BlockSpec(memory_space=pltpu.MemorySpace.VMEM),
            pl.BlockSpec(memory_space=pltpu.MemorySpace.VMEM),
        ),
        scratch_shapes=[pltpu.VMEM((T, Bp, Dmax), jnp.float32)],
    )(x_pad, W, bias)

    return h_n_p[:, :B, :H], c_n_p[:, :B, :H]


# ----------------------------------------------------------------------------
# Plain-JAX reference (for numerical parity check)
# ----------------------------------------------------------------------------
def _encoder_forward_ref(params, x_tokens):
    emb = jnp.take(params["embedding"], x_tokens, axis=0).astype(jnp.float32)
    layer_in = emb
    hs, cs = [], []
    for layer in params["lstm"]:
        H = layer["w_hh"].shape[1]
        B = layer_in.shape[1]
        w_ih_t = layer["w_ih"].T
        w_hh_t = layer["w_hh"].T
        b = layer["b_ih"] + layer["b_hh"]

        def step(carry, x_t, w_ih_t=w_ih_t, w_hh_t=w_hh_t, b=b, H=H):
            h, c = carry
            gates = (jnp.dot(x_t, w_ih_t, precision=jax.lax.Precision.HIGHEST)
                     + jnp.dot(h, w_hh_t, precision=jax.lax.Precision.HIGHEST)
                     + b)
            i_g = jax.nn.sigmoid(gates[:, 0 * H:1 * H])
            f_g = jax.nn.sigmoid(gates[:, 1 * H:2 * H])
            g_g = jnp.tanh(gates[:, 2 * H:3 * H])
            o_g = jax.nn.sigmoid(gates[:, 3 * H:4 * H])
            c_new = f_g * c + i_g * g_g
            h_new = o_g * jnp.tanh(c_new)
            return (h_new, c_new), h_new

        init = (jnp.zeros((B, H), jnp.float32), jnp.zeros((B, H), jnp.float32))
        (h_f, c_f), y = jax.lax.scan(step, init, layer_in)
        hs.append(h_f)
        cs.append(c_f)
        layer_in = y
    return jnp.stack(hs), jnp.stack(cs)


if __name__ == "__main__":
    # Small shapes consistent with the module's forward.
    input_size = 50        # vocab
    embedding_size = 16
    hidden_size = 32
    n_layers = 2
    seq_len = 8
    batch = 2

    key = jax.random.PRNGKey(0)
    pkey, xkey = jax.random.split(key)

    params = init_encoder_params(pkey, input_size, embedding_size,
                                 hidden_size, n_layers)
    x = jax.random.randint(xkey, (seq_len, batch), 0, input_size,
                           dtype=jnp.int32)

    h_n, c_n = encoder_forward(params, x)
    jax.block_until_ready((h_n, c_n))

    assert h_n.shape == (n_layers, batch, hidden_size)
    assert c_n.shape == (n_layers, batch, hidden_size)

    # Numerical parity with the plain-JAX reference of the same module.
    h_ref, c_ref = _encoder_forward_ref(params, x)
    assert jnp.allclose(h_n, h_ref, atol=2e-3, rtol=2e-3)
    assert jnp.allclose(c_n, c_ref, atol=2e-3, rtol=2e-3)

    print("KERNEL_OK")
</pallas_src>

<mosaic_0001>
module attributes {stable_mosaic.version = 11 : i64} {
  func.func @_encoder_lstm_kernel(%arg0: memref<8x8x128xf32, #tpu.memory_space<vmem>>, %arg1: memref<2x256x512xf32, #tpu.memory_space<vmem>>, %arg2: memref<2x1x512xf32, #tpu.memory_space<vmem>>, %arg3: memref<2x8x128xf32, #tpu.memory_space<vmem>>, %arg4: memref<2x8x128xf32, #tpu.memory_space<vmem>>, %arg5: memref<8x8x128xf32, #tpu.memory_space<vmem>>) attributes {dimension_semantics = [], scalar_prefetch = 0 : i64, scratch_operands = 1 : i64, tpu.core_type = #tpu.core_type<tc>} {
    %c0 = arith.constant 0 : index
    %c0_0 = arith.constant 0 : index
    %c0_1 = arith.constant 0 : index
    %0 = vector.load %arg0[%c0, %c0_0, %c0_1] : memref<8x8x128xf32, #tpu.memory_space<vmem>>, vector<8x8x128xf32>
    %c0_2 = arith.constant 0 : index
    %c0_3 = arith.constant 0 : index
    %c0_4 = arith.constant 0 : index
    %1 = vector.load %arg5[%c0_2, %c0_3, %c0_4] : memref<8x8x128xf32, #tpu.memory_space<vmem>>, vector<8x8x128xf32>
    tpu.vector_store %arg5[%c0_2, %c0_3, %c0_4], %0 {strides = array<i32>} : memref<8x8x128xf32, #tpu.memory_space<vmem>>, vector<8x8x128xf32>,
    %c0_5 = arith.constant 0 : index
    %c0_6 = arith.constant 0 : index
    %c0_7 = arith.constant 0 : index
    %2 = vector.load %arg2[%c0_5, %c0_6, %c0_7] : memref<2x1x512xf32, #tpu.memory_space<vmem>>, vector<1x1x512xf32>
    %3 = vector.shape_cast %2 : vector<1x1x512xf32> to vector<1x512xf32>
    %4 = vector.shape_cast %3 : vector<1x512xf32> to vector<1x512xf32>
    %5 = vector.broadcast %4 : vector<1x512xf32> to vector<8x512xf32>
    %cst = arith.constant 0.000000e+00 : f32
    %6 = vector.broadcast %cst : f32 to vector<8x128xf32>
    %cst_8 = arith.constant 0.000000e+00 : f32
    %7 = vector.broadcast %cst_8 : f32 to vector<8x128xf32>
    %c0_i32 = arith.constant 0 : i32
    %8 = arith.index_cast %c0_i32 : i32 to index
    %c0_9 = arith.constant 0 : index
    %c0_10 = arith.constant 0 : index
    %9 = vector.load %arg5[%8, %c0_9, %c0_10] : memref<8x8x128xf32, #tpu.memory_space<vmem>>, vector<1x8x128xf32>
    %10 = vector.shape_cast %9 : vector<1x8x128xf32> to vector<8x128xf32>
    %11 = tpu.concatenate %10, %6 in 1 : vector<8x128xf32>, vector<8x128xf32> -> vector<8x256xf32>
    %c0_11 = arith.constant 0 : index
    %c0_12 = arith.constant 0 : index
    %c0_13 = arith.constant 0 : index
    %12 = vector.load %arg1[%c0_11, %c0_12, %c0_13] : memref<2x256x512xf32, #tpu.memory_space<vmem>>, vector<1x256x512xf32>
    %13 = vector.shape_cast %12 : vector<1x256x512xf32> to vector<256x512xf32>
    %cst_14 = arith.constant dense<0.000000e+00> : vector<8x512xf32>
    %14 = tpu.matmul %11, %13, %cst_14 {dimension_numbers = #tpu.dot_dimension_numbers<[1], [0], [0], [1], [0, 0, 1, 1], [], []>} : vector<8x256xf32>, vector<256x512xf32>, vector<8x512xf32> -> vector<8x512xf32>
    %15 = arith.addf %14, %5 : vector<8x512xf32>
    %16 = vector.extract_strided_slice %15 {offsets = [0, 0], sizes = [8, 128], strides = [1, 1]} : vector<8x512xf32> to vector<8x128xf32>
    %17 = arith.negf %16 : vector<8x128xf32>
    %18 = math.exp %17 : vector<8x128xf32>
    %cst_15 = arith.constant 1.000000e+00 : f32
    %19 = vector.broadcast %cst_15 : f32 to vector<8x128xf32>
    %20 = arith.addf %19, %18 : vector<8x128xf32>
    %21 = arith.divf %19, %20 : vector<8x128xf32>
    %22 = vector.extract_strided_slice %15 {offsets = [0, 128], sizes = [8, 128], strides = [1, 1]} : vector<8x512xf32> to vector<8x128xf32>
    %23 = arith.negf %22 : vector<8x128xf32>
    %24 = math.exp %23 : vector<8x128xf32>
    %cst_16 = arith.constant 1.000000e+00 : f32
    %25 = vector.broadcast %cst_16 : f32 to vector<8x128xf32>
    %26 = arith.addf %25, %24 : vector<8x128xf32>
    %27 = arith.divf %25, %26 : vector<8x128xf32>
    %28 = vector.extract_strided_slice %15 {offsets = [0, 256], sizes = [8, 128], strides = [1, 1]} : vector<8x512xf32> to vector<8x128xf32>
    %29 = math.tanh %28 : vector<8x128xf32>
    %30 = vector.extract_strided_slice %15 {offsets = [0, 384], sizes = [8, 128], strides = [1, 1]} : vector<8x512xf32> to vector<8x128xf32>
    %31 = arith.negf %30 : vector<8x128xf32>
    %32 = math.exp %31 : vector<8x128xf32>
    %cst_17 = arith.constant 1.000000e+00 : f32
    %33 = vector.broadcast %cst_17 : f32 to vector<8x128xf32>
    %34 = arith.addf %33, %32 : vector<8x128xf32>
    %35 = arith.divf %33, %34 : vector<8x128xf32>
    %36 = arith.mulf %27, %7 : vector<8x128xf32>
    %37 = arith.mulf %21, %29 : vector<8x128xf32>
    %38 = arith.addf %36, %37 : vector<8x128xf32>
    %39 = math.tanh %38 : vector<8x128xf32>
    %40 = arith.mulf %35, %39 : vector<8x128xf32>
    %41 = arith.index_cast %c0_i32 : i32 to index
    %c0_18 = arith.constant 0 : index
    %c0_19 = arith.constant 0 : index
    %42 = vector.load %arg5[%41, %c0_18, %c0_19] : memref<8x8x128xf32, #tpu.memory_space<vmem>>, vector<1x8x128xf32>
    %43 = vector.shape_cast %42 : vector<1x8x128xf32> to vector<8x128xf32>
    %44 = vector.shape_cast %40 : vector<8x128xf32> to vector<1x8x128xf32>
    tpu.vector_store %arg5[%41, %c0_18, %c0_19], %44 {strides = array<i32>} : memref<8x8x128xf32, #tpu.memory_space<vmem>>, vector<1x8x128xf32>,
    %c1_i32 = arith.constant 1 : i32
    %45 = arith.index_cast %c1_i32 : i32 to index
    %c0_20 = arith.constant 0 : index
    %c0_21 = arith.constant 0 : index
    %46 = vector.load %arg5[%45, %c0_20, %c0_21] : memref<8x8x128xf32, #tpu.memory_space<vmem>>, vector<1x8x128xf32>
    %47 = vector.shape_cast %46 : vector<1x8x128xf32> to vector<8x128xf32>
    %48 = tpu.concatenate %47, %40 in 1 : vector<8x128xf32>, vector<8x128xf32> -> vector<8x256xf32>
    %c0_22 = arith.constant 0 : index
    %c0_23 = arith.constant 0 : index
    %c0_24 = arith.constant 0 : index
    %49 = vector.load %arg1[%c0_22, %c0_23, %c0_24] : memref<2x256x512xf32, #tpu.memory_space<vmem>>, vector<1x256x512xf32>
    %50 = vector.shape_cast %49 : vector<1x256x512xf32> to vector<256x512xf32>
    %cst_25 = arith.constant dense<0.000000e+00> : vector<8x512xf32>
    %51 = tpu.matmul %48, %50, %cst_25 {dimension_numbers = #tpu.dot_dimension_numbers<[1], [0], [0], [1], [0, 0, 1, 1], [], []>} : vector<8x256xf32>, vector<256x512xf32>, vector<8x512xf32> -> vector<8x512xf32>
    %52 = arith.addf %51, %5 : vector<8x512xf32>
    %53 = vector.extract_strided_slice %52 {offsets = [0, 0], sizes = [8, 128], strides = [1, 1]} : vector<8x512xf32> to vector<8x128xf32>
    %54 = arith.negf %53 : vector<8x128xf32>
    %55 = math.exp %54 : vector<8x128xf32>
    %cst_26 = arith.constant 1.000000e+00 : f32
    %56 = vector.broadcast %cst_26 : f32 to vector<8x128xf32>
    %57 = arith.addf %56, %55 : vector<8x128xf32>
    %58 = arith.divf %56, %57 : vector<8x128xf32>
    %59 = vector.extract_strided_slice %52 {offsets = [0, 128], sizes = [8, 128], strides = [1, 1]} : vector<8x512xf32> to vector<8x128xf32>
    %60 = arith.negf %59 : vector<8x128xf32>
    %61 = math.exp %60 : vector<8x128xf32>
    %cst_27 = arith.constant 1.000000e+00 : f32
    %62 = vector.broadcast %cst_27 : f32 to vector<8x128xf32>
    %63 = arith.addf %62, %61 : vector<8x128xf32>
    %64 = arith.divf %62, %63 : vector<8x128xf32>
    %65 = vector.extract_strided_slice %52 {offsets = [0, 256], sizes = [8, 128], strides = [1, 1]} : vector<8x512xf32> to vector<8x128xf32>
    %66 = math.tanh %65 : vector<8x128xf32>
    %67 = vector.extract_strided_slice %52 {offsets = [0, 384], sizes = [8, 128], strides = [1, 1]} : vector<8x512xf32> to vector<8x128xf32>
    %68 = arith.negf %67 : vector<8x128xf32>
    %69 = math.exp %68 : vector<8x128xf32>
    %cst_28 = arith.constant 1.000000e+00 : f32
    %70 = vector.broadcast %cst_28 : f32 to vector<8x128xf32>
    %71 = arith.addf %70, %69 : vector<8x128xf32>
    %72 = arith.divf %70, %71 : vector<8x128xf32>
    %73 = arith.mulf %64, %38 : vector<8x128xf32>
    %74 = arith.mulf %58, %66 : vector<8x128xf32>
    %75 = arith.addf %73, %74 : vector<8x128xf32>
    %76 = math.tanh %75 : vector<8x128xf32>
    %77 = arith.mulf %72, %76 : vector<8x128xf32>
    %78 = arith.index_cast %c1_i32 : i32 to index
    %c0_29 = arith.constant 0 : index
    %c0_30 = arith.constant 0 : index
    %79 = vector.load %arg5[%78, %c0_29, %c0_30] : memref<8x8x128xf32, #tpu.memory_space<vmem>>, vector<1x8x128xf32>
    %80 = vector.shape_cast %79 : vector<1x8x128xf32> to vector<8x128xf32>
    %81 = vector.shape_cast %77 : vector<8x128xf32> to vector<1x8x128xf32>
    tpu.vector_store %arg5[%78, %c0_29, %c0_30], %81 {strides = array<i32>} : memref<8x8x128xf32, #tpu.memory_space<vmem>>, vector<1x8x128xf32>,
    %c2_i32 = arith.constant 2 : i32
    %82 = arith.index_cast %c2_i32 : i32 to index
    %c0_31 = arith.constant 0 : index
    %c0_32 = arith.constant 0 : index
    %83 = vector.load %arg5[%82, %c0_31, %c0_32] : memref<8x8x128xf32, #tpu.memory_space<vmem>>, vector<1x8x128xf32>
    %84 = vector.shape_cast %83 : vector<1x8x128xf32> to vector<8x128xf32>
    %85 = tpu.concatenate %84, %77 in 1 : vector<8x128xf32>, vector<8x128xf32> -> vector<8x256xf32>
    %c0_33 = arith.constant 0 : index
    %c0_34 = arith.constant 0 : index
    %c0_35 = arith.constant 0 : index
    %86 = vector.load %arg1[%c0_33, %c0_34, %c0_35] : memref<2x256x512xf32, #tpu.memory_space<vmem>>, vector<1x256x512xf32>
    %87 = vector.shape_cast %86 : vector<1x256x512xf32> to vector<256x512xf32>
    %cst_36 = arith.constant dense<0.000000e+00> : vector<8x512xf32>
    %88 = tpu.matmul %85, %87, %cst_36 {dimension_numbers = #tpu.dot_dimension_numbers<[1], [0], [0], [1], [0, 0, 1, 1], [], []>} : vector<8x256xf32>, vector<256x512xf32>, vector<8x512xf32> -> vector<8x512xf32>
    %89 = arith.addf %88, %5 : vector<8x512xf32>
    %90 = vector.extract_strided_slice %89 {offsets = [0, 0], sizes = [8, 128], strides = [1, 1]} : vector<8x512xf32> to vector<8x128xf32>
    %91 = arith.negf %90 : vector<8x128xf32>
    %92 = math.exp %91 : vector<8x128xf32>
    %cst_37 = arith.constant 1.000000e+00 : f32
    %93 = vector.broadcast %cst_37 : f32 to vector<8x128xf32>
    %94 = arith.addf %93, %92 : vector<8x128xf32>
    %95 = arith.divf %93, %94 : vector<8x128xf32>
    %96 = vector.extract_strided_slice %89 {offsets = [0, 128], sizes = [8, 128], strides = [1, 1]} : vector<8x512xf32> to vector<8x128xf32>
    %97 = arith.negf %96 : vector<8x128xf32>
    %98 = math.exp %97 : vector<8x128xf32>
    %cst_38 = arith.constant 1.000000e+00 : f32
    %99 = vector.broadcast %cst_38 : f32 to vector<8x128xf32>
    %100 = arith.addf %99, %98 : vector<8x128xf32>
    %101 = arith.divf %99, %100 : vector<8x128xf32>
    %102 = vector.extract_strided_slice %89 {offsets = [0, 256], sizes = [8, 128], strides = [1, 1]} : vector<8x512xf32> to vector<8x128xf32>
    %103 = math.tanh %102 : vector<8x128xf32>
    %104 = vector.extract_strided_slice %89 {offsets = [0, 384], sizes = [8, 128], strides = [1, 1]} : vector<8x512xf32> to vector<8x128xf32>
    %105 = arith.negf %104 : vector<8x128xf32>
    %106 = math.exp %105 : vector<8x128xf32>
    %cst_39 = arith.constant 1.000000e+00 : f32
    %107 = vector.broadcast %cst_39 : f32 to vector<8x128xf32>
    %108 = arith.addf %107, %106 : vector<8x128xf32>
    %109 = arith.divf %107, %108 : vector<8x128xf32>
    %110 = arith.mulf %101, %75 : vector<8x128xf32>
    %111 = arith.mulf %95, %103 : vector<8x128xf32>
    %112 = arith.addf %110, %111 : vector<8x128xf32>
    %113 = math.tanh %112 : vector<8x128xf32>
    %114 = arith.mulf %109, %113 : vector<8x128xf32>
    %115 = arith.index_cast %c2_i32 : i32 to index
    %c0_40 = arith.constant 0 : index
    %c0_41 = arith.constant 0 : index
    %116 = vector.load %arg5[%115, %c0_40, %c0_41] : memref<8x8x128xf32, #tpu.memory_space<vmem>>, vector<1x8x128xf32>
    %117 = vector.shape_cast %116 : vector<1x8x128xf32> to vector<8x128xf32>
    %118 = vector.shape_cast %114 : vector<8x128xf32> to vector<1x8x128xf32>
    tpu.vector_store %arg5[%115, %c0_40, %c0_41], %118 {strides = array<i32>} : memref<8x8x128xf32, #tpu.memory_space<vmem>>, vector<1x8x128xf32>,
    %c3_i32 = arith.constant 3 : i32
    %119 = arith.index_cast %c3_i32 : i32 to index
    %c0_42 = arith.constant 0 : index
    %c0_43 = arith.constant 0 : index
    %120 = vector.load %arg5[%119, %c0_42, %c0_43] : memref<8x8x128xf32, #tpu.memory_space<vmem>>, vector<1x8x128xf32>
    %121 = vector.shape_cast %120 : vector<1x8x128xf32> to vector<8x128xf32>
    %122 = tpu.concatenate %121, %114 in 1 : vector<8x128xf32>, vector<8x128xf32> -> vector<8x256xf32>
    %c0_44 = arith.constant 0 : index
    %c0_45 = arith.constant 0 : index
    %c0_46 = arith.constant 0 : index
    %123 = vector.load %arg1[%c0_44, %c0_45, %c0_46] : memref<2x256x512xf32, #tpu.memory_space<vmem>>, vector<1x256x512xf32>
    %124 = vector.shape_cast %123 : vector<1x256x512xf32> to vector<256x512xf32>
    %cst_47 = arith.constant dense<0.000000e+00> : vector<8x512xf32>
    %125 = tpu.matmul %122, %124, %cst_47 {dimension_numbers = #tpu.dot_dimension_numbers<[1], [0], [0], [1], [0, 0, 1, 1], [], []>} : vector<8x256xf32>, vector<256x512xf32>, vector<8x512xf32> -> vector<8x512xf32>
    %126 = arith.addf %125, %5 : vector<8x512xf32>
    %127 = vector.extract_strided_slice %126 {offsets = [0, 0], sizes = [8, 128], strides = [1, 1]} : vector<8x512xf32> to vector<8x128xf32>
    %128 = arith.negf %127 : vector<8x128xf32>
    %129 = math.exp %128 : vector<8x128xf32>
    %cst_48 = arith.constant 1.000000e+00 : f32
    %130 = vector.broadcast %cst_48 : f32 to vector<8x128xf32>
    %131 = arith.addf %130, %129 : vector<8x128xf32>
    %132 = arith.divf %130, %131 : vector<8x128xf32>
    %133 = vector.extract_strided_slice %126 {offsets = [0, 128], sizes = [8, 128], strides = [1, 1]} : vector<8x512xf32> to vector<8x128xf32>
    %134 = arith.negf %133 : vector<8x128xf32>
    %135 = math.exp %134 : vector<8x128xf32>
    %cst_49 = arith.constant 1.000000e+00 : f32
    %136 = vector.broadcast %cst_49 : f32 to vector<8x128xf32>
    %137 = arith.addf %136, %135 : vector<8x128xf32>
    %138 = arith.divf %136, %137 : vector<8x128xf32>
    %139 = vector.extract_strided_slice %126 {offsets = [0, 256], sizes = [8, 128], strides = [1, 1]} : vector<8x512xf32> to vector<8x128xf32>
    %140 = math.tanh %139 : vector<8x128xf32>
    %141 = vector.extract_strided_slice %126 {offsets = [0, 384], sizes = [8, 128], strides = [1, 1]} : vector<8x512xf32> to vector<8x128xf32>
    %142 = arith.negf %141 : vector<8x128xf32>
    %143 = math.exp %142 : vector<8x128xf32>
    %cst_50 = arith.constant 1.000000e+00 : f32
    %144 = vector.broadcast %cst_50 : f32 to vector<8x128xf32>
    %145 = arith.addf %144, %143 : vector<8x128xf32>
    %146 = arith.divf %144, %145 : vector<8x128xf32>
    %147 = arith.mulf %138, %112 : vector<8x128xf32>
    %148 = arith.mulf %132, %140 : vector<8x128xf32>
    %149 = arith.addf %147, %148 : vector<8x128xf32>
    %150 = math.tanh %149 : vector<8x128xf32>
    %151 = arith.mulf %146, %150 : vector<8x128xf32>
    %152 = arith.index_cast %c3_i32 : i32 to index
    %c0_51 = arith.constant 0 : index
    %c0_52 = arith.constant 0 : index
    %153 = vector.load %arg5[%152, %c0_51, %c0_52] : memref<8x8x128xf32, #tpu.memory_space<vmem>>, vector<1x8x128xf32>
    %154 = vector.shape_cast %153 : vector<1x8x128xf32> to vector<8x128xf32>
    %155 = vector.shape_cast %151 : vector<8x128xf32> to vector<1x8x128xf32>
    tpu.vector_store %arg5[%152, %c0_51, %c0_52], %155 {strides = array<i32>} : memref<8x8x128xf32, #tpu.memory_space<vmem>>, vector<1x8x128xf32>,
    %c4_i32 = arith.constant 4 : i32
    %156 = arith.index_cast %c4_i32 : i32 to index
    %c0_53 = arith.constant 0 : index
    %c0_54 = arith.constant 0 : index
    %157 = vector.load %arg5[%156, %c0_53, %c0_54] : memref<8x8x128xf32, #tpu.memory_space<vmem>>, vector<1x8x128xf32>
    %158 = vector.shape_cast %157 : vector<1x8x128xf32> to vector<8x128xf32>
    %159 = tpu.concatenate %158, %151 in 1 : vector<8x128xf32>, vector<8x128xf32> -> vector<8x256xf32>
    %c0_55 = arith.constant 0 : index
    %c0_56 = arith.constant 0 : index
    %c0_57 = arith.constant 0 : index
    %160 = vector.load %arg1[%c0_55, %c0_56, %c0_57] : memref<2x256x512xf32, #tpu.memory_space<vmem>>, vector<1x256x512xf32>
    %161 = vector.shape_cast %160 : vector<1x256x512xf32> to vector<256x512xf32>
    %cst_58 = arith.constant dense<0.000000e+00> : vector<8x512xf32>
    %162 = tpu.matmul %159, %161, %cst_58 {dimension_numbers = #tpu.dot_dimension_numbers<[1], [0], [0], [1], [0, 0, 1, 1], [], []>} : vector<8x256xf32>, vector<256x512xf32>, vector<8x512xf32> -> vector<8x512xf32>
    %163 = arith.addf %162, %5 : vector<8x512xf32>
    %164 = vector.extract_strided_slice %163 {offsets = [0, 0], sizes = [8, 128], strides = [1, 1]} : vector<8x512xf32> to vector<8x128xf32>
    %165 = arith.negf %164 : vector<8x128xf32>
    %166 = math.exp %165 : vector<8x128xf32>
    %cst_59 = arith.constant 1.000000e+00 : f32
    %167 = vector.broadcast %cst_59 : f32 to vector<8x128xf32>
    %168 = arith.addf %167, %166 : vector<8x128xf32>
    %169 = arith.divf %167, %168 : vector<8x128xf32>
    %170 = vector.extract_strided_slice %163 {offsets = [0, 128], sizes = [8, 128], strides = [1, 1]} : vector<8x512xf32> to vector<8x128xf32>
    %171 = arith.negf %170 : vector<8x128xf32>
    %172 = math.exp %171 : vector<8x128xf32>
    %cst_60 = arith.constant 1.000000e+00 : f32
    %173 = vector.broadcast %cst_60 : f32 to vector<8x128xf32>
    %174 = arith.addf %173, %172 : vector<8x128xf32>
    %175 = arith.divf %173, %174 : vector<8x128xf32>
    %176 = vector.extract_strided_slice %163 {offsets = [0, 256], sizes = [8, 128], strides = [1, 1]} : vector<8x512xf32> to vector<8x128xf32>
    %177 = math.tanh %176 : vector<8x128xf32>
    %178 = vector.extract_strided_slice %163 {offsets = [0, 384], sizes = [8, 128], strides = [1, 1]} : vector<8x512xf32> to vector<8x128xf32>
    %179 = arith.negf %178 : vector<8x128xf32>
    %180 = math.exp %179 : vector<8x128xf32>
    %cst_61 = arith.constant 1.000000e+00 : f32
    %181 = vector.broadcast %cst_61 : f32 to vector<8x128xf32>
    %182 = arith.addf %181, %180 : vector<8x128xf32>
    %183 = arith.divf %181, %182 : vector<8x128xf32>
    %184 = arith.mulf %175, %149 : vector<8x128xf32>
    %185 = arith.mulf %169, %177 : vector<8x128xf32>
    %186 = arith.addf %184, %185 : vector<8x128xf32>
    %187 = math.tanh %186 : vector<8x128xf32>
    %188 = arith.mulf %183, %187 : vector<8x128xf32>
    %189 = arith.index_cast %c4_i32 : i32 to index
    %c0_62 = arith.constant 0 : index
    %c0_63 = arith.constant 0 : index
    %190 = vector.load %arg5[%189, %c0_62, %c0_63] : memref<8x8x128xf32, #tpu.memory_space<vmem>>, vector<1x8x128xf32>
    %191 = vector.shape_cast %190 : vector<1x8x128xf32> to vector<8x128xf32>
    %192 = vector.shape_cast %188 : vector<8x128xf32> to vector<1x8x128xf32>
    tpu.vector_store %arg5[%189, %c0_62, %c0_63], %192 {strides = array<i32>} : memref<8x8x128xf32, #tpu.memory_space<vmem>>, vector<1x8x128xf32>,
    %c5_i32 = arith.constant 5 : i32
    %193 = arith.index_cast %c5_i32 : i32 to index
    %c0_64 = arith.constant 0 : index
    %c0_65 = arith.constant 0 : index
    %194 = vector.load %arg5[%193, %c0_64, %c0_65] : memref<8x8x128xf32, #tpu.memory_space<vmem>>, vector<1x8x128xf32>
    %195 = vector.shape_cast %194 : vector<1x8x128xf32> to vector<8x128xf32>
    %196 = tpu.concatenate %195, %188 in 1 : vector<8x128xf32>, vector<8x128xf32> -> vector<8x256xf32>
    %c0_66 = arith.constant 0 : index
    %c0_67 = arith.constant 0 : index
    %c0_68 = arith.constant 0 : index
    %197 = vector.load %arg1[%c0_66, %c0_67, %c0_68] : memref<2x256x512xf32, #tpu.memory_space<vmem>>, vector<1x256x512xf32>
    %198 = vector.shape_cast %197 : vector<1x256x512xf32> to vector<256x512xf32>
    %cst_69 = arith.constant dense<0.000000e+00> : vector<8x512xf32>
    %199 = tpu.matmul %196, %198, %cst_69 {dimension_numbers = #tpu.dot_dimension_numbers<[1], [0], [0], [1], [0, 0, 1, 1], [], []>} : vector<8x256xf32>, vector<256x512xf32>, vector<8x512xf32> -> vector<8x512xf32>
    %200 = arith.addf %199, %5 : vector<8x512xf32>
    %201 = vector.extract_strided_slice %200 {offsets = [0, 0], sizes = [8, 128], strides = [1, 1]} : vector<8x512xf32> to vector<8x128xf32>
    %202 = arith.negf %201 : vector<8x128xf32>
    %203 = math.exp %202 : vector<8x128xf32>
    %cst_70 = arith.constant 1.000000e+00 : f32
    %204 = vector.broadcast %cst_70 : f32 to vector<8x128xf32>
    %205 = arith.addf %204, %203 : vector<8x128xf32>
    %206 = arith.divf %204, %205 : vector<8x128xf32>
    %207 = vector.extract_strided_slice %200 {offsets = [0, 128], sizes = [8, 128], strides = [1, 1]} : vector<8x512xf32> to vector<8x128xf32>
    %208 = arith.negf %207 : vector<8x128xf32>
    %209 = math.exp %208 : vector<8x128xf32>
    %cst_71 = arith.constant 1.000000e+00 : f32
    %210 = vector.broadcast %cst_71 : f32 to vector<8x128xf32>
    %211 = arith.addf %210, %209 : vector<8x128xf32>
    %212 = arith.divf %210, %211 : vector<8x128xf32>
    %213 = vector.extract_strided_slice %200 {offsets = [0, 256], sizes = [8, 128], strides = [1, 1]} : vector<8x512xf32> to vector<8x128xf32>
    %214 = math.tanh %213 : vector<8x128xf32>
    %215 = vector.extract_strided_slice %200 {offsets = [0, 384], sizes = [8, 128], strides = [1, 1]} : vector<8x512xf32> to vector<8x128xf32>
    %216 = arith.negf %215 : vector<8x128xf32>
    %217 = math.exp %216 : vector<8x128xf32>
    %cst_72 = arith.constant 1.000000e+00 : f32
    %218 = vector.broadcast %cst_72 : f32 to vector<8x128xf32>
    %219 = arith.addf %218, %217 : vector<8x128xf32>
    %220 = arith.divf %218, %219 : vector<8x128xf32>
    %221 = arith.mulf %212, %186 : vector<8x128xf32>
    %222 = arith.mulf %206, %214 : vector<8x128xf32>
    %223 = arith.addf %221, %222 : vector<8x128xf32>
    %224 = math.tanh %223 : vector<8x128xf32>
    %225 = arith.mulf %220, %224 : vector<8x128xf32>
    %226 = arith.index_cast %c5_i32 : i32 to index
    %c0_73 = arith.constant 0 : index
    %c0_74 = arith.constant 0 : index
    %227 = vector.load %arg5[%226, %c0_73, %c0_74] : memref<8x8x128xf32, #tpu.memory_space<vmem>>, vector<1x8x128xf32>
    %228 = vector.shape_cast %227 : vector<1x8x128xf32> to vector<8x128xf32>
    %229 = vector.shape_cast %225 : vector<8x128xf32> to vector<1x8x128xf32>
    tpu.vector_store %arg5[%226, %c0_73, %c0_74], %229 {strides = array<i32>} : memref<8x8x128xf32, #tpu.memory_space<vmem>>, vector<1x8x128xf32>,
    %c6_i32 = arith.constant 6 : i32
    %230 = arith.index_cast %c6_i32 : i32 to index
    %c0_75 = arith.constant 0 : index
    %c0_76 = arith.constant 0 : index
    %231 = vector.load %arg5[%230, %c0_75, %c0_76] : memref<8x8x128xf32, #tpu.memory_space<vmem>>, vector<1x8x128xf32>
    %232 = vector.shape_cast %231 : vector<1x8x128xf32> to vector<8x128xf32>
    %233 = tpu.concatenate %232, %225 in 1 : vector<8x128xf32>, vector<8x128xf32> -> vector<8x256xf32>
    %c0_77 = arith.constant 0 : index
    %c0_78 = arith.constant 0 : index
    %c0_79 = arith.constant 0 : index
    %234 = vector.load %arg1[%c0_77, %c0_78, %c0_79] : memref<2x256x512xf32, #tpu.memory_space<vmem>>, vector<1x256x512xf32>
    %235 = vector.shape_cast %234 : vector<1x256x512xf32> to vector<256x512xf32>
    %cst_80 = arith.constant dense<0.000000e+00> : vector<8x512xf32>
    %236 = tpu.matmul %233, %235, %cst_80 {dimension_numbers = #tpu.dot_dimension_numbers<[1], [0], [0], [1], [0, 0, 1, 1], [], []>} : vector<8x256xf32>, vector<256x512xf32>, vector<8x512xf32> -> vector<8x512xf32>
    %237 = arith.addf %236, %5 : vector<8x512xf32>
    %238 = vector.extract_strided_slice %237 {offsets = [0, 0], sizes = [8, 128], strides = [1, 1]} : vector<8x512xf32> to vector<8x128xf32>
    %239 = arith.negf %238 : vector<8x128xf32>
    %240 = math.exp %239 : vector<8x128xf32>
    %cst_81 = arith.constant 1.000000e+00 : f32
    %241 = vector.broadcast %cst_81 : f32 to vector<8x128xf32>
    %242 = arith.addf %241, %240 : vector<8x128xf32>
    %243 = arith.divf %241, %242 : vector<8x128xf32>
    %244 = vector.extract_strided_slice %237 {offsets = [0, 128], sizes = [8, 128], strides = [1, 1]} : vector<8x512xf32> to vector<8x128xf32>
    %245 = arith.negf %244 : vector<8x128xf32>
    %246 = math.exp %245 : vector<8x128xf32>
    %cst_82 = arith.constant 1.000000e+00 : f32
    %247 = vector.broadcast %cst_82 : f32 to vector<8x128xf32>
    %248 = arith.addf %247, %246 : vector<8x128xf32>
    %249 = arith.divf %247, %248 : vector<8x128xf32>
    %250 = vector.extract_strided_slice %237 {offsets = [0, 256], sizes = [8, 128], strides = [1, 1]} : vector<8x512xf32> to vector<8x128xf32>
    %251 = math.tanh %250 : vector<8x128xf32>
    %252 = vector.extract_strided_slice %237 {offsets = [0, 384], sizes = [8, 128], strides = [1, 1]} : vector<8x512xf32> to vector<8x128xf32>
    %253 = arith.negf %252 : vector<8x128xf32>
    %254 = math.exp %253 : vector<8x128xf32>
    %cst_83 = arith.constant 1.000000e+00 : f32
    %255 = vector.broadcast %cst_83 : f32 to vector<8x128xf32>
    %256 = arith.addf %255, %254 : vector<8x128xf32>
    %257 = arith.divf %255, %256 : vector<8x128xf32>
    %258 = arith.mulf %249, %223 : vector<8x128xf32>
    %259 = arith.mulf %243, %251 : vector<8x128xf32>
    %260 = arith.addf %258, %259 : vector<8x128xf32>
    %261 = math.tanh %260 : vector<8x128xf32>
    %262 = arith.mulf %257, %261 : vector<8x128xf32>
    %263 = arith.index_cast %c6_i32 : i32 to index
    %c0_84 = arith.constant 0 : index
    %c0_85 = arith.constant 0 : index
    %264 = vector.load %arg5[%263, %c0_84, %c0_85] : memref<8x8x128xf32, #tpu.memory_space<vmem>>, vector<1x8x128xf32>
    %265 = vector.shape_cast %264 : vector<1x8x128xf32> to vector<8x128xf32>
    %266 = vector.shape_cast %262 : vector<8x128xf32> to vector<1x8x128xf32>
    tpu.vector_store %arg5[%263, %c0_84, %c0_85], %266 {strides = array<i32>} : memref<8x8x128xf32, #tpu.memory_space<vmem>>, vector<1x8x128xf32>,
    %c7_i32 = arith.constant 7 : i32
    %267 = arith.index_cast %c7_i32 : i32 to index
    %c0_86 = arith.constant 0 : index
    %c0_87 = arith.constant 0 : index
    %268 = vector.load %arg5[%267, %c0_86, %c0_87] : memref<8x8x128xf32, #tpu.memory_space<vmem>>, vector<1x8x128xf32>
    %269 = vector.shape_cast %268 : vector<1x8x128xf32> to vector<8x128xf32>
    %270 = tpu.concatenate %269, %262 in 1 : vector<8x128xf32>, vector<8x128xf32> -> vector<8x256xf32>
    %c0_88 = arith.constant 0 : index
    %c0_89 = arith.constant 0 : index
    %c0_90 = arith.constant 0 : index
    %271 = vector.load %arg1[%c0_88, %c0_89, %c0_90] : memref<2x256x512xf32, #tpu.memory_space<vmem>>, vector<1x256x512xf32>
    %272 = vector.shape_cast %271 : vector<1x256x512xf32> to vector<256x512xf32>
    %cst_91 = arith.constant dense<0.000000e+00> : vector<8x512xf32>
    %273 = tpu.matmul %270, %272, %cst_91 {dimension_numbers = #tpu.dot_dimension_numbers<[1], [0], [0], [1], [0, 0, 1, 1], [], []>} : vector<8x256xf32>, vector<256x512xf32>, vector<8x512xf32> -> vector<8x512xf32>
    %274 = arith.addf %273, %5 : vector<8x512xf32>
    %275 = vector.extract_strided_slice %274 {offsets = [0, 0], sizes = [8, 128], strides = [1, 1]} : vector<8x512xf32> to vector<8x128xf32>
    %276 = arith.negf %275 : vector<8x128xf32>
    %277 = math.exp %276 : vector<8x128xf32>
    %cst_92 = arith.constant 1.000000e+00 : f32
    %278 = vector.broadcast %cst_92 : f32 to vector<8x128xf32>
    %279 = arith.addf %278, %277 : vector<8x128xf32>
    %280 = arith.divf %278, %279 : vector<8x128xf32>
    %281 = vector.extract_strided_slice %274 {offsets = [0, 128], sizes = [8, 128], strides = [1, 1]} : vector<8x512xf32> to vector<8x128xf32>
    %282 = arith.negf %281 : vector<8x128xf32>
    %283 = math.exp %282 : vector<8x128xf32>
    %cst_93 = arith.constant 1.000000e+00 : f32
    %284 = vector.broadcast %cst_93 : f32 to vector<8x128xf32>
    %285 = arith.addf %284, %283 : vector<8x128xf32>
    %286 = arith.divf %284, %285 : vector<8x128xf32>
    %287 = vector.extract_strided_slice %274 {offsets = [0, 256], sizes = [8, 128], strides = [1, 1]} : vector<8x512xf32> to vector<8x128xf32>
    %288 = math.tanh %287 : vector<8x128xf32>
    %289 = vector.extract_strided_slice %274 {offsets = [0, 384], sizes = [8, 128], strides = [1, 1]} : vector<8x512xf32> to vector<8x128xf32>
    %290 = arith.negf %289 : vector<8x128xf32>
    %291 = math.exp %290 : vector<8x128xf32>
    %cst_94 = arith.constant 1.000000e+00 : f32
    %292 = vector.broadcast %cst_94 : f32 to vector<8x128xf32>
    %293 = arith.addf %292, %291 : vector<8x128xf32>
    %294 = arith.divf %292, %293 : vector<8x128xf32>
    %295 = arith.mulf %286, %260 : vector<8x128xf32>
    %296 = arith.mulf %280, %288 : vector<8x128xf32>
    %297 = arith.addf %295, %296 : vector<8x128xf32>
    %298 = math.tanh %297 : vector<8x128xf32>
    %299 = arith.mulf %294, %298 : vector<8x128xf32>
    %300 = arith.index_cast %c7_i32 : i32 to index
    %c0_95 = arith.constant 0 : index
    %c0_96 = arith.constant 0 : index
    %301 = vector.load %arg5[%300, %c0_95, %c0_96] : memref<8x8x128xf32, #tpu.memory_space<vmem>>, vector<1x8x128xf32>
    %302 = vector.shape_cast %301 : vector<1x8x128xf32> to vector<8x128xf32>
    %303 = vector.shape_cast %299 : vector<8x128xf32> to vector<1x8x128xf32>
    tpu.vector_store %arg5[%300, %c0_95, %c0_96], %303 {strides = array<i32>} : memref<8x8x128xf32, #tpu.memory_space<vmem>>, vector<1x8x128xf32>,
    %c8_i32 = arith.constant 8 : i32
    %c0_97 = arith.constant 0 : index
    %c0_98 = arith.constant 0 : index
    %c0_99 = arith.constant 0 : index
    %304 = vector.load %arg3[%c0_97, %c0_98, %c0_99] : memref<2x8x128xf32, #tpu.memory_space<vmem>>, vector<1x8x128xf32>
    %305 = vector.shape_cast %304 : vector<1x8x128xf32> to vector<8x128xf32>
    %306 = vector.shape_cast %299 : vector<8x128xf32> to vector<1x8x128xf32>
    tpu.vector_store %arg3[%c0_97, %c0_98, %c0_99], %306 {strides = array<i32>} : memref<2x8x128xf32, #tpu.memory_space<vmem>>, vector<1x8x128xf32>,
    %c0_100 = arith.constant 0 : index
    %c0_101 = arith.constant 0 : index
    %c0_102 = arith.constant 0 : index
    %307 = vector.load %arg4[%c0_100, %c0_101, %c0_102] : memref<2x8x128xf32, #tpu.memory_space<vmem>>, vector<1x8x128xf32>
    %308 = vector.shape_cast %307 : vector<1x8x128xf32> to vector<8x128xf32>
    %309 = vector.shape_cast %297 : vector<8x128xf32> to vector<1x8x128xf32>
    tpu.vector_store %arg4[%c0_100, %c0_101, %c0_102], %309 {strides = array<i32>} : memref<2x8x128xf32, #tpu.memory_space<vmem>>, vector<1x8x128xf32>,
    %c1 = arith.constant 1 : index
    %c0_103 = arith.constant 0 : index
    %c0_104 = arith.constant 0 : index
    %310 = vector.load %arg2[%c1, %c0_103, %c0_104] : memref<2x1x512xf32, #tpu.memory_space<vmem>>, vector<1x1x512xf32>
    %311 = vector.shape_cast %310 : vector<1x1x512xf32> to vector<1x512xf32>
    %312 = vector.shape_cast %311 : vector<1x512xf32> to vector<1x512xf32>
    %313 = vector.broadcast %312 : vector<1x512xf32> to vector<8x512xf32>
    %cst_105 = arith.constant 0.000000e+00 : f32
    %314 = vector.broadcast %cst_105 : f32 to vector<8x128xf32>
    %cst_106 = arith.constant 0.000000e+00 : f32
    %315 = vector.broadcast %cst_106 : f32 to vector<8x128xf32>
    %c0_i32_107 = arith.constant 0 : i32
    %316 = arith.index_cast %c0_i32_107 : i32 to index
    %c0_108 = arith.constant 0 : index
    %c0_109 = arith.constant 0 : index
    %317 = vector.load %arg5[%316, %c0_108, %c0_109] : memref<8x8x128xf32, #tpu.memory_space<vmem>>, vector<1x8x128xf32>
    %318 = vector.shape_cast %317 : vector<1x8x128xf32> to vector<8x128xf32>
    %319 = tpu.concatenate %318, %314 in 1 : vector<8x128xf32>, vector<8x128xf32> -> vector<8x256xf32>
    %c1_110 = arith.constant 1 : index
    %c0_111 = arith.constant 0 : index
    %c0_112 = arith.constant 0 : index
    %320 = vector.load %arg1[%c1_110, %c0_111, %c0_112] : memref<2x256x512xf32, #tpu.memory_space<vmem>>, vector<1x256x512xf32>
    %321 = vector.shape_cast %320 : vector<1x256x512xf32> to vector<256x512xf32>
    %cst_113 = arith.constant dense<0.000000e+00> : vector<8x512xf32>
    %322 = tpu.matmul %319, %321, %cst_113 {dimension_numbers = #tpu.dot_dimension_numbers<[1], [0], [0], [1], [0, 0, 1, 1], [], []>} : vector<8x256xf32>, vector<256x512xf32>, vector<8x512xf32> -> vector<8x512xf32>
    %323 = arith.addf %322, %313 : vector<8x512xf32>
    %324 = vector.extract_strided_slice %323 {offsets = [0, 0], sizes = [8, 128], strides = [1, 1]} : vector<8x512xf32> to vector<8x128xf32>
    %325 = arith.negf %324 : vector<8x128xf32>
    %326 = math.exp %325 : vector<8x128xf32>
    %cst_114 = arith.constant 1.000000e+00 : f32
    %327 = vector.broadcast %cst_114 : f32 to vector<8x128xf32>
    %328 = arith.addf %327, %326 : vector<8x128xf32>
    %329 = arith.divf %327, %328 : vector<8x128xf32>
    %330 = vector.extract_strided_slice %323 {offsets = [0, 128], sizes = [8, 128], strides = [1, 1]} : vector<8x512xf32> to vector<8x128xf32>
    %331 = arith.negf %330 : vector<8x128xf32>
    %332 = math.exp %331 : vector<8x128xf32>
    %cst_115 = arith.constant 1.000000e+00 : f32
    %333 = vector.broadcast %cst_115 : f32 to vector<8x128xf32>
    %334 = arith.addf %333, %332 : vector<8x128xf32>
    %335 = arith.divf %333, %334 : vector<8x128xf32>
    %336 = vector.extract_strided_slice %323 {offsets = [0, 256], sizes = [8, 128], strides = [1, 1]} : vector<8x512xf32> to vector<8x128xf32>
    %337 = math.tanh %336 : vector<8x128xf32>
    %338 = vector.extract_strided_slice %323 {offsets = [0, 384], sizes = [8, 128], strides = [1, 1]} : vector<8x512xf32> to vector<8x128xf32>
    %339 = arith.negf %338 : vector<8x128xf32>
    %340 = math.exp %339 : vector<8x128xf32>
    %cst_116 = arith.constant 1.000000e+00 : f32
    %341 = vector.broadcast %cst_116 : f32 to vector<8x128xf32>
    %342 = arith.addf %341, %340 : vector<8x128xf32>
    %343 = arith.divf %341, %342 : vector<8x128xf32>
    %344 = arith.mulf %335, %315 : vector<8x128xf32>
    %345 = arith.mulf %329, %337 : vector<8x128xf32>
    %346 = arith.addf %344, %345 : vector<8x128xf32>
    %347 = math.tanh %346 : vector<8x128xf32>
    %348 = arith.mulf %343, %347 : vector<8x128xf32>
    %349 = arith.index_cast %c0_i32_107 : i32 to index
    %c0_117 = arith.constant 0 : index
    %c0_118 = arith.constant 0 : index
    %350 = vector.load %arg5[%349, %c0_117, %c0_118] : memref<8x8x128xf32, #tpu.memory_space<vmem>>, vector<1x8x128xf32>
    %351 = vector.shape_cast %350 : vector<1x8x128xf32> to vector<8x128xf32>
    %352 = vector.shape_cast %348 : vector<8x128xf32> to vector<1x8x128xf32>
    tpu.vector_store %arg5[%349, %c0_117, %c0_118], %352 {strides = array<i32>} : memref<8x8x128xf32, #tpu.memory_space<vmem>>, vector<1x8x128xf32>,
    %c1_i32_119 = arith.constant 1 : i32
    %353 = arith.index_cast %c1_i32_119 : i32 to index
    %c0_120 = arith.constant 0 : index
    %c0_121 = arith.constant 0 : index
    %354 = vector.load %arg5[%353, %c0_120, %c0_121] : memref<8x8x128xf32, #tpu.memory_space<vmem>>, vector<1x8x128xf32>
    %355 = vector.shape_cast %354 : vector<1x8x128xf32> to vector<8x128xf32>
    %356 = tpu.concatenate %355, %348 in 1 : vector<8x128xf32>, vector<8x128xf32> -> vector<8x256xf32>
    %c1_122 = arith.constant 1 : index
    %c0_123 = arith.constant 0 : index
    %c0_124 = arith.constant 0 : index
    %357 = vector.load %arg1[%c1_122, %c0_123, %c0_124] : memref<2x256x512xf32, #tpu.memory_space<vmem>>, vector<1x256x512xf32>
    %358 = vector.shape_cast %357 : vector<1x256x512xf32> to vector<256x512xf32>
    %cst_125 = arith.constant dense<0.000000e+00> : vector<8x512xf32>
    %359 = tpu.matmul %356, %358, %cst_125 {dimension_numbers = #tpu.dot_dimension_numbers<[1], [0], [0], [1], [0, 0, 1, 1], [], []>} : vector<8x256xf32>, vector<256x512xf32>, vector<8x512xf32> -> vector<8x512xf32>
    %360 = arith.addf %359, %313 : vector<8x512xf32>
    %361 = vector.extract_strided_slice %360 {offsets = [0, 0], sizes = [8, 128], strides = [1, 1]} : vector<8x512xf32> to vector<8x128xf32>
    %362 = arith.negf %361 : vector<8x128xf32>
    %363 = math.exp %362 : vector<8x128xf32>
    %cst_126 = arith.constant 1.000000e+00 : f32
    %364 = vector.broadcast %cst_126 : f32 to vector<8x128xf32>
    %365 = arith.addf %364, %363 : vector<8x128xf32>
    %366 = arith.divf %364, %365 : vector<8x128xf32>
    %367 = vector.extract_strided_slice %360 {offsets = [0, 128], sizes = [8, 128], strides = [1, 1]} : vector<8x512xf32> to vector<8x128xf32>
    %368 = arith.negf %367 : vector<8x128xf32>
    %369 = math.exp %368 : vector<8x128xf32>
    %cst_127 = arith.constant 1.000000e+00 : f32
    %370 = vector.broadcast %cst_127 : f32 to vector<8x128xf32>
    %371 = arith.addf %370, %369 : vector<8x128xf32>
    %372 = arith.divf %370, %371 : vector<8x128xf32>
    %373 = vector.extract_strided_slice %360 {offsets = [0, 256], sizes = [8, 128], strides = [1, 1]} : vector<8x512xf32> to vector<8x128xf32>
    %374 = math.tanh %373 : vector<8x128xf32>
    %375 = vector.extract_strided_slice %360 {offsets = [0, 384], sizes = [8, 128], strides = [1, 1]} : vector<8x512xf32> to vector<8x128xf32>
    %376 = arith.negf %375 : vector<8x128xf32>
    %377 = math.exp %376 : vector<8x128xf32>
    %cst_128 = arith.constant 1.000000e+00 : f32
    %378 = vector.broadcast %cst_128 : f32 to vector<8x128xf32>
    %379 = arith.addf %378, %377 : vector<8x128xf32>
    %380 = arith.divf %378, %379 : vector<8x128xf32>
    %381 = arith.mulf %372, %346 : vector<8x128xf32>
    %382 = arith.mulf %366, %374 : vector<8x128xf32>
    %383 = arith.addf %381, %382 : vector<8x128xf32>
    %384 = math.tanh %383 : vector<8x128xf32>
    %385 = arith.mulf %380, %384 : vector<8x128xf32>
    %386 = arith.index_cast %c1_i32_119 : i32 to index
    %c0_129 = arith.constant 0 : index
    %c0_130 = arith.constant 0 : index
    %387 = vector.load %arg5[%386, %c0_129, %c0_130] : memref<8x8x128xf32, #tpu.memory_space<vmem>>, vector<1x8x128xf32>
    %388 = vector.shape_cast %387 : vector<1x8x128xf32> to vector<8x128xf32>
    %389 = vector.shape_cast %385 : vector<8x128xf32> to vector<1x8x128xf32>
    tpu.vector_store %arg5[%386, %c0_129, %c0_130], %389 {strides = array<i32>} : memref<8x8x128xf32, #tpu.memory_space<vmem>>, vector<1x8x128xf32>,
    %c2_i32_131 = arith.constant 2 : i32
    %390 = arith.index_cast %c2_i32_131 : i32 to index
    %c0_132 = arith.constant 0 : index
    %c0_133 = arith.constant 0 : index
    %391 = vector.load %arg5[%390, %c0_132, %c0_133] : memref<8x8x128xf32, #tpu.memory_space<vmem>>, vector<1x8x128xf32>
    %392 = vector.shape_cast %391 : vector<1x8x128xf32> to vector<8x128xf32>
    %393 = tpu.concatenate %392, %385 in 1 : vector<8x128xf32>, vector<8x128xf32> -> vector<8x256xf32>
    %c1_134 = arith.constant 1 : index
    %c0_135 = arith.constant 0 : index
    %c0_136 = arith.constant 0 : index
    %394 = vector.load %arg1[%c1_134, %c0_135, %c0_136] : memref<2x256x512xf32, #tpu.memory_space<vmem>>, vector<1x256x512xf32>
    %395 = vector.shape_cast %394 : vector<1x256x512xf32> to vector<256x512xf32>
    %cst_137 = arith.constant dense<0.000000e+00> : vector<8x512xf32>
    %396 = tpu.matmul %393, %395, %cst_137 {dimension_numbers = #tpu.dot_dimension_numbers<[1], [0], [0], [1], [0, 0, 1, 1], [], []>} : vector<8x256xf32>, vector<256x512xf32>, vector<8x512xf32> -> vector<8x512xf32>
    %397 = arith.addf %396, %313 : vector<8x512xf32>
    %398 = vector.extract_strided_slice %397 {offsets = [0, 0], sizes = [8, 128], strides = [1, 1]} : vector<8x512xf32> to vector<8x128xf32>
    %399 = arith.negf %398 : vector<8x128xf32>
    %400 = math.exp %399 : vector<8x128xf32>
    %cst_138 = arith.constant 1.000000e+00 : f32
    %401 = vector.broadcast %cst_138 : f32 to vector<8x128xf32>
    %402 = arith.addf %401, %400 : vector<8x128xf32>
    %403 = arith.divf %401, %402 : vector<8x128xf32>
    %404 = vector.extract_strided_slice %397 {offsets = [0, 128], sizes = [8, 128], strides = [1, 1]} : vector<8x512xf32> to vector<8x128xf32>
    %405 = arith.negf %404 : vector<8x128xf32>
    %406 = math.exp %405 : vector<8x128xf32>
    %cst_139 = arith.constant 1.000000e+00 : f32
    %407 = vector.broadcast %cst_139 : f32 to vector<8x128xf32>
    %408 = arith.addf %407, %406 : vector<8x128xf32>
    %409 = arith.divf %407, %408 : vector<8x128xf32>
    %410 = vector.extract_strided_slice %397 {offsets = [0, 256], sizes = [8, 128], strides = [1, 1]} : vector<8x512xf32> to vector<8x128xf32>
    %411 = math.tanh %410 : vector<8x128xf32>
    %412 = vector.extract_strided_slice %397 {offsets = [0, 384], sizes = [8, 128], strides = [1, 1]} : vector<8x512xf32> to vector<8x128xf32>
    %413 = arith.negf %412 : vector<8x128xf32>
    %414 = math.exp %413 : vector<8x128xf32>
    %cst_140 = arith.constant 1.000000e+00 : f32
    %415 = vector.broadcast %cst_140 : f32 to vector<8x128xf32>
    %416 = arith.addf %415, %414 : vector<8x128xf32>
    %417 = arith.divf %415, %416 : vector<8x128xf32>
    %418 = arith.mulf %409, %383 : vector<8x128xf32>
    %419 = arith.mulf %403, %411 : vector<8x128xf32>
    %420 = arith.addf %418, %419 : vector<8x128xf32>
    %421 = math.tanh %420 : vector<8x128xf32>
    %422 = arith.mulf %417, %421 : vector<8x128xf32>
    %423 = arith.index_cast %c2_i32_131 : i32 to index
    %c0_141 = arith.constant 0 : index
    %c0_142 = arith.constant 0 : index
    %424 = vector.load %arg5[%423, %c0_141, %c0_142] : memref<8x8x128xf32, #tpu.memory_space<vmem>>, vector<1x8x128xf32>
    %425 = vector.shape_cast %424 : vector<1x8x128xf32> to vector<8x128xf32>
    %426 = vector.shape_cast %422 : vector<8x128xf32> to vector<1x8x128xf32>
    tpu.vector_store %arg5[%423, %c0_141, %c0_142], %426 {strides = array<i32>} : memref<8x8x128xf32, #tpu.memory_space<vmem>>, vector<1x8x128xf32>,
    %c3_i32_143 = arith.constant 3 : i32
    %427 = arith.index_cast %c3_i32_143 : i32 to index
    %c0_144 = arith.constant 0 : index
    %c0_145 = arith.constant 0 : index
    %428 = vector.load %arg5[%427, %c0_144, %c0_145] : memref<8x8x128xf32, #tpu.memory_space<vmem>>, vector<1x8x128xf32>
    %429 = vector.shape_cast %428 : vector<1x8x128xf32> to vector<8x128xf32>
    %430 = tpu.concatenate %429, %422 in 1 : vector<8x128xf32>, vector<8x128xf32> -> vector<8x256xf32>
    %c1_146 = arith.constant 1 : index
    %c0_147 = arith.constant 0 : index
    %c0_148 = arith.constant 0 : index
    %431 = vector.load %arg1[%c1_146, %c0_147, %c0_148] : memref<2x256x512xf32, #tpu.memory_space<vmem>>, vector<1x256x512xf32>
    %432 = vector.shape_cast %431 : vector<1x256x512xf32> to vector<256x512xf32>
    %cst_149 = arith.constant dense<0.000000e+00> : vector<8x512xf32>
    %433 = tpu.matmul %430, %432, %cst_149 {dimension_numbers = #tpu.dot_dimension_numbers<[1], [0], [0], [1], [0, 0, 1, 1], [], []>} : vector<8x256xf32>, vector<256x512xf32>, vector<8x512xf32> -> vector<8x512xf32>
    %434 = arith.addf %433, %313 : vector<8x512xf32>
    %435 = vector.extract_strided_slice %434 {offsets = [0, 0], sizes = [8, 128], strides = [1, 1]} : vector<8x512xf32> to vector<8x128xf32>
    %436 = arith.negf %435 : vector<8x128xf32>
    %437 = math.exp %436 : vector<8x128xf32>
    %cst_150 = arith.constant 1.000000e+00 : f32
    %438 = vector.broadcast %cst_150 : f32 to vector<8x128xf32>
    %439 = arith.addf %438, %437 : vector<8x128xf32>
    %440 = arith.divf %438, %439 : vector<8x128xf32>
    %441 = vector.extract_strided_slice %434 {offsets = [0, 128], sizes = [8, 128], strides = [1, 1]} : vector<8x512xf32> to vector<8x128xf32>
    %442 = arith.negf %441 : vector<8x128xf32>
    %443 = math.exp %442 : vector<8x128xf32>
    %cst_151 = arith.constant 1.000000e+00 : f32
    %444 = vector.broadcast %cst_151 : f32 to vector<8x128xf32>
    %445 = arith.addf %444, %443 : vector<8x128xf32>
    %446 = arith.divf %444, %445 : vector<8x128xf32>
    %447 = vector.extract_strided_slice %434 {offsets = [0, 256], sizes = [8, 128], strides = [1, 1]} : vector<8x512xf32> to vector<8x128xf32>
    %448 = math.tanh %447 : vector<8x128xf32>
    %449 = vector.extract_strided_slice %434 {offsets = [0, 384], sizes = [8, 128], strides = [1, 1]} : vector<8x512xf32> to vector<8x128xf32>
    %450 = arith.negf %449 : vector<8x128xf32>
    %451 = math.exp %450 : vector<8x128xf32>
    %cst_152 = arith.constant 1.000000e+00 : f32
    %452 = vector.broadcast %cst_152 : f32 to vector<8x128xf32>
    %453 = arith.addf %452, %451 : vector<8x128xf32>
    %454 = arith.divf %452, %453 : vector<8x128xf32>
    %455 = arith.mulf %446, %420 : vector<8x128xf32>
    %456 = arith.mulf %440, %448 : vector<8x128xf32>
    %457 = arith.addf %455, %456 : vector<8x128xf32>
    %458 = math.tanh %457 : vector<8x128xf32>
    %459 = arith.mulf %454, %458 : vector<8x128xf32>
    %460 = arith.index_cast %c3_i32_143 : i32 to index
    %c0_153 = arith.constant 0 : index
    %c0_154 = arith.constant 0 : index
    %461 = vector.load %arg5[%460, %c0_153, %c0_154] : memref<8x8x128xf32, #tpu.memory_space<vmem>>, vector<1x8x128xf32>
    %462 = vector.shape_cast %461 : vector<1x8x128xf32> to vector<8x128xf32>
    %463 = vector.shape_cast %459 : vector<8x128xf32> to vector<1x8x128xf32>
    tpu.vector_store %arg5[%460, %c0_153, %c0_154], %463 {strides = array<i32>} : memref<8x8x128xf32, #tpu.memory_space<vmem>>, vector<1x8x128xf32>,
    %c4_i32_155 = arith.constant 4 : i32
    %464 = arith.index_cast %c4_i32_155 : i32 to index
    %c0_156 = arith.constant 0 : index
    %c0_157 = arith.constant 0 : index
    %465 = vector.load %arg5[%464, %c0_156, %c0_157] : memref<8x8x128xf32, #tpu.memory_space<vmem>>, vector<1x8x128xf32>
    %466 = vector.shape_cast %465 : vector<1x8x128xf32> to vector<8x128xf32>
    %467 = tpu.concatenate %466, %459 in 1 : vector<8x128xf32>, vector<8x128xf32> -> vector<8x256xf32>
    %c1_158 = arith.constant 1 : index
    %c0_159 = arith.constant 0 : index
    %c0_160 = arith.constant 0 : index
    %468 = vector.load %arg1[%c1_158, %c0_159, %c0_160] : memref<2x256x512xf32, #tpu.memory_space<vmem>>, vector<1x256x512xf32>
    %469 = vector.shape_cast %468 : vector<1x256x512xf32> to vector<256x512xf32>
    %cst_161 = arith.constant dense<0.000000e+00> : vector<8x512xf32>
    %470 = tpu.matmul %467, %469, %cst_161 {dimension_numbers = #tpu.dot_dimension_numbers<[1], [0], [0], [1], [0, 0, 1, 1], [], []>} : vector<8x256xf32>, vector<256x512xf32>, vector<8x512xf32> -> vector<8x512xf32>
    %471 = arith.addf %470, %313 : vector<8x512xf32>
    %472 = vector.extract_strided_slice %471 {offsets = [0, 0], sizes = [8, 128], strides = [1, 1]} : vector<8x512xf32> to vector<8x128xf32>
    %473 = arith.negf %472 : vector<8x128xf32>
    %474 = math.exp %473 : vector<8x128xf32>
    %cst_162 = arith.constant 1.000000e+00 : f32
    %475 = vector.broadcast %cst_162 : f32 to vector<8x128xf32>
    %476 = arith.addf %475, %474 : vector<8x128xf32>
    %477 = arith.divf %475, %476 : vector<8x128xf32>
    %478 = vector.extract_strided_slice %471 {offsets = [0, 128], sizes = [8, 128], strides = [1, 1]} : vector<8x512xf32> to vector<8x128xf32>
    %479 = arith.negf %478 : vector<8x128xf32>
    %480 = math.exp %479 : vector<8x128xf32>
    %cst_163 = arith.constant 1.000000e+00 : f32
    %481 = vector.broadcast %cst_163 : f32 to vector<8x128xf32>
    %482 = arith.addf %481, %480 : vector<8x128xf32>
    %483 = arith.divf %481, %482 : vector<8x128xf32>
    %484 = vector.extract_strided_slice %471 {offsets = [0, 256], sizes = [8, 128], strides = [1, 1]} : vector<8x512xf32> to vector<8x128xf32>
    %485 = math.tanh %484 : vector<8x128xf32>
    %486 = vector.extract_strided_slice %471 {offsets = [0, 384], sizes = [8, 128], strides = [1, 1]} : vector<8x512xf32> to vector<8x128xf32>
    %487 = arith.negf %486 : vector<8x128xf32>
    %488 = math.exp %487 : vector<8x128xf32>
    %cst_164 = arith.constant 1.000000e+00 : f32
    %489 = vector.broadcast %cst_164 : f32 to vector<8x128xf32>
    %490 = arith.addf %489, %488 : vector<8x128xf32>
    %491 = arith.divf %489, %490 : vector<8x128xf32>
    %492 = arith.mulf %483, %457 : vector<8x128xf32>
    %493 = arith.mulf %477, %485 : vector<8x128xf32>
    %494 = arith.addf %492, %493 : vector<8x128xf32>
    %495 = math.tanh %494 : vector<8x128xf32>
    %496 = arith.mulf %491, %495 : vector<8x128xf32>
    %497 = arith.index_cast %c4_i32_155 : i32 to index
    %c0_165 = arith.constant 0 : index
    %c0_166 = arith.constant 0 : index
    %498 = vector.load %arg5[%497, %c0_165, %c0_166] : memref<8x8x128xf32, #tpu.memory_space<vmem>>, vector<1x8x128xf32>
    %499 = vector.shape_cast %498 : vector<1x8x128xf32> to vector<8x128xf32>
    %500 = vector.shape_cast %496 : vector<8x128xf32> to vector<1x8x128xf32>
    tpu.vector_store %arg5[%497, %c0_165, %c0_166], %500 {strides = array<i32>} : memref<8x8x128xf32, #tpu.memory_space<vmem>>, vector<1x8x128xf32>,
    %c5_i32_167 = arith.constant 5 : i32
    %501 = arith.index_cast %c5_i32_167 : i32 to index
    %c0_168 = arith.constant 0 : index
    %c0_169 = arith.constant 0 : index
    %502 = vector.load %arg5[%501, %c0_168, %c0_169] : memref<8x8x128xf32, #tpu.memory_space<vmem>>, vector<1x8x128xf32>
    %503 = vector.shape_cast %502 : vector<1x8x128xf32> to vector<8x128xf32>
    %504 = tpu.concatenate %503, %496 in 1 : vector<8x128xf32>, vector<8x128xf32> -> vector<8x256xf32>
    %c1_170 = arith.constant 1 : index
    %c0_171 = arith.constant 0 : index
    %c0_172 = arith.constant 0 : index
    %505 = vector.load %arg1[%c1_170, %c0_171, %c0_172] : memref<2x256x512xf32, #tpu.memory_space<vmem>>, vector<1x256x512xf32>
    %506 = vector.shape_cast %505 : vector<1x256x512xf32> to vector<256x512xf32>
    %cst_173 = arith.constant dense<0.000000e+00> : vector<8x512xf32>
    %507 = tpu.matmul %504, %506, %cst_173 {dimension_numbers = #tpu.dot_dimension_numbers<[1], [0], [0], [1], [0, 0, 1, 1], [], []>} : vector<8x256xf32>, vector<256x512xf32>, vector<8x512xf32> -> vector<8x512xf32>
    %508 = arith.addf %507, %313 : vector<8x512xf32>
    %509 = vector.extract_strided_slice %508 {offsets = [0, 0], sizes = [8, 128], strides = [1, 1]} : vector<8x512xf32> to vector<8x128xf32>
    %510 = arith.negf %509 : vector<8x128xf32>
    %511 = math.exp %510 : vector<8x128xf32>
    %cst_174 = arith.constant 1.000000e+00 : f32
    %512 = vector.broadcast %cst_174 : f32 to vector<8x128xf32>
    %513 = arith.addf %512, %511 : vector<8x128xf32>
    %514 = arith.divf %512, %513 : vector<8x128xf32>
    %515 = vector.extract_strided_slice %508 {offsets = [0, 128], sizes = [8, 128], strides = [1, 1]} : vector<8x512xf32> to vector<8x128xf32>
    %516 = arith.negf %515 : vector<8x128xf32>
    %517 = math.exp %516 : vector<8x128xf32>
    %cst_175 = arith.constant 1.000000e+00 : f32
    %518 = vector.broadcast %cst_175 : f32 to vector<8x128xf32>
    %519 = arith.addf %518, %517 : vector<8x128xf32>
    %520 = arith.divf %518, %519 : vector<8x128xf32>
    %521 = vector.extract_strided_slice %508 {offsets = [0, 256], sizes = [8, 128], strides = [1, 1]} : vector<8x512xf32> to vector<8x128xf32>
    %522 = math.tanh %521 : vector<8x128xf32>
    %523 = vector.extract_strided_slice %508 {offsets = [0, 384], sizes = [8, 128], strides = [1, 1]} : vector<8x512xf32> to vector<8x128xf32>
    %524 = arith.negf %523 : vector<8x128xf32>
    %525 = math.exp %524 : vector<8x128xf32>
    %cst_176 = arith.constant 1.000000e+00 : f32
    %526 = vector.broadcast %cst_176 : f32 to vector<8x128xf32>
    %527 = arith.addf %526, %525 : vector<8x128xf32>
    %528 = arith.divf %526, %527 : vector<8x128xf32>
    %529 = arith.mulf %520, %494 : vector<8x128xf32>
    %530 = arith.mulf %514, %522 : vector<8x128xf32>
    %531 = arith.addf %529, %530 : vector<8x128xf32>
    %532 = math.tanh %531 : vector<8x128xf32>
    %533 = arith.mulf %528, %532 : vector<8x128xf32>
    %534 = arith.index_cast %c5_i32_167 : i32 to index
    %c0_177 = arith.constant 0 : index
    %c0_178 = arith.constant 0 : index
    %535 = vector.load %arg5[%534, %c0_177, %c0_178] : memref<8x8x128xf32, #tpu.memory_space<vmem>>, vector<1x8x128xf32>
    %536 = vector.shape_cast %535 : vector<1x8x128xf32> to vector<8x128xf32>
    %537 = vector.shape_cast %533 : vector<8x128xf32> to vector<1x8x128xf32>
    tpu.vector_store %arg5[%534, %c0_177, %c0_178], %537 {strides = array<i32>} : memref<8x8x128xf32, #tpu.memory_space<vmem>>, vector<1x8x128xf32>,
    %c6_i32_179 = arith.constant 6 : i32
    %538 = arith.index_cast %c6_i32_179 : i32 to index
    %c0_180 = arith.constant 0 : index
    %c0_181 = arith.constant 0 : index
    %539 = vector.load %arg5[%538, %c0_180, %c0_181] : memref<8x8x128xf32, #tpu.memory_space<vmem>>, vector<1x8x128xf32>
    %540 = vector.shape_cast %539 : vector<1x8x128xf32> to vector<8x128xf32>
    %541 = tpu.concatenate %540, %533 in 1 : vector<8x128xf32>, vector<8x128xf32> -> vector<8x256xf32>
    %c1_182 = arith.constant 1 : index
    %c0_183 = arith.constant 0 : index
    %c0_184 = arith.constant 0 : index
    %542 = vector.load %arg1[%c1_182, %c0_183, %c0_184] : memref<2x256x512xf32, #tpu.memory_space<vmem>>, vector<1x256x512xf32>
    %543 = vector.shape_cast %542 : vector<1x256x512xf32> to vector<256x512xf32>
    %cst_185 = arith.constant dense<0.000000e+00> : vector<8x512xf32>
    %544 = tpu.matmul %541, %543, %cst_185 {dimension_numbers = #tpu.dot_dimension_numbers<[1], [0], [0], [1], [0, 0, 1, 1], [], []>} : vector<8x256xf32>, vector<256x512xf32>, vector<8x512xf32> -> vector<8x512xf32>
    %545 = arith.addf %544, %313 : vector<8x512xf32>
    %546 = vector.extract_strided_slice %545 {offsets = [0, 0], sizes = [8, 128], strides = [1, 1]} : vector<8x512xf32> to vector<8x128xf32>
    %547 = arith.negf %546 : vector<8x128xf32>
    %548 = math.exp %547 : vector<8x128xf32>
    %cst_186 = arith.constant 1.000000e+00 : f32
    %549 = vector.broadcast %cst_186 : f32 to vector<8x128xf32>
    %550 = arith.addf %549, %548 : vector<8x128xf32>
    %551 = arith.divf %549, %550 : vector<8x128xf32>
    %552 = vector.extract_strided_slice %545 {offsets = [0, 128], sizes = [8, 128], strides = [1, 1]} : vector<8x512xf32> to vector<8x128xf32>
    %553 = arith.negf %552 : vector<8x128xf32>
    %554 = math.exp %553 : vector<8x128xf32>
    %cst_187 = arith.constant 1.000000e+00 : f32
    %555 = vector.broadcast %cst_187 : f32 to vector<8x128xf32>
    %556 = arith.addf %555, %554 : vector<8x128xf32>
    %557 = arith.divf %555, %556 : vector<8x128xf32>
    %558 = vector.extract_strided_slice %545 {offsets = [0, 256], sizes = [8, 128], strides = [1, 1]} : vector<8x512xf32> to vector<8x128xf32>
    %559 = math.tanh %558 : vector<8x128xf32>
    %560 = vector.extract_strided_slice %545 {offsets = [0, 384], sizes = [8, 128], strides = [1, 1]} : vector<8x512xf32> to vector<8x128xf32>
    %561 = arith.negf %560 : vector<8x128xf32>
    %562 = math.exp %561 : vector<8x128xf32>
    %cst_188 = arith.constant 1.000000e+00 : f32
    %563 = vector.broadcast %cst_188 : f32 to vector<8x128xf32>
    %564 = arith.addf %563, %562 : vector<8x128xf32>
    %565 = arith.divf %563, %564 : vector<8x128xf32>
    %566 = arith.mulf %557, %531 : vector<8x128xf32>
    %567 = arith.mulf %551, %559 : vector<8x128xf32>
    %568 = arith.addf %566, %567 : vector<8x128xf32>
    %569 = math.tanh %568 : vector<8x128xf32>
    %570 = arith.mulf %565, %569 : vector<8x128xf32>
    %571 = arith.index_cast %c6_i32_179 : i32 to index
    %c0_189 = arith.constant 0 : index
    %c0_190 = arith.constant 0 : index
    %572 = vector.load %arg5[%571, %c0_189, %c0_190] : memref<8x8x128xf32, #tpu.memory_space<vmem>>, vector<1x8x128xf32>
    %573 = vector.shape_cast %572 : vector<1x8x128xf32> to vector<8x128xf32>
    %574 = vector.shape_cast %570 : vector<8x128xf32> to vector<1x8x128xf32>
    tpu.vector_store %arg5[%571, %c0_189, %c0_190], %574 {strides = array<i32>} : memref<8x8x128xf32, #tpu.memory_space<vmem>>, vector<1x8x128xf32>,
    %c7_i32_191 = arith.constant 7 : i32
    %575 = arith.index_cast %c7_i32_191 : i32 to index
    %c0_192 = arith.constant 0 : index
    %c0_193 = arith.constant 0 : index
    %576 = vector.load %arg5[%575, %c0_192, %c0_193] : memref<8x8x128xf32, #tpu.memory_space<vmem>>, vector<1x8x128xf32>
    %577 = vector.shape_cast %576 : vector<1x8x128xf32> to vector<8x128xf32>
    %578 = tpu.concatenate %577, %570 in 1 : vector<8x128xf32>, vector<8x128xf32> -> vector<8x256xf32>
    %c1_194 = arith.constant 1 : index
    %c0_195 = arith.constant 0 : index
    %c0_196 = arith.constant 0 : index
    %579 = vector.load %arg1[%c1_194, %c0_195, %c0_196] : memref<2x256x512xf32, #tpu.memory_space<vmem>>, vector<1x256x512xf32>
    %580 = vector.shape_cast %579 : vector<1x256x512xf32> to vector<256x512xf32>
    %cst_197 = arith.constant dense<0.000000e+00> : vector<8x512xf32>
    %581 = tpu.matmul %578, %580, %cst_197 {dimension_numbers = #tpu.dot_dimension_numbers<[1], [0], [0], [1], [0, 0, 1, 1], [], []>} : vector<8x256xf32>, vector<256x512xf32>, vector<8x512xf32> -> vector<8x512xf32>
    %582 = arith.addf %581, %313 : vector<8x512xf32>
    %583 = vector.extract_strided_slice %582 {offsets = [0, 0], sizes = [8, 128], strides = [1, 1]} : vector<8x512xf32> to vector<8x128xf32>
    %584 = arith.negf %583 : vector<8x128xf32>
    %585 = math.exp %584 : vector<8x128xf32>
    %cst_198 = arith.constant 1.000000e+00 : f32
    %586 = vector.broadcast %cst_198 : f32 to vector<8x128xf32>
    %587 = arith.addf %586, %585 : vector<8x128xf32>
    %588 = arith.divf %586, %587 : vector<8x128xf32>
    %589 = vector.extract_strided_slice %582 {offsets = [0, 128], sizes = [8, 128], strides = [1, 1]} : vector<8x512xf32> to vector<8x128xf32>
    %590 = arith.negf %589 : vector<8x128xf32>
    %591 = math.exp %590 : vector<8x128xf32>
    %cst_199 = arith.constant 1.000000e+00 : f32
    %592 = vector.broadcast %cst_199 : f32 to vector<8x128xf32>
    %593 = arith.addf %592, %591 : vector<8x128xf32>
    %594 = arith.divf %592, %593 : vector<8x128xf32>
    %595 = vector.extract_strided_slice %582 {offsets = [0, 256], sizes = [8, 128], strides = [1, 1]} : vector<8x512xf32> to vector<8x128xf32>
    %596 = math.tanh %595 : vector<8x128xf32>
    %597 = vector.extract_strided_slice %582 {offsets = [0, 384], sizes = [8, 128], strides = [1, 1]} : vector<8x512xf32> to vector<8x128xf32>
    %598 = arith.negf %597 : vector<8x128xf32>
    %599 = math.exp %598 : vector<8x128xf32>
    %cst_200 = arith.constant 1.000000e+00 : f32
    %600 = vector.broadcast %cst_200 : f32 to vector<8x128xf32>
    %601 = arith.addf %600, %599 : vector<8x128xf32>
    %602 = arith.divf %600, %601 : vector<8x128xf32>
    %603 = arith.mulf %594, %568 : vector<8x128xf32>
    %604 = arith.mulf %588, %596 : vector<8x128xf32>
    %605 = arith.addf %603, %604 : vector<8x128xf32>
    %606 = math.tanh %605 : vector<8x128xf32>
    %607 = arith.mulf %602, %606 : vector<8x128xf32>
    %608 = arith.index_cast %c7_i32_191 : i32 to index
    %c0_201 = arith.constant 0 : index
    %c0_202 = arith.constant 0 : index
    %609 = vector.load %arg5[%608, %c0_201, %c0_202] : memref<8x8x128xf32, #tpu.memory_space<vmem>>, vector<1x8x128xf32>
    %610 = vector.shape_cast %609 : vector<1x8x128xf32> to vector<8x128xf32>
    %611 = vector.shape_cast %607 : vector<8x128xf32> to vector<1x8x128xf32>
    tpu.vector_store %arg5[%608, %c0_201, %c0_202], %611 {strides = array<i32>} : memref<8x8x128xf32, #tpu.memory_space<vmem>>, vector<1x8x128xf32>,
    %c8_i32_203 = arith.constant 8 : i32
    %c1_204 = arith.constant 1 : index
    %c0_205 = arith.constant 0 : index
    %c0_206 = arith.constant 0 : index
    %612 = vector.load %arg3[%c1_204, %c0_205, %c0_206] : memref<2x8x128xf32, #tpu.memory_space<vmem>>, vector<1x8x128xf32>
    %613 = vector.shape_cast %612 : vector<1x8x128xf32> to vector<8x128xf32>
    %614 = vector.shape_cast %607 : vector<8x128xf32> to vector<1x8x128xf32>
    tpu.vector_store %arg3[%c1_204, %c0_205, %c0_206], %614 {strides = array<i32>} : memref<2x8x128xf32, #tpu.memory_space<vmem>>, vector<1x8x128xf32>,
    %c1_207 = arith.constant 1 : index
    %c0_208 = arith.constant 0 : index
    %c0_209 = arith.constant 0 : index
    %615 = vector.load %arg4[%c1_207, %c0_208, %c0_209] : memref<2x8x128xf32, #tpu.memory_space<vmem>>, vector<1x8x128xf32>
    %616 = vector.shape_cast %615 : vector<1x8x128xf32> to vector<8x128xf32>
    %617 = vector.shape_cast %605 : vector<8x128xf32> to vector<1x8x128xf32>
    tpu.vector_store %arg4[%c1_207, %c0_208, %c0_209], %617 {strides = array<i32>} : memref<2x8x128xf32, #tpu.memory_space<vmem>>, vector<1x8x128xf32>,
    return
  }
}

</mosaic_0001>

<bundles_post_ra>
// kernel: encoder_forward.1
= control target key start
LH: loop header
LB: loop body
LE: loop exit
PB: predicated region body
PF: predicated region fallthrough
CT: control target
= control target key end

     0   :  { %v13612_v3 = vmov 0.0   ;;  %s13607_s1 = inlined_call_operand.vmem [shape: f32[2,256,512], index: 1, kind: input, shape index: {}]   ;;  %s13608_s0 = inlined_call_operand.vmem [shape: f32[8,8,128], index: 0, kind: input, shape index: {}]   ;;  %s13609_s2 = inlined_call_operand.vmem [shape: f32[2,1,512], index: 2, kind: input, shape index: {}]   ;;  %s13610_s4 = inlined_call_operand.vmem [shape: f32[2,8,128], index: 4, kind: output, shape index: {1}]   ;;  %s13611_s3 = inlined_call_operand.vmem [shape: f32[2,8,128], index: 3, kind: output, shape index: {0}]  }
   0x1   :  { %v56_v0 = vld [vmem:[%s13607_s1 + $0x8] sm:$0xff]  ;;  %v55_v2 = vld [vmem:[%s13607_s1] sm:$0xff]  ;;  %247 = vmatprep.mubr.f32.mxu0 %v13612_v3  ;;  %318 = vmatprep.mubr.f32.mxu1 %v13612_v3  ;;  %v58_v19 = vld [vmem:[%s13607_s1 + $0x18] sm:$0xff] }
   0x2   :  { %v60_v1 = vld [vmem:[%s13607_s1 + $0x28] sm:$0xff]  ;;  %v59_v5 = vld [vmem:[%s13607_s1 + $0x20] sm:$0xff]  ;;  %v62_v20 = vld [vmem:[%s13607_s1 + $0x38] sm:$0xff] }
   0x3   :  { %v8253_v4 = vpack.c.bf16 %v60_v1, %v56_v0  ;;  %v64_v6 = vld [vmem:[%s13607_s1 + $0x48] sm:$0xff]  ;;  %v8264_v8 = vpack.c.bf16 %v59_v5, %v55_v2  ;;  %v63_v10 = vld [vmem:[%s13607_s1 + $0x40] sm:$0xff]  ;;  %v8305_v22 = vpack.c.bf16 %v62_v20, %v58_v19  ;;  %v57_v23 = vld [vmem:[%s13607_s1 + $0x10] sm:$0xff] }
   0x4   :  { %v68_v7 = vld [vmem:[%s13607_s1 + $0x68] sm:$0xff]  ;;  %v67_v11 = vld [vmem:[%s13607_s1 + $0x60] sm:$0xff]  ;;  %v61_v24 = vld [vmem:[%s13607_s1 + $0x30] sm:$0xff] }
   0x5   :  { %v8266_v9 = vpack.c.bf16 %v68_v7, %v64_v6  ;;  %v72_v12 = vld [vmem:[%s13607_s1 + $0x88] sm:$0xff]  ;;  %5911 = vmatprep.subr.bf16.mxu0 %v8253_v4  ;;  %v8282_v14 = vpack.c.bf16 %v67_v11, %v63_v10  ;;  %v71_v15 = vld [vmem:[%s13607_s1 + $0x80] sm:$0xff]  ;;  %v8313_v25 = vpack.c.bf16 %v61_v24, %v57_v23  ;;  %5975 = vmatprep.subr.bf16.mxu1 %v8305_v22  ;;  %v66_v27 = vld [vmem:[%s13607_s1 + $0x58] sm:$0xff] }
   0x6   :  { %v76_v13 = vld [vmem:[%s13607_s1 + $0xa8] sm:$0xff]  ;;  %5913 = vmatpush1.bf16.msra.mxu0 %v8264_v8  ;;  %v75_v16 = vld [vmem:[%s13607_s1 + $0xa0] sm:$0xff]  ;;  %v70_v28 = vld [vmem:[%s13607_s1 + $0x78] sm:$0xff] }
   0x7   :  { %5915 = vmatprep.subr.bf16.mxu0 %v8266_v9  ;;  %v8291_v17 = vpack.c.bf16 %v76_v13, %v72_v12  ;;  %v80_v18 = vld [vmem:[%s13607_s1 + $0xc8] sm:$0xff]  ;;  %v8316_v26 = vpack.c.bf16 %v75_v16, %v71_v15  ;;  %v65_v29 = vld [vmem:[%s13607_s1 + $0x50] sm:$0xff]  ;;  %v79_v31 = vld [vmem:[%s13607_s1 + $0xc0] sm:$0xff]  ;;  %5977 = vmatpush1.bf16.msra.mxu1 %v8313_v25  ;;  %v8338_v33 = vpack.c.bf16 %v70_v28, %v66_v27 }
   0x8   :  { %v84_v21 = vld [vmem:[%s13607_s1 + $0xe8] sm:$0xff]  ;;  %v83_v32 = vld [vmem:[%s13607_s1 + $0xe0] sm:$0xff]  ;;  %v69_v34 = vld [vmem:[%s13607_s1 + $0x70] sm:$0xff] }
   0x9   :  { %v8329_v30 = vpack.c.bf16 %v84_v21, %v80_v18  ;;  %v88_v35 = vld [vmem:[%s13607_s1 + $0x108] sm:$0xff]  ;;  %v8349_v37 = vpack.c.bf16 %v69_v34, %v65_v29  ;;  %v74_v38 = vld [vmem:[%s13607_s1 + $0x98] sm:$0xff]  ;;  %5979 = vmatprep.subr.bf16.mxu1 %v8338_v33  ;;  %v73_v40 = vld [vmem:[%s13607_s1 + $0x90] sm:$0xff]  ;;  %v8365_v42 = vpack.c.bf16 %v83_v32, %v79_v31 }
   0xa   :  { %5917 = vmatpush1.bf16.msra.mxu0 %v8282_v14  ;;  %v92_v36 = vld [vmem:[%s13607_s1 + $0x128] sm:$0xff]  ;;  %v78_v39 = vld [vmem:[%s13607_s1 + $0xb8] sm:$0xff]  ;;  %v77_v41 = vld [vmem:[%s13607_s1 + $0xb0] sm:$0xff] }
   0xb   :  { %5919 = vmatprep.subr.bf16.mxu0 %v8291_v17  ;;  %v87_v43 = vld [vmem:[%s13607_s1 + $0x100] sm:$0xff]  ;;  %v8373_v45 = vpack.c.bf16 %v78_v39, %v74_v38  ;;  %v8376_v46 = vpack.c.bf16 %v92_v36, %v88_v35  ;;  %5981 = vmatpush1.bf16.msra.mxu1 %v8349_v37  ;;  %v96_v47 = vld [vmem:[%s13607_s1 + $0x148] sm:$0xff]  ;;  %v8382_v48 = vpack.c.bf16 %v77_v41, %v73_v40  ;;  %v82_v49 = vld [vmem:[%s13607_s1 + $0xd8] sm:$0xff] }
   0xc   :  { %v91_v44 = vld [vmem:[%s13607_s1 + $0x120] sm:$0xff]  ;;  %v86_v50 = vld [vmem:[%s13607_s1 + $0xf8] sm:$0xff]  ;;  %v100_v51 = vld [vmem:[%s13607_s1 + $0x168] sm:$0xff] }
   0xd   :  { %5983 = vmatprep.subr.bf16.mxu1 %v8373_v45  ;;  %v8394_v52 = vpack.c.bf16 %v86_v50, %v82_v49  ;;  %v81_v53 = vld [vmem:[%s13607_s1 + $0xd0] sm:$0xff]  ;;  %v8403_v55 = vpack.c.bf16 %v91_v44, %v87_v43  ;;  %v90_v56 = vld [vmem:[%s13607_s1 + $0x118] sm:$0xff]  ;;  %v8412_v58 = vpack.c.bf16 %v100_v51, %v96_v47  ;;  %v95_v59 = vld [vmem:[%s13607_s1 + $0x140] sm:$0xff] }
   0xe   :  { %5921 = vmatpush1.bf16.msra.mxu0 %v8316_v26  ;;  %v85_v54 = vld [vmem:[%s13607_s1 + $0xf0] sm:$0xff]  ;;  %v94_v57 = vld [vmem:[%s13607_s1 + $0x138] sm:$0xff]  ;;  %v99_v60 = vld [vmem:[%s13607_s1 + $0x160] sm:$0xff] }
   0xf   :  { %5923 = vmatprep.subr.bf16.mxu0 %v8329_v30  ;;  %5985 = vmatpush1.bf16.msra.mxu1 %v8382_v48  ;;  %v104_v61 = vld [vmem:[%s13607_s1 + $0x188] sm:$0xff]  ;;  %v8424_v62 = vpack.c.bf16 %v85_v54, %v81_v53  ;;  %v8430_v0 = vpack.c.bf16 %v94_v57, %v90_v56  ;;  %v89_v1 = vld [vmem:[%s13607_s1 + $0x110] sm:$0xff]  ;;  %v98_v5 = vld [vmem:[%s13607_s1 + $0x158] sm:$0xff]  ;;  %v8445_v7 = vpack.c.bf16 %v99_v60, %v95_v59 }
  0x10   :  { %v108_v63 = vld [vmem:[%s13607_s1 + $0x1a8] sm:$0xff]  ;;  %5987 = vmatprep.subr.bf16.mxu1 %v8394_v52  ;;  %v93_v2 = vld [vmem:[%s13607_s1 + $0x130] sm:$0xff]  ;;  %v102_v6 = vld [vmem:[%s13607_s1 + $0x178] sm:$0xff] }
  0x11   :  { %v8448_v10 = vpack.c.bf16 %v108_v63, %v104_v61  ;;  %v103_v11 = vld [vmem:[%s13607_s1 + $0x180] sm:$0xff]  ;;  %v112_v13 = vld [vmem:[%s13607_s1 + $0x1c8] sm:$0xff]  ;;  %v8460_v15 = vpack.c.bf16 %v93_v2, %v89_v1  ;;  %v8466_v18 = vpack.c.bf16 %v102_v6, %v98_v5  ;;  %v97_v19 = vld [vmem:[%s13607_s1 + $0x150] sm:$0xff] }
  0x12   :  { %5925 = vmatpush1.bf16.msra.mxu0 %v8365_v42  ;;  %v107_v12 = vld [vmem:[%s13607_s1 + $0x1a0] sm:$0xff]  ;;  %v116_v16 = vld [vmem:[%s13607_s1 + $0x1e8] sm:$0xff]  ;;  %v101_v20 = vld [vmem:[%s13607_s1 + $0x170] sm:$0xff] }
  0x13   :  { %5927 = vmatprep.subr.bf16.mxu0 %v8376_v46  ;;  %5989 = vmatpush1.bf16.msra.mxu1 %v8424_v62  ;;  %v106_v21 = vld [vmem:[%s13607_s1 + $0x198] sm:$0xff]  ;;  %v8481_v24 = vpack.c.bf16 %v107_v12, %v103_v11  ;;  %v8484_v27 = vpack.c.bf16 %v116_v16, %v112_v13  ;;  %v111_v28 = vld [vmem:[%s13607_s1 + $0x1c0] sm:$0xff]  ;;  %v120_v31 = vld [vmem:[%s13607_s1 + $0x208] sm:$0xff]  ;;  %v8496_v32 = vpack.c.bf16 %v101_v20, %v97_v19 }
  0x14   :  { %5991 = vmatprep.subr.bf16.mxu1 %v8430_v0  ;;  %v110_v23 = vld [vmem:[%s13607_s1 + $0x1b8] sm:$0xff]  ;;  %v115_v29 = vld [vmem:[%s13607_s1 + $0x1e0] sm:$0xff]  ;;  %v124_v34 = vld [vmem:[%s13607_s1 + $0x228] sm:$0xff] }
  0x15   :  { %v8502_v35 = vpack.c.bf16 %v110_v23, %v106_v21  ;;  %v105_v36 = vld [vmem:[%s13607_s1 + $0x190] sm:$0xff]  ;;  %v114_v39 = vld [vmem:[%s13607_s1 + $0x1d8] sm:$0xff]  ;;  %v8517_v41 = vpack.c.bf16 %v115_v29, %v111_v28  ;;  %v8520_v43 = vpack.c.bf16 %v124_v34, %v120_v31  ;;  %v119_v44 = vld [vmem:[%s13607_s1 + $0x200] sm:$0xff] }
  0x16   :  { %5929 = vmatpush1.bf16.msra.mxu0 %v8403_v55  ;;  %v109_v38 = vld [vmem:[%s13607_s1 + $0x1b0] sm:$0xff]  ;;  %v118_v40 = vld [vmem:[%s13607_s1 + $0x1f8] sm:$0xff]  ;;  %v123_v47 = vld [vmem:[%s13607_s1 + $0x220] sm:$0xff] }
  0x17   :  { %5931 = vmatprep.subr.bf16.mxu0 %v8412_v58  ;;  %5993 = vmatpush1.bf16.msra.mxu1 %v8460_v15  ;;  %v128_v49 = vld [vmem:[%s13607_s1 + $0x248] sm:$0xff]  ;;  %v8532_v50 = vpack.c.bf16 %v109_v38, %v105_v36  ;;  %v8538_v53 = vpack.c.bf16 %v118_v40, %v114_v39  ;;  %v113_v54 = vld [vmem:[%s13607_s1 + $0x1d0] sm:$0xff]  ;;  %v122_v57 = vld [vmem:[%s13607_s1 + $0x218] sm:$0xff]  ;;  %v8553_v60 = vpack.c.bf16 %v123_v47, %v119_v44 }
  0x18   :  { %5995 = vmatprep.subr.bf16.mxu1 %v8466_v18  ;;  %v132_v51 = vld [vmem:[%s13607_s1 + $0x268] sm:$0xff]  ;;  %v117_v56 = vld [vmem:[%s13607_s1 + $0x1f0] sm:$0xff]  ;;  %v126_v59 = vld [vmem:[%s13607_s1 + $0x238] sm:$0xff] }
  0x19   :  { %v8556_v61 = vpack.c.bf16 %v132_v51, %v128_v49  ;;  %v127_v63 = vld [vmem:[%s13607_s1 + $0x240] sm:$0xff]  ;;  %v136_v2 = vld [vmem:[%s13607_s1 + $0x288] sm:$0xff]  ;;  %v8568_v5 = vpack.c.bf16 %v117_v56, %v113_v54  ;;  %v8574_v11 = vpack.c.bf16 %v126_v59, %v122_v57  ;;  %v121_v12 = vld [vmem:[%s13607_s1 + $0x210] sm:$0xff] }
  0x1a   :  { %5933 = vmatpush1.bf16.msra.mxu0 %v8445_v7  ;;  %v131_v1 = vld [vmem:[%s13607_s1 + $0x260] sm:$0xff]  ;;  %v140_v6 = vld [vmem:[%s13607_s1 + $0x2a8] sm:$0xff]  ;;  %v125_v13 = vld [vmem:[%s13607_s1 + $0x230] sm:$0xff] }
  0x1b   :  { %5935 = vmatprep.subr.bf16.mxu0 %v8448_v10  ;;  %5997 = vmatpush1.bf16.msra.mxu1 %v8496_v32  ;;  %v130_v16 = vld [vmem:[%s13607_s1 + $0x258] sm:$0xff]  ;;  %v8589_v20 = vpack.c.bf16 %v131_v1, %v127_v63  ;;  %v8592_v21 = vpack.c.bf16 %v140_v6, %v136_v2  ;;  %v135_v23 = vld [vmem:[%s13607_s1 + $0x280] sm:$0xff]  ;;  %v144_v29 = vld [vmem:[%s13607_s1 + $0x2c8] sm:$0xff]  ;;  %v8604_v31 = vpack.c.bf16 %v125_v13, %v121_v12 }
  0x1c   :  { %5999 = vmatprep.subr.bf16.mxu1 %v8502_v35  ;;  %v134_v19 = vld [vmem:[%s13607_s1 + $0x278] sm:$0xff]  ;;  %v139_v28 = vld [vmem:[%s13607_s1 + $0x2a0] sm:$0xff]  ;;  %v148_v34 = vld [vmem:[%s13607_s1 + $0x2e8] sm:$0xff] }
  0x1d   :  { %v8610_v36 = vpack.c.bf16 %v134_v19, %v130_v16  ;;  %v129_v38 = vld [vmem:[%s13607_s1 + $0x250] sm:$0xff]  ;;  %v138_v40 = vld [vmem:[%s13607_s1 + $0x298] sm:$0xff]  ;;  %v8625_v47 = vpack.c.bf16 %v139_v28, %v135_v23  ;;  %v8628_v49 = vpack.c.bf16 %v148_v34, %v144_v29  ;;  %v143_v51 = vld [vmem:[%s13607_s1 + $0x2c0] sm:$0xff] }
  0x1e   :  { %5937 = vmatpush1.bf16.msra.mxu0 %v8481_v24  ;;  %v133_v39 = vld [vmem:[%s13607_s1 + $0x270] sm:$0xff]  ;;  %v142_v44 = vld [vmem:[%s13607_s1 + $0x2b8] sm:$0xff]  ;;  %v147_v54 = vld [vmem:[%s13607_s1 + $0x2e0] sm:$0xff] }
  0x1f   :  { %5939 = vmatprep.subr.bf16.mxu0 %v8484_v27  ;;  %6001 = vmatpush1.bf16.msra.mxu1 %v8532_v50  ;;  %v152_v56 = vld [vmem:[%s13607_s1 + $0x308] sm:$0xff]  ;;  %v8640_v57 = vpack.c.bf16 %v133_v39, %v129_v38  ;;  %v8646_v63 = vpack.c.bf16 %v142_v44, %v138_v40  ;;  %v137_v1 = vld [vmem:[%s13607_s1 + $0x290] sm:$0xff]  ;;  %v146_v6 = vld [vmem:[%s13607_s1 + $0x2d8] sm:$0xff]  ;;  %v8661_v13 = vpack.c.bf16 %v147_v54, %v143_v51 }
  0x20   :  { %6003 = vmatprep.subr.bf16.mxu1 %v8538_v53  ;;  %v156_v59 = vld [vmem:[%s13607_s1 + $0x328] sm:$0xff]  ;;  %v141_v2 = vld [vmem:[%s13607_s1 + $0x2b0] sm:$0xff]  ;;  %v150_v12 = vld [vmem:[%s13607_s1 + $0x2f8] sm:$0xff] }
  0x21   :  { %v8664_v16 = vpack.c.bf16 %v156_v59, %v152_v56  ;;  %v151_v19 = vld [vmem:[%s13607_s1 + $0x300] sm:$0xff]  ;;  %v160_v28 = vld [vmem:[%s13607_s1 + $0x348] sm:$0xff]  ;;  %v8676_v29 = vpack.c.bf16 %v141_v2, %v137_v1  ;;  %v8682_v38 = vpack.c.bf16 %v150_v12, %v146_v6  ;;  %v145_v39 = vld [vmem:[%s13607_s1 + $0x2d0] sm:$0xff] }
  0x22   :  { %5941 = vmatpush1.bf16.msra.mxu0 %v8517_v41  ;;  %v155_v23 = vld [vmem:[%s13607_s1 + $0x320] sm:$0xff]  ;;  %v164_v34 = vld [vmem:[%s13607_s1 + $0x368] sm:$0xff]  ;;  %v149_v40 = vld [vmem:[%s13607_s1 + $0x2f0] sm:$0xff] }
  0x23   :  { %5943 = vmatprep.subr.bf16.mxu0 %v8520_v43  ;;  %6005 = vmatpush1.bf16.msra.mxu1 %v8568_v5  ;;  %13769 = vst [vmem:[#allocation3_spill] sm:$0xff] %v8682_v38  ;;  %v154_v44 = vld [vmem:[%s13607_s1 + $0x318] sm:$0xff]  ;;  %v8697_v54 = vpack.c.bf16 %v155_v23, %v151_v19  ;;  %v8700_v56 = vpack.c.bf16 %v164_v34, %v160_v28  ;;  %v159_v59 = vld [vmem:[%s13607_s1 + $0x340] sm:$0xff]  ;;  %v168_v2 = vld [vmem:[%s13607_s1 + $0x388] sm:$0xff] }
  0x24   :  { %6007 = vmatprep.subr.bf16.mxu1 %v8574_v11  ;;  %v158_v51 = vld [vmem:[%s13607_s1 + $0x338] sm:$0xff]  ;;  %v163_v1 = vld [vmem:[%s13607_s1 + $0x360] sm:$0xff]  ;;  %v8712_v6 = vpack.c.bf16 %v149_v40, %v145_v39  ;;  %v172_v12 = vld [vmem:[%s13607_s1 + $0x3a8] sm:$0xff] }
  0x25   :  { %13770 = vst [vmem:[#allocation4_spill] sm:$0xff] %v8697_v54  ;;  %13771 = vst [vmem:[#allocation5_spill] sm:$0xff] %v8700_v56  ;;  %v8718_v19 = vpack.c.bf16 %v158_v51, %v154_v44  ;;  %v153_v23 = vld [vmem:[%s13607_s1 + $0x310] sm:$0xff]  ;;  %v162_v34 = vld [vmem:[%s13607_s1 + $0x358] sm:$0xff]  ;;  %v8733_v40 = vpack.c.bf16 %v163_v1, %v159_v59  ;;  %v8736_v44 = vpack.c.bf16 %v172_v12, %v168_v2 }
  0x26   :  { %5945 = vmatpush1.bf16.msra.mxu0 %v8553_v60  ;;  %13772 = vst [vmem:[#allocation6_spill] sm:$0xff] %v8712_v6  ;;  %v157_v28 = vld [vmem:[%s13607_s1 + $0x330] sm:$0xff]  ;;  %v166_v39 = vld [vmem:[%s13607_s1 + $0x378] sm:$0xff]  ;;  %v167_v51 = vld [vmem:[%s13607_s1 + $0x380] sm:$0xff] }
  0x27   :  { %5947 = vmatprep.subr.bf16.mxu0 %v8556_v61  ;;  %6009 = vmatpush1.bf16.msra.mxu1 %v8604_v31  ;;  %13773 = vst [vmem:[#allocation7_spill] sm:$0xff] %v8718_v19  ;;  %v171_v3 = vld [vmem:[%s13607_s1 + $0x3a0] sm:$0xff]  ;;  %v8748_v59 = vpack.c.bf16 %v157_v28, %v153_v23  ;;  %v180_v1 = vld [vmem:[%s13607_s1 + $0x3e8] sm:$0xff]  ;;  %v8754_v2 = vpack.c.bf16 %v166_v39, %v162_v34  ;;  %v161_v12 = vld [vmem:[%s13607_s1 + $0x350] sm:$0xff] }
  0x28   :  { %6011 = vmatprep.subr.bf16.mxu1 %v8610_v36  ;;  %v170_v23 = vld [vmem:[%s13607_s1 + $0x398] sm:$0xff]  ;;  %v8769_v34 = vpack.c.bf16 %v171_v3, %v167_v51  ;;  %v173_v51 = vld [vmem:[%s13607_s1 + $0x3b0] sm:$0xff] }
  0x29   :  { %13774 = vst [vmem:[#allocation8_spill] sm:$0xff] %v8754_v2  ;;  %v174_v28 = vld [vmem:[%s13607_s1 + $0x3b8] sm:$0xff] }
  0x2a   :  { %5949 = vmatpush1.bf16.msra.mxu0 %v8589_v20  ;;  %13775 = vst [vmem:[#allocation9_spill] sm:$0xff] %v8769_v34  ;;  %v8784_v3 = vpack.c.bf16 %v174_v28, %v170_v23 }
  0x2b   :  { %5951 = vmatprep.subr.bf16.mxu0 %v8592_v21  ;;  %6013 = vmatpush1.bf16.msra.mxu1 %v8640_v57 }
  0x2c   :  { %6015 = vmatprep.subr.bf16.mxu1 %v8646_v63 }
  0x2e   :  { %5953 = vmatpush1.bf16.msra.mxu0 %v8625_v47 }
  0x2f   :  { %5955 = vmatprep.subr.bf16.mxu0 %v8628_v49  ;;  %6017 = vmatpush1.bf16.msra.mxu1 %v8676_v29 }
  0x30   :  { %6019 = vmatprep.subr.bf16.mxu1 %v8682_v38 }
  0x32   :  { %5957 = vmatpush1.bf16.msra.mxu0 %v8661_v13 }
  0x33   :  { %5959 = vmatprep.subr.bf16.mxu0 %v8664_v16  ;;  %6021 = vmatpush1.bf16.msra.mxu1 %v8712_v6  ;;  %v165_v6 = vld [vmem:[%s13607_s1 + $0x370] sm:$0xff] }
  0x34   :  { %6023 = vmatprep.subr.bf16.mxu1 %v8718_v19  ;;  %v175_v19 = vld [vmem:[%s13607_s1 + $0x3c0] sm:$0xff]  ;;  %v8781_v38 = vpack.c.bf16 %v165_v6, %v161_v12  ;;  %v182_v6 = vld [vmem:[%s13607_s1 + $0x3f8] sm:$0xff] }
  0x36   :  { %5961 = vmatpush1.bf16.msra.mxu0 %v8697_v54  ;;  %v176_v54 = vld [vmem:[%s13607_s1 + $0x3c8] sm:$0xff] }
  0x37   :  { %5963 = vmatprep.subr.bf16.mxu0 %v8700_v56  ;;  %v8772_v39 = vpack.c.bf16 %v180_v1, %v176_v54  ;;  %v179_v56 = vld [vmem:[%s13607_s1 + $0x3e0] sm:$0xff]  ;;  %6025 = vmatpush1.bf16.msra.mxu1 %v8748_v59  ;;  %v169_v54 = vld [vmem:[%s13607_s1 + $0x390] sm:$0xff]  ;;  %v178_v1 = vld [vmem:[%s13607_s1 + $0x3d8] sm:$0xff] }
  0x38   :  { %6027 = vmatprep.subr.bf16.mxu1 %v8754_v2  ;;  %v8799_v12 = vpack.c.bf16 %v179_v56, %v175_v19  ;;  %v8803_v23 = vpack.c.bf16 %v173_v51, %v169_v54  ;;  %v8806_v28 = vpack.c.bf16 %v182_v6, %v178_v1  ;;  %v177_v2 = vld [vmem:[%s13607_s1 + $0x3d0] sm:$0xff]  ;;  %v16_v56 = vld [vmem:[%s13608_s0] sm:$0xff]  ;;  %v17_v51 = vld [vmem:[%s13608_s0 + $0x8] sm:$0xff] }
  0x3a   :  { %5965 = vmatpush1.bf16.msra.mxu0 %v8733_v40 }
  0x3b   :  { %5967 = vmatprep.subr.bf16.mxu0 %v8736_v44  ;;  %6029 = vmatpush1.bf16.msra.mxu1 %v8781_v38 }
  0x3c   :  { %6031 = vmatprep.subr.bf16.mxu1 %v8784_v3 }
  0x3e   :  { %5969 = vmatpush1.bf16.msra.mxu0 %v8769_v34  ;;  %v181_v34 = vld [vmem:[%s13607_s1 + $0x3f0] sm:$0xff] }
  0x3f   :  { %5971 = vmatprep.subr.bf16.mxu0 %v8772_v39  ;;  %6033 = vmatpush1.bf16.msra.mxu1 %v8803_v23  ;;  %v8819_v19 = vpack.c.bf16 %v181_v34, %v177_v2  ;;  %v655_v2 = vld [vmem:[%s13607_s1 + $0x30] sm:$0xff]  ;;  %v658_v34 = vld [vmem:[%s13607_s1 + $0x48] sm:$0xff] }
  0x40   :  { %6035 = vmatprep.subr.bf16.mxu1 %v8806_v28 }
  0x42   :  { %5973 = vmatpush1.bf16.msra.mxu0 %v8799_v12 }
  0x43   :  { %6039 = vmatprep.subr.bf16.mxu0 %v8253_v4  ;;  %6037 = vmatpush1.bf16.msra.mxu1 %v8819_v19  ;;  %v13776_v4 = vld [vmem:[#allocation3_spill] sm:$0xff] }
  0x44   :  { %6103 = vmatprep.subr.bf16.mxu1 %v8305_v22  ;;  %v13781_v22 = vld [vmem:[#allocation8_spill] sm:$0xff] }
  0x45   :  { %248 = vmatmul.mubr.f32.vlgmr.msra.gmra.mrb[0].mxu0 %v16_v56 }
  0x46   :  { %6041 = vmatpush1.bf16.msra.mxu0 %v8264_v8  ;;  %319 = vmatmul.mubr.f32.vlgmr.msra.gmra.mrb[0].mxu1 %v16_v56  ;;  %v13777_v8 = vld [vmem:[#allocation4_spill] sm:$0xff] }
  0x47   :  { %6043 = vmatprep.subr.bf16.mxu0 %v8266_v9  ;;  %6105 = vmatpush1.bf16.msra.mxu1 %v8313_v25  ;;  %v13778_v9 = vld [vmem:[#allocation5_spill] sm:$0xff]  ;;  %v666_v56 = vld [vmem:[%s13607_s1 + $0x88] sm:$0xff] }
  0x48   :  { %6107 = vmatprep.subr.bf16.mxu1 %v8338_v33  ;;  %v13782_v25 = vld [vmem:[#allocation9_spill] sm:$0xff] }
  0x4a   :  { %6045 = vmatpush1.bf16.msra.mxu0 %v8282_v14  ;;  %v13779_v14 = vld [vmem:[#allocation6_spill] sm:$0xff] }
  0x4b   :  { %6047 = vmatprep.subr.bf16.mxu0 %v8291_v17  ;;  %6109 = vmatpush1.bf16.msra.mxu1 %v8349_v37  ;;  %v13780_v17 = vld [vmem:[#allocation7_spill] sm:$0xff]  ;;  %v652_v37 = vld [vmem:[%s13607_s1 + $0x18] sm:$0xff] }
  0x4c   :  { %6111 = vmatprep.subr.bf16.mxu1 %v8373_v45 }
  0x4e   :  { %6049 = vmatpush1.bf16.msra.mxu0 %v8316_v26  ;;  %v650_v26 = vld [vmem:[%s13607_s1 + $0x8] sm:$0xff] }
  0x4f   :  { %6051 = vmatprep.subr.bf16.mxu0 %v8329_v30  ;;  %6113 = vmatpush1.bf16.msra.mxu1 %v8382_v48  ;;  %v654_v30 = vld [vmem:[%s13607_s1 + $0x28] sm:$0xff] }
  0x50   :  { %6115 = vmatprep.subr.bf16.mxu1 %v8394_v52  ;;  %v8893_v33 = vpack.c.bf16 %v654_v30, %v650_v26  ;;  %v673_v30 = vld [vmem:[%s13607_s1 + $0xc0] sm:$0xff] }
  0x52   :  { %6053 = vmatpush1.bf16.msra.mxu0 %v8365_v42  ;;  %v656_v42 = vld [vmem:[%s13607_s1 + $0x38] sm:$0xff] }
  0x53   :  { %6055 = vmatprep.subr.bf16.mxu0 %v8376_v46  ;;  %6117 = vmatpush1.bf16.msra.mxu1 %v8424_v62  ;;  %v8902_v45 = vpack.c.bf16 %v656_v42, %v652_v37  ;;  %v34_v46 = vlaneseq  ;;  %v677_v37 = vld [vmem:[%s13607_s1 + $0xe0] sm:$0xff] }
  0x54   :  { %6119 = vmatprep.subr.bf16.mxu1 %v8430_v0  ;;  %v9012_v42 = vpack.c.bf16 %v677_v37, %v673_v30  ;;  %v684_v37 = vld [vmem:[%s13607_s1 + $0x118] sm:$0xff] }
  0x55   :  { %v8905_v48 = vshrl.u32 %v34_v46, 7  ;;  %v682_v46 = vld [vmem:[%s13607_s1 + $0x108] sm:$0xff] }
  0x56   :  { %6057 = vmatpush1.bf16.msra.mxu0 %v8403_v55  ;;  %v32_v55 = vld [vmem:[%s13609_s2] sm:$0xf] }
  0x57   :  { %6059 = vmatprep.subr.bf16.mxu0 %v8412_v58  ;;  %6121 = vmatpush1.bf16.msra.mxu1 %v8460_v15  ;;  %13783 = vst [vmem:[#allocation3_spill] sm:$0xff] %v8905_v48  ;;  %v13624_v52 = vsub.s32 0, %v8905_v48  ;;  %v13623_v58 = vsub.s32 1, %v8905_v48 }
  0x58   :  { %6123 = vmatprep.subr.bf16.mxu1 %v8466_v18 }
  0x59   :  { %v8914_v62 = vrot.slane %v32_v55, %v13624_v52  ;;  %v8918_v0 = vrot.slane %v32_v55, %v13623_v58  ;;  %v761_v52 = vld [vmem:[%s13607_s1 + $0x380] sm:$0xff] }
  0x5a   :  { %6061 = vmatpush1.bf16.msra.mxu0 %v8445_v7  ;;  %v13622_v7 = vsub.s32 3, %v8905_v48 }
  0x5b   :  { %6063 = vmatprep.subr.bf16.mxu0 %v8448_v10  ;;  %6125 = vmatpush1.bf16.msra.mxu1 %v8496_v32  ;;  %13784 = vst [vmem:[#allocation4_spill] sm:$0xff] %v8914_v62  ;;  %13785 = vst [vmem:[#allocation5_spill] sm:$0xff] %v8918_v0 }
  0x5c   :  { %6127 = vmatprep.subr.bf16.mxu1 %v8502_v35  ;;  %v8925_v32 = vrot.slane %v32_v55, %v13622_v7 }
  0x5e   :  { %6065 = vmatpush1.bf16.msra.mxu0 %v8481_v24  ;;  %13786 = vst [vmem:[#allocation6_spill] sm:$0xff] %v8925_v32 }
  0x5f   :  { %6067 = vmatprep.subr.bf16.mxu0 %v8484_v27  ;;  %6129 = vmatpush1.bf16.msra.mxu1 %v8532_v50 }
  0x60   :  { %6131 = vmatprep.subr.bf16.mxu1 %v8538_v53 }
  0x62   :  { %6069 = vmatpush1.bf16.msra.mxu0 %v8517_v41  ;;  %v13621_v41 = vsub.s32 2, %v8905_v48 }
  0x63   :  { %6071 = vmatprep.subr.bf16.mxu0 %v8520_v43  ;;  %6133 = vmatpush1.bf16.msra.mxu1 %v8568_v5 }
  0x64   :  { %6135 = vmatprep.subr.bf16.mxu1 %v8574_v11 }
  0x66   :  { %6073 = vmatpush1.bf16.msra.mxu0 %v8553_v60  ;;  %v8931_v60 = vrot.slane %v32_v55, %v13621_v41  ;;  %v686_v55 = vld [vmem:[%s13607_s1 + $0x128] sm:$0xff]  ;;  %v735_v41 = vld [vmem:[%s13607_s1 + $0x2b0] sm:$0xff] }
  0x67   :  { %6075 = vmatprep.subr.bf16.mxu0 %v8556_v61  ;;  %6137 = vmatpush1.bf16.msra.mxu1 %v8604_v31 }
  0x68   :  { %6139 = vmatprep.subr.bf16.mxu1 %v8610_v36  ;;  %13787 = vst [vmem:[#allocation7_spill] sm:$0xff] %v8931_v60 }
  0x6a   :  { %6077 = vmatpush1.bf16.msra.mxu0 %v8589_v20 }
  0x6b   :  { %6079 = vmatprep.subr.bf16.mxu0 %v8592_v21  ;;  %6141 = vmatpush1.bf16.msra.mxu1 %v8640_v57 }
  0x6c   :  { %6143 = vmatprep.subr.bf16.mxu1 %v8646_v63 }
  0x6e   :  { %6081 = vmatpush1.bf16.msra.mxu0 %v8625_v47 }
  0x6f   :  { %6083 = vmatprep.subr.bf16.mxu0 %v8628_v49  ;;  %6145 = vmatpush1.bf16.msra.mxu1 %v8676_v29 }
  0x70   :  { %6147 = vmatprep.subr.bf16.mxu1 %v13776_v4 }
  0x72   :  { %6085 = vmatpush1.bf16.msra.mxu0 %v8661_v13 }
  0x73   :  { %6087 = vmatprep.subr.bf16.mxu0 %v8664_v16  ;;  %6149 = vmatpush1.bf16.msra.mxu1 %v13779_v14  ;;  %v669_v14 = vld [vmem:[%s13607_s1 + $0xa0] sm:$0xff] }
  0x74   :  { %6151 = vmatprep.subr.bf16.mxu1 %v13780_v17  ;;  %v674_v17 = vld [vmem:[%s13607_s1 + $0xc8] sm:$0xff] }
  0x76   :  { %6089 = vmatpush1.bf16.msra.mxu0 %v13777_v8 }
  0x77   :  { %6091 = vmatprep.subr.bf16.mxu0 %v13778_v9  ;;  %6153 = vmatpush1.bf16.msra.mxu1 %v8748_v59  ;;  %v651_v59 = vld [vmem:[%s13607_s1 + $0x10] sm:$0xff]  ;;  %v665_v9 = vld [vmem:[%s13607_s1 + $0x80] sm:$0xff] }
  0x78   :  { %6155 = vmatprep.subr.bf16.mxu1 %v13781_v22  ;;  %v8962_v6 = vpack.c.bf16 %v655_v2, %v651_v59  ;;  %v678_v22 = vld [vmem:[%s13607_s1 + $0xe8] sm:$0xff]  ;;  %v697_v59 = vld [vmem:[%s13607_s1 + $0x180] sm:$0xff] }
  0x79   :  { %v9003_v26 = vpack.c.bf16 %v678_v22, %v674_v17  ;;  %v701_v2 = vld [vmem:[%s13607_s1 + $0x1a0] sm:$0xff] }
  0x7a   :  { %6093 = vmatpush1.bf16.msra.mxu0 %v8733_v40  ;;  %v705_v17 = vld [vmem:[%s13607_s1 + $0x1c0] sm:$0xff] }
  0x7b   :  { %6095 = vmatprep.subr.bf16.mxu0 %v8736_v44  ;;  %6157 = vmatpush1.bf16.msra.mxu1 %v8781_v38  ;;  %v649_v38 = vld [vmem:[%s13607_s1] sm:$0xff] }
  0x7c   :  { %6159 = vmatprep.subr.bf16.mxu1 %v8784_v3  ;;  %v653_v44 = vld [vmem:[%s13607_s1 + $0x20] sm:$0xff] }
  0x7d   :  { %v8960_v1 = vpack.c.bf16 %v653_v44, %v649_v38  ;;  %v698_v38 = vld [vmem:[%s13607_s1 + $0x188] sm:$0xff]  ;;  %v709_v22 = vld [vmem:[%s13607_s1 + $0x1e0] sm:$0xff] }
  0x7e   :  { %6097 = vmatpush1.bf16.msra.mxu0 %v13782_v25  ;;  %v9000_v25 = vpack.c.bf16 %v669_v14, %v665_v9  ;;  %v710_v9 = vld [vmem:[%s13607_s1 + $0x1e8] sm:$0xff]  ;;  %v9138_v30 = vpack.c.bf16 %v709_v22, %v705_v17  ;;  %v699_v17 = vld [vmem:[%s13607_s1 + $0x190] sm:$0xff] }
  0x7f   :  { %6099 = vmatprep.subr.bf16.mxu0 %v8772_v39  ;;  %6161 = vmatpush1.bf16.msra.mxu1 %v8803_v23  ;;  %v662_v39 = vld [vmem:[%s13607_s1 + $0x68] sm:$0xff]  ;;  %v657_v23 = vld [vmem:[%s13607_s1 + $0x40] sm:$0xff]  ;;  %v703_v22 = vld [vmem:[%s13607_s1 + $0x1b0] sm:$0xff] }
  0x80   :  { %6163 = vmatprep.subr.bf16.mxu1 %v8806_v28  ;;  %v661_v28 = vld [vmem:[%s13607_s1 + $0x60] sm:$0xff] }
  0x81   :  { %v8981_v4 = vpack.c.bf16 %v661_v28, %v657_v23  ;;  %v675_v23 = vld [vmem:[%s13607_s1 + $0xd0] sm:$0xff] }
  0x82   :  { %6101 = vmatpush1.bf16.msra.mxu0 %v8799_v12  ;;  %v8964_v12 = vpack.c.bf16 %v662_v39, %v658_v34  ;;  %v9102_v34 = vpack.c.bf16 %v701_v2, %v697_v59  ;;  %v676_v39 = vld [vmem:[%s13607_s1 + $0xd8] sm:$0xff]  ;;  %v679_v28 = vld [vmem:[%s13607_s1 + $0xf0] sm:$0xff]  ;;  %v726_v59 = vld [vmem:[%s13607_s1 + $0x268] sm:$0xff] }
  0x83   :  { %6165 = vmatpush1.bf16.msra.mxu1 %v8819_v19  ;;  %6167 = vmatprep.subr.bf16.mxu0 %v8893_v33  ;;  %v670_v19 = vld [vmem:[%s13607_s1 + $0xa8] sm:$0xff] }
  0x84   :  { %6231 = vmatprep.subr.bf16.mxu1 %v8902_v45  ;;  %v8985_v8 = vpack.c.bf16 %v670_v19, %v666_v56  ;;  %v9120_v56 = vpack.c.bf16 %v679_v28, %v675_v23  ;;  %v706_v19 = vld [vmem:[%s13607_s1 + $0x1c8] sm:$0xff]  ;;  %v700_v28 = vld [vmem:[%s13607_s1 + $0x198] sm:$0xff] }
  0x85   :  { %v9129_v14 = vpack.c.bf16 %v710_v9, %v706_v19  ;;  %v704_v19 = vld [vmem:[%s13607_s1 + $0x1b8] sm:$0xff] }
  0x86   :  { %v9219_v9 = vpack.c.bf16 %v704_v19, %v700_v28  ;;  %v737_v28 = vld [vmem:[%s13607_s1 + $0x2c0] sm:$0xff] }
  0x87   :  { %v741_v19 = vld [vmem:[%s13607_s1 + $0x2e0] sm:$0xff] }
 0x118   :  { %v249_v10 = vpop.f32.mrb[0].mxu0 }
 0x119   :  { %v250_v15 = vadd.f32 %v249_v10, %v8914_v62  ;;  %v251_v18 = vpop.f32.mrb[1].mxu0  ;;  %v320_v43 = vpop.f32.mrb[0].mxu1  ;;  %v9022_v10 = vpack.c.bf16 %v686_v55, %v682_v46  ;;  %v688_v46 = vld [vmem:[%s13607_s1 + $0x138] sm:$0xff] }
 0x11a   :  { %v252_v24 = vadd.f32 %v251_v18, %v8918_v0  ;;  %v322_v50 = vpop.f32.mrb[1].mxu1  ;;  %v321_v5 = vadd.f32 %v320_v43, %v8931_v60  ;;  %v685_v18 = vld [vmem:[%s13607_s1 + $0x120] sm:$0xff]  ;;  %v9147_v55 = vpack.c.bf16 %v688_v46, %v684_v37  ;;  %v9228_v37 = vpack.c.bf16 %v703_v22, %v699_v17  ;;  %v730_v46 = vld [vmem:[%s13607_s1 + $0x288] sm:$0xff]  ;;  %v716_v22 = vld [vmem:[%s13607_s1 + $0x218] sm:$0xff] }
 0x11b   :  { %v4835_v27 = vmul.f32 -1.442695, %v250_v15  ;;  %v323_v53 = vadd.f32 %v322_v50, %v8925_v32  ;;  %v681_v15 = vld [vmem:[%s13607_s1 + $0x100] sm:$0xff]  ;;  %v659_v50 = vld [vmem:[%s13607_s1 + $0x50] sm:$0xff]  ;;  %v9282_v17 = vpack.c.bf16 %v741_v19, %v737_v28  ;;  %v724_v19 = vld [vmem:[%s13607_s1 + $0x258] sm:$0xff] }
 0x11c   :  { %v4836_v35 = vmul.f32 -1.442695, %v252_v24  ;;  %v9030_v24 = vpack.c.bf16 %v685_v18, %v681_v15  ;;  %v683_v15 = vld [vmem:[%s13607_s1 + $0x110] sm:$0xff] }
 0x11d   :  { %7959 = vpow2.f32 %v4835_v27  ;;  %v4837_v61 = vmul.f32 -1.442695, %v323_v53  ;;  %v660_v27 = vld [vmem:[%s13607_s1 + $0x58] sm:$0xff]  ;;  %v663_v53 = vld [vmem:[%s13607_s1 + $0x70] sm:$0xff]  ;;  %13789 = vst [vmem:[#allocation9_spill] sm:$0xff] %v9282_v17 }
 0x11e   :  { %7961 = vpow2.f32 %v4836_v35  ;;  %v664_v35 = vld [vmem:[%s13607_s1 + $0x78] sm:$0xff]  ;;  %v687_v18 = vld [vmem:[%s13607_s1 + $0x130] sm:$0xff] }
 0x11f   :  { %7963 = vpow2.f32 %v4837_v61  ;;  %v9039_v43 = vpack.c.bf16 %v664_v35, %v660_v27  ;;  %v9048_v61 = vpack.c.bf16 %v663_v53, %v659_v50  ;;  %v9156_v27 = vpack.c.bf16 %v687_v18, %v683_v15  ;;  %v714_v35 = vld [vmem:[%s13607_s1 + $0x208] sm:$0xff] }
 0x120   :  { %7965 = vtanh.f32 %v321_v5  ;;  %v690_v5 = vld [vmem:[%s13607_s1 + $0x148] sm:$0xff] }
 0x121   :  { %v718_v50 = vld [vmem:[%s13607_s1 + $0x228] sm:$0xff] }
 0x122   :  { %v9165_v53 = vpack.c.bf16 %v718_v50, %v714_v35  ;;  %v734_v15 = vld [vmem:[%s13607_s1 + $0x2a8] sm:$0xff]  ;;  %v729_v35 = vld [vmem:[%s13607_s1 + $0x280] sm:$0xff] }
 0x123   :  { %v9237_v18 = vpack.c.bf16 %v734_v15, %v730_v46  ;;  %v733_v50 = vld [vmem:[%s13607_s1 + $0x2a0] sm:$0xff]  ;;  %v720_v46 = vld [vmem:[%s13607_s1 + $0x238] sm:$0xff] }
 0x124   :  { %v9291_v15 = vpack.c.bf16 %v720_v46, %v716_v22  ;;  %v728_v22 = vld [vmem:[%s13607_s1 + $0x278] sm:$0xff] }
 0x125   :  { %v9327_v46 = vpack.c.bf16 %v728_v22, %v724_v19  ;;  %v753_v19 = vld [vmem:[%s13607_s1 + $0x340] sm:$0xff] }
 0x126   :  { %v757_v22 = vld [vmem:[%s13607_s1 + $0x360] sm:$0xff] }
 0x127   :  { %v7960_v11 = vpop.eup %7959 }
 0x128   :  { %v7962_v20 = vpop.eup %7961  ;;  %v328_v21 = vadd.f32 1.0, %v7960_v11  ;;  %v694_v11 = vld [vmem:[%s13607_s1 + $0x168] sm:$0xff] }
 0x129   :  { %v334_v31 = vadd.f32 1.0, %v7962_v20  ;;  %v7964_v36 = vpop.eup %7963  ;;  %v9057_v20 = vpack.c.bf16 %v694_v11, %v690_v5  ;;  %v713_v5 = vld [vmem:[%s13607_s1 + $0x200] sm:$0xff] }
 0x12a   :  { %7967 = vrcp.f32 %v328_v21  ;;  %v7966_v47 = vpop.eup %7965  ;;  %v341_v57 = vadd.f32 1.0, %v7964_v36  ;;  %v689_v21 = vld [vmem:[%s13607_s1 + $0x140] sm:$0xff] }
 0x12b   :  { %7969 = vrcp.f32 %v334_v31  ;;  %v693_v31 = vld [vmem:[%s13607_s1 + $0x160] sm:$0xff] }
 0x12c   :  { %7971 = vrcp.f32 %v341_v57  ;;  %v9066_v36 = vpack.c.bf16 %v693_v31, %v689_v21  ;;  %v717_v11 = vld [vmem:[%s13607_s1 + $0x220] sm:$0xff]  ;;  %v692_v31 = vld [vmem:[%s13607_s1 + $0x158] sm:$0xff] }
 0x12d   :  { %v9174_v21 = vpack.c.bf16 %v717_v11, %v713_v5  ;;  %v9246_v5 = vpack.c.bf16 %v733_v50, %v729_v35  ;;  %v708_v11 = vld [vmem:[%s13607_s1 + $0x1d8] sm:$0xff]  ;;  %v715_v35 = vld [vmem:[%s13607_s1 + $0x210] sm:$0xff] }
 0x12e   :  { %v719_v50 = vld [vmem:[%s13607_s1 + $0x230] sm:$0xff] }
 0x134   :  { %v7968_v49 = vpop.eup %7967 }
 0x135   :  { %v7970_v63 = vpop.eup %7969  ;;  %v345_v13 = vmul.f32 %v7968_v49, %v7966_v47  ;;  %v668_v47 = vld [vmem:[%s13607_s1 + $0x98] sm:$0xff] }
 0x136   :  { %v344_v16 = vmul.f32 0.0, %v7970_v63  ;;  %v7972_v40 = vpop.eup %7971  ;;  %v672_v49 = vld [vmem:[%s13607_s1 + $0xb8] sm:$0xff]  ;;  %v667_v63 = vld [vmem:[%s13607_s1 + $0x90] sm:$0xff] }
 0x137   :  { %v9075_v57 = vpack.c.bf16 %v672_v49, %v668_v47  ;;  %v696_v47 = vld [vmem:[%s13607_s1 + $0x178] sm:$0xff] }
 0x138   :  { %v8934_v29 = vadd.f32 %v345_v13, %v344_v16  ;;  %v671_v13 = vld [vmem:[%s13607_s1 + $0xb0] sm:$0xff]  ;;  %v9183_v49 = vpack.c.bf16 %v696_v47, %v692_v31  ;;  %v712_v31 = vld [vmem:[%s13607_s1 + $0x1f8] sm:$0xff] }
 0x139   :  { %v9084_v16 = vpack.c.bf16 %v671_v13, %v667_v63  ;;  %v691_v63 = vld [vmem:[%s13607_s1 + $0x150] sm:$0xff]  ;;  %v9255_v47 = vpack.c.bf16 %v712_v31, %v708_v11  ;;  %v9300_v11 = vpack.c.bf16 %v719_v50, %v715_v35  ;;  %v746_v31 = vld [vmem:[%s13607_s1 + $0x308] sm:$0xff] }
 0x13a   :  { %7973 = vtanh.f32 %v8934_v29  ;;  %v695_v13 = vld [vmem:[%s13607_s1 + $0x170] sm:$0xff] }
 0x13b   :  { %v723_v35 = vld [vmem:[%s13607_s1 + $0x250] sm:$0xff] }
 0x13c   :  { %v727_v50 = vld [vmem:[%s13607_s1 + $0x270] sm:$0xff] }
 0x144   :  { %v7974_v3 = vpop.eup %7973 }
 0x145   :  { %v8955_v54 = vmul.f32 %v7974_v3, %v7972_v40  ;;  %v702_v40 = vld [vmem:[%s13607_s1 + $0x1a8] sm:$0xff]  ;;  %v680_v3 = vld [vmem:[%s13607_s1 + $0xf8] sm:$0xff] }
 0x146   :  { %v9093_v44 = vpack.c.bf16 %v702_v40, %v698_v38  ;;  %v9192_v38 = vpack.c.bf16 %v695_v13, %v691_v63  ;;  %v722_v40 = vld [vmem:[%s13607_s1 + $0x248] sm:$0xff]  ;;  %v707_v63 = vld [vmem:[%s13607_s1 + $0x1d0] sm:$0xff] }
 0x147   :  { %13788 = vst [vmem:[#allocation8_spill] sm:$0xff] %v8955_v54  ;;  %544 = vmatprep.mubr.f32.mxu0 %v8955_v54  ;;  %615 = vmatprep.mubr.f32.mxu1 %v8955_v54  ;;  %v9201_v2 = vpack.c.bf16 %v726_v59, %v722_v40  ;;  %v711_v13 = vld [vmem:[%s13607_s1 + $0x1f0] sm:$0xff]  ;;  %v738_v59 = vld [vmem:[%s13607_s1 + $0x2c8] sm:$0xff] }
 0x148   :  { %545 = vmatmul.mubr.f32.vlgmr.msra.gmra.mrb[2].mxu0 %v17_v51  ;;  %616 = vmatmul.mubr.f32.vlgmr.msra.gmra.mrb[2].mxu1 %v17_v51  ;;  %v9111_v51 = vpack.c.bf16 %v680_v3, %v676_v39  ;;  %v721_v39 = vld [vmem:[%s13607_s1 + $0x240] sm:$0xff]  ;;  %v9264_v40 = vpack.c.bf16 %v711_v13, %v707_v63  ;;  %v750_v63 = vld [vmem:[%s13607_s1 + $0x328] sm:$0xff] }
 0x149   :  { %6169 = vmatpush1.bf16.msra.mxu0 %v8960_v1  ;;  %6233 = vmatpush1.bf16.msra.mxu1 %v8962_v6  ;;  %v725_v3 = vld [vmem:[%s13607_s1 + $0x260] sm:$0xff]  ;;  %v9309_v13 = vpack.c.bf16 %v750_v63, %v746_v31  ;;  %v9336_v31 = vpack.c.bf16 %v727_v50, %v723_v35  ;;  %v754_v63 = vld [vmem:[%s13607_s1 + $0x348] sm:$0xff]  ;;  %v732_v35 = vld [vmem:[%s13607_s1 + $0x298] sm:$0xff]  ;;  %v9357_v50 = vpack.c.bf16 %v757_v22, %v753_v19 }
 0x14a   :  { %6171 = vmatprep.subr.bf16.mxu0 %v8964_v12  ;;  %6235 = vmatprep.subr.bf16.mxu1 %v9039_v43  ;;  %v9210_v23 = vpack.c.bf16 %v725_v3, %v721_v39  ;;  %v742_v39 = vld [vmem:[%s13607_s1 + $0x2e8] sm:$0xff] }
 0x14b   :  { %v9273_v3 = vpack.c.bf16 %v742_v39, %v738_v59  ;;  %13790 = vst [vmem:[#allocation10_spill] sm:$0xff] %v9309_v13  ;;  %v745_v59 = vld [vmem:[%s13607_s1 + $0x300] sm:$0xff]  ;;  %13793 = vst [vmem:[#allocation13_spill] sm:$0xff] %v9357_v50  ;;  %v762_v19 = vld [vmem:[%s13607_s1 + $0x388] sm:$0xff] }
 0x14c   :  { %v749_v39 = vld [vmem:[%s13607_s1 + $0x320] sm:$0xff]  ;;  %v766_v22 = vld [vmem:[%s13607_s1 + $0x3a8] sm:$0xff] }
 0x14d   :  { %6173 = vmatpush1.bf16.msra.mxu0 %v8981_v4  ;;  %6237 = vmatpush1.bf16.msra.mxu1 %v9048_v61  ;;  %v9318_v28 = vpack.c.bf16 %v749_v39, %v745_v59  ;;  %v758_v59 = vld [vmem:[%s13607_s1 + $0x368] sm:$0xff]  ;;  %v9383_v48 = vpack.c.bf16 %v766_v22, %v762_v19  ;;  %v739_v19 = vld [vmem:[%s13607_s1 + $0x2d0] sm:$0xff] }
 0x14e   :  { %6175 = vmatprep.subr.bf16.mxu0 %v8985_v8  ;;  %6239 = vmatprep.subr.bf16.mxu1 %v9075_v57  ;;  %v9345_v39 = vpack.c.bf16 %v758_v59, %v754_v63  ;;  %v736_v63 = vld [vmem:[%s13607_s1 + $0x2b8] sm:$0xff]  ;;  %v731_v59 = vld [vmem:[%s13607_s1 + $0x290] sm:$0xff] }
 0x14f   :  { %13791 = vst [vmem:[#allocation11_spill] sm:$0xff] %v9318_v28  ;;  %v9369_v7 = vpack.c.bf16 %v736_v63, %v732_v35  ;;  %v9371_v58 = vpack.c.bf16 %v735_v41, %v731_v59  ;;  %13794 = vst [vmem:[#allocation14_spill] sm:$0xff] %v9383_v48  ;;  %v765_v41 = vld [vmem:[%s13607_s1 + $0x3a0] sm:$0xff]  ;;  %v740_v35 = vld [vmem:[%s13607_s1 + $0x2d8] sm:$0xff] }
 0x150   :  { %13792 = vst [vmem:[#allocation12_spill] sm:$0xff] %v9345_v39  ;;  %v744_v63 = vld [vmem:[%s13607_s1 + $0x2f8] sm:$0xff]  ;;  %v9395_v59 = vpack.c.bf16 %v765_v41, %v761_v52  ;;  %v743_v22 = vld [vmem:[%s13607_s1 + $0x2f0] sm:$0xff]  ;;  %v774_v41 = vld [vmem:[%s13607_s1 + $0x3e8] sm:$0xff] }
 0x151   :  { %6177 = vmatpush1.bf16.msra.mxu0 %v9000_v25  ;;  %6241 = vmatpush1.bf16.msra.mxu1 %v9084_v16  ;;  %v9397_v54 = vpack.c.bf16 %v744_v63, %v740_v35  ;;  %v9410_v52 = vpack.c.bf16 %v743_v22, %v739_v19  ;;  %v769_v35 = vld [vmem:[%s13607_s1 + $0x3c0] sm:$0xff]  ;;  %v748_v19 = vld [vmem:[%s13607_s1 + $0x318] sm:$0xff] }
 0x152   :  { %6179 = vmatprep.subr.bf16.mxu0 %v9003_v26  ;;  %6243 = vmatprep.subr.bf16.mxu1 %v9111_v51  ;;  %13795 = vst [vmem:[#allocation15_spill] sm:$0xff] %v9395_v59  ;;  %v773_v63 = vld [vmem:[%s13607_s1 + $0x3e0] sm:$0xff]  ;;  %v752_v22 = vld [vmem:[%s13607_s1 + $0x338] sm:$0xff] }
 0x153   :  { %13796 = vst [vmem:[#allocation16_spill] sm:$0xff] %v9410_v52 }
 0x155   :  { %6181 = vmatpush1.bf16.msra.mxu0 %v9012_v42  ;;  %6245 = vmatpush1.bf16.msra.mxu1 %v9120_v56 }
 0x156   :  { %6183 = vmatprep.subr.bf16.mxu0 %v9022_v10  ;;  %6247 = vmatprep.subr.bf16.mxu1 %v9147_v55 }
 0x159   :  { %6185 = vmatpush1.bf16.msra.mxu0 %v9030_v24  ;;  %6249 = vmatpush1.bf16.msra.mxu1 %v9156_v27 }
 0x15a   :  { %6187 = vmatprep.subr.bf16.mxu0 %v9057_v20  ;;  %6251 = vmatprep.subr.bf16.mxu1 %v9183_v49 }
 0x15d   :  { %6189 = vmatpush1.bf16.msra.mxu0 %v9066_v36  ;;  %6253 = vmatpush1.bf16.msra.mxu1 %v9192_v38 }
 0x15e   :  { %6191 = vmatprep.subr.bf16.mxu0 %v9093_v44  ;;  %6255 = vmatprep.subr.bf16.mxu1 %v9219_v9 }
 0x161   :  { %6193 = vmatpush1.bf16.msra.mxu0 %v9102_v34  ;;  %6257 = vmatpush1.bf16.msra.mxu1 %v9228_v37 }
 0x162   :  { %6195 = vmatprep.subr.bf16.mxu0 %v9129_v14  ;;  %6259 = vmatprep.subr.bf16.mxu1 %v9255_v47 }
 0x165   :  { %6197 = vmatpush1.bf16.msra.mxu0 %v9138_v30  ;;  %6261 = vmatpush1.bf16.msra.mxu1 %v9264_v40 }
 0x166   :  { %6199 = vmatprep.subr.bf16.mxu0 %v9165_v53  ;;  %6263 = vmatprep.subr.bf16.mxu1 %v9291_v15 }
 0x169   :  { %6201 = vmatpush1.bf16.msra.mxu0 %v9174_v21  ;;  %6265 = vmatpush1.bf16.msra.mxu1 %v9300_v11 }
 0x16a   :  { %6203 = vmatprep.subr.bf16.mxu0 %v9201_v2  ;;  %6267 = vmatprep.subr.bf16.mxu1 %v9327_v46 }
 0x16d   :  { %6205 = vmatpush1.bf16.msra.mxu0 %v9210_v23  ;;  %6269 = vmatpush1.bf16.msra.mxu1 %v9336_v31 }
 0x16e   :  { %6207 = vmatprep.subr.bf16.mxu0 %v9237_v18  ;;  %6271 = vmatprep.subr.bf16.mxu1 %v9369_v7 }
 0x171   :  { %6209 = vmatpush1.bf16.msra.mxu0 %v9246_v5  ;;  %6273 = vmatpush1.bf16.msra.mxu1 %v9371_v58 }
 0x172   :  { %6211 = vmatprep.subr.bf16.mxu0 %v9273_v3  ;;  %6275 = vmatprep.subr.bf16.mxu1 %v9397_v54 }
 0x175   :  { %6213 = vmatpush1.bf16.msra.mxu0 %v9282_v17  ;;  %6277 = vmatpush1.bf16.msra.mxu1 %v9410_v52 }
 0x176   :  { %6215 = vmatprep.subr.bf16.mxu0 %v9309_v13 }
 0x179   :  { %6217 = vmatpush1.bf16.msra.mxu0 %v9318_v28  ;;  %v9433_v28 = vpack.c.bf16 %v752_v22, %v748_v19  ;;  %v760_v19 = vld [vmem:[%s13607_s1 + $0x378] sm:$0xff] }
 0x17a   :  { %6219 = vmatprep.subr.bf16.mxu0 %v9345_v39 }
 0x17b   :  { %13799 = vst [vmem:[#allocation19_spill] sm:$0xff] %v9433_v28  ;;  %6279 = vmatprep.subr.bf16.mxu1 %v9433_v28 }
 0x17d   :  { %6221 = vmatpush1.bf16.msra.mxu0 %v9357_v50  ;;  %v770_v50 = vld [vmem:[%s13607_s1 + $0x3c8] sm:$0xff] }
 0x17e   :  { %6223 = vmatprep.subr.bf16.mxu0 %v9383_v48  ;;  %v9422_v39 = vpack.c.bf16 %v774_v41, %v770_v50  ;;  %v9431_v48 = vpack.c.bf16 %v773_v63, %v769_v35  ;;  %v747_v50 = vld [vmem:[%s13607_s1 + $0x310] sm:$0xff]  ;;  %v756_v63 = vld [vmem:[%s13607_s1 + $0x358] sm:$0xff] }
 0x17f   :  { %v751_v41 = vld [vmem:[%s13607_s1 + $0x330] sm:$0xff]  ;;  %v9455_v22 = vpack.c.bf16 %v760_v19, %v756_v63 }
 0x180   :  { %13797 = vst [vmem:[#allocation17_spill] sm:$0xff] %v9422_v39  ;;  %13798 = vst [vmem:[#allocation18_spill] sm:$0xff] %v9431_v48  ;;  %v9445_v35 = vpack.c.bf16 %v751_v41, %v747_v50  ;;  %v764_v50 = vld [vmem:[%s13607_s1 + $0x398] sm:$0xff]  ;;  %v763_v63 = vld [vmem:[%s13607_s1 + $0x390] sm:$0xff] }
 0x181   :  { %6225 = vmatpush1.bf16.msra.mxu0 %v9395_v59  ;;  %13801 = vst [vmem:[#allocation21_spill] sm:$0xff] %v9455_v22  ;;  %v767_v19 = vld [vmem:[%s13607_s1 + $0x3b0] sm:$0xff] }
 0x182   :  { %6227 = vmatprep.subr.bf16.mxu0 %v9422_v39  ;;  %13800 = vst [vmem:[#allocation20_spill] sm:$0xff] %v9445_v35  ;;  %6281 = vmatpush1.bf16.msra.mxu1 %v9445_v35  ;;  %v768_v39 = vld [vmem:[%s13607_s1 + $0x3b8] sm:$0xff]  ;;  %v9487_v35 = vpack.c.bf16 %v767_v19, %v763_v63 }
 0x183   :  { %6283 = vmatprep.subr.bf16.mxu1 %v9455_v22  ;;  %v9478_v59 = vpack.c.bf16 %v768_v39, %v764_v50  ;;  %v771_v39 = vld [vmem:[%s13607_s1 + $0x3d0] sm:$0xff] }
 0x184   :  { %13804 = vst [vmem:[#allocation24_spill] sm:$0xff] %v9487_v35  ;;  %v775_v50 = vld [vmem:[%s13607_s1 + $0x3f0] sm:$0xff] }
 0x185   :  { %6229 = vmatpush1.bf16.msra.mxu0 %v9431_v48  ;;  %v755_v48 = vld [vmem:[%s13607_s1 + $0x350] sm:$0xff]  ;;  %13803 = vst [vmem:[#allocation23_spill] sm:$0xff] %v9478_v59  ;;  %v9499_v22 = vpack.c.bf16 %v775_v50, %v771_v39 }
 0x186   :  { %6295 = vmatprep.subr.bf16.mxu0 %v8893_v33  ;;  %v759_v33 = vld [vmem:[%s13607_s1 + $0x370] sm:$0xff] }
 0x187   :  { %v9466_v41 = vpack.c.bf16 %v759_v33, %v755_v48  ;;  %v772_v48 = vld [vmem:[%s13607_s1 + $0x3d8] sm:$0xff]  ;;  %13806 = vst [vmem:[#allocation26_spill] sm:$0xff] %v9499_v22 }
 0x188   :  { %v776_v33 = vld [vmem:[%s13607_s1 + $0x3f8] sm:$0xff] }
 0x189   :  { %13802 = vst [vmem:[#allocation22_spill] sm:$0xff] %v9466_v41  ;;  %6285 = vmatpush1.bf16.msra.mxu1 %v9466_v41  ;;  %v9490_v28 = vpack.c.bf16 %v776_v33, %v772_v48 }
 0x18a   :  { %6287 = vmatprep.subr.bf16.mxu1 %v9478_v59 }
 0x18b   :  { %13805 = vst [vmem:[#allocation25_spill] sm:$0xff] %v9490_v28 }
 0x18d   :  { %6289 = vmatpush1.bf16.msra.mxu1 %v9487_v35 }
 0x18e   :  { %6291 = vmatprep.subr.bf16.mxu1 %v9490_v28 }
 0x191   :  { %6293 = vmatpush1.bf16.msra.mxu1 %v9499_v22 }
 0x192   :  { %6359 = vmatprep.subr.bf16.mxu1 %v8902_v45 }
 0x21b   :  { %v546_v63 = vpop.f32.mrb[2].mxu0  ;;  %v617_v19 = vpop.f32.mrb[2].mxu1 }
 0x21c   :  { %v547_v48 = vadd.f32 %v546_v63, %v8914_v62  ;;  %v548_v33 = vpop.f32.mrb[3].mxu0  ;;  %v619_v59 = vpop.f32.mrb[3].mxu1  ;;  %v618_v28 = vadd.f32 %v617_v19, %v8931_v60 }
 0x21d   :  { %v549_v41 = vadd.f32 %v548_v33, %v8918_v0  ;;  %v620_v39 = vadd.f32 %v619_v59, %v8925_v32 }
 0x21e   :  { %v4838_v13 = vmul.f32 -1.442695, %v547_v48 }
 0x21f   :  { %v4839_v52 = vmul.f32 -1.442695, %v549_v41  ;;  %v4840_v50 = vmul.f32 -1.442695, %v620_v39 }
 0x220   :  { %7975 = vpow2.f32 %v4838_v13 }
 0x221   :  { %7977 = vpow2.f32 %v4839_v52 }
 0x222   :  { %7979 = vpow2.f32 %v4840_v50  ;;  %v1243_v50 = vld [vmem:[%s13607_s1] sm:$0xff] }
 0x223   :  { %7981 = vtanh.f32 %v618_v28 }
 0x22a   :  { %v7976_v22 = vpop.eup %7975 }
 0x22b   :  { %v7978_v45 = vpop.eup %7977  ;;  %v625_v35 = vadd.f32 1.0, %v7976_v22 }
 0x22c   :  { %v631_v17 = vadd.f32 1.0, %v7978_v45  ;;  %v7980_v63 = vpop.eup %7979 }
 0x22d   :  { %7983 = vrcp.f32 %v625_v35  ;;  %v7982_v62 = vpop.eup %7981  ;;  %v638_v48 = vadd.f32 1.0, %v7980_v63  ;;  %v1247_v63 = vld [vmem:[%s13607_s1 + $0x20] sm:$0xff] }
 0x22e   :  { %7985 = vrcp.f32 %v631_v17  ;;  %v18_v17 = vld [vmem:[%s13608_s0 + $0x10] sm:$0xff] }
 0x22f   :  { %7987 = vrcp.f32 %v638_v48  ;;  %v1249_v48 = vld [vmem:[%s13607_s1 + $0x30] sm:$0xff] }
 0x237   :  { %v7984_v33 = vpop.eup %7983 }
 0x238   :  { %v7986_v41 = vpop.eup %7985  ;;  %v642_v13 = vmul.f32 %v7984_v33, %v7982_v62  ;;  %v13808_v62 = vld [vmem:[#allocation9_spill] sm:$0xff] }
 0x239   :  { %v641_v52 = vmul.f32 %v7986_v41, %v8934_v29  ;;  %v7988_v19 = vpop.eup %7987  ;;  %v13809_v29 = vld [vmem:[#allocation16_spill] sm:$0xff]  ;;  %v1245_v33 = vld [vmem:[%s13607_s1 + $0x10] sm:$0xff] }
 0x23a   :  { %v1252_v41 = vld [vmem:[%s13607_s1 + $0x48] sm:$0xff] }
 0x23b   :  { %v9509_v59 = vadd.f32 %v642_v13, %v641_v52  ;;  %v1256_v13 = vld [vmem:[%s13607_s1 + $0x68] sm:$0xff] }
 0x23d   :  { %7989 = vtanh.f32 %v9509_v59 }
 0x247   :  { %v7990_v39 = vpop.eup %7989 }
 0x248   :  { %v9512_v22 = vmul.f32 %v7990_v39, %v7988_v19  ;;  %v19_v19 = vld [vmem:[%s13608_s0 + $0x18] sm:$0xff]  ;;  %v9630_v39 = vpack.c.bf16 %v1247_v63, %v1243_v50  ;;  %v1295_v50 = vld [vmem:[%s13607_s1 + $0x1a0] sm:$0xff] }
 0x249   :  { %v1270_v63 = vld [vmem:[%s13607_s1 + $0xd8] sm:$0xff] }
 0x24a   :  { %13807 = vst [vmem:[#allocation27_spill] sm:$0xff] %v9512_v22  ;;  %841 = vmatprep.mubr.f32.mxu0 %v9512_v22  ;;  %912 = vmatprep.mubr.f32.mxu1 %v9512_v22 }
 0x24b   :  { %842 = vmatmul.mubr.f32.vlgmr.msra.gmra.mrb[4].mxu0 %v18_v17  ;;  %913 = vmatmul.mubr.f32.vlgmr.msra.gmra.mrb[4].mxu1 %v18_v17  ;;  %v9632_v17 = vpack.c.bf16 %v1249_v48, %v1245_v33  ;;  %v1274_v33 = vld [vmem:[%s13607_s1 + $0xf8] sm:$0xff] }
 0x24c   :  { %6297 = vmatpush1.bf16.msra.mxu0 %v8960_v1  ;;  %6361 = vmatpush1.bf16.msra.mxu1 %v8962_v6  ;;  %v13810_v1 = vld [vmem:[#allocation10_spill] sm:$0xff]  ;;  %v13811_v6 = vld [vmem:[#allocation19_spill] sm:$0xff]  ;;  %v9781_v48 = vpack.c.bf16 %v1274_v33, %v1270_v63 }
 0x24d   :  { %6299 = vmatprep.subr.bf16.mxu0 %v8964_v12  ;;  %6363 = vmatprep.subr.bf16.mxu1 %v9039_v43  ;;  %v13812_v12 = vld [vmem:[#allocation11_spill] sm:$0xff]  ;;  %v13823_v43 = vld [vmem:[#allocation25_spill] sm:$0xff]  ;;  %v1298_v63 = vld [vmem:[%s13607_s1 + $0x1b8] sm:$0xff] }
 0x250   :  { %6301 = vmatpush1.bf16.msra.mxu0 %v8981_v4  ;;  %6365 = vmatpush1.bf16.msra.mxu1 %v9048_v61  ;;  %v13813_v4 = vld [vmem:[#allocation20_spill] sm:$0xff]  ;;  %v13824_v61 = vld [vmem:[#allocation18_spill] sm:$0xff] }
 0x251   :  { %6303 = vmatprep.subr.bf16.mxu0 %v8985_v8  ;;  %6367 = vmatprep.subr.bf16.mxu1 %v9075_v57  ;;  %v13815_v8 = vld [vmem:[#allocation21_spill] sm:$0xff]  ;;  %v1248_v57 = vld [vmem:[%s13607_s1 + $0x28] sm:$0xff] }
 0x254   :  { %6305 = vmatpush1.bf16.msra.mxu0 %v9000_v25  ;;  %6369 = vmatpush1.bf16.msra.mxu1 %v9084_v16  ;;  %v13817_v25 = vld [vmem:[#allocation22_spill] sm:$0xff] }
 0x255   :  { %6307 = vmatprep.subr.bf16.mxu0 %v9003_v26  ;;  %6371 = vmatprep.subr.bf16.mxu1 %v9111_v51  ;;  %v13819_v26 = vld [vmem:[#allocation23_spill] sm:$0xff] }
 0x258   :  { %6309 = vmatpush1.bf16.msra.mxu0 %v9012_v42  ;;  %6373 = vmatpush1.bf16.msra.mxu1 %v9120_v56  ;;  %v13820_v42 = vld [vmem:[#allocation15_spill] sm:$0xff] }
 0x259   :  { %6311 = vmatprep.subr.bf16.mxu0 %v9022_v10  ;;  %6375 = vmatprep.subr.bf16.mxu1 %v9147_v55  ;;  %v13821_v10 = vld [vmem:[#allocation24_spill] sm:$0xff] }
 0x25c   :  { %6313 = vmatpush1.bf16.msra.mxu0 %v9030_v24  ;;  %6377 = vmatpush1.bf16.msra.mxu1 %v9156_v27  ;;  %v13822_v24 = vld [vmem:[#allocation17_spill] sm:$0xff] }
 0x25d   :  { %6315 = vmatprep.subr.bf16.mxu0 %v9057_v20  ;;  %6379 = vmatprep.subr.bf16.mxu1 %v9183_v49  ;;  %v13825_v20 = vld [vmem:[#allocation26_spill] sm:$0xff] }
 0x260   :  { %6317 = vmatpush1.bf16.msra.mxu0 %v9066_v36  ;;  %6381 = vmatpush1.bf16.msra.mxu1 %v9192_v38  ;;  %v1244_v36 = vld [vmem:[%s13607_s1 + $0x8] sm:$0xff] }
 0x261   :  { %6319 = vmatprep.subr.bf16.mxu0 %v9093_v44  ;;  %6383 = vmatprep.subr.bf16.mxu1 %v9219_v9  ;;  %v9587_v16 = vpack.c.bf16 %v1248_v57, %v1244_v36  ;;  %v1246_v44 = vld [vmem:[%s13607_s1 + $0x18] sm:$0xff]  ;;  %v1275_v57 = vld [vmem:[%s13607_s1 + $0x100] sm:$0xff] }
 0x264   :  { %6321 = vmatpush1.bf16.msra.mxu0 %v9102_v34  ;;  %6385 = vmatpush1.bf16.msra.mxu1 %v9228_v37  ;;  %v1250_v34 = vld [vmem:[%s13607_s1 + $0x38] sm:$0xff] }
 0x265   :  { %6323 = vmatprep.subr.bf16.mxu0 %v9129_v14  ;;  %6387 = vmatprep.subr.bf16.mxu1 %v9255_v47  ;;  %v9596_v51 = vpack.c.bf16 %v1250_v34, %v1246_v44  ;;  %v1279_v44 = vld [vmem:[%s13607_s1 + $0x120] sm:$0xff] }
 0x266   :  { %v9700_v34 = vpack.c.bf16 %v1279_v44, %v1275_v57  ;;  %v1312_v57 = vld [vmem:[%s13607_s1 + $0x228] sm:$0xff] }
 0x268   :  { %6325 = vmatpush1.bf16.msra.mxu0 %v9138_v30  ;;  %6389 = vmatpush1.bf16.msra.mxu1 %v9264_v40  ;;  %v13826_v30 = vld [vmem:[#allocation4_spill] sm:$0xff] }
 0x269   :  { %6327 = vmatprep.subr.bf16.mxu0 %v9165_v53  ;;  %6391 = vmatprep.subr.bf16.mxu1 %v9291_v15 }
 0x26c   :  { %6329 = vmatpush1.bf16.msra.mxu0 %v9174_v21  ;;  %6393 = vmatpush1.bf16.msra.mxu1 %v9300_v11 }
 0x26d   :  { %6331 = vmatprep.subr.bf16.mxu0 %v9201_v2  ;;  %6395 = vmatprep.subr.bf16.mxu1 %v9327_v46 }
 0x270   :  { %6333 = vmatpush1.bf16.msra.mxu0 %v9210_v23  ;;  %6397 = vmatpush1.bf16.msra.mxu1 %v9336_v31 }
 0x271   :  { %6335 = vmatprep.subr.bf16.mxu0 %v9237_v18  ;;  %6399 = vmatprep.subr.bf16.mxu1 %v9369_v7  ;;  %v13814_v7 = vld [vmem:[#allocation12_spill] sm:$0xff] }
 0x274   :  { %6337 = vmatpush1.bf16.msra.mxu0 %v9246_v5  ;;  %6401 = vmatpush1.bf16.msra.mxu1 %v9371_v58  ;;  %v13816_v58 = vld [vmem:[#allocation13_spill] sm:$0xff] }
 0x275   :  { %6339 = vmatprep.subr.bf16.mxu0 %v9273_v3  ;;  %6403 = vmatprep.subr.bf16.mxu1 %v9397_v54  ;;  %v13818_v54 = vld [vmem:[#allocation14_spill] sm:$0xff] }
 0x278   :  { %6341 = vmatpush1.bf16.msra.mxu0 %v13808_v62  ;;  %6405 = vmatpush1.bf16.msra.mxu1 %v13809_v29  ;;  %v9634_v62 = vpack.c.bf16 %v1256_v13, %v1252_v41  ;;  %v1251_v29 = vld [vmem:[%s13607_s1 + $0x40] sm:$0xff]  ;;  %v1269_v41 = vld [vmem:[%s13607_s1 + $0xd0] sm:$0xff] }
 0x279   :  { %6343 = vmatprep.subr.bf16.mxu0 %v13810_v1  ;;  %6407 = vmatprep.subr.bf16.mxu1 %v13811_v6  ;;  %v1255_v1 = vld [vmem:[%s13607_s1 + $0x60] sm:$0xff]  ;;  %v1260_v6 = vld [vmem:[%s13607_s1 + $0x88] sm:$0xff]  ;;  %v1273_v13 = vld [vmem:[%s13607_s1 + $0xf0] sm:$0xff] }
 0x27c   :  { %6345 = vmatpush1.bf16.msra.mxu0 %v13812_v12  ;;  %6409 = vmatpush1.bf16.msra.mxu1 %v13813_v4  ;;  %v1264_v12 = vld [vmem:[%s13607_s1 + $0xa8] sm:$0xff]  ;;  %v9651_v4 = vpack.c.bf16 %v1255_v1, %v1251_v29 }
 0x27d   :  { %6347 = vmatprep.subr.bf16.mxu0 %v13814_v7  ;;  %6411 = vmatprep.subr.bf16.mxu1 %v13815_v8  ;;  %v9655_v7 = vpack.c.bf16 %v1264_v12, %v1260_v6  ;;  %v1259_v8 = vld [vmem:[%s13607_s1 + $0x80] sm:$0xff]  ;;  %v1304_v29 = vld [vmem:[%s13607_s1 + $0x1e8] sm:$0xff] }
 0x27e   :  { %v1299_v6 = vld [vmem:[%s13607_s1 + $0x1c0] sm:$0xff] }
 0x27f   :  { %v1303_v12 = vld [vmem:[%s13607_s1 + $0x1e0] sm:$0xff] }
 0x280   :  { %6349 = vmatpush1.bf16.msra.mxu0 %v13816_v58  ;;  %6413 = vmatpush1.bf16.msra.mxu1 %v13817_v25  ;;  %v1263_v58 = vld [vmem:[%s13607_s1 + $0xa0] sm:$0xff]  ;;  %v1268_v25 = vld [vmem:[%s13607_s1 + $0xc8] sm:$0xff] }
 0x281   :  { %6351 = vmatprep.subr.bf16.mxu0 %v13818_v54  ;;  %6415 = vmatprep.subr.bf16.mxu1 %v13819_v26  ;;  %v1272_v54 = vld [vmem:[%s13607_s1 + $0xe8] sm:$0xff]  ;;  %v9670_v26 = vpack.c.bf16 %v1263_v58, %v1259_v8  ;;  %v9808_v8 = vpack.c.bf16 %v1303_v12, %v1299_v6  ;;  %v1278_v58 = vld [vmem:[%s13607_s1 + $0x118] sm:$0xff] }
 0x282   :  { %v1328_v6 = vld [vmem:[%s13607_s1 + $0x2a8] sm:$0xff] }
 0x284   :  { %6353 = vmatpush1.bf16.msra.mxu0 %v13820_v42  ;;  %6417 = vmatpush1.bf16.msra.mxu1 %v13821_v10  ;;  %v9673_v42 = vpack.c.bf16 %v1272_v54, %v1268_v25  ;;  %v1267_v10 = vld [vmem:[%s13607_s1 + $0xc0] sm:$0xff]  ;;  %v1282_v25 = vld [vmem:[%s13607_s1 + $0x138] sm:$0xff] }
 0x285   :  { %6355 = vmatprep.subr.bf16.mxu0 %v13822_v24  ;;  %6419 = vmatprep.subr.bf16.mxu1 %v13823_v43  ;;  %v1271_v24 = vld [vmem:[%s13607_s1 + $0xe0] sm:$0xff]  ;;  %v9817_v54 = vpack.c.bf16 %v1282_v25, %v1278_v58 }
 0x286   :  { %v9682_v43 = vpack.c.bf16 %v1271_v24, %v1267_v10  ;;  %v1277_v10 = vld [vmem:[%s13607_s1 + $0x110] sm:$0xff]  ;;  %v1323_v58 = vld [vmem:[%s13607_s1 + $0x280] sm:$0xff] }
 0x287   :  { %v1281_v24 = vld [vmem:[%s13607_s1 + $0x130] sm:$0xff]  ;;  %v1327_v25 = vld [vmem:[%s13607_s1 + $0x2a0] sm:$0xff] }
 0x288   :  { %6357 = vmatpush1.bf16.msra.mxu0 %v13824_v61  ;;  %6421 = vmatpush1.bf16.msra.mxu1 %v13825_v20  ;;  %v1276_v61 = vld [vmem:[%s13607_s1 + $0x108] sm:$0xff] }
 0x289   :  { %6423 = vmatprep.subr.bf16.mxu0 %v9587_v16  ;;  %6487 = vmatprep.subr.bf16.mxu1 %v9596_v51  ;;  %v1280_v20 = vld [vmem:[%s13607_s1 + $0x128] sm:$0xff] }
 0x28a   :  { %v9692_v36 = vpack.c.bf16 %v1280_v20, %v1276_v61  ;;  %v9826_v61 = vpack.c.bf16 %v1281_v24, %v1277_v10  ;;  %v1308_v20 = vld [vmem:[%s13607_s1 + $0x208] sm:$0xff]  ;;  %v9916_v10 = vpack.c.bf16 %v1327_v25, %v1323_v58  ;;  %v1302_v24 = vld [vmem:[%s13607_s1 + $0x1d8] sm:$0xff] }
 0x28b   :  { %v9835_v44 = vpack.c.bf16 %v1312_v57, %v1308_v20  ;;  %v1306_v20 = vld [vmem:[%s13607_s1 + $0x1f8] sm:$0xff]  ;;  %v1344_v58 = vld [vmem:[%s13607_s1 + $0x328] sm:$0xff] }
 0x28c   :  { %v9925_v57 = vpack.c.bf16 %v1306_v20, %v1302_v24  ;;  %v1339_v24 = vld [vmem:[%s13607_s1 + $0x300] sm:$0xff] }
 0x28d   :  { %v1343_v20 = vld [vmem:[%s13607_s1 + $0x320] sm:$0xff] }
 0x31e   :  { %v843_v56 = vpop.f32.mrb[4].mxu0  ;;  %v914_v14 = vpop.f32.mrb[4].mxu1 }
 0x31f   :  { %v844_v55 = vadd.f32 %v843_v56, %v13826_v30  ;;  %v845_v27 = vpop.f32.mrb[5].mxu0  ;;  %v916_v53 = vpop.f32.mrb[5].mxu1  ;;  %v915_v9 = vadd.f32 %v914_v14, %v8931_v60  ;;  %v1254_v56 = vld [vmem:[%s13607_s1 + $0x58] sm:$0xff] }
 0x320   :  { %v846_v21 = vadd.f32 %v845_v27, %v8918_v0  ;;  %v917_v2 = vadd.f32 %v916_v53, %v8925_v32  ;;  %v1258_v14 = vld [vmem:[%s13607_s1 + $0x78] sm:$0xff]  ;;  %v1253_v27 = vld [vmem:[%s13607_s1 + $0x50] sm:$0xff] }
 0x321   :  { %v4841_v49 = vmul.f32 -1.442695, %v844_v55  ;;  %v9709_v55 = vpack.c.bf16 %v1258_v14, %v1254_v56  ;;  %v1257_v53 = vld [vmem:[%s13607_s1 + $0x70] sm:$0xff]  ;;  %v1307_v56 = vld [vmem:[%s13607_s1 + $0x200] sm:$0xff] }
 0x322   :  { %v4842_v38 = vmul.f32 -1.442695, %v846_v21  ;;  %v4843_v23 = vmul.f32 -1.442695, %v917_v2  ;;  %v9718_v21 = vpack.c.bf16 %v1257_v53, %v1253_v27  ;;  %v1311_v14 = vld [vmem:[%s13607_s1 + $0x220] sm:$0xff]  ;;  %v1286_v53 = vld [vmem:[%s13607_s1 + $0x158] sm:$0xff] }
 0x323   :  { %7991 = vpow2.f32 %v4841_v49  ;;  %v1284_v49 = vld [vmem:[%s13607_s1 + $0x148] sm:$0xff]  ;;  %v9844_v27 = vpack.c.bf16 %v1311_v14, %v1307_v56  ;;  %v1301_v56 = vld [vmem:[%s13607_s1 + $0x1d0] sm:$0xff] }
 0x324   :  { %7993 = vpow2.f32 %v4842_v38  ;;  %v1288_v38 = vld [vmem:[%s13607_s1 + $0x168] sm:$0xff]  ;;  %v1305_v14 = vld [vmem:[%s13607_s1 + $0x1f0] sm:$0xff] }
 0x325   :  { %7995 = vpow2.f32 %v4843_v23  ;;  %v9727_v2 = vpack.c.bf16 %v1288_v38, %v1284_v49  ;;  %v1283_v23 = vld [vmem:[%s13607_s1 + $0x140] sm:$0xff]  ;;  %v1290_v49 = vld [vmem:[%s13607_s1 + $0x178] sm:$0xff] }
 0x326   :  { %7997 = vtanh.f32 %v915_v9  ;;  %v1287_v9 = vld [vmem:[%s13607_s1 + $0x160] sm:$0xff]  ;;  %v9853_v38 = vpack.c.bf16 %v1290_v49, %v1286_v53  ;;  %v9934_v53 = vpack.c.bf16 %v1305_v14, %v1301_v56  ;;  %v1332_v49 = vld [vmem:[%s13607_s1 + $0x2c8] sm:$0xff]  ;;  %v9988_v56 = vpack.c.bf16 %v1343_v20, %v1339_v24  ;;  %v1318_v14 = vld [vmem:[%s13607_s1 + $0x258] sm:$0xff] }
 0x327   :  { %v1326_v24 = vld [vmem:[%s13607_s1 + $0x298] sm:$0xff] }
 0x328   :  { %13830 = vst [vmem:[#allocation19_spill] sm:$0xff] %v9988_v56 }
 0x32d   :  { %v7992_v37 = vpop.eup %7991 }
 0x32e   :  { %v7994_v18 = vpop.eup %7993  ;;  %v922_v5 = vadd.f32 1.0, %v7992_v37  ;;  %v9736_v37 = vpack.c.bf16 %v1287_v9, %v1283_v23  ;;  %v1285_v23 = vld [vmem:[%s13607_s1 + $0x150] sm:$0xff] }
 0x32f   :  { %v928_v47 = vadd.f32 1.0, %v7994_v18  ;;  %v7996_v40 = vpop.eup %7995  ;;  %v1262_v18 = vld [vmem:[%s13607_s1 + $0x98] sm:$0xff]  ;;  %v1289_v9 = vld [vmem:[%s13607_s1 + $0x170] sm:$0xff] }
 0x330   :  { %7999 = vrcp.f32 %v922_v5  ;;  %v7998_v3 = vpop.eup %7997  ;;  %v935_v11 = vadd.f32 1.0, %v7996_v40  ;;  %v1266_v5 = vld [vmem:[%s13607_s1 + $0xb8] sm:$0xff]  ;;  %v1261_v40 = vld [vmem:[%s13607_s1 + $0x90] sm:$0xff] }
 0x331   :  { %8001 = vrcp.f32 %v928_v47  ;;  %v9745_v47 = vpack.c.bf16 %v1266_v5, %v1262_v18  ;;  %v9862_v18 = vpack.c.bf16 %v1289_v9, %v1285_v23  ;;  %v1316_v5 = vld [vmem:[%s13607_s1 + $0x248] sm:$0xff] }
 0x332   :  { %8003 = vrcp.f32 %v935_v11  ;;  %v1292_v11 = vld [vmem:[%s13607_s1 + $0x188] sm:$0xff] }
 0x333   :  { %v1336_v23 = vld [vmem:[%s13607_s1 + $0x2e8] sm:$0xff] }
 0x334   :  { %v9943_v9 = vpack.c.bf16 %v1336_v23, %v1332_v49  ;;  %v1322_v49 = vld [vmem:[%s13607_s1 + $0x278] sm:$0xff] }
 0x335   :  { %v9997_v23 = vpack.c.bf16 %v1322_v49, %v1318_v14  ;;  %v1330_v14 = vld [vmem:[%s13607_s1 + $0x2b8] sm:$0xff]  ;;  %v1325_v49 = vld [vmem:[%s13607_s1 + $0x290] sm:$0xff] }
 0x33a   :  { %v8000_v15 = vpop.eup %7999 }
 0x33b   :  { %v8002_v28 = vpop.eup %8001  ;;  %v939_v46 = vmul.f32 %v8000_v15, %v7998_v3  ;;  %v1265_v3 = vld [vmem:[%s13607_s1 + $0xb0] sm:$0xff] }
 0x33c   :  { %v938_v31 = vmul.f32 %v8002_v28, %v9509_v59  ;;  %v8004_v45 = vpop.eup %8003  ;;  %v9754_v15 = vpack.c.bf16 %v1265_v3, %v1261_v40  ;;  %v1296_v28 = vld [vmem:[%s13607_s1 + $0x1a8] sm:$0xff] }
 0x33d   :  { %v1320_v40 = vld [vmem:[%s13607_s1 + $0x268] sm:$0xff] }
 0x33e   :  { %v9604_v35 = vadd.f32 %v939_v46, %v938_v31  ;;  %v9763_v46 = vpack.c.bf16 %v1296_v28, %v1292_v11  ;;  %v1291_v31 = vld [vmem:[%s13607_s1 + $0x180] sm:$0xff]  ;;  %v9871_v3 = vpack.c.bf16 %v1320_v40, %v1316_v5 }
 0x33f   :  { %v1315_v11 = vld [vmem:[%s13607_s1 + $0x240] sm:$0xff] }
 0x340   :  { %8005 = vtanh.f32 %v9604_v35  ;;  %v1319_v28 = vld [vmem:[%s13607_s1 + $0x260] sm:$0xff] }
 0x341   :  { %v1331_v5 = vld [vmem:[%s13607_s1 + $0x2c0] sm:$0xff] }
 0x342   :  { %v1335_v40 = vld [vmem:[%s13607_s1 + $0x2e0] sm:$0xff] }
 0x34a   :  { %v8006_v52 = vpop.eup %8005 }
 0x34b   :  { %v9625_v59 = vmul.f32 %v8006_v52, %v8004_v45  ;;  %v9772_v45 = vpack.c.bf16 %v1295_v50, %v1291_v31  ;;  %v9790_v52 = vpack.c.bf16 %v1273_v13, %v1269_v41  ;;  %v9880_v31 = vpack.c.bf16 %v1319_v28, %v1315_v11  ;;  %v1294_v50 = vld [vmem:[%s13607_s1 + $0x198] sm:$0xff]  ;;  %v1293_v41 = vld [vmem:[%s13607_s1 + $0x190] sm:$0xff] }
 0x34c   :  { %v9889_v33 = vpack.c.bf16 %v1298_v63, %v1294_v50  ;;  %v1297_v13 = vld [vmem:[%s13607_s1 + $0x1b0] sm:$0xff]  ;;  %v9952_v11 = vpack.c.bf16 %v1335_v40, %v1331_v5  ;;  %v1310_v28 = vld [vmem:[%s13607_s1 + $0x218] sm:$0xff] }
 0x34d   :  { %13827 = vst [vmem:[#allocation9_spill] sm:$0xff] %v9625_v59  ;;  %1138 = vmatprep.mubr.f32.mxu0 %v9625_v59  ;;  %1209 = vmatprep.mubr.f32.mxu1 %v9625_v59  ;;  %v1314_v50 = vld [vmem:[%s13607_s1 + $0x238] sm:$0xff]  ;;  %v1317_v5 = vld [vmem:[%s13607_s1 + $0x250] sm:$0xff] }
 0x34e   :  { %1139 = vmatmul.mubr.f32.vlgmr.msra.gmra.mrb[6].mxu0 %v19_v19  ;;  %1210 = vmatmul.mubr.f32.vlgmr.msra.gmra.mrb[6].mxu1 %v19_v19  ;;  %v1300_v19 = vld [vmem:[%s13607_s1 + $0x1c8] sm:$0xff]  ;;  %13828 = vst [vmem:[#allocation16_spill] sm:$0xff] %v9952_v11  ;;  %v9961_v63 = vpack.c.bf16 %v1314_v50, %v1310_v28  ;;  %v1321_v40 = vld [vmem:[%s13607_s1 + $0x270] sm:$0xff] }
 0x34f   :  { %6425 = vmatpush1.bf16.msra.mxu0 %v9630_v39  ;;  %6489 = vmatpush1.bf16.msra.mxu1 %v9632_v17  ;;  %v9799_v1 = vpack.c.bf16 %v1304_v29, %v1300_v19  ;;  %v9898_v19 = vpack.c.bf16 %v1297_v13, %v1293_v41  ;;  %v1324_v29 = vld [vmem:[%s13607_s1 + $0x288] sm:$0xff]  ;;  %v1309_v41 = vld [vmem:[%s13607_s1 + $0x210] sm:$0xff]  ;;  %v10006_v28 = vpack.c.bf16 %v1321_v40, %v1317_v5 }
 0x350   :  { %6427 = vmatprep.subr.bf16.mxu0 %v9634_v62  ;;  %6491 = vmatprep.subr.bf16.mxu1 %v9709_v55  ;;  %v9907_v12 = vpack.c.bf16 %v1328_v6, %v1324_v29  ;;  %v1313_v13 = vld [vmem:[%s13607_s1 + $0x230] sm:$0xff]  ;;  %v1340_v6 = vld [vmem:[%s13607_s1 + $0x308] sm:$0xff]  ;;  %v10039_v40 = vpack.c.bf16 %v1330_v14, %v1326_v24  ;;  %v1359_v24 = vld [vmem:[%s13607_s1 + $0x3a0] sm:$0xff] }
 0x351   :  { %v9970_v29 = vpack.c.bf16 %v1313_v13, %v1309_v41  ;;  %v9979_v25 = vpack.c.bf16 %v1344_v58, %v1340_v6  ;;  %v1348_v50 = vld [vmem:[%s13607_s1 + $0x348] sm:$0xff]  ;;  %v1347_v6 = vld [vmem:[%s13607_s1 + $0x340] sm:$0xff]  ;;  %v1329_v5 = vld [vmem:[%s13607_s1 + $0x2b0] sm:$0xff] }
 0x352   :  { %v1352_v41 = vld [vmem:[%s13607_s1 + $0x368] sm:$0xff]  ;;  %v1351_v58 = vld [vmem:[%s13607_s1 + $0x360] sm:$0xff]  ;;  %v1334_v14 = vld [vmem:[%s13607_s1 + $0x2d8] sm:$0xff] }
 0x353   :  { %6429 = vmatpush1.bf16.msra.mxu0 %v9651_v4  ;;  %6493 = vmatpush1.bf16.msra.mxu1 %v9718_v21  ;;  %13829 = vst [vmem:[#allocation10_spill] sm:$0xff] %v9979_v25  ;;  %v10015_v13 = vpack.c.bf16 %v1352_v41, %v1348_v50  ;;  %v10027_v20 = vpack.c.bf16 %v1351_v58, %v1347_v6  ;;  %v1356_v41 = vld [vmem:[%s13607_s1 + $0x388] sm:$0xff]  ;;  %v1355_v58 = vld [vmem:[%s13607_s1 + $0x380] sm:$0xff] }
 0x354   :  { %6431 = vmatprep.subr.bf16.mxu0 %v9655_v7  ;;  %6495 = vmatprep.subr.bf16.mxu1 %v9745_v47  ;;  %v10041_v50 = vpack.c.bf16 %v1329_v5, %v1325_v49  ;;  %v1360_v6 = vld [vmem:[%s13607_s1 + $0x3a8] sm:$0xff]  ;;  %v1338_v49 = vld [vmem:[%s13607_s1 + $0x2f8] sm:$0xff]  ;;  %v10065_v5 = vpack.c.bf16 %v1359_v24, %v1355_v58 }
 0x355   :  { %13831 = vst [vmem:[#allocation11_spill] sm:$0xff] %v10015_v13  ;;  %13832 = vst [vmem:[#allocation20_spill] sm:$0xff] %v10027_v20  ;;  %v10053_v59 = vpack.c.bf16 %v1360_v6, %v1356_v41  ;;  %v10067_v22 = vpack.c.bf16 %v1338_v49, %v1334_v14  ;;  %v1333_v41 = vld [vmem:[%s13607_s1 + $0x2d0] sm:$0xff]  ;;  %v1368_v24 = vld [vmem:[%s13607_s1 + $0x3e8] sm:$0xff] }
 0x356   :  { %13834 = vst [vmem:[#allocation21_spill] sm:$0xff] %v10065_v5  ;;  %v1337_v6 = vld [vmem:[%s13607_s1 + $0x2f0] sm:$0xff]  ;;  %v1363_v14 = vld [vmem:[%s13607_s1 + $0x3c0] sm:$0xff] }
 0x357   :  { %6433 = vmatpush1.bf16.msra.mxu0 %v9670_v26  ;;  %6497 = vmatpush1.bf16.msra.mxu1 %v9754_v15  ;;  %13833 = vst [vmem:[#allocation12_spill] sm:$0xff] %v10053_v59  ;;  %v10080_v58 = vpack.c.bf16 %v1337_v6, %v1333_v41  ;;  %v1367_v49 = vld [vmem:[%s13607_s1 + $0x3e0] sm:$0xff]  ;;  %v1342_v41 = vld [vmem:[%s13607_s1 + $0x318] sm:$0xff] }
 0x358   :  { %6435 = vmatprep.subr.bf16.mxu0 %v9673_v42  ;;  %6499 = vmatprep.subr.bf16.mxu1 %v9781_v48  ;;  %v1346_v6 = vld [vmem:[%s13607_s1 + $0x338] sm:$0xff] }
 0x359   :  { %13835 = vst [vmem:[#allocation13_spill] sm:$0xff] %v10080_v58 }
 0x35b   :  { %6437 = vmatpush1.bf16.msra.mxu0 %v9682_v43  ;;  %6501 = vmatpush1.bf16.msra.mxu1 %v9790_v52 }
 0x35c   :  { %6439 = vmatprep.subr.bf16.mxu0 %v9692_v36  ;;  %6503 = vmatprep.subr.bf16.mxu1 %v9817_v54 }
 0x35f   :  { %6441 = vmatpush1.bf16.msra.mxu0 %v9700_v34  ;;  %6505 = vmatpush1.bf16.msra.mxu1 %v9826_v61 }
 0x360   :  { %6443 = vmatprep.subr.bf16.mxu0 %v9727_v2  ;;  %6507 = vmatprep.subr.bf16.mxu1 %v9853_v38 }
 0x363   :  { %6445 = vmatpush1.bf16.msra.mxu0 %v9736_v37  ;;  %6509 = vmatpush1.bf16.msra.mxu1 %v9862_v18 }
 0x364   :  { %6447 = vmatprep.subr.bf16.mxu0 %v9763_v46  ;;  %6511 = vmatprep.subr.bf16.mxu1 %v9889_v33 }
 0x367   :  { %6449 = vmatpush1.bf16.msra.mxu0 %v9772_v45  ;;  %6513 = vmatpush1.bf16.msra.mxu1 %v9898_v19 }
 0x368   :  { %6451 = vmatprep.subr.bf16.mxu0 %v9799_v1  ;;  %6515 = vmatprep.subr.bf16.mxu1 %v9925_v57 }
 0x36b   :  { %6453 = vmatpush1.bf16.msra.mxu0 %v9808_v8  ;;  %6517 = vmatpush1.bf16.msra.mxu1 %v9934_v53 }
 0x36c   :  { %6455 = vmatprep.subr.bf16.mxu0 %v9835_v44  ;;  %6519 = vmatprep.subr.bf16.mxu1 %v9961_v63 }
 0x36f   :  { %6457 = vmatpush1.bf16.msra.mxu0 %v9844_v27  ;;  %6521 = vmatpush1.bf16.msra.mxu1 %v9970_v29 }
 0x370   :  { %6459 = vmatprep.subr.bf16.mxu0 %v9871_v3  ;;  %6523 = vmatprep.subr.bf16.mxu1 %v9997_v23 }
 0x373   :  { %6461 = vmatpush1.bf16.msra.mxu0 %v9880_v31  ;;  %6525 = vmatpush1.bf16.msra.mxu1 %v10006_v28 }
 0x374   :  { %6463 = vmatprep.subr.bf16.mxu0 %v9907_v12  ;;  %6527 = vmatprep.subr.bf16.mxu1 %v10039_v40 }
 0x377   :  { %6465 = vmatpush1.bf16.msra.mxu0 %v9916_v10  ;;  %6529 = vmatpush1.bf16.msra.mxu1 %v10041_v50 }
 0x378   :  { %6467 = vmatprep.subr.bf16.mxu0 %v9943_v9  ;;  %6531 = vmatprep.subr.bf16.mxu1 %v10067_v22 }
 0x37b   :  { %6469 = vmatpush1.bf16.msra.mxu0 %v9952_v11  ;;  %6533 = vmatpush1.bf16.msra.mxu1 %v10080_v58 }
 0x37c   :  { %6471 = vmatprep.subr.bf16.mxu0 %v9979_v25 }
 0x37f   :  { %6473 = vmatpush1.bf16.msra.mxu0 %v9988_v56  ;;  %v10103_v56 = vpack.c.bf16 %v1346_v6, %v1342_v41  ;;  %v1354_v41 = vld [vmem:[%s13607_s1 + $0x378] sm:$0xff] }
 0x380   :  { %6475 = vmatprep.subr.bf16.mxu0 %v10015_v13 }
 0x381   :  { %13838 = vst [vmem:[#allocation23_spill] sm:$0xff] %v10103_v56  ;;  %6535 = vmatprep.subr.bf16.mxu1 %v10103_v56 }
 0x383   :  { %6477 = vmatpush1.bf16.msra.mxu0 %v10027_v20  ;;  %v1364_v20 = vld [vmem:[%s13607_s1 + $0x3c8] sm:$0xff] }
 0x384   :  { %6479 = vmatprep.subr.bf16.mxu0 %v10053_v59  ;;  %v10092_v13 = vpack.c.bf16 %v1368_v24, %v1364_v20  ;;  %v10101_v59 = vpack.c.bf16 %v1367_v49, %v1363_v14  ;;  %v1341_v20 = vld [vmem:[%s13607_s1 + $0x310] sm:$0xff]  ;;  %v1350_v49 = vld [vmem:[%s13607_s1 + $0x358] sm:$0xff] }
 0x385   :  { %v1345_v24 = vld [vmem:[%s13607_s1 + $0x330] sm:$0xff]  ;;  %v10125_v6 = vpack.c.bf16 %v1354_v41, %v1350_v49 }
 0x386   :  { %13836 = vst [vmem:[#allocation22_spill] sm:$0xff] %v10092_v13  ;;  %13837 = vst [vmem:[#allocation14_spill] sm:$0xff] %v10101_v59  ;;  %v10115_v14 = vpack.c.bf16 %v1345_v24, %v1341_v20  ;;  %v1358_v20 = vld [vmem:[%s13607_s1 + $0x398] sm:$0xff]  ;;  %v1357_v49 = vld [vmem:[%s13607_s1 + $0x390] sm:$0xff] }
 0x387   :  { %6481 = vmatpush1.bf16.msra.mxu0 %v10065_v5  ;;  %13840 = vst [vmem:[#allocation24_spill] sm:$0xff] %v10125_v6  ;;  %v1361_v41 = vld [vmem:[%s13607_s1 + $0x3b0] sm:$0xff] }
 0x388   :  { %6483 = vmatprep.subr.bf16.mxu0 %v10092_v13  ;;  %13839 = vst [vmem:[#allocation15_spill] sm:$0xff] %v10115_v14  ;;  %6537 = vmatpush1.bf16.msra.mxu1 %v10115_v14  ;;  %v1362_v13 = vld [vmem:[%s13607_s1 + $0x3b8] sm:$0xff]  ;;  %v10157_v14 = vpack.c.bf16 %v1361_v41, %v1357_v49 }
 0x389   :  { %6539 = vmatprep.subr.bf16.mxu1 %v10125_v6  ;;  %v10148_v5 = vpack.c.bf16 %v1362_v13, %v1358_v20  ;;  %v1365_v13 = vld [vmem:[%s13607_s1 + $0x3d0] sm:$0xff] }
 0x38a   :  { %13843 = vst [vmem:[#allocation18_spill] sm:$0xff] %v10157_v14  ;;  %v1369_v20 = vld [vmem:[%s13607_s1 + $0x3f0] sm:$0xff] }
 0x38b   :  { %6485 = vmatpush1.bf16.msra.mxu0 %v10101_v59  ;;  %v1349_v59 = vld [vmem:[%s13607_s1 + $0x350] sm:$0xff]  ;;  %13842 = vst [vmem:[#allocation25_spill] sm:$0xff] %v10148_v5  ;;  %v10169_v6 = vpack.c.bf16 %v1369_v20, %v1365_v13 }
 0x38c   :  { %6551 = vmatprep.subr.bf16.mxu0 %v9587_v16  ;;  %v1353_v16 = vld [vmem:[%s13607_s1 + $0x370] sm:$0xff] }
 0x38d   :  { %v10136_v24 = vpack.c.bf16 %v1353_v16, %v1349_v59  ;;  %v1366_v59 = vld [vmem:[%s13607_s1 + $0x3d8] sm:$0xff]  ;;  %13845 = vst [vmem:[#allocation28_spill] sm:$0xff] %v10169_v6 }
 0x38e   :  { %v1370_v16 = vld [vmem:[%s13607_s1 + $0x3f8] sm:$0xff] }
 0x38f   :  { %13841 = vst [vmem:[#allocation17_spill] sm:$0xff] %v10136_v24  ;;  %6541 = vmatpush1.bf16.msra.mxu1 %v10136_v24  ;;  %v10160_v56 = vpack.c.bf16 %v1370_v16, %v1366_v59 }
 0x390   :  { %6543 = vmatprep.subr.bf16.mxu1 %v10148_v5 }
 0x391   :  { %13844 = vst [vmem:[#allocation26_spill] sm:$0xff] %v10160_v56 }
 0x393   :  { %6545 = vmatpush1.bf16.msra.mxu1 %v10157_v14 }
 0x394   :  { %6547 = vmatprep.subr.bf16.mxu1 %v10160_v56 }
 0x397   :  { %6549 = vmatpush1.bf16.msra.mxu1 %v10169_v6 }
 0x398   :  { %6615 = vmatprep.subr.bf16.mxu1 %v9596_v51 }
 0x421   :  { %v1140_v49 = vpop.f32.mrb[6].mxu0  ;;  %v1211_v41 = vpop.f32.mrb[6].mxu1 }
 0x422   :  { %v1141_v59 = vadd.f32 %v1140_v49, %v13826_v30  ;;  %v1142_v16 = vpop.f32.mrb[7].mxu0  ;;  %v1213_v5 = vpop.f32.mrb[7].mxu1  ;;  %v1212_v56 = vadd.f32 %v1211_v41, %v8931_v60 }
 0x423   :  { %v1143_v24 = vadd.f32 %v1142_v16, %v8918_v0  ;;  %v1214_v13 = vadd.f32 %v1213_v5, %v8925_v32 }
 0x424   :  { %v4844_v25 = vmul.f32 -1.442695, %v1141_v59 }
 0x425   :  { %v4845_v58 = vmul.f32 -1.442695, %v1143_v24  ;;  %v4846_v20 = vmul.f32 -1.442695, %v1214_v13 }
 0x426   :  { %8007 = vpow2.f32 %v4844_v25 }
 0x427   :  { %8009 = vpow2.f32 %v4845_v58 }
 0x428   :  { %8011 = vpow2.f32 %v4846_v20  ;;  %v1837_v20 = vld [vmem:[%s13607_s1] sm:$0xff] }
 0x429   :  { %8013 = vtanh.f32 %v1212_v56 }
 0x430   :  { %v8008_v6 = vpop.eup %8007 }
 0x431   :  { %v8010_v51 = vpop.eup %8009  ;;  %v1219_v14 = vadd.f32 1.0, %v8008_v6 }
 0x432   :  { %v1225_v11 = vadd.f32 1.0, %v8010_v51  ;;  %v8012_v49 = vpop.eup %8011 }
 0x433   :  { %8015 = vrcp.f32 %v1219_v14  ;;  %v8014_v30 = vpop.eup %8013  ;;  %v1232_v59 = vadd.f32 1.0, %v8012_v49  ;;  %v1841_v49 = vld [vmem:[%s13607_s1 + $0x20] sm:$0xff] }
 0x434   :  { %8017 = vrcp.f32 %v1225_v11  ;;  %v20_v11 = vld [vmem:[%s13608_s0 + $0x20] sm:$0xff] }
 0x435   :  { %8019 = vrcp.f32 %v1232_v59  ;;  %v1843_v59 = vld [vmem:[%s13607_s1 + $0x30] sm:$0xff] }
 0x43d   :  { %v8016_v16 = vpop.eup %8015 }
 0x43e   :  { %v8018_v24 = vpop.eup %8017  ;;  %v1236_v25 = vmul.f32 %v8016_v16, %v8014_v30  ;;  %v13847_v30 = vld [vmem:[#allocation16_spill] sm:$0xff]  ;;  %v1839_v16 = vld [vmem:[%s13607_s1 + $0x10] sm:$0xff] }
 0x43f   :  { %v1235_v58 = vmul.f32 %v8018_v24, %v9604_v35  ;;  %v8020_v41 = vpop.eup %8019  ;;  %v13848_v35 = vld [vmem:[#allocation13_spill] sm:$0xff]  ;;  %v1846_v24 = vld [vmem:[%s13607_s1 + $0x48] sm:$0xff] }
 0x441   :  { %v10179_v5 = vadd.f32 %v1236_v25, %v1235_v58  ;;  %v1850_v25 = vld [vmem:[%s13607_s1 + $0x68] sm:$0xff] }
 0x443   :  { %8021 = vtanh.f32 %v10179_v5 }
 0x44d   :  { %v8022_v13 = vpop.eup %8021 }
 0x44e   :  { %v10182_v6 = vmul.f32 %v8022_v13, %v8020_v41  ;;  %v21_v41 = vld [vmem:[%s13608_s0 + $0x28] sm:$0xff]  ;;  %v10300_v13 = vpack.c.bf16 %v1841_v49, %v1837_v20  ;;  %v1889_v20 = vld [vmem:[%s13607_s1 + $0x1a0] sm:$0xff]  ;;  %v1864_v49 = vld [vmem:[%s13607_s1 + $0xd8] sm:$0xff] }
 0x450   :  { %13846 = vst [vmem:[#allocation29_spill] sm:$0xff] %v10182_v6  ;;  %1435 = vmatprep.mubr.f32.mxu0 %v10182_v6  ;;  %1506 = vmatprep.mubr.f32.mxu1 %v10182_v6 }
 0x451   :  { %1436 = vmatmul.mubr.f32.vlgmr.msra.gmra.mrb[8].mxu0 %v20_v11  ;;  %1507 = vmatmul.mubr.f32.vlgmr.msra.gmra.mrb[8].mxu1 %v20_v11  ;;  %v10302_v11 = vpack.c.bf16 %v1843_v59, %v1839_v16  ;;  %v1868_v16 = vld [vmem:[%s13607_s1 + $0xf8] sm:$0xff] }
 0x452   :  { %6553 = vmatpush1.bf16.msra.mxu0 %v9630_v39  ;;  %6617 = vmatpush1.bf16.msra.mxu1 %v9632_v17  ;;  %v13849_v39 = vld [vmem:[#allocation10_spill] sm:$0xff]  ;;  %v13850_v17 = vld [vmem:[#allocation23_spill] sm:$0xff]  ;;  %v10451_v59 = vpack.c.bf16 %v1868_v16, %v1864_v49 }
 0x453   :  { %6555 = vmatprep.subr.bf16.mxu0 %v9634_v62  ;;  %6619 = vmatprep.subr.bf16.mxu1 %v9709_v55  ;;  %v13851_v62 = vld [vmem:[#allocation19_spill] sm:$0xff]  ;;  %v13860_v55 = vld [vmem:[#allocation18_spill] sm:$0xff] }
 0x454   :  { %v1892_v49 = vld [vmem:[%s13607_s1 + $0x1b8] sm:$0xff] }
 0x456   :  { %6557 = vmatpush1.bf16.msra.mxu0 %v9651_v4  ;;  %6621 = vmatpush1.bf16.msra.mxu1 %v9718_v21  ;;  %v13852_v4 = vld [vmem:[#allocation15_spill] sm:$0xff]  ;;  %v13861_v21 = vld [vmem:[#allocation22_spill] sm:$0xff] }
 0x457   :  { %6559 = vmatprep.subr.bf16.mxu0 %v9655_v7  ;;  %6623 = vmatprep.subr.bf16.mxu1 %v9745_v47  ;;  %v13853_v7 = vld [vmem:[#allocation11_spill] sm:$0xff]  ;;  %v13864_v47 = vld [vmem:[#allocation28_spill] sm:$0xff] }
 0x45a   :  { %6561 = vmatpush1.bf16.msra.mxu0 %v9670_v26  ;;  %6625 = vmatpush1.bf16.msra.mxu1 %v9754_v15  ;;  %v13854_v26 = vld [vmem:[#allocation24_spill] sm:$0xff] }
 0x45b   :  { %6563 = vmatprep.subr.bf16.mxu0 %v9673_v42  ;;  %6627 = vmatprep.subr.bf16.mxu1 %v9781_v48  ;;  %v13855_v42 = vld [vmem:[#allocation20_spill] sm:$0xff]  ;;  %v1840_v48 = vld [vmem:[%s13607_s1 + $0x18] sm:$0xff] }
 0x45c   :  { %v1838_v15 = vld [vmem:[%s13607_s1 + $0x8] sm:$0xff] }
 0x45e   :  { %6565 = vmatpush1.bf16.msra.mxu0 %v9682_v43  ;;  %6629 = vmatpush1.bf16.msra.mxu1 %v9790_v52  ;;  %v13856_v43 = vld [vmem:[#allocation17_spill] sm:$0xff]  ;;  %v1844_v52 = vld [vmem:[%s13607_s1 + $0x38] sm:$0xff] }
 0x45f   :  { %6567 = vmatprep.subr.bf16.mxu0 %v9692_v36  ;;  %6631 = vmatprep.subr.bf16.mxu1 %v9817_v54  ;;  %v13858_v36 = vld [vmem:[#allocation25_spill] sm:$0xff] }
 0x462   :  { %6569 = vmatpush1.bf16.msra.mxu0 %v9700_v34  ;;  %6633 = vmatpush1.bf16.msra.mxu1 %v9826_v61  ;;  %v13859_v34 = vld [vmem:[#allocation21_spill] sm:$0xff]  ;;  %v13865_v61 = vld [vmem:[#allocation4_spill] sm:$0xff] }
 0x463   :  { %6571 = vmatprep.subr.bf16.mxu0 %v9727_v2  ;;  %6635 = vmatprep.subr.bf16.mxu1 %v9853_v38  ;;  %v13862_v2 = vld [vmem:[#allocation26_spill] sm:$0xff] }
 0x466   :  { %6573 = vmatpush1.bf16.msra.mxu0 %v9736_v37  ;;  %6637 = vmatpush1.bf16.msra.mxu1 %v9862_v18  ;;  %v13863_v37 = vld [vmem:[#allocation14_spill] sm:$0xff] }
 0x467   :  { %6575 = vmatprep.subr.bf16.mxu0 %v9763_v46  ;;  %6639 = vmatprep.subr.bf16.mxu1 %v9889_v33  ;;  %v1842_v46 = vld [vmem:[%s13607_s1 + $0x28] sm:$0xff] }
 0x46a   :  { %6577 = vmatpush1.bf16.msra.mxu0 %v9772_v45  ;;  %6641 = vmatpush1.bf16.msra.mxu1 %v9898_v19  ;;  %v10257_v45 = vpack.c.bf16 %v1842_v46, %v1838_v15  ;;  %v1869_v46 = vld [vmem:[%s13607_s1 + $0x100] sm:$0xff] }
 0x46b   :  { %6579 = vmatprep.subr.bf16.mxu0 %v9799_v1  ;;  %6643 = vmatprep.subr.bf16.mxu1 %v9925_v57  ;;  %v10266_v1 = vpack.c.bf16 %v1844_v52, %v1840_v48  ;;  %v1873_v48 = vld [vmem:[%s13607_s1 + $0x120] sm:$0xff] }
 0x46c   :  { %v10370_v52 = vpack.c.bf16 %v1873_v48, %v1869_v46  ;;  %v1906_v46 = vld [vmem:[%s13607_s1 + $0x228] sm:$0xff] }
 0x46e   :  { %6581 = vmatpush1.bf16.msra.mxu0 %v9808_v8  ;;  %6645 = vmatpush1.bf16.msra.mxu1 %v9934_v53 }
 0x46f   :  { %6583 = vmatprep.subr.bf16.mxu0 %v9835_v44  ;;  %6647 = vmatprep.subr.bf16.mxu1 %v9961_v63 }
 0x472   :  { %6585 = vmatpush1.bf16.msra.mxu0 %v9844_v27  ;;  %6649 = vmatpush1.bf16.msra.mxu1 %v9970_v29 }
 0x473   :  { %6587 = vmatprep.subr.bf16.mxu0 %v9871_v3  ;;  %6651 = vmatprep.subr.bf16.mxu1 %v9997_v23 }
 0x476   :  { %6589 = vmatpush1.bf16.msra.mxu0 %v9880_v31  ;;  %6653 = vmatpush1.bf16.msra.mxu1 %v10006_v28 }
 0x477   :  { %6591 = vmatprep.subr.bf16.mxu0 %v9907_v12  ;;  %6655 = vmatprep.subr.bf16.mxu1 %v10039_v40 }
 0x47a   :  { %6593 = vmatpush1.bf16.msra.mxu0 %v9916_v10  ;;  %6657 = vmatpush1.bf16.msra.mxu1 %v10041_v50 }
 0x47b   :  { %6595 = vmatprep.subr.bf16.mxu0 %v9943_v9  ;;  %6659 = vmatprep.subr.bf16.mxu1 %v10067_v22  ;;  %v13857_v22 = vld [vmem:[#allocation12_spill] sm:$0xff] }
 0x47e   :  { %6597 = vmatpush1.bf16.msra.mxu0 %v13847_v30  ;;  %6661 = vmatpush1.bf16.msra.mxu1 %v13848_v35  ;;  %v10304_v30 = vpack.c.bf16 %v1850_v25, %v1846_v24  ;;  %v1845_v35 = vld [vmem:[%s13607_s1 + $0x40] sm:$0xff]  ;;  %v1863_v24 = vld [vmem:[%s13607_s1 + $0xd0] sm:$0xff] }
 0x47f   :  { %6599 = vmatprep.subr.bf16.mxu0 %v13849_v39  ;;  %6663 = vmatprep.subr.bf16.mxu1 %v13850_v17  ;;  %v1849_v39 = vld [vmem:[%s13607_s1 + $0x60] sm:$0xff]  ;;  %v1854_v17 = vld [vmem:[%s13607_s1 + $0x88] sm:$0xff]  ;;  %v1867_v25 = vld [vmem:[%s13607_s1 + $0xf0] sm:$0xff] }
 0x482   :  { %6601 = vmatpush1.bf16.msra.mxu0 %v13851_v62  ;;  %6665 = vmatpush1.bf16.msra.mxu1 %v13852_v4  ;;  %v1858_v62 = vld [vmem:[%s13607_s1 + $0xa8] sm:$0xff]  ;;  %v10321_v4 = vpack.c.bf16 %v1849_v39, %v1845_v35 }
 0x483   :  { %6603 = vmatprep.subr.bf16.mxu0 %v13853_v7  ;;  %6667 = vmatprep.subr.bf16.mxu1 %v13854_v26  ;;  %v10325_v7 = vpack.c.bf16 %v1858_v62, %v1854_v17  ;;  %v1853_v26 = vld [vmem:[%s13607_s1 + $0x80] sm:$0xff]  ;;  %v1898_v35 = vld [vmem:[%s13607_s1 + $0x1e8] sm:$0xff] }
 0x484   :  { %v1893_v17 = vld [vmem:[%s13607_s1 + $0x1c0] sm:$0xff] }
 0x485   :  { %v1897_v62 = vld [vmem:[%s13607_s1 + $0x1e0] sm:$0xff] }
 0x486   :  { %6605 = vmatpush1.bf16.msra.mxu0 %v13855_v42  ;;  %6669 = vmatpush1.bf16.msra.mxu1 %v13856_v43  ;;  %v1857_v42 = vld [vmem:[%s13607_s1 + $0xa0] sm:$0xff]  ;;  %v1862_v43 = vld [vmem:[%s13607_s1 + $0xc8] sm:$0xff] }
 0x487   :  { %6607 = vmatprep.subr.bf16.mxu0 %v13857_v22  ;;  %6671 = vmatprep.subr.bf16.mxu1 %v13858_v36  ;;  %v1866_v22 = vld [vmem:[%s13607_s1 + $0xe8] sm:$0xff]  ;;  %v10340_v36 = vpack.c.bf16 %v1857_v42, %v1853_v26  ;;  %v10478_v26 = vpack.c.bf16 %v1897_v62, %v1893_v17  ;;  %v1872_v42 = vld [vmem:[%s13607_s1 + $0x118] sm:$0xff] }
 0x488   :  { %v1922_v17 = vld [vmem:[%s13607_s1 + $0x2a8] sm:$0xff] }
 0x48a   :  { %6609 = vmatpush1.bf16.msra.mxu0 %v13859_v34  ;;  %6673 = vmatpush1.bf16.msra.mxu1 %v13860_v55  ;;  %v10343_v34 = vpack.c.bf16 %v1866_v22, %v1862_v43  ;;  %v1861_v55 = vld [vmem:[%s13607_s1 + $0xc0] sm:$0xff]  ;;  %v1876_v43 = vld [vmem:[%s13607_s1 + $0x138] sm:$0xff] }
 0x48b   :  { %6611 = vmatprep.subr.bf16.mxu0 %v13861_v21  ;;  %6675 = vmatprep.subr.bf16.mxu1 %v13862_v2  ;;  %v1865_v21 = vld [vmem:[%s13607_s1 + $0xe0] sm:$0xff]  ;;  %v10487_v22 = vpack.c.bf16 %v1876_v43, %v1872_v42 }
 0x48c   :  { %v10352_v2 = vpack.c.bf16 %v1865_v21, %v1861_v55  ;;  %v1871_v55 = vld [vmem:[%s13607_s1 + $0x110] sm:$0xff]  ;;  %v1917_v42 = vld [vmem:[%s13607_s1 + $0x280] sm:$0xff] }
 0x48d   :  { %v1875_v21 = vld [vmem:[%s13607_s1 + $0x130] sm:$0xff]  ;;  %v1921_v43 = vld [vmem:[%s13607_s1 + $0x2a0] sm:$0xff] }
 0x48e   :  { %6613 = vmatpush1.bf16.msra.mxu0 %v13863_v37  ;;  %6677 = vmatpush1.bf16.msra.mxu1 %v13864_v47  ;;  %v1870_v37 = vld [vmem:[%s13607_s1 + $0x108] sm:$0xff] }
 0x48f   :  { %6679 = vmatprep.subr.bf16.mxu0 %v10257_v45  ;;  %6743 = vmatprep.subr.bf16.mxu1 %v10266_v1  ;;  %v1874_v47 = vld [vmem:[%s13607_s1 + $0x128] sm:$0xff] }
 0x490   :  { %v10362_v15 = vpack.c.bf16 %v1874_v47, %v1870_v37  ;;  %v10496_v37 = vpack.c.bf16 %v1875_v21, %v1871_v55  ;;  %v1902_v47 = vld [vmem:[%s13607_s1 + $0x208] sm:$0xff]  ;;  %v10586_v55 = vpack.c.bf16 %v1921_v43, %v1917_v42  ;;  %v1896_v21 = vld [vmem:[%s13607_s1 + $0x1d8] sm:$0xff] }
 0x491   :  { %v10505_v48 = vpack.c.bf16 %v1906_v46, %v1902_v47  ;;  %v1900_v47 = vld [vmem:[%s13607_s1 + $0x1f8] sm:$0xff]  ;;  %v1938_v42 = vld [vmem:[%s13607_s1 + $0x328] sm:$0xff] }
 0x492   :  { %v10595_v46 = vpack.c.bf16 %v1900_v47, %v1896_v21  ;;  %v1933_v21 = vld [vmem:[%s13607_s1 + $0x300] sm:$0xff] }
 0x493   :  { %v1937_v47 = vld [vmem:[%s13607_s1 + $0x320] sm:$0xff] }
 0x524   :  { %v1437_v8 = vpop.f32.mrb[8].mxu0  ;;  %v1508_v54 = vpop.f32.mrb[8].mxu1 }
 0x525   :  { %v1438_v44 = vadd.f32 %v1437_v8, %v13865_v61  ;;  %v1439_v27 = vpop.f32.mrb[9].mxu0  ;;  %v1510_v38 = vpop.f32.mrb[9].mxu1  ;;  %v1509_v12 = vadd.f32 %v1508_v54, %v8931_v60  ;;  %v1848_v8 = vld [vmem:[%s13607_s1 + $0x58] sm:$0xff] }
 0x526   :  { %v1440_v18 = vadd.f32 %v1439_v27, %v8918_v0  ;;  %v1511_v33 = vadd.f32 %v1510_v38, %v8925_v32  ;;  %v1852_v54 = vld [vmem:[%s13607_s1 + $0x78] sm:$0xff]  ;;  %v1847_v27 = vld [vmem:[%s13607_s1 + $0x50] sm:$0xff] }
 0x527   :  { %v4847_v3 = vmul.f32 -1.442695, %v1438_v44  ;;  %v10379_v44 = vpack.c.bf16 %v1852_v54, %v1848_v8  ;;  %v1851_v38 = vld [vmem:[%s13607_s1 + $0x70] sm:$0xff]  ;;  %v1901_v8 = vld [vmem:[%s13607_s1 + $0x200] sm:$0xff] }
 0x528   :  { %v4848_v31 = vmul.f32 -1.442695, %v1440_v18  ;;  %v4849_v19 = vmul.f32 -1.442695, %v1511_v33  ;;  %v10388_v18 = vpack.c.bf16 %v1851_v38, %v1847_v27  ;;  %v1905_v54 = vld [vmem:[%s13607_s1 + $0x220] sm:$0xff]  ;;  %v1880_v38 = vld [vmem:[%s13607_s1 + $0x158] sm:$0xff] }
 0x529   :  { %8023 = vpow2.f32 %v4847_v3  ;;  %v1878_v3 = vld [vmem:[%s13607_s1 + $0x148] sm:$0xff]  ;;  %v10514_v27 = vpack.c.bf16 %v1905_v54, %v1901_v8  ;;  %v1895_v8 = vld [vmem:[%s13607_s1 + $0x1d0] sm:$0xff] }
 0x52a   :  { %8025 = vpow2.f32 %v4848_v31  ;;  %v1882_v31 = vld [vmem:[%s13607_s1 + $0x168] sm:$0xff]  ;;  %v1899_v54 = vld [vmem:[%s13607_s1 + $0x1f0] sm:$0xff] }
 0x52b   :  { %8027 = vpow2.f32 %v4849_v19  ;;  %v10397_v33 = vpack.c.bf16 %v1882_v31, %v1878_v3  ;;  %v1877_v19 = vld [vmem:[%s13607_s1 + $0x140] sm:$0xff]  ;;  %v1884_v3 = vld [vmem:[%s13607_s1 + $0x178] sm:$0xff] }
 0x52c   :  { %8029 = vtanh.f32 %v1509_v12  ;;  %v1881_v12 = vld [vmem:[%s13607_s1 + $0x160] sm:$0xff]  ;;  %v10523_v31 = vpack.c.bf16 %v1884_v3, %v1880_v38  ;;  %v10604_v38 = vpack.c.bf16 %v1899_v54, %v1895_v8  ;;  %v1926_v3 = vld [vmem:[%s13607_s1 + $0x2c8] sm:$0xff]  ;;  %v10658_v8 = vpack.c.bf16 %v1937_v47, %v1933_v21  ;;  %v1912_v54 = vld [vmem:[%s13607_s1 + $0x258] sm:$0xff] }
 0x52d   :  { %v1920_v21 = vld [vmem:[%s13607_s1 + $0x298] sm:$0xff] }
 0x52e   :  { %13869 = vst [vmem:[#allocation23_spill] sm:$0xff] %v10658_v8 }
 0x533   :  { %v8024_v10 = vpop.eup %8023 }
 0x534   :  { %v8026_v57 = vpop.eup %8025  ;;  %v1516_v53 = vadd.f32 1.0, %v8024_v10  ;;  %v10406_v10 = vpack.c.bf16 %v1881_v12, %v1877_v19  ;;  %v1879_v19 = vld [vmem:[%s13607_s1 + $0x150] sm:$0xff] }
 0x535   :  { %v1522_v9 = vadd.f32 1.0, %v8026_v57  ;;  %v8028_v63 = vpop.eup %8027  ;;  %v1856_v57 = vld [vmem:[%s13607_s1 + $0x98] sm:$0xff]  ;;  %v1883_v12 = vld [vmem:[%s13607_s1 + $0x170] sm:$0xff] }
 0x536   :  { %8031 = vrcp.f32 %v1516_v53  ;;  %v8030_v29 = vpop.eup %8029  ;;  %v1529_v23 = vadd.f32 1.0, %v8028_v63  ;;  %v1860_v53 = vld [vmem:[%s13607_s1 + $0xb8] sm:$0xff]  ;;  %v1855_v63 = vld [vmem:[%s13607_s1 + $0x90] sm:$0xff] }
 0x537   :  { %8033 = vrcp.f32 %v1522_v9  ;;  %v10415_v9 = vpack.c.bf16 %v1860_v53, %v1856_v57  ;;  %v10532_v57 = vpack.c.bf16 %v1883_v12, %v1879_v19  ;;  %v1910_v53 = vld [vmem:[%s13607_s1 + $0x248] sm:$0xff] }
 0x538   :  { %8035 = vrcp.f32 %v1529_v23  ;;  %v1886_v23 = vld [vmem:[%s13607_s1 + $0x188] sm:$0xff] }
 0x539   :  { %v1930_v19 = vld [vmem:[%s13607_s1 + $0x2e8] sm:$0xff] }
 0x53a   :  { %v10613_v12 = vpack.c.bf16 %v1930_v19, %v1926_v3  ;;  %v1916_v3 = vld [vmem:[%s13607_s1 + $0x278] sm:$0xff] }
 0x53b   :  { %v10667_v19 = vpack.c.bf16 %v1916_v3, %v1912_v54  ;;  %v1924_v54 = vld [vmem:[%s13607_s1 + $0x2b8] sm:$0xff]  ;;  %v1919_v3 = vld [vmem:[%s13607_s1 + $0x290] sm:$0xff] }
 0x540   :  { %v8032_v56 = vpop.eup %8031 }
 0x541   :  { %v8034_v28 = vpop.eup %8033  ;;  %v1533_v40 = vmul.f32 %v8032_v56, %v8030_v29  ;;  %v1859_v29 = vld [vmem:[%s13607_s1 + $0xb0] sm:$0xff] }
 0x542   :  { %v1532_v50 = vmul.f32 %v8034_v28, %v10179_v5  ;;  %v8036_v51 = vpop.eup %8035  ;;  %v10424_v56 = vpack.c.bf16 %v1859_v29, %v1855_v63  ;;  %v1890_v28 = vld [vmem:[%s13607_s1 + $0x1a8] sm:$0xff] }
 0x543   :  { %v1914_v63 = vld [vmem:[%s13607_s1 + $0x268] sm:$0xff] }
 0x544   :  { %v10274_v14 = vadd.f32 %v1533_v40, %v1532_v50  ;;  %v10433_v40 = vpack.c.bf16 %v1890_v28, %v1886_v23  ;;  %v1885_v50 = vld [vmem:[%s13607_s1 + $0x180] sm:$0xff]  ;;  %v10541_v29 = vpack.c.bf16 %v1914_v63, %v1910_v53 }
 0x545   :  { %v1909_v23 = vld [vmem:[%s13607_s1 + $0x240] sm:$0xff] }
 0x546   :  { %8037 = vtanh.f32 %v10274_v14  ;;  %v1913_v28 = vld [vmem:[%s13607_s1 + $0x260] sm:$0xff] }
 0x547   :  { %v1925_v53 = vld [vmem:[%s13607_s1 + $0x2c0] sm:$0xff] }
 0x548   :  { %v1929_v63 = vld [vmem:[%s13607_s1 + $0x2e0] sm:$0xff] }
 0x550   :  { %v8038_v58 = vpop.eup %8037 }
 0x551   :  { %v10295_v5 = vmul.f32 %v8038_v58, %v8036_v51  ;;  %v10442_v51 = vpack.c.bf16 %v1889_v20, %v1885_v50  ;;  %v10460_v58 = vpack.c.bf16 %v1867_v25, %v1863_v24  ;;  %v10550_v50 = vpack.c.bf16 %v1913_v28, %v1909_v23  ;;  %v1888_v20 = vld [vmem:[%s13607_s1 + $0x198] sm:$0xff]  ;;  %v1887_v24 = vld [vmem:[%s13607_s1 + $0x190] sm:$0xff] }
 0x552   :  { %v10559_v16 = vpack.c.bf16 %v1892_v49, %v1888_v20  ;;  %v1891_v25 = vld [vmem:[%s13607_s1 + $0x1b0] sm:$0xff]  ;;  %v10622_v23 = vpack.c.bf16 %v1929_v63, %v1925_v53  ;;  %v1904_v28 = vld [vmem:[%s13607_s1 + $0x218] sm:$0xff] }
 0x553   :  { %13866 = vst [vmem:[#allocation16_spill] sm:$0xff] %v10295_v5  ;;  %1732 = vmatprep.mubr.f32.mxu0 %v10295_v5  ;;  %1803 = vmatprep.mubr.f32.mxu1 %v10295_v5  ;;  %v1908_v20 = vld [vmem:[%s13607_s1 + $0x238] sm:$0xff]  ;;  %v1911_v53 = vld [vmem:[%s13607_s1 + $0x250] sm:$0xff] }
 0x554   :  { %1733 = vmatmul.mubr.f32.vlgmr.msra.gmra.mrb[10].mxu0 %v21_v41  ;;  %1804 = vmatmul.mubr.f32.vlgmr.msra.gmra.mrb[10].mxu1 %v21_v41  ;;  %v1894_v41 = vld [vmem:[%s13607_s1 + $0x1c8] sm:$0xff]  ;;  %13867 = vst [vmem:[#allocation13_spill] sm:$0xff] %v10622_v23  ;;  %v10631_v49 = vpack.c.bf16 %v1908_v20, %v1904_v28  ;;  %v1915_v63 = vld [vmem:[%s13607_s1 + $0x270] sm:$0xff] }
 0x555   :  { %6681 = vmatpush1.bf16.msra.mxu0 %v10300_v13  ;;  %6745 = vmatpush1.bf16.msra.mxu1 %v10302_v11  ;;  %v10469_v39 = vpack.c.bf16 %v1898_v35, %v1894_v41  ;;  %v10568_v41 = vpack.c.bf16 %v1891_v25, %v1887_v24  ;;  %v1918_v35 = vld [vmem:[%s13607_s1 + $0x288] sm:$0xff]  ;;  %v1903_v24 = vld [vmem:[%s13607_s1 + $0x210] sm:$0xff]  ;;  %v10676_v28 = vpack.c.bf16 %v1915_v63, %v1911_v53 }
 0x556   :  { %6683 = vmatprep.subr.bf16.mxu0 %v10304_v30  ;;  %6747 = vmatprep.subr.bf16.mxu1 %v10379_v44  ;;  %v10577_v62 = vpack.c.bf16 %v1922_v17, %v1918_v35  ;;  %v1907_v25 = vld [vmem:[%s13607_s1 + $0x230] sm:$0xff]  ;;  %v1934_v17 = vld [vmem:[%s13607_s1 + $0x308] sm:$0xff]  ;;  %v10709_v63 = vpack.c.bf16 %v1924_v54, %v1920_v21  ;;  %v1953_v21 = vld [vmem:[%s13607_s1 + $0x3a0] sm:$0xff] }
 0x557   :  { %v10640_v35 = vpack.c.bf16 %v1907_v25, %v1903_v24  ;;  %v10649_v43 = vpack.c.bf16 %v1938_v42, %v1934_v17  ;;  %v1942_v20 = vld [vmem:[%s13607_s1 + $0x348] sm:$0xff]  ;;  %v1941_v17 = vld [vmem:[%s13607_s1 + $0x340] sm:$0xff]  ;;  %v1923_v53 = vld [vmem:[%s13607_s1 + $0x2b0] sm:$0xff] }
 0x558   :  { %v1946_v24 = vld [vmem:[%s13607_s1 + $0x368] sm:$0xff]  ;;  %v1945_v42 = vld [vmem:[%s13607_s1 + $0x360] sm:$0xff]  ;;  %v1928_v54 = vld [vmem:[%s13607_s1 + $0x2d8] sm:$0xff] }
 0x559   :  { %6685 = vmatpush1.bf16.msra.mxu0 %v10321_v4  ;;  %6749 = vmatpush1.bf16.msra.mxu1 %v10388_v18  ;;  %13868 = vst [vmem:[#allocation10_spill] sm:$0xff] %v10649_v43  ;;  %v10685_v25 = vpack.c.bf16 %v1946_v24, %v1942_v20  ;;  %v10697_v47 = vpack.c.bf16 %v1945_v42, %v1941_v17  ;;  %v1950_v24 = vld [vmem:[%s13607_s1 + $0x388] sm:$0xff]  ;;  %v1949_v42 = vld [vmem:[%s13607_s1 + $0x380] sm:$0xff] }
 0x55a   :  { %6687 = vmatprep.subr.bf16.mxu0 %v10325_v7  ;;  %6751 = vmatprep.subr.bf16.mxu1 %v10415_v9  ;;  %v10711_v20 = vpack.c.bf16 %v1923_v53, %v1919_v3  ;;  %v1954_v17 = vld [vmem:[%s13607_s1 + $0x3a8] sm:$0xff]  ;;  %v1932_v3 = vld [vmem:[%s13607_s1 + $0x2f8] sm:$0xff]  ;;  %v10735_v53 = vpack.c.bf16 %v1953_v21, %v1949_v42 }
 0x55b   :  { %13870 = vst [vmem:[#allocation19_spill] sm:$0xff] %v10685_v25  ;;  %13871 = vst [vmem:[#allocation15_spill] sm:$0xff] %v10697_v47  ;;  %v10723_v5 = vpack.c.bf16 %v1954_v17, %v1950_v24  ;;  %v10737_v6 = vpack.c.bf16 %v1932_v3, %v1928_v54  ;;  %v1927_v24 = vld [vmem:[%s13607_s1 + $0x2d0] sm:$0xff]  ;;  %v1962_v21 = vld [vmem:[%s13607_s1 + $0x3e8] sm:$0xff] }
 0x55c   :  { %13873 = vst [vmem:[#allocation24_spill] sm:$0xff] %v10735_v53  ;;  %v1931_v17 = vld [vmem:[%s13607_s1 + $0x2f0] sm:$0xff]  ;;  %v1957_v54 = vld [vmem:[%s13607_s1 + $0x3c0] sm:$0xff] }
 0x55d   :  { %6689 = vmatpush1.bf16.msra.mxu0 %v10340_v36  ;;  %6753 = vmatpush1.bf16.msra.mxu1 %v10424_v56  ;;  %13872 = vst [vmem:[#allocation11_spill] sm:$0xff] %v10723_v5  ;;  %v10750_v42 = vpack.c.bf16 %v1931_v17, %v1927_v24  ;;  %v1961_v3 = vld [vmem:[%s13607_s1 + $0x3e0] sm:$0xff]  ;;  %v1936_v24 = vld [vmem:[%s13607_s1 + $0x318] sm:$0xff] }
 0x55e   :  { %6691 = vmatprep.subr.bf16.mxu0 %v10343_v34  ;;  %6755 = vmatprep.subr.bf16.mxu1 %v10451_v59  ;;  %v1940_v17 = vld [vmem:[%s13607_s1 + $0x338] sm:$0xff] }
 0x55f   :  { %13874 = vst [vmem:[#allocation20_spill] sm:$0xff] %v10750_v42 }
 0x561   :  { %6693 = vmatpush1.bf16.msra.mxu0 %v10352_v2  ;;  %6757 = vmatpush1.bf16.msra.mxu1 %v10460_v58 }
 0x562   :  { %6695 = vmatprep.subr.bf16.mxu0 %v10362_v15  ;;  %6759 = vmatprep.subr.bf16.mxu1 %v10487_v22 }
 0x565   :  { %6697 = vmatpush1.bf16.msra.mxu0 %v10370_v52  ;;  %6761 = vmatpush1.bf16.msra.mxu1 %v10496_v37 }
 0x566   :  { %6699 = vmatprep.subr.bf16.mxu0 %v10397_v33  ;;  %6763 = vmatprep.subr.bf16.mxu1 %v10523_v31 }
 0x569   :  { %6701 = vmatpush1.bf16.msra.mxu0 %v10406_v10  ;;  %6765 = vmatpush1.bf16.msra.mxu1 %v10532_v57 }
 0x56a   :  { %6703 = vmatprep.subr.bf16.mxu0 %v10433_v40  ;;  %6767 = vmatprep.subr.bf16.mxu1 %v10559_v16 }
 0x56d   :  { %6705 = vmatpush1.bf16.msra.mxu0 %v10442_v51  ;;  %6769 = vmatpush1.bf16.msra.mxu1 %v10568_v41 }
 0x56e   :  { %6707 = vmatprep.subr.bf16.mxu0 %v10469_v39  ;;  %6771 = vmatprep.subr.bf16.mxu1 %v10595_v46 }
 0x571   :  { %6709 = vmatpush1.bf16.msra.mxu0 %v10478_v26  ;;  %6773 = vmatpush1.bf16.msra.mxu1 %v10604_v38 }
 0x572   :  { %6711 = vmatprep.subr.bf16.mxu0 %v10505_v48  ;;  %6775 = vmatprep.subr.bf16.mxu1 %v10631_v49 }
 0x575   :  { %6713 = vmatpush1.bf16.msra.mxu0 %v10514_v27  ;;  %6777 = vmatpush1.bf16.msra.mxu1 %v10640_v35 }
 0x576   :  { %6715 = vmatprep.subr.bf16.mxu0 %v10541_v29  ;;  %6779 = vmatprep.subr.bf16.mxu1 %v10667_v19 }
 0x579   :  { %6717 = vmatpush1.bf16.msra.mxu0 %v10550_v50  ;;  %6781 = vmatpush1.bf16.msra.mxu1 %v10676_v28 }
 0x57a   :  { %6719 = vmatprep.subr.bf16.mxu0 %v10577_v62  ;;  %6783 = vmatprep.subr.bf16.mxu1 %v10709_v63 }
 0x57d   :  { %6721 = vmatpush1.bf16.msra.mxu0 %v10586_v55  ;;  %6785 = vmatpush1.bf16.msra.mxu1 %v10711_v20 }
 0x57e   :  { %6723 = vmatprep.subr.bf16.mxu0 %v10613_v12  ;;  %6787 = vmatprep.subr.bf16.mxu1 %v10737_v6 }
 0x581   :  { %6725 = vmatpush1.bf16.msra.mxu0 %v10622_v23  ;;  %6789 = vmatpush1.bf16.msra.mxu1 %v10750_v42 }
 0x582   :  { %6727 = vmatprep.subr.bf16.mxu0 %v10649_v43 }
 0x585   :  { %6729 = vmatpush1.bf16.msra.mxu0 %v10658_v8  ;;  %v10773_v8 = vpack.c.bf16 %v1940_v17, %v1936_v24  ;;  %v1948_v24 = vld [vmem:[%s13607_s1 + $0x378] sm:$0xff] }
 0x586   :  { %6731 = vmatprep.subr.bf16.mxu0 %v10685_v25 }
 0x587   :  { %13877 = vst [vmem:[#allocation25_spill] sm:$0xff] %v10773_v8  ;;  %6791 = vmatprep.subr.bf16.mxu1 %v10773_v8 }
 0x589   :  { %6733 = vmatpush1.bf16.msra.mxu0 %v10697_v47  ;;  %v1958_v47 = vld [vmem:[%s13607_s1 + $0x3c8] sm:$0xff] }
 0x58a   :  { %6735 = vmatprep.subr.bf16.mxu0 %v10723_v5  ;;  %v10762_v25 = vpack.c.bf16 %v1962_v21, %v1958_v47  ;;  %v10771_v5 = vpack.c.bf16 %v1961_v3, %v1957_v54  ;;  %v1935_v47 = vld [vmem:[%s13607_s1 + $0x310] sm:$0xff]  ;;  %v1944_v3 = vld [vmem:[%s13607_s1 + $0x358] sm:$0xff] }
 0x58b   :  { %v1939_v21 = vld [vmem:[%s13607_s1 + $0x330] sm:$0xff]  ;;  %v10795_v17 = vpack.c.bf16 %v1948_v24, %v1944_v3 }
 0x58c   :  { %13875 = vst [vmem:[#allocation17_spill] sm:$0xff] %v10762_v25  ;;  %13876 = vst [vmem:[#allocation12_spill] sm:$0xff] %v10771_v5  ;;  %v10785_v54 = vpack.c.bf16 %v1939_v21, %v1935_v47  ;;  %v1952_v47 = vld [vmem:[%s13607_s1 + $0x398] sm:$0xff]  ;;  %v1951_v3 = vld [vmem:[%s13607_s1 + $0x390] sm:$0xff] }
 0x58d   :  { %6737 = vmatpush1.bf16.msra.mxu0 %v10735_v53  ;;  %13879 = vst [vmem:[#allocation18_spill] sm:$0xff] %v10795_v17  ;;  %v1955_v24 = vld [vmem:[%s13607_s1 + $0x3b0] sm:$0xff] }
 0x58e   :  { %6739 = vmatprep.subr.bf16.mxu0 %v10762_v25  ;;  %13878 = vst [vmem:[#allocation21_spill] sm:$0xff] %v10785_v54  ;;  %6793 = vmatpush1.bf16.msra.mxu1 %v10785_v54  ;;  %v1956_v25 = vld [vmem:[%s13607_s1 + $0x3b8] sm:$0xff]  ;;  %v10827_v54 = vpack.c.bf16 %v1955_v24, %v1951_v3 }
 0x58f   :  { %6795 = vmatprep.subr.bf16.mxu1 %v10795_v17  ;;  %v10818_v53 = vpack.c.bf16 %v1956_v25, %v1952_v47  ;;  %v1959_v25 = vld [vmem:[%s13607_s1 + $0x3d0] sm:$0xff] }
 0x590   :  { %13882 = vst [vmem:[#allocation14_spill] sm:$0xff] %v10827_v54  ;;  %v1963_v47 = vld [vmem:[%s13607_s1 + $0x3f0] sm:$0xff] }
 0x591   :  { %6741 = vmatpush1.bf16.msra.mxu0 %v10771_v5  ;;  %v1943_v5 = vld [vmem:[%s13607_s1 + $0x350] sm:$0xff]  ;;  %13881 = vst [vmem:[#allocation26_spill] sm:$0xff] %v10818_v53  ;;  %v10839_v17 = vpack.c.bf16 %v1963_v47, %v1959_v25 }
 0x592   :  { %6807 = vmatprep.subr.bf16.mxu0 %v10257_v45  ;;  %v1947_v45 = vld [vmem:[%s13607_s1 + $0x370] sm:$0xff] }
 0x593   :  { %v10806_v21 = vpack.c.bf16 %v1947_v45, %v1943_v5  ;;  %v1960_v5 = vld [vmem:[%s13607_s1 + $0x3d8] sm:$0xff]  ;;  %13884 = vst [vmem:[#allocation30_spill] sm:$0xff] %v10839_v17 }
 0x594   :  { %v1964_v45 = vld [vmem:[%s13607_s1 + $0x3f8] sm:$0xff] }
 0x595   :  { %13880 = vst [vmem:[#allocation22_spill] sm:$0xff] %v10806_v21  ;;  %6797 = vmatpush1.bf16.msra.mxu1 %v10806_v21  ;;  %v10830_v8 = vpack.c.bf16 %v1964_v45, %v1960_v5 }
 0x596   :  { %6799 = vmatprep.subr.bf16.mxu1 %v10818_v53 }
 0x597   :  { %13883 = vst [vmem:[#allocation28_spill] sm:$0xff] %v10830_v8 }
 0x599   :  { %6801 = vmatpush1.bf16.msra.mxu1 %v10827_v54 }
 0x59a   :  { %6803 = vmatprep.subr.bf16.mxu1 %v10830_v8 }
 0x59d   :  { %6805 = vmatpush1.bf16.msra.mxu1 %v10839_v17 }
 0x59e   :  { %6871 = vmatprep.subr.bf16.mxu1 %v10266_v1 }
 0x627   :  { %v1734_v3 = vpop.f32.mrb[10].mxu0  ;;  %v1805_v24 = vpop.f32.mrb[10].mxu1 }
 0x628   :  { %v1735_v5 = vadd.f32 %v1734_v3, %v13865_v61  ;;  %v1736_v45 = vpop.f32.mrb[11].mxu0  ;;  %v1807_v53 = vpop.f32.mrb[11].mxu1  ;;  %v1806_v8 = vadd.f32 %v1805_v24, %v8931_v60 }
 0x629   :  { %v1737_v21 = vadd.f32 %v1736_v45, %v8918_v0  ;;  %v1808_v25 = vadd.f32 %v1807_v53, %v8925_v32 }
 0x62a   :  { %v4850_v43 = vmul.f32 -1.442695, %v1735_v5 }
 0x62b   :  { %v4851_v42 = vmul.f32 -1.442695, %v1737_v21  ;;  %v4852_v47 = vmul.f32 -1.442695, %v1808_v25 }
 0x62c   :  { %8039 = vpow2.f32 %v4850_v43 }
 0x62d   :  { %8041 = vpow2.f32 %v4851_v42 }
 0x62e   :  { %8043 = vpow2.f32 %v4852_v47  ;;  %v4860_v47 = vld [vmem:[%s13607_s1 + $0x400] sm:$0xff] }
 0x62f   :  { %8045 = vtanh.f32 %v1806_v8 }
 0x636   :  { %v8040_v17 = vpop.eup %8039 }
 0x637   :  { %v8042_v1 = vpop.eup %8041  ;;  %v1813_v54 = vadd.f32 1.0, %v8040_v17 }
 0x638   :  { %v1819_v23 = vadd.f32 1.0, %v8042_v1  ;;  %v8044_v3 = vpop.eup %8043  ;;  %v4864_v1 = vld [vmem:[%s13607_s1 + $0x420] sm:$0xff] }
 0x639   :  { %8047 = vrcp.f32 %v1813_v54  ;;  %v8046_v61 = vpop.eup %8045  ;;  %v1826_v5 = vadd.f32 1.0, %v8044_v3 }
 0x63a   :  { %8049 = vrcp.f32 %v1819_v23  ;;  %v22_v23 = vld [vmem:[%s13608_s0 + $0x30] sm:$0xff] }
 0x63b   :  { %8051 = vrcp.f32 %v1826_v5  ;;  %v4866_v5 = vld [vmem:[%s13607_s1 + $0x430] sm:$0xff] }
 0x643   :  { %v8048_v45 = vpop.eup %8047 }
 0x644   :  { %v8050_v21 = vpop.eup %8049  ;;  %v1830_v43 = vmul.f32 %v8048_v45, %v8046_v61  ;;  %v13886_v61 = vld [vmem:[#allocation13_spill] sm:$0xff] }
 0x645   :  { %v1829_v42 = vmul.f32 %v8050_v21, %v10274_v14  ;;  %v8052_v24 = vpop.eup %8051  ;;  %v13887_v14 = vld [vmem:[#allocation20_spill] sm:$0xff]  ;;  %v4862_v45 = vld [vmem:[%s13607_s1 + $0x410] sm:$0xff] }
 0x646   :  { %v4869_v21 = vld [vmem:[%s13607_s1 + $0x448] sm:$0xff] }
 0x647   :  { %v10849_v53 = vadd.f32 %v1830_v43, %v1829_v42  ;;  %v4873_v43 = vld [vmem:[%s13607_s1 + $0x468] sm:$0xff]  ;;  %v4871_v42 = vld [vmem:[%s13607_s1 + $0x458] sm:$0xff] }
 0x649   :  { %8053 = vtanh.f32 %v10849_v53 }
 0x653   :  { %v8054_v25 = vpop.eup %8053 }
 0x654   :  { %v10852_v17 = vmul.f32 %v8054_v25, %v8052_v24 }
 0x656   :  { %13885 = vst [vmem:[#allocation31_spill] sm:$0xff] %v10852_v17  ;;  %2029 = vmatprep.mubr.f32.mxu0 %v10852_v17  ;;  %2100 = vmatprep.mubr.f32.mxu1 %v10852_v17 }
 0x657   :  { %2030 = vmatmul.mubr.f32.vlgmr.msra.gmra.mrb[12].mxu0 %v22_v23  ;;  %2101 = vmatmul.mubr.f32.vlgmr.msra.gmra.mrb[12].mxu1 %v22_v23  ;;  %v23_v23 = vld [vmem:[%s13608_s0 + $0x38] sm:$0xff] }
 0x658   :  { %6809 = vmatpush1.bf16.msra.mxu0 %v10300_v13  ;;  %6873 = vmatpush1.bf16.msra.mxu1 %v10302_v11  ;;  %v13888_v13 = vld [vmem:[#allocation10_spill] sm:$0xff]  ;;  %v13889_v11 = vld [vmem:[#allocation25_spill] sm:$0xff] }
 0x659   :  { %6811 = vmatprep.subr.bf16.mxu0 %v10304_v30  ;;  %6875 = vmatprep.subr.bf16.mxu1 %v10379_v44  ;;  %v13890_v30 = vld [vmem:[#allocation23_spill] sm:$0xff]  ;;  %v13899_v44 = vld [vmem:[#allocation14_spill] sm:$0xff] }
 0x65c   :  { %6813 = vmatpush1.bf16.msra.mxu0 %v10321_v4  ;;  %6877 = vmatpush1.bf16.msra.mxu1 %v10388_v18  ;;  %v13891_v4 = vld [vmem:[#allocation21_spill] sm:$0xff] }
 0x65d   :  { %6815 = vmatprep.subr.bf16.mxu0 %v10325_v7  ;;  %6879 = vmatprep.subr.bf16.mxu1 %v10415_v9  ;;  %v13892_v7 = vld [vmem:[#allocation19_spill] sm:$0xff]  ;;  %v13900_v18 = vld [vmem:[#allocation17_spill] sm:$0xff]  ;;  %v13903_v9 = vld [vmem:[#allocation30_spill] sm:$0xff] }
 0x660   :  { %6817 = vmatpush1.bf16.msra.mxu0 %v10340_v36  ;;  %6881 = vmatpush1.bf16.msra.mxu1 %v10424_v56  ;;  %v13893_v36 = vld [vmem:[#allocation18_spill] sm:$0xff]  ;;  %v4861_v56 = vld [vmem:[%s13607_s1 + $0x408] sm:$0xff] }
 0x661   :  { %6819 = vmatprep.subr.bf16.mxu0 %v10343_v34  ;;  %6883 = vmatprep.subr.bf16.mxu1 %v10451_v59  ;;  %v13894_v34 = vld [vmem:[#allocation15_spill] sm:$0xff] }
 0x664   :  { %6821 = vmatpush1.bf16.msra.mxu0 %v10352_v2  ;;  %6885 = vmatpush1.bf16.msra.mxu1 %v10460_v58  ;;  %v13895_v2 = vld [vmem:[#allocation22_spill] sm:$0xff] }
 0x665   :  { %6823 = vmatprep.subr.bf16.mxu0 %v10362_v15  ;;  %6887 = vmatprep.subr.bf16.mxu1 %v10487_v22  ;;  %v13897_v15 = vld [vmem:[#allocation26_spill] sm:$0xff] }
 0x666   :  { %v4867_v58 = vld [vmem:[%s13607_s1 + $0x438] sm:$0xff] }
 0x668   :  { %6825 = vmatpush1.bf16.msra.mxu0 %v10370_v52  ;;  %6889 = vmatpush1.bf16.msra.mxu1 %v10496_v37  ;;  %v13898_v52 = vld [vmem:[#allocation24_spill] sm:$0xff] }
 0x669   :  { %6827 = vmatprep.subr.bf16.mxu0 %v10397_v33  ;;  %6891 = vmatprep.subr.bf16.mxu1 %v10523_v31  ;;  %v13901_v33 = vld [vmem:[#allocation28_spill] sm:$0xff] }
 0x66a   :  { %v13904_v37 = vld [vmem:[#allocation4_spill] sm:$0xff] }
 0x66c   :  { %6829 = vmatpush1.bf16.msra.mxu0 %v10406_v10  ;;  %6893 = vmatpush1.bf16.msra.mxu1 %v10532_v57  ;;  %v13902_v10 = vld [vmem:[#allocation12_spill] sm:$0xff] }
 0x66d   :  { %6831 = vmatprep.subr.bf16.mxu0 %v10433_v40  ;;  %6895 = vmatprep.subr.bf16.mxu1 %v10559_v16  ;;  %v4865_v40 = vld [vmem:[%s13607_s1 + $0x428] sm:$0xff] }
 0x66e   :  { %v10930_v59 = vpack.c.bf16 %v4865_v40, %v4861_v56  ;;  %v4878_v56 = vld [vmem:[%s13607_s1 + $0x490] sm:$0xff] }
 0x66f   :  { %v4882_v40 = vld [vmem:[%s13607_s1 + $0x4b0] sm:$0xff] }
 0x670   :  { %6833 = vmatpush1.bf16.msra.mxu0 %v10442_v51  ;;  %6897 = vmatpush1.bf16.msra.mxu1 %v10568_v41  ;;  %v4863_v51 = vld [vmem:[%s13607_s1 + $0x418] sm:$0xff] }
 0x671   :  { %6835 = vmatprep.subr.bf16.mxu0 %v10469_v39  ;;  %6899 = vmatprep.subr.bf16.mxu1 %v10595_v46  ;;  %v10935_v39 = vpack.c.bf16 %v4867_v58, %v4863_v51  ;;  %v4885_v51 = vld [vmem:[%s13607_s1 + $0x4c8] sm:$0xff] }
 0x672   :  { %v4889_v58 = vld [vmem:[%s13607_s1 + $0x4e8] sm:$0xff] }
 0x674   :  { %6837 = vmatpush1.bf16.msra.mxu0 %v10478_v26  ;;  %6901 = vmatpush1.bf16.msra.mxu1 %v10604_v38 }
 0x675   :  { %6839 = vmatprep.subr.bf16.mxu0 %v10505_v48  ;;  %6903 = vmatprep.subr.bf16.mxu1 %v10631_v49 }
 0x678   :  { %6841 = vmatpush1.bf16.msra.mxu0 %v10514_v27  ;;  %6905 = vmatpush1.bf16.msra.mxu1 %v10640_v35 }
 0x679   :  { %6843 = vmatprep.subr.bf16.mxu0 %v10541_v29  ;;  %6907 = vmatprep.subr.bf16.mxu1 %v10667_v19 }
 0x67c   :  { %6845 = vmatpush1.bf16.msra.mxu0 %v10550_v50  ;;  %6909 = vmatpush1.bf16.msra.mxu1 %v10676_v28 }
 0x67d   :  { %6847 = vmatprep.subr.bf16.mxu0 %v10577_v62  ;;  %6911 = vmatprep.subr.bf16.mxu1 %v10709_v63 }
 0x680   :  { %6849 = vmatpush1.bf16.msra.mxu0 %v10586_v55  ;;  %6913 = vmatpush1.bf16.msra.mxu1 %v10711_v20 }
 0x681   :  { %6851 = vmatprep.subr.bf16.mxu0 %v10613_v12  ;;  %6915 = vmatprep.subr.bf16.mxu1 %v10737_v6  ;;  %v13896_v6 = vld [vmem:[#allocation11_spill] sm:$0xff] }
 0x684   :  { %6853 = vmatpush1.bf16.msra.mxu0 %v13886_v61  ;;  %6917 = vmatpush1.bf16.msra.mxu1 %v13887_v14  ;;  %v10976_v61 = vpack.c.bf16 %v4864_v1, %v4860_v47  ;;  %v10978_v14 = vpack.c.bf16 %v4866_v5, %v4862_v45  ;;  %v4898_v47 = vld [vmem:[%s13607_s1 + $0x530] sm:$0xff]  ;;  %v4901_v1 = vld [vmem:[%s13607_s1 + $0x548] sm:$0xff]  ;;  %v4903_v45 = vld [vmem:[%s13607_s1 + $0x558] sm:$0xff] }
 0x685   :  { %6855 = vmatprep.subr.bf16.mxu0 %v13888_v13  ;;  %6919 = vmatprep.subr.bf16.mxu1 %v13889_v11  ;;  %v4868_v13 = vld [vmem:[%s13607_s1 + $0x440] sm:$0xff]  ;;  %v4907_v5 = vld [vmem:[%s13607_s1 + $0x578] sm:$0xff] }
 0x686   :  { %v4872_v11 = vld [vmem:[%s13607_s1 + $0x460] sm:$0xff] }
 0x688   :  { %6857 = vmatpush1.bf16.msra.mxu0 %v13890_v30  ;;  %6921 = vmatpush1.bf16.msra.mxu1 %v13891_v4  ;;  %v10986_v30 = vpack.c.bf16 %v4873_v43, %v4869_v21 }
 0x689   :  { %6859 = vmatprep.subr.bf16.mxu0 %v13892_v7  ;;  %6923 = vmatprep.subr.bf16.mxu1 %v13893_v36  ;;  %v4870_v7 = vld [vmem:[%s13607_s1 + $0x450] sm:$0xff] }
 0x68a   :  { %v4874_v36 = vld [vmem:[%s13607_s1 + $0x470] sm:$0xff] }
 0x68c   :  { %6861 = vmatpush1.bf16.msra.mxu0 %v13894_v34  ;;  %6925 = vmatpush1.bf16.msra.mxu1 %v13895_v2  ;;  %v4877_v34 = vld [vmem:[%s13607_s1 + $0x488] sm:$0xff] }
 0x68d   :  { %6863 = vmatprep.subr.bf16.mxu0 %v13896_v6  ;;  %6927 = vmatprep.subr.bf16.mxu1 %v13897_v15  ;;  %v4881_v2 = vld [vmem:[%s13607_s1 + $0x4a8] sm:$0xff]  ;;  %v4879_v6 = vld [vmem:[%s13607_s1 + $0x498] sm:$0xff] }
 0x68e   :  { %v4883_v15 = vld [vmem:[%s13607_s1 + $0x4b8] sm:$0xff] }
 0x690   :  { %6865 = vmatpush1.bf16.msra.mxu0 %v13898_v52  ;;  %6929 = vmatpush1.bf16.msra.mxu1 %v13899_v44  ;;  %v11012_v52 = vpack.c.bf16 %v4872_v11, %v4868_v13  ;;  %v11014_v44 = vpack.c.bf16 %v4874_v36, %v4870_v7  ;;  %v4902_v13 = vld [vmem:[%s13607_s1 + $0x550] sm:$0xff]  ;;  %v4909_v7 = vld [vmem:[%s13607_s1 + $0x588] sm:$0xff] }
 0x691   :  { %6867 = vmatprep.subr.bf16.mxu0 %v13900_v18  ;;  %6931 = vmatprep.subr.bf16.mxu1 %v13901_v33  ;;  %v4876_v18 = vld [vmem:[%s13607_s1 + $0x480] sm:$0xff]  ;;  %v4906_v11 = vld [vmem:[%s13607_s1 + $0x570] sm:$0xff]  ;;  %v4913_v36 = vld [vmem:[%s13607_s1 + $0x5a8] sm:$0xff] }
 0x692   :  { %v4880_v33 = vld [vmem:[%s13607_s1 + $0x4a0] sm:$0xff] }
 0x694   :  { %6869 = vmatpush1.bf16.msra.mxu0 %v13902_v10  ;;  %6933 = vmatpush1.bf16.msra.mxu1 %v13903_v9  ;;  %v11024_v10 = vpack.c.bf16 %v4881_v2, %v4877_v34  ;;  %v11026_v9 = vpack.c.bf16 %v4883_v15, %v4879_v6  ;;  %v4911_v34 = vld [vmem:[%s13607_s1 + $0x598] sm:$0xff]  ;;  %v11160_v15 = vpack.c.bf16 %v4906_v11, %v4902_v13  ;;  %v4926_v11 = vld [vmem:[%s13607_s1 + $0x610] sm:$0xff] }
 0x695   :  { %6935 = vmatprep.subr.bf16.mxu0 %v10930_v59  ;;  %6999 = vmatprep.subr.bf16.mxu1 %v10935_v39  ;;  %v4915_v2 = vld [vmem:[%s13607_s1 + $0x5b8] sm:$0xff] }
 0x72a   :  { %v2031_v26 = vpop.f32.mrb[12].mxu0  ;;  %v2102_v22 = vpop.f32.mrb[12].mxu1 }
 0x72b   :  { %v2032_v48 = vadd.f32 %v2031_v26, %v13904_v37  ;;  %v2033_v27 = vpop.f32.mrb[13].mxu0  ;;  %v2104_v31 = vpop.f32.mrb[13].mxu1  ;;  %v2103_v62 = vadd.f32 %v2102_v22, %v8931_v60  ;;  %v4887_v26 = vld [vmem:[%s13607_s1 + $0x4d8] sm:$0xff]  ;;  %v4964_v60 = vld [vmem:[%s13607_s1 + $0x740] sm:$0xff] }
 0x72c   :  { %v2034_v57 = vadd.f32 %v2033_v27, %v8918_v0  ;;  %v2105_v16 = vadd.f32 %v2104_v31, %v8925_v32  ;;  %v4891_v22 = vld [vmem:[%s13607_s1 + $0x4f8] sm:$0xff]  ;;  %v11050_v27 = vpack.c.bf16 %v4880_v33, %v4876_v18  ;;  %v11052_v31 = vpack.c.bf16 %v4882_v40, %v4878_v56  ;;  %v4908_v18 = vld [vmem:[%s13607_s1 + $0x580] sm:$0xff] }
 0x72d   :  { %v4853_v29 = vmul.f32 -1.442695, %v2032_v48  ;;  %v13907_v48 = vmov 0.0   ;;  %v4912_v33 = vld [vmem:[%s13607_s1 + $0x5a0] sm:$0xff]  ;;  %v11170_v56 = vpack.c.bf16 %v4913_v36, %v4909_v7  ;;  %v11172_v40 = vpack.c.bf16 %v4915_v2, %v4911_v34  ;;  %v4930_v7 = vld [vmem:[%s13607_s1 + $0x630] sm:$0xff]  ;;  %v4933_v36 = vld [vmem:[%s13607_s1 + $0x648] sm:$0xff] }
 0x72e   :  { %v4854_v50 = vmul.f32 -1.442695, %v2034_v57  ;;  %v4855_v41 = vmul.f32 -1.442695, %v2105_v16  ;;  %v4884_v57 = vld [vmem:[%s13607_s1 + $0x4c0] sm:$0xff]  ;;  %v11064_v16 = vpack.c.bf16 %v4891_v22, %v4887_v26  ;;  %v4917_v26 = vld [vmem:[%s13607_s1 + $0x5c8] sm:$0xff] }
 0x72f   :  { %8055 = vpow2.f32 %v4853_v29  ;;  %v4888_v29 = vld [vmem:[%s13607_s1 + $0x4e0] sm:$0xff]  ;;  %v4921_v22 = vld [vmem:[%s13607_s1 + $0x5e8] sm:$0xff]  ;;  %v4935_v2 = vld [vmem:[%s13607_s1 + $0x658] sm:$0xff] }
 0x730   :  { %8057 = vpow2.f32 %v4854_v50  ;;  %v11062_v50 = vpack.c.bf16 %v4889_v58, %v4885_v51  ;;  %v4910_v51 = vld [vmem:[%s13607_s1 + $0x590] sm:$0xff]  ;;  %v4937_v34 = vld [vmem:[%s13607_s1 + $0x668] sm:$0xff]  ;;  %v4968_v32 = vld [vmem:[%s13607_s1 + $0x760] sm:$0xff] }
 0x731   :  { %8059 = vpow2.f32 %v4855_v41  ;;  %v4886_v41 = vld [vmem:[%s13607_s1 + $0x4d0] sm:$0xff] }
 0x732   :  { %8061 = vtanh.f32 %v2103_v62  ;;  %v4890_v62 = vld [vmem:[%s13607_s1 + $0x4f0] sm:$0xff] }
 0x733   :  { %v4914_v58 = vld [vmem:[%s13607_s1 + $0x5b0] sm:$0xff] }
 0x739   :  { %v8056_v55 = vpop.eup %8055 }
 0x73a   :  { %v8058_v46 = vpop.eup %8057  ;;  %v2110_v38 = vadd.f32 1.0, %v8056_v55  ;;  %v4893_v55 = vld [vmem:[%s13607_s1 + $0x508] sm:$0xff] }
 0x73b   :  { %v2116_v12 = vadd.f32 1.0, %v8058_v46  ;;  %v8060_v49 = vpop.eup %8059  ;;  %v4897_v46 = vld [vmem:[%s13607_s1 + $0x528] sm:$0xff] }
 0x73c   :  { %8063 = vrcp.f32 %v2110_v38  ;;  %v8062_v35 = vpop.eup %8061  ;;  %v2123_v19 = vadd.f32 1.0, %v8060_v49  ;;  %v4895_v38 = vld [vmem:[%s13607_s1 + $0x518] sm:$0xff]  ;;  %v11086_v49 = vpack.c.bf16 %v4888_v29, %v4884_v57  ;;  %v11194_v29 = vpack.c.bf16 %v4912_v33, %v4908_v18 }
 0x73d   :  { %8065 = vrcp.f32 %v2116_v12  ;;  %v4899_v12 = vld [vmem:[%s13607_s1 + $0x538] sm:$0xff] }
 0x73e   :  { %8067 = vrcp.f32 %v2123_v19  ;;  %v4896_v19 = vld [vmem:[%s13607_s1 + $0x520] sm:$0xff]  ;;  %v4923_v57 = vld [vmem:[%s13607_s1 + $0x5f8] sm:$0xff] }
 0x73f   :  { %v4939_v18 = vld [vmem:[%s13607_s1 + $0x678] sm:$0xff] }
 0x746   :  { %v8064_v8 = vpop.eup %8063 }
 0x747   :  { %v8066_v28 = vpop.eup %8065  ;;  %v2127_v63 = vmul.f32 %v8064_v8, %v8062_v35  ;;  %v11088_v35 = vpack.c.bf16 %v4890_v62, %v4886_v41  ;;  %v4892_v8 = vld [vmem:[%s13607_s1 + $0x500] sm:$0xff]  ;;  %v11196_v41 = vpack.c.bf16 %v4914_v58, %v4910_v51  ;;  %v11268_v51 = vpack.c.bf16 %v4930_v7, %v4926_v11  ;;  %v4942_v7 = vld [vmem:[%s13607_s1 + $0x690] sm:$0xff] }
 0x748   :  { %v2126_v20 = vmul.f32 %v8066_v28, %v10849_v53  ;;  %v8068_v3 = vpop.eup %8067  ;;  %v4875_v53 = vld [vmem:[%s13607_s1 + $0x478] sm:$0xff]  ;;  %v11098_v28 = vpack.c.bf16 %v4897_v46, %v4893_v55  ;;  %v11122_v21 = vpack.c.bf16 %v4896_v19, %v4892_v8  ;;  %v4916_v62 = vld [vmem:[%s13607_s1 + $0x5c0] sm:$0xff]  ;;  %v11206_v46 = vpack.c.bf16 %v4921_v22, %v4917_v26  ;;  %v4922_v8 = vld [vmem:[%s13607_s1 + $0x5f0] sm:$0xff] }
 0x749   :  { %v10988_v4 = vpack.c.bf16 %v4875_v53, %v4871_v42  ;;  %v4900_v42 = vld [vmem:[%s13607_s1 + $0x540] sm:$0xff]  ;;  %v4925_v19 = vld [vmem:[%s13607_s1 + $0x608] sm:$0xff]  ;;  %v11278_v22 = vpack.c.bf16 %v4937_v34, %v4933_v36  ;;  %v4946_v36 = vld [vmem:[%s13607_s1 + $0x6b0] sm:$0xff] }
 0x74a   :  { %v10944_v54 = vadd.f32 %v2127_v63, %v2126_v20  ;;  %v11100_v63 = vpack.c.bf16 %v4899_v12, %v4895_v38  ;;  %v4894_v20 = vld [vmem:[%s13607_s1 + $0x510] sm:$0xff]  ;;  %v4904_v53 = vld [vmem:[%s13607_s1 + $0x560] sm:$0xff]  ;;  %v4949_v34 = vld [vmem:[%s13607_s1 + $0x6c8] sm:$0xff] }
 0x74b   :  { %v11124_v43 = vpack.c.bf16 %v4898_v47, %v4894_v20  ;;  %v11158_v6 = vpack.c.bf16 %v4904_v53, %v4900_v42  ;;  %v4920_v55 = vld [vmem:[%s13607_s1 + $0x5e0] sm:$0xff]  ;;  %v4918_v12 = vld [vmem:[%s13607_s1 + $0x5d0] sm:$0xff]  ;;  %v4929_v20 = vld [vmem:[%s13607_s1 + $0x628] sm:$0xff] }
 0x74c   :  { %13905 = vst [vmem:[#allocation13_spill] sm:$0xff] %v10944_v54  ;;  %8069 = vtanh.f32 %v10944_v54  ;;  %v4927_v47 = vld [vmem:[%s13607_s1 + $0x618] sm:$0xff]  ;;  %v4928_v42 = vld [vmem:[%s13607_s1 + $0x620] sm:$0xff]  ;;  %v11242_v53 = vpack.c.bf16 %v4929_v20, %v4925_v19 }
 0x74d   :  { %v4932_v58 = vld [vmem:[%s13607_s1 + $0x640] sm:$0xff]  ;;  %v4947_v19 = vld [vmem:[%s13607_s1 + $0x6b8] sm:$0xff] }
 0x74e   :  { %v4936_v26 = vld [vmem:[%s13607_s1 + $0x660] sm:$0xff] }
 0x74f   :  { %v11302_v20 = vpack.c.bf16 %v4936_v26, %v4932_v58  ;;  %v4955_v58 = vld [vmem:[%s13607_s1 + $0x6f8] sm:$0xff] }
 0x756   :  { %v8070_v24 = vpop.eup %8069 }
 0x757   :  { %v10971_v25 = vmul.f32 %v8070_v24, %v8068_v3  ;;  %v4905_v3 = vld [vmem:[%s13607_s1 + $0x568] sm:$0xff] }
 0x758   :  { %v11134_v24 = vpack.c.bf16 %v4905_v3, %v4901_v1  ;;  %v4931_v1 = vld [vmem:[%s13607_s1 + $0x638] sm:$0xff]  ;;  %v11230_v3 = vpack.c.bf16 %v4920_v55, %v4916_v62  ;;  %v4938_v62 = vld [vmem:[%s13607_s1 + $0x670] sm:$0xff]  ;;  %v4941_v55 = vld [vmem:[%s13607_s1 + $0x688] sm:$0xff] }
 0x759   :  { %13906 = vst [vmem:[#allocation20_spill] sm:$0xff] %v10971_v25  ;;  %2326 = vmatprep.mubr.f32.mxu0 %v10971_v25  ;;  %2397 = vmatprep.mubr.f32.mxu1 %v10971_v25  ;;  %v11244_v13 = vpack.c.bf16 %v4931_v1, %v4927_v47  ;;  %v4940_v1 = vld [vmem:[%s13607_s1 + $0x680] sm:$0xff] }
 0x75a   :  { %2327 = vmatmul.mubr.f32.vlgmr.msra.gmra.mrb[14].mxu0 %v23_v23  ;;  %2398 = vmatmul.mubr.f32.vlgmr.msra.gmra.mrb[14].mxu1 %v23_v23  ;;  %v11136_v23 = vpack.c.bf16 %v4907_v5, %v4903_v45  ;;  %v11232_v45 = vpack.c.bf16 %v4922_v8, %v4918_v12  ;;  %v4924_v5 = vld [vmem:[%s13607_s1 + $0x600] sm:$0xff]  ;;  %v4945_v12 = vld [vmem:[%s13607_s1 + $0x6a8] sm:$0xff]  ;;  %v4943_v8 = vld [vmem:[%s13607_s1 + $0x698] sm:$0xff] }
 0x75b   :  { %6937 = vmatpush1.bf16.msra.mxu0 %v10976_v61  ;;  %7001 = vmatpush1.bf16.msra.mxu1 %v10978_v14  ;;  %v11266_v33 = vpack.c.bf16 %v4928_v42, %v4924_v5  ;;  %v4944_v5 = vld [vmem:[%s13607_s1 + $0x6a0] sm:$0xff]  ;;  %v11314_v42 = vpack.c.bf16 %v4945_v12, %v4941_v55  ;;  %v11316_v11 = vpack.c.bf16 %v4947_v19, %v4943_v8  ;;  %v4950_v19 = vld [vmem:[%s13607_s1 + $0x6d0] sm:$0xff] }
 0x75c   :  { %6939 = vmatprep.subr.bf16.mxu0 %v10986_v30  ;;  %7003 = vmatprep.subr.bf16.mxu1 %v10988_v4  ;;  %v11338_v26 = vpack.c.bf16 %v4944_v5, %v4940_v1  ;;  %v4952_v55 = vld [vmem:[%s13607_s1 + $0x6e0] sm:$0xff]  ;;  %v4954_v1 = vld [vmem:[%s13607_s1 + $0x6f0] sm:$0xff]  ;;  %v4957_v5 = vld [vmem:[%s13607_s1 + $0x708] sm:$0xff] }
 0x75d   :  { %2648 = vmatprep.mubr.f32.mxu0 %v13907_v48  ;;  %2719 = vmatprep.mubr.f32.mxu1 %v13907_v48  ;;  %v4919_v48 = vld [vmem:[%s13607_s1 + $0x5d8] sm:$0xff]  ;;  %v4960_v25 = vld [vmem:[%s13607_s1 + $0x720] sm:$0xff] }
 0x75e   :  { %v11208_v38 = vpack.c.bf16 %v4923_v57, %v4919_v48  ;;  %v11280_v48 = vpack.c.bf16 %v4939_v18, %v4935_v2  ;;  %v4934_v57 = vld [vmem:[%s13607_s1 + $0x650] sm:$0xff]  ;;  %v4953_v2 = vld [vmem:[%s13607_s1 + $0x6e8] sm:$0xff]  ;;  %v4951_v18 = vld [vmem:[%s13607_s1 + $0x6d8] sm:$0xff] }
 0x75f   :  { %6941 = vmatpush1.bf16.msra.mxu0 %v11012_v52  ;;  %7005 = vmatpush1.bf16.msra.mxu1 %v11014_v44  ;;  %v11304_v47 = vpack.c.bf16 %v4938_v62, %v4934_v57  ;;  %v11340_v57 = vpack.c.bf16 %v4946_v36, %v4942_v7  ;;  %v4948_v62 = vld [vmem:[%s13607_s1 + $0x6c0] sm:$0xff]  ;;  %v11350_v12 = vpack.c.bf16 %v4953_v2, %v4949_v34  ;;  %v4961_v7 = vld [vmem:[%s13607_s1 + $0x728] sm:$0xff]  ;;  %v4959_v36 = vld [vmem:[%s13607_s1 + $0x718] sm:$0xff] }
 0x760   :  { %6943 = vmatprep.subr.bf16.mxu0 %v11024_v10  ;;  %7007 = vmatprep.subr.bf16.mxu1 %v11026_v9  ;;  %v11352_v8 = vpack.c.bf16 %v4955_v58, %v4951_v18  ;;  %v4963_v34 = vld [vmem:[%s13607_s1 + $0x738] sm:$0xff]  ;;  %v11374_v2 = vpack.c.bf16 %v4952_v55, %v4948_v62  ;;  %v11376_v18 = vpack.c.bf16 %v4954_v1, %v4950_v19  ;;  %v4956_v58 = vld [vmem:[%s13607_s1 + $0x700] sm:$0xff]  ;;  %v4958_v62 = vld [vmem:[%s13607_s1 + $0x710] sm:$0xff] }
 0x761   :  { %v11386_v17 = vpack.c.bf16 %v4961_v7, %v4957_v5  ;;  %v11388_v54 = vpack.c.bf16 %v4963_v34, %v4959_v36  ;;  %v4962_v55 = vld [vmem:[%s13607_s1 + $0x730] sm:$0xff]  ;;  %v4965_v19 = vld [vmem:[%s13607_s1 + $0x748] sm:$0xff]  ;;  %v4967_v5 = vld [vmem:[%s13607_s1 + $0x758] sm:$0xff]  ;;  %v11410_v36 = vpack.c.bf16 %v4960_v25, %v4956_v58 }
 0x762   :  { %13908 = vst [vmem:[#allocation10_spill] sm:$0xff] %v11376_v18  ;;  %v4969_v1 = vld [vmem:[%s13607_s1 + $0x768] sm:$0xff]  ;;  %v4971_v7 = vld [vmem:[%s13607_s1 + $0x778] sm:$0xff]  ;;  %v11412_v34 = vpack.c.bf16 %v4962_v55, %v4958_v62  ;;  %v4966_v25 = vld [vmem:[%s13607_s1 + $0x750] sm:$0xff] }
 0x763   :  { %6945 = vmatpush1.bf16.msra.mxu0 %v11050_v27  ;;  %7009 = vmatpush1.bf16.msra.mxu1 %v11052_v31  ;;  %13909 = vst [vmem:[#allocation25_spill] sm:$0xff] %v11386_v17  ;;  %13910 = vst [vmem:[#allocation23_spill] sm:$0xff] %v11388_v54  ;;  %v11422_v0 = vpack.c.bf16 %v4969_v1, %v4965_v19  ;;  %v11424_v37 = vpack.c.bf16 %v4971_v7, %v4967_v5  ;;  %v4970_v58 = vld [vmem:[%s13607_s1 + $0x770] sm:$0xff]  ;;  %v4973_v62 = vld [vmem:[%s13607_s1 + $0x788] sm:$0xff] }
 0x764   :  { %6947 = vmatprep.subr.bf16.mxu0 %v11062_v50  ;;  %7011 = vmatprep.subr.bf16.mxu1 %v11064_v16  ;;  %13911 = vst [vmem:[#allocation21_spill] sm:$0xff] %v11410_v36  ;;  %13912 = vst [vmem:[#allocation19_spill] sm:$0xff] %v11412_v34  ;;  %v4977_v55 = vld [vmem:[%s13607_s1 + $0x7a8] sm:$0xff]  ;;  %v4975_v19 = vld [vmem:[%s13607_s1 + $0x798] sm:$0xff]  ;;  %v11446_v5 = vpack.c.bf16 %v4968_v32, %v4964_v60  ;;  %v11448_v7 = vpack.c.bf16 %v4970_v58, %v4966_v25 }
 0x765   :  { %13913 = vst [vmem:[#allocation18_spill] sm:$0xff] %v11422_v0  ;;  %13914 = vst [vmem:[#allocation15_spill] sm:$0xff] %v11424_v37  ;;  %v4979_v1 = vld [vmem:[%s13607_s1 + $0x7b8] sm:$0xff]  ;;  %v4974_v32 = vld [vmem:[%s13607_s1 + $0x790] sm:$0xff] }
 0x766   :  { %13915 = vst [vmem:[#allocation22_spill] sm:$0xff] %v11448_v7  ;;  %v4978_v60 = vld [vmem:[%s13607_s1 + $0x7b0] sm:$0xff]  ;;  %v4981_v25 = vld [vmem:[%s13607_s1 + $0x7c8] sm:$0xff] }
 0x767   :  { %6949 = vmatpush1.bf16.msra.mxu0 %v11086_v49  ;;  %7013 = vmatpush1.bf16.msra.mxu1 %v11088_v35  ;;  %v4985_v58 = vld [vmem:[%s13607_s1 + $0x7e8] sm:$0xff] }
 0x768   :  { %6951 = vmatprep.subr.bf16.mxu0 %v11098_v28  ;;  %7015 = vmatprep.subr.bf16.mxu1 %v11100_v63 }
 0x76b   :  { %6953 = vmatpush1.bf16.msra.mxu0 %v11122_v21  ;;  %7017 = vmatpush1.bf16.msra.mxu1 %v11124_v43 }
 0x76c   :  { %6955 = vmatprep.subr.bf16.mxu0 %v11134_v24  ;;  %7019 = vmatprep.subr.bf16.mxu1 %v11136_v23 }
 0x76f   :  { %6957 = vmatpush1.bf16.msra.mxu0 %v11158_v6  ;;  %7021 = vmatpush1.bf16.msra.mxu1 %v11160_v15 }
 0x770   :  { %6959 = vmatprep.subr.bf16.mxu0 %v11170_v56  ;;  %7023 = vmatprep.subr.bf16.mxu1 %v11172_v40 }
 0x773   :  { %6961 = vmatpush1.bf16.msra.mxu0 %v11194_v29  ;;  %7025 = vmatpush1.bf16.msra.mxu1 %v11196_v41 }
 0x774   :  { %6963 = vmatprep.subr.bf16.mxu0 %v11206_v46  ;;  %7027 = vmatprep.subr.bf16.mxu1 %v11208_v38 }
 0x777   :  { %6965 = vmatpush1.bf16.msra.mxu0 %v11230_v3  ;;  %7029 = vmatpush1.bf16.msra.mxu1 %v11232_v45 }
 0x778   :  { %6967 = vmatprep.subr.bf16.mxu0 %v11242_v53  ;;  %7031 = vmatprep.subr.bf16.mxu1 %v11244_v13 }
 0x77b   :  { %6969 = vmatpush1.bf16.msra.mxu0 %v11266_v33  ;;  %7033 = vmatpush1.bf16.msra.mxu1 %v11268_v51 }
 0x77c   :  { %6971 = vmatprep.subr.bf16.mxu0 %v11278_v22  ;;  %7035 = vmatprep.subr.bf16.mxu1 %v11280_v48 }
 0x77f   :  { %6973 = vmatpush1.bf16.msra.mxu0 %v11302_v20  ;;  %7037 = vmatpush1.bf16.msra.mxu1 %v11304_v47 }
 0x780   :  { %6975 = vmatprep.subr.bf16.mxu0 %v11314_v42  ;;  %7039 = vmatprep.subr.bf16.mxu1 %v11316_v11 }
 0x783   :  { %6977 = vmatpush1.bf16.msra.mxu0 %v11338_v26  ;;  %7041 = vmatpush1.bf16.msra.mxu1 %v11340_v57 }
 0x784   :  { %6979 = vmatprep.subr.bf16.mxu0 %v11350_v12  ;;  %7043 = vmatprep.subr.bf16.mxu1 %v11352_v8 }
 0x787   :  { %6981 = vmatpush1.bf16.msra.mxu0 %v11374_v2  ;;  %7045 = vmatpush1.bf16.msra.mxu1 %v11376_v18  ;;  %v11458_v18 = vpack.c.bf16 %v4977_v55, %v4973_v62  ;;  %v4983_v62 = vld [vmem:[%s13607_s1 + $0x7d8] sm:$0xff] }
 0x788   :  { %6983 = vmatprep.subr.bf16.mxu0 %v11386_v17  ;;  %7047 = vmatprep.subr.bf16.mxu1 %v11388_v54  ;;  %v4972_v54 = vld [vmem:[%s13607_s1 + $0x780] sm:$0xff]  ;;  %v4987_v55 = vld [vmem:[%s13607_s1 + $0x7f8] sm:$0xff] }
 0x789   :  { %v4976_v17 = vld [vmem:[%s13607_s1 + $0x7a0] sm:$0xff] }
 0x78b   :  { %6985 = vmatpush1.bf16.msra.mxu0 %v11410_v36  ;;  %7049 = vmatpush1.bf16.msra.mxu1 %v11412_v34  ;;  %v11460_v36 = vpack.c.bf16 %v4979_v1, %v4975_v19  ;;  %v11482_v19 = vpack.c.bf16 %v4976_v17, %v4972_v54  ;;  %v11484_v1 = vpack.c.bf16 %v4978_v60, %v4974_v32  ;;  %v4982_v17 = vld [vmem:[%s13607_s1 + $0x7d0] sm:$0xff] }
 0x78c   :  { %6987 = vmatprep.subr.bf16.mxu0 %v11422_v0  ;;  %7051 = vmatprep.subr.bf16.mxu1 %v11424_v37  ;;  %v4980_v37 = vld [vmem:[%s13607_s1 + $0x7c0] sm:$0xff]  ;;  %v11491_v0 = vpack.c.bf16 %v4985_v58, %v4981_v25  ;;  %v11493_v34 = vpack.c.bf16 %v4987_v55, %v4983_v62  ;;  %v4986_v54 = vld [vmem:[%s13607_s1 + $0x7f0] sm:$0xff]  ;;  %v13916_v25 = vld [vmem:[#allocation8_spill] sm:$0xff] }
 0x78d   :  { %v11508_v60 = vpack.c.bf16 %v4986_v54, %v4982_v17 }
 0x78f   :  { %6989 = vmatpush1.bf16.msra.mxu0 %v11446_v5  ;;  %7053 = vmatpush1.bf16.msra.mxu1 %v11448_v7  ;;  %v4984_v7 = vld [vmem:[%s13607_s1 + $0x7e0] sm:$0xff] }
 0x790   :  { %6991 = vmatprep.subr.bf16.mxu0 %v11458_v18  ;;  %7055 = vmatprep.subr.bf16.mxu1 %v11460_v36  ;;  %v11506_v32 = vpack.c.bf16 %v4984_v7, %v4980_v37  ;;  %v13919_v37 = vld [vmem:[#allocation23_spill] sm:$0xff] }
 0x793   :  { %6993 = vmatpush1.bf16.msra.mxu0 %v11482_v19  ;;  %7057 = vmatpush1.bf16.msra.mxu1 %v11484_v1 }
 0x794   :  { %6995 = vmatprep.subr.bf16.mxu0 %v11491_v0  ;;  %7059 = vmatprep.subr.bf16.mxu1 %v11493_v34 }
 0x797   :  { %6997 = vmatpush1.bf16.msra.mxu0 %v11506_v32  ;;  %7061 = vmatpush1.bf16.msra.mxu1 %v11508_v60 }
 0x798   :  { %7063 = vmatprep.subr.bf16.mxu0 %v10930_v59  ;;  %7127 = vmatprep.subr.bf16.mxu1 %v10935_v39  ;;  %v13917_v59 = vld [vmem:[#allocation10_spill] sm:$0xff]  ;;  %v13918_v39 = vld [vmem:[#allocation25_spill] sm:$0xff] }
 0x79a   :  { %2649 = vmatmul.mubr.f32.vlgmr.msra.gmra.mrb[16].mxu0 %v13916_v25  ;;  %2720 = vmatmul.mubr.f32.vlgmr.msra.gmra.mrb[16].mxu1 %v13916_v25 }
 0x79b   :  { %7065 = vmatpush1.bf16.msra.mxu0 %v10976_v61  ;;  %7129 = vmatpush1.bf16.msra.mxu1 %v10978_v14  ;;  %v13920_v61 = vld [vmem:[#allocation21_spill] sm:$0xff]  ;;  %v13921_v14 = vld [vmem:[#allocation19_spill] sm:$0xff] }
 0x79c   :  { %7067 = vmatprep.subr.bf16.mxu0 %v10986_v30  ;;  %7131 = vmatprep.subr.bf16.mxu1 %v10988_v4  ;;  %v13922_v30 = vld [vmem:[#allocation18_spill] sm:$0xff]  ;;  %v13923_v4 = vld [vmem:[#allocation15_spill] sm:$0xff] }
 0x79f   :  { %7069 = vmatpush1.bf16.msra.mxu0 %v11012_v52  ;;  %7133 = vmatpush1.bf16.msra.mxu1 %v11014_v44  ;;  %v13924_v52 = vld [vmem:[#allocation22_spill] sm:$0xff]  ;;  %v5123_v44 = vld [vmem:[%s13607_s1 + $0x408] sm:$0xff] }
 0x7a0   :  { %7071 = vmatprep.subr.bf16.mxu0 %v11024_v10  ;;  %7135 = vmatprep.subr.bf16.mxu1 %v11026_v9  ;;  %v5127_v10 = vld [vmem:[%s13607_s1 + $0x428] sm:$0xff]  ;;  %v5125_v9 = vld [vmem:[%s13607_s1 + $0x418] sm:$0xff] }
 0x7a3   :  { %7073 = vmatpush1.bf16.msra.mxu0 %v11050_v27  ;;  %7137 = vmatpush1.bf16.msra.mxu1 %v11052_v31  ;;  %v11589_v27 = vpack.c.bf16 %v5127_v10, %v5123_v44 }
 0x7a4   :  { %7075 = vmatprep.subr.bf16.mxu0 %v11062_v50  ;;  %7139 = vmatprep.subr.bf16.mxu1 %v11064_v16 }
 0x7a7   :  { %7077 = vmatpush1.bf16.msra.mxu0 %v11086_v49  ;;  %7141 = vmatpush1.bf16.msra.mxu1 %v11088_v35  ;;  %v13925_v49 = vld [vmem:[#allocation4_spill] sm:$0xff] }
 0x7a8   :  { %7079 = vmatprep.subr.bf16.mxu0 %v11098_v28  ;;  %7143 = vmatprep.subr.bf16.mxu1 %v11100_v63 }
 0x7ab   :  { %7081 = vmatpush1.bf16.msra.mxu0 %v11122_v21  ;;  %7145 = vmatpush1.bf16.msra.mxu1 %v11124_v43  ;;  %v13926_v21 = vld [vmem:[#allocation5_spill] sm:$0xff] }
 0x7ac   :  { %7083 = vmatprep.subr.bf16.mxu0 %v11134_v24  ;;  %7147 = vmatprep.subr.bf16.mxu1 %v11136_v23 }
 0x7af   :  { %7085 = vmatpush1.bf16.msra.mxu0 %v11158_v6  ;;  %7149 = vmatpush1.bf16.msra.mxu1 %v11160_v15  ;;  %v13927_v6 = vld [vmem:[#allocation6_spill] sm:$0xff] }
 0x7b0   :  { %7087 = vmatprep.subr.bf16.mxu0 %v11170_v56  ;;  %7151 = vmatprep.subr.bf16.mxu1 %v11172_v40  ;;  %v13928_v40 = vld [vmem:[#allocation7_spill] sm:$0xff] }
 0x7b3   :  { %7089 = vmatpush1.bf16.msra.mxu0 %v11194_v29  ;;  %7153 = vmatpush1.bf16.msra.mxu1 %v11196_v41 }
 0x7b4   :  { %7091 = vmatprep.subr.bf16.mxu0 %v11206_v46  ;;  %7155 = vmatprep.subr.bf16.mxu1 %v11208_v38 }
 0x7b7   :  { %7093 = vmatpush1.bf16.msra.mxu0 %v11230_v3  ;;  %7157 = vmatpush1.bf16.msra.mxu1 %v11232_v45 }
 0x7b8   :  { %7095 = vmatprep.subr.bf16.mxu0 %v11242_v53  ;;  %7159 = vmatprep.subr.bf16.mxu1 %v11244_v13 }
 0x7bb   :  { %7097 = vmatpush1.bf16.msra.mxu0 %v11266_v33  ;;  %7161 = vmatpush1.bf16.msra.mxu1 %v11268_v51 }
 0x7bc   :  { %7099 = vmatprep.subr.bf16.mxu0 %v11278_v22  ;;  %7163 = vmatprep.subr.bf16.mxu1 %v11280_v48  ;;  %v13929_v48 = vld [vmem:[#allocation13_spill] sm:$0xff] }
 0x7bf   :  { %7101 = vmatpush1.bf16.msra.mxu0 %v11302_v20  ;;  %7165 = vmatpush1.bf16.msra.mxu1 %v11304_v47 }
 0x7c0   :  { %7103 = vmatprep.subr.bf16.mxu0 %v11314_v42  ;;  %7167 = vmatprep.subr.bf16.mxu1 %v11316_v11 }
 0x7c3   :  { %7105 = vmatpush1.bf16.msra.mxu0 %v11338_v26  ;;  %7169 = vmatpush1.bf16.msra.mxu1 %v11340_v57  ;;  %v4859_v57 = vld [vmem:[%s13609_s2 + $0x4] sm:$0xf] }
 0x7c4   :  { %7107 = vmatprep.subr.bf16.mxu0 %v11350_v12  ;;  %7171 = vmatprep.subr.bf16.mxu1 %v11352_v8  ;;  %v13930_v12 = vld [vmem:[#allocation3_spill] sm:$0xff] }
 0x7c5   :  { %v13931_v8 = vsub.s32 0, %v13930_v12  ;;  %v13934_v17 = vsub.s32 3, %v13930_v12 }
 0x7c7   :  { %7109 = vmatpush1.bf16.msra.mxu0 %v11374_v2  ;;  %7173 = vmatpush1.bf16.msra.mxu1 %v13917_v59  ;;  %v11614_v2 = vrot.slane %v4859_v57, %v13931_v8  ;;  %v11624_v54 = vrot.slane %v4859_v57, %v13934_v17  ;;  %v5144_v8 = vld [vmem:[%s13607_s1 + $0x4b0] sm:$0xff]  ;;  %v5150_v17 = vld [vmem:[%s13607_s1 + $0x4e0] sm:$0xff] }
 0x7c8   :  { %7111 = vmatprep.subr.bf16.mxu0 %v13918_v39  ;;  %7175 = vmatprep.subr.bf16.mxu1 %v13919_v37 }
 0x7c9   :  { %13932 = vst [vmem:[#allocation11_spill] sm:$0xff] %v11614_v2 }
 0x7cb   :  { %7113 = vmatpush1.bf16.msra.mxu0 %v13920_v61  ;;  %7177 = vmatpush1.bf16.msra.mxu1 %v13921_v14 }
 0x7cc   :  { %7115 = vmatprep.subr.bf16.mxu0 %v13922_v30  ;;  %7179 = vmatprep.subr.bf16.mxu1 %v13923_v4 }
 0x7cf   :  { %7117 = vmatpush1.bf16.msra.mxu0 %v11446_v5  ;;  %7181 = vmatpush1.bf16.msra.mxu1 %v13924_v52 }
 0x7d0   :  { %7119 = vmatprep.subr.bf16.mxu0 %v11458_v18  ;;  %7183 = vmatprep.subr.bf16.mxu1 %v11460_v36  ;;  %v13933_v18 = vsub.s32 1, %v13930_v12 }
 0x7d2   :  { %v11618_v36 = vrot.slane %v4859_v57, %v13933_v18  ;;  %v5147_v18 = vld [vmem:[%s13607_s1 + $0x4c8] sm:$0xff] }
 0x7d3   :  { %7121 = vmatpush1.bf16.msra.mxu0 %v11482_v19  ;;  %7185 = vmatpush1.bf16.msra.mxu1 %v11484_v1 }
 0x7d4   :  { %7123 = vmatprep.subr.bf16.mxu0 %v11491_v0  ;;  %7187 = vmatprep.subr.bf16.mxu1 %v11493_v34  ;;  %v5129_v0 = vld [vmem:[%s13607_s1 + $0x438] sm:$0xff] }
 0x7d5   :  { %v11594_v31 = vpack.c.bf16 %v5129_v0, %v5125_v9 }
 0x7d7   :  { %7125 = vmatpush1.bf16.msra.mxu0 %v11506_v32  ;;  %7189 = vmatpush1.bf16.msra.mxu1 %v11508_v60  ;;  %v13935_v60 = vsub.s32 2, %v13930_v12  ;;  %v5140_v12 = vld [vmem:[%s13607_s1 + $0x490] sm:$0xff] }
 0x7d8   :  { %7191 = vmatprep.subr.bf16.mxu0 %v11589_v27  ;;  %7255 = vmatprep.subr.bf16.mxu1 %v11594_v31 }
 0x7d9   :  { %v11629_v25 = vrot.slane %v4859_v57, %v13935_v60  ;;  %v5152_v60 = vld [vmem:[%s13607_s1 + $0x4f0] sm:$0xff] }
 0x82d   :  { %v2328_v50 = vpop.f32.mrb[14].mxu0  ;;  %v2399_v16 = vpop.f32.mrb[14].mxu1 }
 0x82e   :  { %v2329_v35 = vadd.f32 %v2328_v50, %v13925_v49  ;;  %v2330_v28 = vpop.f32.mrb[15].mxu0  ;;  %v2401_v63 = vpop.f32.mrb[15].mxu1  ;;  %v2400_v29 = vadd.f32 %v2399_v16, %v13928_v40  ;;  %v5122_v49 = vld [vmem:[%s13607_s1 + $0x400] sm:$0xff] }
 0x82f   :  { %v2331_v43 = vadd.f32 %v2330_v28, %v13926_v21  ;;  %v2402_v15 = vadd.f32 %v2401_v63, %v13927_v6  ;;  %v5124_v28 = vld [vmem:[%s13607_s1 + $0x410] sm:$0xff]  ;;  %v5131_v21 = vld [vmem:[%s13607_s1 + $0x448] sm:$0xff]  ;;  %v5137_v6 = vld [vmem:[%s13607_s1 + $0x478] sm:$0xff] }
 0x830   :  { %v4856_v24 = vmul.f32 -1.442695, %v2329_v35  ;;  %v5126_v35 = vld [vmem:[%s13607_s1 + $0x420] sm:$0xff]  ;;  %v5128_v63 = vld [vmem:[%s13607_s1 + $0x430] sm:$0xff] }
 0x831   :  { %v4857_v23 = vmul.f32 -1.442695, %v2331_v43  ;;  %v4858_v56 = vmul.f32 -1.442695, %v2402_v15  ;;  %v11659_v40 = vpack.c.bf16 %v5126_v35, %v5122_v49  ;;  %v5163_v35 = vld [vmem:[%s13607_s1 + $0x548] sm:$0xff] }
 0x832   :  { %8071 = vpow2.f32 %v4856_v24  ;;  %v5135_v24 = vld [vmem:[%s13607_s1 + $0x468] sm:$0xff] }
 0x833   :  { %8073 = vpow2.f32 %v4857_v23  ;;  %v5133_v23 = vld [vmem:[%s13607_s1 + $0x458] sm:$0xff] }
 0x834   :  { %8075 = vpow2.f32 %v4858_v56 }
 0x835   :  { %8077 = vtanh.f32 %v2400_v29  ;;  %v11661_v29 = vpack.c.bf16 %v5128_v63, %v5124_v28  ;;  %v5167_v28 = vld [vmem:[%s13607_s1 + $0x568] sm:$0xff]  ;;  %v5165_v63 = vld [vmem:[%s13607_s1 + $0x558] sm:$0xff] }
 0x83c   :  { %v8072_v41 = vpop.eup %8071 }
 0x83d   :  { %v8074_v46 = vpop.eup %8073  ;;  %v2407_v38 = vadd.f32 1.0, %v8072_v41  ;;  %v5130_v41 = vld [vmem:[%s13607_s1 + $0x440] sm:$0xff] }
 0x83e   :  { %v2413_v3 = vadd.f32 1.0, %v8074_v46  ;;  %v8076_v45 = vpop.eup %8075  ;;  %v5134_v46 = vld [vmem:[%s13607_s1 + $0x460] sm:$0xff] }
 0x83f   :  { %8079 = vrcp.f32 %v2407_v38  ;;  %v8078_v53 = vpop.eup %8077  ;;  %v2420_v33 = vadd.f32 1.0, %v8076_v45  ;;  %v11669_v38 = vpack.c.bf16 %v5135_v24, %v5131_v21  ;;  %v5132_v45 = vld [vmem:[%s13607_s1 + $0x450] sm:$0xff]  ;;  %v11808_v21 = vpack.c.bf16 %v5167_v28, %v5163_v35  ;;  %v5162_v24 = vld [vmem:[%s13607_s1 + $0x540] sm:$0xff]  ;;  %v5193_v28 = vld [vmem:[%s13607_s1 + $0x638] sm:$0xff] }
 0x840   :  { %8081 = vrcp.f32 %v2413_v3  ;;  %v11671_v3 = vpack.c.bf16 %v5137_v6, %v5133_v23  ;;  %v5166_v23 = vld [vmem:[%s13607_s1 + $0x560] sm:$0xff] }
 0x841   :  { %8083 = vrcp.f32 %v2420_v33  ;;  %v5143_v33 = vld [vmem:[%s13607_s1 + $0x4a8] sm:$0xff] }
 0x849   :  { %v8080_v13 = vpop.eup %8079 }
 0x84a   :  { %v8082_v51 = vpop.eup %8081  ;;  %v2424_v22 = vmul.f32 %v8080_v13, %v8078_v53  ;;  %v5136_v53 = vld [vmem:[%s13607_s1 + $0x470] sm:$0xff]  ;;  %v5139_v13 = vld [vmem:[%s13607_s1 + $0x488] sm:$0xff] }
 0x84b   :  { %v2423_v20 = vmul.f32 %v8082_v51, %v13929_v48  ;;  %v8084_v42 = vpop.eup %8083  ;;  %v5141_v51 = vld [vmem:[%s13607_s1 + $0x498] sm:$0xff]  ;;  %v13936_v48 = vld [vmem:[#allocation27_spill] sm:$0xff] }
 0x84d   :  { %v2425_v47 = vadd.f32 %v2424_v22, %v2423_v20  ;;  %v5145_v22 = vld [vmem:[%s13607_s1 + $0x4b8] sm:$0xff]  ;;  %v11695_v20 = vpack.c.bf16 %v5134_v46, %v5130_v41  ;;  %v5168_v41 = vld [vmem:[%s13607_s1 + $0x570] sm:$0xff] }
 0x84e   :  { %v11709_v57 = vpack.c.bf16 %v5145_v22, %v5141_v51  ;;  %v5177_v51 = vld [vmem:[%s13607_s1 + $0x5b8] sm:$0xff]  ;;  %v5170_v22 = vld [vmem:[%s13607_s1 + $0x580] sm:$0xff] }
 0x84f   :  { %8085 = vtanh.f32 %v2425_v47  ;;  %2430 = vst [vmem:[%s13610_s4] sm:$0xff] %v2425_v47  ;;  %v11697_v47 = vpack.c.bf16 %v5136_v53, %v5132_v45  ;;  %v5171_v45 = vld [vmem:[%s13607_s1 + $0x588] sm:$0xff] }
 0x850   :  { %v5175_v53 = vld [vmem:[%s13607_s1 + $0x5a8] sm:$0xff] }
 0x859   :  { %v8086_v11 = vpop.eup %8085 }
 0x85a   :  { %v2427_v26 = vmul.f32 %v8086_v11, %v8084_v42  ;;  %v5138_v42 = vld [vmem:[%s13607_s1 + $0x480] sm:$0xff] }
 0x85b   :  { %v5142_v11 = vld [vmem:[%s13607_s1 + $0x4a0] sm:$0xff] }
 0x85c   :  { %2429 = vst [vmem:[%s13611_s3] sm:$0xff] %v2427_v26  ;;  %v11707_v26 = vpack.c.bf16 %v5143_v33, %v5139_v13  ;;  %v5173_v13 = vld [vmem:[%s13607_s1 + $0x598] sm:$0xff]  ;;  %v11844_v33 = vpack.c.bf16 %v5175_v53, %v5171_v45  ;;  %v5195_v53 = vld [vmem:[%s13607_s1 + $0x648] sm:$0xff] }
 0x86d   :  { %v2650_v34 = vpop.f32.mrb[16].mxu0  ;;  %v2721_v5 = vpop.f32.mrb[16].mxu1 }
 0x86e   :  { %v2651_v7 = vadd.f32 %v2650_v34, %v11614_v2  ;;  %v2652_v58 = vpop.f32.mrb[17].mxu0  ;;  %v2723_v62 = vpop.f32.mrb[17].mxu1  ;;  %v2722_v39 = vadd.f32 %v2721_v5, %v11629_v25  ;;  %v5151_v34 = vld [vmem:[%s13607_s1 + $0x4e8] sm:$0xff]  ;;  %v5149_v5 = vld [vmem:[%s13607_s1 + $0x4d8] sm:$0xff] }
 0x86f   :  { %v2653_v55 = vadd.f32 %v2652_v58, %v11618_v36  ;;  %v2724_v32 = vadd.f32 %v2723_v62, %v11624_v54  ;;  %v11731_v58 = vpack.c.bf16 %v5142_v11, %v5138_v42  ;;  %v11733_v62 = vpack.c.bf16 %v5144_v8, %v5140_v12  ;;  %v5172_v12 = vld [vmem:[%s13607_s1 + $0x590] sm:$0xff] }
 0x870   :  { %v4988_v19 = vmul.f32 -1.442695, %v2651_v7  ;;  %v5153_v7 = vld [vmem:[%s13607_s1 + $0x4f8] sm:$0xff]  ;;  %v11855_v42 = vpack.c.bf16 %v5177_v51, %v5173_v13  ;;  %v5176_v8 = vld [vmem:[%s13607_s1 + $0x5b0] sm:$0xff]  ;;  %v5199_v13 = vld [vmem:[%s13607_s1 + $0x668] sm:$0xff] }
 0x871   :  { %v4989_v1 = vmul.f32 -1.442695, %v2653_v55  ;;  %v4990_v59 = vmul.f32 -1.442695, %v2724_v32  ;;  %v5146_v55 = vld [vmem:[%s13607_s1 + $0x4c0] sm:$0xff]  ;;  %v5148_v32 = vld [vmem:[%s13607_s1 + $0x4d0] sm:$0xff] }
 0x872   :  { %8087 = vpow2.f32 %v4988_v19  ;;  %v11740_v19 = vpack.c.bf16 %v5151_v34, %v5147_v18  ;;  %v11866_v18 = vpack.c.bf16 %v5176_v8, %v5172_v12  ;;  %v5179_v34 = vld [vmem:[%s13607_s1 + $0x5c8] sm:$0xff]  ;;  %v5197_v51 = vld [vmem:[%s13607_s1 + $0x658] sm:$0xff]  ;;  %v5194_v12 = vld [vmem:[%s13607_s1 + $0x640] sm:$0xff] }
 0x873   :  { %8089 = vpow2.f32 %v4989_v1  ;;  %v11742_v1 = vpack.c.bf16 %v5153_v7, %v5149_v5  ;;  %v5183_v5 = vld [vmem:[%s13607_s1 + $0x5e8] sm:$0xff]  ;;  %v5181_v7 = vld [vmem:[%s13607_s1 + $0x5d8] sm:$0xff]  ;;  %v5198_v8 = vld [vmem:[%s13607_s1 + $0x660] sm:$0xff] }
 0x874   :  { %8091 = vpow2.f32 %v4990_v59  ;;  %v11755_v59 = vpack.c.bf16 %v5150_v17, %v5146_v55  ;;  %v11880_v55 = vpack.c.bf16 %v5183_v5, %v5179_v34  ;;  %v5185_v17 = vld [vmem:[%s13607_s1 + $0x5f8] sm:$0xff]  ;;  %v11965_v5 = vpack.c.bf16 %v5198_v8, %v5194_v12 }
 0x875   :  { %8093 = vtanh.f32 %v2722_v39  ;;  %v11757_v39 = vpack.c.bf16 %v5152_v60, %v5148_v32  ;;  %v5178_v32 = vld [vmem:[%s13607_s1 + $0x5c0] sm:$0xff]  ;;  %v5217_v8 = vld [vmem:[%s13607_s1 + $0x6f8] sm:$0xff] }
 0x876   :  { %v5182_v60 = vld [vmem:[%s13607_s1 + $0x5e0] sm:$0xff] }
 0x87c   :  { %v8088_v37 = vpop.eup %8087 }
 0x87d   :  { %v8090_v61 = vpop.eup %8089  ;;  %v2729_v14 = vadd.f32 1.0, %v8088_v37  ;;  %v5155_v37 = vld [vmem:[%s13607_s1 + $0x508] sm:$0xff] }
 0x87e   :  { %v2735_v30 = vadd.f32 1.0, %v8090_v61  ;;  %v8092_v4 = vpop.eup %8091  ;;  %v5159_v61 = vld [vmem:[%s13607_s1 + $0x528] sm:$0xff] }
 0x87f   :  { %8095 = vrcp.f32 %v2729_v14  ;;  %v8094_v52 = vpop.eup %8093  ;;  %v2742_v0 = vadd.f32 1.0, %v8092_v4  ;;  %v5157_v14 = vld [vmem:[%s13607_s1 + $0x518] sm:$0xff] }
 0x880   :  { %8097 = vrcp.f32 %v2735_v30  ;;  %v11772_v30 = vpack.c.bf16 %v5159_v61, %v5155_v37  ;;  %v5161_v4 = vld [vmem:[%s13607_s1 + $0x538] sm:$0xff]  ;;  %v11891_v37 = vpack.c.bf16 %v5185_v17, %v5181_v7  ;;  %v11893_v61 = vpack.c.bf16 %v5182_v60, %v5178_v32  ;;  %v5196_v7 = vld [vmem:[%s13607_s1 + $0x650] sm:$0xff]  ;;  %v5203_v60 = vld [vmem:[%s13607_s1 + $0x688] sm:$0xff] }
 0x881   :  { %8099 = vrcp.f32 %v2742_v0  ;;  %v5156_v0 = vld [vmem:[%s13607_s1 + $0x510] sm:$0xff] }
 0x882   :  { %v5200_v17 = vld [vmem:[%s13607_s1 + $0x670] sm:$0xff] }
 0x883   :  { %v11974_v32 = vpack.c.bf16 %v5200_v17, %v5196_v7  ;;  %v5210_v7 = vld [vmem:[%s13607_s1 + $0x6c0] sm:$0xff] }
 0x884   :  { %v5214_v17 = vld [vmem:[%s13607_s1 + $0x6e0] sm:$0xff] }
 0x889   :  { %v8096_v44 = vpop.eup %8095 }
 0x88a   :  { %v8098_v10 = vpop.eup %8097  ;;  %v2746_v9 = vmul.f32 %v8096_v44, %v8094_v52  ;;  %v5154_v52 = vld [vmem:[%s13607_s1 + $0x500] sm:$0xff] }
 0x88b   :  { %v2745_v50 = vmul.f32 0.0, %v8098_v10  ;;  %v8100_v43 = vpop.eup %8099  ;;  %v5158_v44 = vld [vmem:[%s13607_s1 + $0x520] sm:$0xff]  ;;  %v11783_v10 = vpack.c.bf16 %v5161_v4, %v5157_v14  ;;  %v5180_v14 = vld [vmem:[%s13607_s1 + $0x5d0] sm:$0xff] }
 0x88c   :  { %v5184_v4 = vld [vmem:[%s13607_s1 + $0x5f0] sm:$0xff] }
 0x88d   :  { %v11632_v16 = vadd.f32 %v2746_v9, %v2745_v50  ;;  %v11785_v9 = vpack.c.bf16 %v5158_v44, %v5154_v52  ;;  %v5160_v50 = vld [vmem:[%s13607_s1 + $0x530] sm:$0xff]  ;;  %v11902_v52 = vpack.c.bf16 %v5184_v4, %v5180_v14  ;;  %v5187_v44 = vld [vmem:[%s13607_s1 + $0x608] sm:$0xff]  ;;  %v5205_v4 = vld [vmem:[%s13607_s1 + $0x698] sm:$0xff] }
 0x88e   :  { %v11794_v49 = vpack.c.bf16 %v5160_v50, %v5156_v0  ;;  %v5191_v0 = vld [vmem:[%s13607_s1 + $0x628] sm:$0xff]  ;;  %v5189_v50 = vld [vmem:[%s13607_s1 + $0x618] sm:$0xff] }
 0x88f   :  { %8101 = vtanh.f32 %v11632_v16  ;;  %v11916_v35 = vpack.c.bf16 %v5191_v0, %v5187_v44  ;;  %v5207_v14 = vld [vmem:[%s13607_s1 + $0x6a8] sm:$0xff]  ;;  %v5209_v0 = vld [vmem:[%s13607_s1 + $0x6b8] sm:$0xff] }
 0x890   :  { %v11988_v44 = vpack.c.bf16 %v5207_v14, %v5203_v60  ;;  %v12037_v14 = vpack.c.bf16 %v5214_v17, %v5210_v7 }
 0x892   :  { %13938 = vst [vmem:[#allocation24_spill] sm:$0xff] %v12037_v14 }
 0x899   :  { %v8102_v15 = vpop.eup %8101 }
 0x89a   :  { %v2749_v56 = vmul.f32 %v8102_v15, %v8100_v43  ;;  %v5169_v43 = vld [vmem:[%s13607_s1 + $0x578] sm:$0xff]  ;;  %v11821_v15 = vpack.c.bf16 %v5166_v23, %v5162_v24  ;;  %v11927_v24 = vpack.c.bf16 %v5193_v28, %v5189_v50  ;;  %v5202_v50 = vld [vmem:[%s13607_s1 + $0x680] sm:$0xff] }
 0x89b   :  { %v11819_v6 = vpack.c.bf16 %v5169_v43, %v5165_v63  ;;  %v5186_v63 = vld [vmem:[%s13607_s1 + $0x600] sm:$0xff] }
 0x89c   :  { %2944 = vmatprep.mubr.f32.mxu0 %v2749_v56  ;;  %3015 = vmatprep.mubr.f32.mxu1 %v2749_v56  ;;  %v5164_v56 = vld [vmem:[%s13607_s1 + $0x550] sm:$0xff]  ;;  %v5190_v43 = vld [vmem:[%s13607_s1 + $0x620] sm:$0xff] }
 0x89d   :  { %2945 = vmatmul.mubr.f32.vlgmr.msra.gmra.mrb[18].mxu0 %v13936_v48  ;;  %3016 = vmatmul.mubr.f32.vlgmr.msra.gmra.mrb[18].mxu1 %v13936_v48  ;;  %v11830_v46 = vpack.c.bf16 %v5168_v41, %v5164_v56  ;;  %v5174_v48 = vld [vmem:[%s13607_s1 + $0x5a0] sm:$0xff]  ;;  %v11929_v23 = vpack.c.bf16 %v5190_v43, %v5186_v63  ;;  %v5188_v56 = vld [vmem:[%s13607_s1 + $0x610] sm:$0xff]  ;;  %v11999_v63 = vpack.c.bf16 %v5209_v0, %v5205_v4 }
 0x89e   :  { %7193 = vmatpush1.bf16.msra.mxu0 %v11659_v40  ;;  %7257 = vmatpush1.bf16.msra.mxu1 %v11661_v29  ;;  %v11857_v11 = vpack.c.bf16 %v5174_v48, %v5170_v22  ;;  %v5192_v41 = vld [vmem:[%s13607_s1 + $0x630] sm:$0xff]  ;;  %v11952_v22 = vpack.c.bf16 %v5199_v13, %v5195_v53  ;;  %v5201_v48 = vld [vmem:[%s13607_s1 + $0x678] sm:$0xff]  ;;  %v5206_v28 = vld [vmem:[%s13607_s1 + $0x6a0] sm:$0xff] }
 0x89f   :  { %7195 = vmatprep.subr.bf16.mxu0 %v11669_v38  ;;  %7259 = vmatprep.subr.bf16.mxu1 %v11671_v3  ;;  %v11938_v45 = vpack.c.bf16 %v5192_v41, %v5188_v56  ;;  %v11963_v34 = vpack.c.bf16 %v5201_v48, %v5197_v51  ;;  %v12001_v43 = vpack.c.bf16 %v5206_v28, %v5202_v50  ;;  %v5204_v56 = vld [vmem:[%s13607_s1 + $0x690] sm:$0xff]  ;;  %v5211_v13 = vld [vmem:[%s13607_s1 + $0x6c8] sm:$0xff]  ;;  %v5213_v48 = vld [vmem:[%s13607_s1 + $0x6d8] sm:$0xff] }
 0x8a0   :  { %v5208_v41 = vld [vmem:[%s13607_s1 + $0x6b0] sm:$0xff]  ;;  %v5215_v51 = vld [vmem:[%s13607_s1 + $0x6e8] sm:$0xff]  ;;  %v12035_v60 = vpack.c.bf16 %v5217_v8, %v5213_v48  ;;  %v5218_v48 = vld [vmem:[%s13607_s1 + $0x700] sm:$0xff] }
 0x8a1   :  { %v12010_v53 = vpack.c.bf16 %v5208_v41, %v5204_v56  ;;  %v12024_v12 = vpack.c.bf16 %v5215_v51, %v5211_v13  ;;  %v5212_v4 = vld [vmem:[%s13607_s1 + $0x6d0] sm:$0xff]  ;;  %v5219_v28 = vld [vmem:[%s13607_s1 + $0x708] sm:$0xff]  ;;  %v5221_v41 = vld [vmem:[%s13607_s1 + $0x718] sm:$0xff] }
 0x8a2   :  { %7197 = vmatpush1.bf16.msra.mxu0 %v11695_v20  ;;  %7261 = vmatpush1.bf16.msra.mxu1 %v11697_v47  ;;  %13937 = vst [vmem:[#allocation26_spill] sm:$0xff] %v12035_v60  ;;  %v5216_v0 = vld [vmem:[%s13607_s1 + $0x6f0] sm:$0xff]  ;;  %v5223_v56 = vld [vmem:[%s13607_s1 + $0x728] sm:$0xff]  ;;  %v5225_v51 = vld [vmem:[%s13607_s1 + $0x738] sm:$0xff] }
 0x8a3   :  { %7199 = vmatprep.subr.bf16.mxu0 %v11707_v26  ;;  %7263 = vmatprep.subr.bf16.mxu1 %v11709_v57  ;;  %v12046_v50 = vpack.c.bf16 %v5216_v0, %v5212_v4  ;;  %v12060_v13 = vpack.c.bf16 %v5223_v56, %v5219_v28  ;;  %v5222_v8 = vld [vmem:[%s13607_s1 + $0x720] sm:$0xff]  ;;  %v12071_v7 = vpack.c.bf16 %v5225_v51, %v5221_v41  ;;  %v5220_v4 = vld [vmem:[%s13607_s1 + $0x710] sm:$0xff]  ;;  %v5227_v28 = vld [vmem:[%s13607_s1 + $0x748] sm:$0xff] }
 0x8a4   :  { %v12073_v17 = vpack.c.bf16 %v5222_v8, %v5218_v48  ;;  %v5224_v0 = vld [vmem:[%s13607_s1 + $0x730] sm:$0xff]  ;;  %v5231_v41 = vld [vmem:[%s13607_s1 + $0x768] sm:$0xff]  ;;  %v5229_v51 = vld [vmem:[%s13607_s1 + $0x758] sm:$0xff] }
 0x8a5   :  { %13939 = vst [vmem:[#allocation14_spill] sm:$0xff] %v12046_v50  ;;  %13940 = vst [vmem:[#allocation17_spill] sm:$0xff] %v12060_v13  ;;  %v12085_v56 = vpack.c.bf16 %v5224_v0, %v5220_v4  ;;  %v5233_v48 = vld [vmem:[%s13607_s1 + $0x778] sm:$0xff]  ;;  %v12098_v8 = vpack.c.bf16 %v5231_v41, %v5227_v28  ;;  %v5226_v0 = vld [vmem:[%s13607_s1 + $0x740] sm:$0xff] }
 0x8a6   :  { %7201 = vmatpush1.bf16.msra.mxu0 %v11731_v58  ;;  %7265 = vmatpush1.bf16.msra.mxu1 %v11733_v62  ;;  %13941 = vst [vmem:[#allocation28_spill] sm:$0xff] %v12071_v7  ;;  %13942 = vst [vmem:[#allocation12_spill] sm:$0xff] %v12073_v17  ;;  %v12100_v4 = vpack.c.bf16 %v5233_v48, %v5229_v51  ;;  %v5232_v28 = vld [vmem:[%s13607_s1 + $0x770] sm:$0xff]  ;;  %v5235_v41 = vld [vmem:[%s13607_s1 + $0x788] sm:$0xff] }
 0x8a7   :  { %7203 = vmatprep.subr.bf16.mxu0 %v11740_v19  ;;  %7267 = vmatprep.subr.bf16.mxu1 %v11742_v1  ;;  %13943 = vst [vmem:[#allocation30_spill] sm:$0xff] %v12085_v56  ;;  %13944 = vst [vmem:[#allocation8_spill] sm:$0xff] %v12098_v8  ;;  %v5239_v51 = vld [vmem:[%s13607_s1 + $0x7a8] sm:$0xff] }
 0x8a8   :  { %13945 = vst [vmem:[#allocation10_spill] sm:$0xff] %v12100_v4 }
 0x8aa   :  { %7205 = vmatpush1.bf16.msra.mxu0 %v11755_v59  ;;  %7269 = vmatpush1.bf16.msra.mxu1 %v11757_v39 }
 0x8ab   :  { %7207 = vmatprep.subr.bf16.mxu0 %v11772_v30  ;;  %7271 = vmatprep.subr.bf16.mxu1 %v11783_v10 }
 0x8ae   :  { %7209 = vmatpush1.bf16.msra.mxu0 %v11785_v9  ;;  %7273 = vmatpush1.bf16.msra.mxu1 %v11794_v49 }
 0x8af   :  { %7211 = vmatprep.subr.bf16.mxu0 %v11808_v21  ;;  %7275 = vmatprep.subr.bf16.mxu1 %v11819_v6 }
 0x8b2   :  { %7213 = vmatpush1.bf16.msra.mxu0 %v11821_v15  ;;  %7277 = vmatpush1.bf16.msra.mxu1 %v11830_v46 }
 0x8b3   :  { %7215 = vmatprep.subr.bf16.mxu0 %v11844_v33  ;;  %7279 = vmatprep.subr.bf16.mxu1 %v11855_v42 }
 0x8b6   :  { %7217 = vmatpush1.bf16.msra.mxu0 %v11857_v11  ;;  %7281 = vmatpush1.bf16.msra.mxu1 %v11866_v18 }
 0x8b7   :  { %7219 = vmatprep.subr.bf16.mxu0 %v11880_v55  ;;  %7283 = vmatprep.subr.bf16.mxu1 %v11891_v37 }
 0x8ba   :  { %7221 = vmatpush1.bf16.msra.mxu0 %v11893_v61  ;;  %7285 = vmatpush1.bf16.msra.mxu1 %v11902_v52 }
 0x8bb   :  { %7223 = vmatprep.subr.bf16.mxu0 %v11916_v35  ;;  %7287 = vmatprep.subr.bf16.mxu1 %v11927_v24 }
 0x8be   :  { %7225 = vmatpush1.bf16.msra.mxu0 %v11929_v23  ;;  %7289 = vmatpush1.bf16.msra.mxu1 %v11938_v45 }
 0x8bf   :  { %7227 = vmatprep.subr.bf16.mxu0 %v11952_v22  ;;  %7291 = vmatprep.subr.bf16.mxu1 %v11963_v34 }
 0x8c2   :  { %7229 = vmatpush1.bf16.msra.mxu0 %v11965_v5  ;;  %7293 = vmatpush1.bf16.msra.mxu1 %v11974_v32 }
 0x8c3   :  { %7231 = vmatprep.subr.bf16.mxu0 %v11988_v44  ;;  %7295 = vmatprep.subr.bf16.mxu1 %v11999_v63 }
 0x8c6   :  { %7233 = vmatpush1.bf16.msra.mxu0 %v12001_v43  ;;  %7297 = vmatpush1.bf16.msra.mxu1 %v12010_v53 }
 0x8c7   :  { %7235 = vmatprep.subr.bf16.mxu0 %v12024_v12  ;;  %7299 = vmatprep.subr.bf16.mxu1 %v12035_v60  ;;  %v5246_v60 = vld [vmem:[%s13607_s1 + $0x7e0] sm:$0xff] }
 0x8ca   :  { %7237 = vmatpush1.bf16.msra.mxu0 %v12037_v14  ;;  %7301 = vmatpush1.bf16.msra.mxu1 %v12046_v50  ;;  %v5228_v50 = vld [vmem:[%s13607_s1 + $0x750] sm:$0xff] }
 0x8cb   :  { %7239 = vmatprep.subr.bf16.mxu0 %v12060_v13  ;;  %7303 = vmatprep.subr.bf16.mxu1 %v12071_v7  ;;  %v5230_v13 = vld [vmem:[%s13607_s1 + $0x760] sm:$0xff]  ;;  %v12125_v48 = vpack.c.bf16 %v5232_v28, %v5228_v50  ;;  %v5236_v28 = vld [vmem:[%s13607_s1 + $0x790] sm:$0xff] }
 0x8cc   :  { %v12112_v7 = vpack.c.bf16 %v5230_v13, %v5226_v0  ;;  %v12127_v13 = vpack.c.bf16 %v5239_v51, %v5235_v41  ;;  %v5237_v0 = vld [vmem:[%s13607_s1 + $0x798] sm:$0xff]  ;;  %v5238_v50 = vld [vmem:[%s13607_s1 + $0x7a0] sm:$0xff]  ;;  %v5240_v41 = vld [vmem:[%s13607_s1 + $0x7b0] sm:$0xff] }
 0x8cd   :  { %13947 = vst [vmem:[#allocation23_spill] sm:$0xff] %v12125_v48 }
 0x8ce   :  { %7241 = vmatpush1.bf16.msra.mxu0 %v12073_v17  ;;  %7305 = vmatpush1.bf16.msra.mxu1 %v12085_v56  ;;  %13946 = vst [vmem:[#allocation25_spill] sm:$0xff] %v12112_v7  ;;  %v5241_v56 = vld [vmem:[%s13607_s1 + $0x7b8] sm:$0xff]  ;;  %v5234_v17 = vld [vmem:[%s13607_s1 + $0x780] sm:$0xff] }
 0x8cf   :  { %7243 = vmatprep.subr.bf16.mxu0 %v12098_v8  ;;  %7307 = vmatprep.subr.bf16.mxu1 %v12100_v4  ;;  %v12138_v14 = vpack.c.bf16 %v5241_v56, %v5237_v0  ;;  %v12150_v51 = vpack.c.bf16 %v5238_v50, %v5234_v17  ;;  %v5243_v56 = vld [vmem:[%s13607_s1 + $0x7c8] sm:$0xff]  ;;  %v5245_v4 = vld [vmem:[%s13607_s1 + $0x7d8] sm:$0xff]  ;;  %v12163_v8 = vpack.c.bf16 %v5240_v41, %v5236_v28  ;;  %v5244_v28 = vld [vmem:[%s13607_s1 + $0x7d0] sm:$0xff] }
 0x8d0   :  { %v5247_v0 = vld [vmem:[%s13607_s1 + $0x7e8] sm:$0xff]  ;;  %v5249_v50 = vld [vmem:[%s13607_s1 + $0x7f8] sm:$0xff]  ;;  %v5248_v41 = vld [vmem:[%s13607_s1 + $0x7f0] sm:$0xff] }
 0x8d1   :  { %13948 = vst [vmem:[#allocation21_spill] sm:$0xff] %v12138_v14  ;;  %13949 = vst [vmem:[#allocation19_spill] sm:$0xff] %v12150_v51  ;;  %v12165_v17 = vpack.c.bf16 %v5247_v0, %v5243_v56  ;;  %v12190_v0 = vpack.c.bf16 %v5248_v41, %v5244_v28 }
 0x8d2   :  { %7245 = vmatpush1.bf16.msra.mxu0 %v12112_v7  ;;  %7309 = vmatpush1.bf16.msra.mxu1 %v12125_v48  ;;  %13950 = vst [vmem:[#allocation18_spill] sm:$0xff] %v12163_v8  ;;  %v5242_v7 = vld [vmem:[%s13607_s1 + $0x7c0] sm:$0xff]  ;;  %v12177_v48 = vpack.c.bf16 %v5249_v50, %v5245_v4 }
 0x8d3   :  { %7247 = vmatprep.subr.bf16.mxu0 %v12127_v13  ;;  %13951 = vst [vmem:[#allocation15_spill] sm:$0xff] %v12165_v17  ;;  %7311 = vmatprep.subr.bf16.mxu1 %v12138_v14  ;;  %v12186_v56 = vpack.c.bf16 %v5246_v60, %v5242_v7  ;;  %13954 = vst [vmem:[#allocation5_spill] sm:$0xff] %v12190_v0 }
 0x8d4   :  { %13952 = vst [vmem:[#allocation22_spill] sm:$0xff] %v12177_v48 }
 0x8d5   :  { %13953 = vst [vmem:[#allocation4_spill] sm:$0xff] %v12186_v56 }
 0x8d6   :  { %7249 = vmatpush1.bf16.msra.mxu0 %v12150_v51  ;;  %7313 = vmatpush1.bf16.msra.mxu1 %v12163_v8 }
 0x8d7   :  { %7251 = vmatprep.subr.bf16.mxu0 %v12165_v17  ;;  %7315 = vmatprep.subr.bf16.mxu1 %v12177_v48 }
 0x8da   :  { %7253 = vmatpush1.bf16.msra.mxu0 %v12186_v56  ;;  %7317 = vmatpush1.bf16.msra.mxu1 %v12190_v0 }
 0x8db   :  { %7319 = vmatprep.subr.bf16.mxu0 %v11589_v27  ;;  %7383 = vmatprep.subr.bf16.mxu1 %v11594_v31 }
 0x970   :  { %v2946_v4 = vpop.f32.mrb[18].mxu0  ;;  %v3017_v50 = vpop.f32.mrb[18].mxu1 }
 0x971   :  { %v2947_v60 = vadd.f32 %v2946_v4, %v11614_v2  ;;  %v2948_v7 = vpop.f32.mrb[19].mxu0  ;;  %v3019_v8 = vpop.f32.mrb[19].mxu1  ;;  %v3018_v0 = vadd.f32 %v3017_v50, %v11629_v25 }
 0x972   :  { %v2949_v17 = vadd.f32 %v2948_v7, %v11618_v36  ;;  %v3020_v56 = vadd.f32 %v3019_v8, %v11624_v54 }
 0x973   :  { %v5119_v28 = vmul.f32 -1.442695, %v2947_v60 }
 0x974   :  { %v5120_v41 = vmul.f32 -1.442695, %v2949_v17  ;;  %v5121_v48 = vmul.f32 -1.442695, %v3020_v56 }
 0x975   :  { %8103 = vpow2.f32 %v5119_v28 }
 0x976   :  { %8105 = vpow2.f32 %v5120_v41 }
 0x977   :  { %8107 = vpow2.f32 %v5121_v48 }
 0x978   :  { %8109 = vtanh.f32 %v3018_v0 }
 0x97f   :  { %v8104_v27 = vpop.eup %8103 }
 0x980   :  { %v8106_v51 = vpop.eup %8105  ;;  %v3025_v31 = vadd.f32 1.0, %v8104_v27  ;;  %v5384_v27 = vld [vmem:[%s13607_s1 + $0x400] sm:$0xff] }
 0x981   :  { %v3031_v14 = vadd.f32 1.0, %v8106_v51  ;;  %v8108_v4 = vpop.eup %8107  ;;  %v13955_v51 = vld [vmem:[#allocation9_spill] sm:$0xff] }
 0x982   :  { %8111 = vrcp.f32 %v3025_v31  ;;  %v8110_v2 = vpop.eup %8109  ;;  %v3038_v28 = vadd.f32 1.0, %v8108_v4  ;;  %v5388_v31 = vld [vmem:[%s13607_s1 + $0x420] sm:$0xff]  ;;  %v5386_v4 = vld [vmem:[%s13607_s1 + $0x410] sm:$0xff] }
 0x983   :  { %8113 = vrcp.f32 %v3031_v14 }
 0x984   :  { %8115 = vrcp.f32 %v3038_v28  ;;  %v5397_v28 = vld [vmem:[%s13607_s1 + $0x468] sm:$0xff] }
 0x98c   :  { %v8112_v7 = vpop.eup %8111 }
 0x98d   :  { %v8114_v60 = vpop.eup %8113  ;;  %v3042_v17 = vmul.f32 %v8112_v7, %v8110_v2  ;;  %v13956_v2 = vld [vmem:[#allocation26_spill] sm:$0xff]  ;;  %v5390_v7 = vld [vmem:[%s13607_s1 + $0x430] sm:$0xff] }
 0x98e   :  { %v3041_v41 = vmul.f32 %v8114_v60, %v11632_v16  ;;  %v8116_v56 = vpop.eup %8115  ;;  %v13957_v16 = vld [vmem:[#allocation24_spill] sm:$0xff] }
 0x98f   :  { %v5393_v60 = vld [vmem:[%s13607_s1 + $0x448] sm:$0xff] }
 0x990   :  { %v12202_v8 = vadd.f32 %v3042_v17, %v3041_v41  ;;  %v5395_v41 = vld [vmem:[%s13607_s1 + $0x458] sm:$0xff] }
 0x992   :  { %8117 = vtanh.f32 %v12202_v8 }
 0x99c   :  { %v8118_v50 = vpop.eup %8117 }
 0x99d   :  { %v3045_v48 = vmul.f32 %v8118_v50, %v8116_v56 }
 0x99f   :  { %3240 = vmatprep.mubr.f32.mxu0 %v3045_v48  ;;  %3311 = vmatprep.mubr.f32.mxu1 %v3045_v48  ;;  %v12319_v48 = vpack.c.bf16 %v5388_v31, %v5384_v27  ;;  %v5425_v31 = vld [vmem:[%s13607_s1 + $0x548] sm:$0xff] }
 0x9a0   :  { %3241 = vmatmul.mubr.f32.vlgmr.msra.gmra.mrb[20].mxu0 %v13955_v51  ;;  %3312 = vmatmul.mubr.f32.vlgmr.msra.gmra.mrb[20].mxu1 %v13955_v51  ;;  %v12321_v51 = vpack.c.bf16 %v5390_v7, %v5386_v4  ;;  %v5429_v4 = vld [vmem:[%s13607_s1 + $0x568] sm:$0xff]  ;;  %v5427_v7 = vld [vmem:[%s13607_s1 + $0x558] sm:$0xff] }
 0x9a1   :  { %7321 = vmatpush1.bf16.msra.mxu0 %v11659_v40  ;;  %7385 = vmatpush1.bf16.msra.mxu1 %v11661_v29  ;;  %v13958_v40 = vld [vmem:[#allocation14_spill] sm:$0xff]  ;;  %v13959_v29 = vld [vmem:[#allocation17_spill] sm:$0xff] }
 0x9a2   :  { %7323 = vmatprep.subr.bf16.mxu0 %v11669_v38  ;;  %7387 = vmatprep.subr.bf16.mxu1 %v11671_v3  ;;  %v13960_v38 = vld [vmem:[#allocation28_spill] sm:$0xff] }
 0x9a3   :  { %v13961_v3 = vld [vmem:[#allocation12_spill] sm:$0xff] }
 0x9a5   :  { %7325 = vmatpush1.bf16.msra.mxu0 %v11695_v20  ;;  %7389 = vmatpush1.bf16.msra.mxu1 %v11697_v47  ;;  %v13962_v20 = vld [vmem:[#allocation30_spill] sm:$0xff]  ;;  %v13963_v47 = vld [vmem:[#allocation8_spill] sm:$0xff] }
 0x9a6   :  { %7327 = vmatprep.subr.bf16.mxu0 %v11707_v26  ;;  %7391 = vmatprep.subr.bf16.mxu1 %v11709_v57  ;;  %v13964_v26 = vld [vmem:[#allocation10_spill] sm:$0xff]  ;;  %v13965_v57 = vld [vmem:[#allocation25_spill] sm:$0xff] }
 0x9a9   :  { %7329 = vmatpush1.bf16.msra.mxu0 %v11731_v58  ;;  %7393 = vmatpush1.bf16.msra.mxu1 %v11733_v62  ;;  %v13966_v58 = vld [vmem:[#allocation23_spill] sm:$0xff]  ;;  %v13967_v62 = vld [vmem:[#allocation21_spill] sm:$0xff] }
 0x9aa   :  { %7331 = vmatprep.subr.bf16.mxu0 %v11740_v19  ;;  %7395 = vmatprep.subr.bf16.mxu1 %v11742_v1  ;;  %v13968_v19 = vld [vmem:[#allocation19_spill] sm:$0xff]  ;;  %v13969_v1 = vld [vmem:[#allocation18_spill] sm:$0xff] }
 0x9ad   :  { %7333 = vmatpush1.bf16.msra.mxu0 %v11755_v59  ;;  %7397 = vmatpush1.bf16.msra.mxu1 %v11757_v39  ;;  %v13970_v59 = vld [vmem:[#allocation15_spill] sm:$0xff]  ;;  %v13971_v39 = vld [vmem:[#allocation22_spill] sm:$0xff] }
 0x9ae   :  { %7335 = vmatprep.subr.bf16.mxu0 %v11772_v30  ;;  %7399 = vmatprep.subr.bf16.mxu1 %v11783_v10  ;;  %v13972_v30 = vld [vmem:[#allocation4_spill] sm:$0xff]  ;;  %v13973_v10 = vld [vmem:[#allocation5_spill] sm:$0xff] }
 0x9b1   :  { %7337 = vmatpush1.bf16.msra.mxu0 %v11785_v9  ;;  %7401 = vmatpush1.bf16.msra.mxu1 %v11794_v49  ;;  %v5385_v9 = vld [vmem:[%s13607_s1 + $0x408] sm:$0xff] }
 0x9b2   :  { %7339 = vmatprep.subr.bf16.mxu0 %v11808_v21  ;;  %7403 = vmatprep.subr.bf16.mxu1 %v11819_v6  ;;  %v5389_v49 = vld [vmem:[%s13607_s1 + $0x428] sm:$0xff]  ;;  %v5387_v21 = vld [vmem:[%s13607_s1 + $0x418] sm:$0xff] }
 0x9b3   :  { %v12278_v6 = vpack.c.bf16 %v5389_v49, %v5385_v9  ;;  %v5406_v9 = vld [vmem:[%s13607_s1 + $0x4b0] sm:$0xff]  ;;  %v5409_v49 = vld [vmem:[%s13607_s1 + $0x4c8] sm:$0xff] }
 0x9b5   :  { %7341 = vmatpush1.bf16.msra.mxu0 %v11821_v15  ;;  %7405 = vmatpush1.bf16.msra.mxu1 %v11830_v46  ;;  %v5391_v15 = vld [vmem:[%s13607_s1 + $0x438] sm:$0xff] }
 0x9b6   :  { %7343 = vmatprep.subr.bf16.mxu0 %v11844_v33  ;;  %7407 = vmatprep.subr.bf16.mxu1 %v11855_v42  ;;  %v12283_v46 = vpack.c.bf16 %v5391_v15, %v5387_v21  ;;  %v5413_v21 = vld [vmem:[%s13607_s1 + $0x4e8] sm:$0xff]  ;;  %v5411_v15 = vld [vmem:[%s13607_s1 + $0x4d8] sm:$0xff] }
 0x9b9   :  { %7345 = vmatpush1.bf16.msra.mxu0 %v11857_v11  ;;  %7409 = vmatpush1.bf16.msra.mxu1 %v11866_v18  ;;  %v13974_v11 = vld [vmem:[#allocation11_spill] sm:$0xff] }
 0x9ba   :  { %7347 = vmatprep.subr.bf16.mxu0 %v11880_v55  ;;  %7411 = vmatprep.subr.bf16.mxu1 %v11891_v37 }
 0x9bd   :  { %7349 = vmatpush1.bf16.msra.mxu0 %v11893_v61  ;;  %7413 = vmatpush1.bf16.msra.mxu1 %v11902_v52 }
 0x9be   :  { %7351 = vmatprep.subr.bf16.mxu0 %v11916_v35  ;;  %7415 = vmatprep.subr.bf16.mxu1 %v11927_v24 }
 0x9c1   :  { %7353 = vmatpush1.bf16.msra.mxu0 %v11929_v23  ;;  %7417 = vmatpush1.bf16.msra.mxu1 %v11938_v45 }
 0x9c2   :  { %7355 = vmatprep.subr.bf16.mxu0 %v11952_v22  ;;  %7419 = vmatprep.subr.bf16.mxu1 %v11963_v34 }
 0x9c5   :  { %7357 = vmatpush1.bf16.msra.mxu0 %v11965_v5  ;;  %7421 = vmatpush1.bf16.msra.mxu1 %v11974_v32 }
 0x9c6   :  { %7359 = vmatprep.subr.bf16.mxu0 %v11988_v44  ;;  %7423 = vmatprep.subr.bf16.mxu1 %v11999_v63 }
 0x9c9   :  { %7361 = vmatpush1.bf16.msra.mxu0 %v12001_v43  ;;  %7425 = vmatpush1.bf16.msra.mxu1 %v12010_v53 }
 0x9ca   :  { %7363 = vmatprep.subr.bf16.mxu0 %v12024_v12  ;;  %7427 = vmatprep.subr.bf16.mxu1 %v13956_v2  ;;  %v5392_v2 = vld [vmem:[%s13607_s1 + $0x440] sm:$0xff] }
 0x9cd   :  { %7365 = vmatpush1.bf16.msra.mxu0 %v13957_v16  ;;  %7429 = vmatpush1.bf16.msra.mxu1 %v13958_v40  ;;  %v5396_v16 = vld [vmem:[%s13607_s1 + $0x460] sm:$0xff]  ;;  %v12329_v40 = vpack.c.bf16 %v5397_v28, %v5393_v60  ;;  %v12468_v60 = vpack.c.bf16 %v5429_v4, %v5425_v31  ;;  %v5455_v4 = vld [vmem:[%s13607_s1 + $0x638] sm:$0xff] }
 0x9ce   :  { %7367 = vmatprep.subr.bf16.mxu0 %v13959_v29  ;;  %7431 = vmatprep.subr.bf16.mxu1 %v13960_v38  ;;  %v5394_v38 = vld [vmem:[%s13607_s1 + $0x450] sm:$0xff]  ;;  %v5424_v28 = vld [vmem:[%s13607_s1 + $0x540] sm:$0xff] }
 0x9d1   :  { %7369 = vmatpush1.bf16.msra.mxu0 %v13961_v3  ;;  %7433 = vmatpush1.bf16.msra.mxu1 %v13962_v20  ;;  %v5398_v3 = vld [vmem:[%s13607_s1 + $0x470] sm:$0xff]  ;;  %v5401_v20 = vld [vmem:[%s13607_s1 + $0x488] sm:$0xff] }
 0x9d2   :  { %7371 = vmatprep.subr.bf16.mxu0 %v13963_v47  ;;  %7435 = vmatprep.subr.bf16.mxu1 %v13964_v26  ;;  %v5405_v47 = vld [vmem:[%s13607_s1 + $0x4a8] sm:$0xff]  ;;  %v5403_v26 = vld [vmem:[%s13607_s1 + $0x498] sm:$0xff] }
 0x9d5   :  { %7373 = vmatpush1.bf16.msra.mxu0 %v13965_v57  ;;  %7437 = vmatpush1.bf16.msra.mxu1 %v13966_v58  ;;  %v5407_v57 = vld [vmem:[%s13607_s1 + $0x4b8] sm:$0xff]  ;;  %v13975_v58 = vld [vmem:[#allocation29_spill] sm:$0xff] }
 0x9d6   :  { %7375 = vmatprep.subr.bf16.mxu0 %v12127_v13  ;;  %7439 = vmatprep.subr.bf16.mxu1 %v13967_v62  ;;  %v12355_v62 = vpack.c.bf16 %v5396_v16, %v5392_v2  ;;  %v5430_v2 = vld [vmem:[%s13607_s1 + $0x570] sm:$0xff] }
 0x9d9   :  { %7377 = vmatpush1.bf16.msra.mxu0 %v13968_v19  ;;  %7441 = vmatpush1.bf16.msra.mxu1 %v13969_v1  ;;  %v12357_v19 = vpack.c.bf16 %v5398_v3, %v5394_v38  ;;  %v5400_v1 = vld [vmem:[%s13607_s1 + $0x480] sm:$0xff]  ;;  %v5433_v38 = vld [vmem:[%s13607_s1 + $0x588] sm:$0xff] }
 0x9da   :  { %7379 = vmatprep.subr.bf16.mxu0 %v13970_v59  ;;  %7443 = vmatprep.subr.bf16.mxu1 %v13971_v39  ;;  %v5404_v59 = vld [vmem:[%s13607_s1 + $0x4a0] sm:$0xff]  ;;  %v12367_v39 = vpack.c.bf16 %v5405_v47, %v5401_v20  ;;  %v5437_v3 = vld [vmem:[%s13607_s1 + $0x5a8] sm:$0xff]  ;;  %v5435_v20 = vld [vmem:[%s13607_s1 + $0x598] sm:$0xff] }
 0x9db   :  { %v12504_v47 = vpack.c.bf16 %v5437_v3, %v5433_v38  ;;  %v5457_v3 = vld [vmem:[%s13607_s1 + $0x648] sm:$0xff] }
 0x9dd   :  { %7381 = vmatpush1.bf16.msra.mxu0 %v13972_v30  ;;  %7445 = vmatpush1.bf16.msra.mxu1 %v13973_v10  ;;  %v12369_v30 = vpack.c.bf16 %v5407_v57, %v5403_v26  ;;  %v5402_v10 = vld [vmem:[%s13607_s1 + $0x490] sm:$0xff]  ;;  %v5439_v26 = vld [vmem:[%s13607_s1 + $0x5b8] sm:$0xff]  ;;  %v5432_v57 = vld [vmem:[%s13607_s1 + $0x580] sm:$0xff] }
 0x9de   :  { %7447 = vmatprep.subr.bf16.mxu0 %v12278_v6  ;;  %7511 = vmatprep.subr.bf16.mxu1 %v12283_v46 }
 0xa73   :  { %v3242_v33 = vpop.f32.mrb[20].mxu0  ;;  %v3313_v42 = vpop.f32.mrb[20].mxu1 }
 0xa74   :  { %v3243_v18 = vadd.f32 %v3242_v33, %v13974_v11  ;;  %v3244_v55 = vpop.f32.mrb[21].mxu0  ;;  %v3315_v37 = vpop.f32.mrb[21].mxu1  ;;  %v3314_v45 = vadd.f32 %v3313_v42, %v11629_v25  ;;  %v5415_v33 = vld [vmem:[%s13607_s1 + $0x4f8] sm:$0xff]  ;;  %v12391_v42 = vpack.c.bf16 %v5404_v59, %v5400_v1  ;;  %v12515_v1 = vpack.c.bf16 %v5439_v26, %v5435_v20  ;;  %v5461_v20 = vld [vmem:[%s13607_s1 + $0x668] sm:$0xff] }
 0xa75   :  { %v3245_v61 = vadd.f32 %v3244_v55, %v11618_v36  ;;  %v3316_v24 = vadd.f32 %v3315_v37, %v11624_v54  ;;  %v5408_v55 = vld [vmem:[%s13607_s1 + $0x4c0] sm:$0xff]  ;;  %v12400_v37 = vpack.c.bf16 %v5413_v21, %v5409_v49  ;;  %v5441_v21 = vld [vmem:[%s13607_s1 + $0x5c8] sm:$0xff]  ;;  %v5459_v26 = vld [vmem:[%s13607_s1 + $0x658] sm:$0xff] }
 0xa76   :  { %v5250_v52 = vmul.f32 -1.442695, %v3243_v18  ;;  %v12393_v18 = vpack.c.bf16 %v5406_v9, %v5402_v10  ;;  %v5434_v10 = vld [vmem:[%s13607_s1 + $0x590] sm:$0xff] }
 0xa77   :  { %v5251_v35 = vmul.f32 -1.442695, %v3245_v61  ;;  %v5252_v23 = vmul.f32 -1.442695, %v3316_v24  ;;  %v12402_v61 = vpack.c.bf16 %v5415_v33, %v5411_v15  ;;  %v5414_v24 = vld [vmem:[%s13607_s1 + $0x4f0] sm:$0xff]  ;;  %v5445_v15 = vld [vmem:[%s13607_s1 + $0x5e8] sm:$0xff] }
 0xa78   :  { %8119 = vpow2.f32 %v5250_v52  ;;  %v5412_v52 = vld [vmem:[%s13607_s1 + $0x4e0] sm:$0xff]  ;;  %v5438_v9 = vld [vmem:[%s13607_s1 + $0x5b0] sm:$0xff]  ;;  %v5443_v33 = vld [vmem:[%s13607_s1 + $0x5d8] sm:$0xff] }
 0xa79   :  { %8121 = vpow2.f32 %v5251_v35  ;;  %v5410_v35 = vld [vmem:[%s13607_s1 + $0x4d0] sm:$0xff]  ;;  %v12526_v49 = vpack.c.bf16 %v5438_v9, %v5434_v10  ;;  %v5456_v10 = vld [vmem:[%s13607_s1 + $0x640] sm:$0xff] }
 0xa7a   :  { %8123 = vpow2.f32 %v5252_v23  ;;  %v12415_v23 = vpack.c.bf16 %v5412_v52, %v5408_v55  ;;  %v12540_v55 = vpack.c.bf16 %v5445_v15, %v5441_v21  ;;  %v5447_v52 = vld [vmem:[%s13607_s1 + $0x5f8] sm:$0xff]  ;;  %v5460_v9 = vld [vmem:[%s13607_s1 + $0x660] sm:$0xff] }
 0xa7b   :  { %8125 = vtanh.f32 %v3314_v45  ;;  %v12417_v45 = vpack.c.bf16 %v5414_v24, %v5410_v35  ;;  %v5440_v35 = vld [vmem:[%s13607_s1 + $0x5c0] sm:$0xff]  ;;  %v12625_v15 = vpack.c.bf16 %v5460_v9, %v5456_v10  ;;  %v5479_v9 = vld [vmem:[%s13607_s1 + $0x6f8] sm:$0xff] }
 0xa7c   :  { %v5444_v24 = vld [vmem:[%s13607_s1 + $0x5e0] sm:$0xff] }
 0xa82   :  { %v8120_v22 = vpop.eup %8119 }
 0xa83   :  { %v8122_v34 = vpop.eup %8121  ;;  %v3321_v5 = vadd.f32 1.0, %v8120_v22  ;;  %v5417_v22 = vld [vmem:[%s13607_s1 + $0x508] sm:$0xff] }
 0xa84   :  { %v3327_v32 = vadd.f32 1.0, %v8122_v34  ;;  %v8124_v44 = vpop.eup %8123  ;;  %v5421_v34 = vld [vmem:[%s13607_s1 + $0x528] sm:$0xff] }
 0xa85   :  { %8127 = vrcp.f32 %v3321_v5  ;;  %v8126_v63 = vpop.eup %8125  ;;  %v3334_v14 = vadd.f32 1.0, %v8124_v44  ;;  %v5419_v5 = vld [vmem:[%s13607_s1 + $0x518] sm:$0xff] }
 0xa86   :  { %8129 = vrcp.f32 %v3327_v32  ;;  %v12432_v32 = vpack.c.bf16 %v5421_v34, %v5417_v22  ;;  %v5423_v44 = vld [vmem:[%s13607_s1 + $0x538] sm:$0xff]  ;;  %v12551_v22 = vpack.c.bf16 %v5447_v52, %v5443_v33  ;;  %v12553_v34 = vpack.c.bf16 %v5444_v24, %v5440_v35  ;;  %v5458_v33 = vld [vmem:[%s13607_s1 + $0x650] sm:$0xff]  ;;  %v5465_v24 = vld [vmem:[%s13607_s1 + $0x688] sm:$0xff] }
 0xa87   :  { %8131 = vrcp.f32 %v3334_v14  ;;  %v5418_v14 = vld [vmem:[%s13607_s1 + $0x510] sm:$0xff] }
 0xa88   :  { %v5462_v52 = vld [vmem:[%s13607_s1 + $0x670] sm:$0xff] }
 0xa89   :  { %v12634_v35 = vpack.c.bf16 %v5462_v52, %v5458_v33  ;;  %v5472_v33 = vld [vmem:[%s13607_s1 + $0x6c0] sm:$0xff] }
 0xa8a   :  { %v5476_v52 = vld [vmem:[%s13607_s1 + $0x6e0] sm:$0xff] }
 0xa8f   :  { %v8128_v43 = vpop.eup %8127 }
 0xa90   :  { %v8130_v53 = vpop.eup %8129  ;;  %v3338_v12 = vmul.f32 %v8128_v43, %v8126_v63  ;;  %v5416_v63 = vld [vmem:[%s13607_s1 + $0x500] sm:$0xff] }
 0xa91   :  { %v3337_v13 = vmul.f32 %v8130_v53, %v12202_v8  ;;  %v8132_v17 = vpop.eup %8131  ;;  %v5399_v8 = vld [vmem:[%s13607_s1 + $0x478] sm:$0xff]  ;;  %v5420_v43 = vld [vmem:[%s13607_s1 + $0x520] sm:$0xff]  ;;  %v12443_v53 = vpack.c.bf16 %v5423_v44, %v5419_v5  ;;  %v5442_v5 = vld [vmem:[%s13607_s1 + $0x5d0] sm:$0xff] }
 0xa92   :  { %v12331_v29 = vpack.c.bf16 %v5399_v8, %v5395_v41  ;;  %v5428_v41 = vld [vmem:[%s13607_s1 + $0x560] sm:$0xff]  ;;  %v5446_v44 = vld [vmem:[%s13607_s1 + $0x5f0] sm:$0xff] }
 0xa93   :  { %v12292_v0 = vadd.f32 %v3338_v12, %v3337_v13  ;;  %v12445_v12 = vpack.c.bf16 %v5420_v43, %v5416_v63  ;;  %v5422_v13 = vld [vmem:[%s13607_s1 + $0x530] sm:$0xff]  ;;  %v12562_v63 = vpack.c.bf16 %v5446_v44, %v5442_v5  ;;  %v5449_v43 = vld [vmem:[%s13607_s1 + $0x608] sm:$0xff]  ;;  %v5467_v44 = vld [vmem:[%s13607_s1 + $0x698] sm:$0xff] }
 0xa94   :  { %v12454_v27 = vpack.c.bf16 %v5422_v13, %v5418_v14  ;;  %v5453_v14 = vld [vmem:[%s13607_s1 + $0x628] sm:$0xff]  ;;  %v5451_v13 = vld [vmem:[%s13607_s1 + $0x618] sm:$0xff] }
 0xa95   :  { %8133 = vtanh.f32 %v12292_v0  ;;  %v12576_v31 = vpack.c.bf16 %v5453_v14, %v5449_v43  ;;  %v5469_v5 = vld [vmem:[%s13607_s1 + $0x6a8] sm:$0xff]  ;;  %v5471_v14 = vld [vmem:[%s13607_s1 + $0x6b8] sm:$0xff] }
 0xa96   :  { %v12648_v43 = vpack.c.bf16 %v5469_v5, %v5465_v24  ;;  %v12697_v5 = vpack.c.bf16 %v5476_v52, %v5472_v33 }
 0xa98   :  { %13977 = vst [vmem:[#allocation7_spill] sm:$0xff] %v12697_v5 }
 0xa9f   :  { %v8134_v56 = vpop.eup %8133 }
 0xaa0   :  { %v3341_v50 = vmul.f32 %v8134_v56, %v8132_v17  ;;  %v5431_v17 = vld [vmem:[%s13607_s1 + $0x578] sm:$0xff]  ;;  %v12481_v56 = vpack.c.bf16 %v5428_v41, %v5424_v28  ;;  %v12587_v28 = vpack.c.bf16 %v5455_v4, %v5451_v13  ;;  %v5464_v13 = vld [vmem:[%s13607_s1 + $0x680] sm:$0xff] }
 0xaa1   :  { %v12479_v8 = vpack.c.bf16 %v5431_v17, %v5427_v7  ;;  %v5448_v7 = vld [vmem:[%s13607_s1 + $0x600] sm:$0xff] }
 0xaa2   :  { %3536 = vmatprep.mubr.f32.mxu0 %v3341_v50  ;;  %3607 = vmatprep.mubr.f32.mxu1 %v3341_v50  ;;  %v5426_v50 = vld [vmem:[%s13607_s1 + $0x550] sm:$0xff]  ;;  %v5452_v17 = vld [vmem:[%s13607_s1 + $0x620] sm:$0xff] }
 0xaa3   :  { %3537 = vmatmul.mubr.f32.vlgmr.msra.gmra.mrb[22].mxu0 %v13975_v58  ;;  %3608 = vmatmul.mubr.f32.vlgmr.msra.gmra.mrb[22].mxu1 %v13975_v58  ;;  %v12490_v16 = vpack.c.bf16 %v5430_v2, %v5426_v50  ;;  %v5436_v58 = vld [vmem:[%s13607_s1 + $0x5a0] sm:$0xff]  ;;  %v12589_v41 = vpack.c.bf16 %v5452_v17, %v5448_v7  ;;  %v5450_v50 = vld [vmem:[%s13607_s1 + $0x610] sm:$0xff]  ;;  %v12659_v7 = vpack.c.bf16 %v5471_v14, %v5467_v44 }
 0xaa4   :  { %7449 = vmatpush1.bf16.msra.mxu0 %v12319_v48  ;;  %7513 = vmatpush1.bf16.msra.mxu1 %v12321_v51  ;;  %v12517_v59 = vpack.c.bf16 %v5436_v58, %v5432_v57  ;;  %v5454_v2 = vld [vmem:[%s13607_s1 + $0x630] sm:$0xff]  ;;  %v12612_v57 = vpack.c.bf16 %v5461_v20, %v5457_v3  ;;  %v5463_v58 = vld [vmem:[%s13607_s1 + $0x678] sm:$0xff]  ;;  %v5468_v4 = vld [vmem:[%s13607_s1 + $0x6a0] sm:$0xff] }
 0xaa5   :  { %7451 = vmatprep.subr.bf16.mxu0 %v12329_v40  ;;  %7515 = vmatprep.subr.bf16.mxu1 %v12331_v29  ;;  %v12598_v38 = vpack.c.bf16 %v5454_v2, %v5450_v50  ;;  %v12623_v21 = vpack.c.bf16 %v5463_v58, %v5459_v26  ;;  %v12661_v17 = vpack.c.bf16 %v5468_v4, %v5464_v13  ;;  %v5466_v50 = vld [vmem:[%s13607_s1 + $0x690] sm:$0xff]  ;;  %v5473_v20 = vld [vmem:[%s13607_s1 + $0x6c8] sm:$0xff]  ;;  %v5475_v58 = vld [vmem:[%s13607_s1 + $0x6d8] sm:$0xff] }
 0xaa6   :  { %v5470_v2 = vld [vmem:[%s13607_s1 + $0x6b0] sm:$0xff]  ;;  %v5477_v26 = vld [vmem:[%s13607_s1 + $0x6e8] sm:$0xff]  ;;  %v12695_v24 = vpack.c.bf16 %v5479_v9, %v5475_v58  ;;  %v5480_v58 = vld [vmem:[%s13607_s1 + $0x700] sm:$0xff] }
 0xaa7   :  { %v12670_v3 = vpack.c.bf16 %v5470_v2, %v5466_v50  ;;  %v12684_v10 = vpack.c.bf16 %v5477_v26, %v5473_v20  ;;  %v5474_v44 = vld [vmem:[%s13607_s1 + $0x6d0] sm:$0xff]  ;;  %v5481_v4 = vld [vmem:[%s13607_s1 + $0x708] sm:$0xff]  ;;  %v5483_v2 = vld [vmem:[%s13607_s1 + $0x718] sm:$0xff] }
 0xaa8   :  { %7453 = vmatpush1.bf16.msra.mxu0 %v12355_v62  ;;  %7517 = vmatpush1.bf16.msra.mxu1 %v12357_v19  ;;  %13976 = vst [vmem:[#allocation6_spill] sm:$0xff] %v12695_v24  ;;  %v5478_v14 = vld [vmem:[%s13607_s1 + $0x6f0] sm:$0xff]  ;;  %v5485_v50 = vld [vmem:[%s13607_s1 + $0x728] sm:$0xff]  ;;  %v5487_v26 = vld [vmem:[%s13607_s1 + $0x738] sm:$0xff] }
 0xaa9   :  { %7455 = vmatprep.subr.bf16.mxu0 %v12367_v39  ;;  %7519 = vmatprep.subr.bf16.mxu1 %v12369_v30  ;;  %v12706_v13 = vpack.c.bf16 %v5478_v14, %v5474_v44  ;;  %v12720_v20 = vpack.c.bf16 %v5485_v50, %v5481_v4  ;;  %v5484_v9 = vld [vmem:[%s13607_s1 + $0x720] sm:$0xff]  ;;  %v12731_v33 = vpack.c.bf16 %v5487_v26, %v5483_v2  ;;  %v5482_v44 = vld [vmem:[%s13607_s1 + $0x710] sm:$0xff]  ;;  %v5489_v4 = vld [vmem:[%s13607_s1 + $0x748] sm:$0xff] }
 0xaaa   :  { %v12733_v52 = vpack.c.bf16 %v5484_v9, %v5480_v58  ;;  %v5486_v14 = vld [vmem:[%s13607_s1 + $0x730] sm:$0xff]  ;;  %v5493_v2 = vld [vmem:[%s13607_s1 + $0x768] sm:$0xff]  ;;  %v5491_v26 = vld [vmem:[%s13607_s1 + $0x758] sm:$0xff] }
 0xaab   :  { %13978 = vst [vmem:[#allocation13_spill] sm:$0xff] %v12706_v13  ;;  %13979 = vst [vmem:[#allocation3_spill] sm:$0xff] %v12720_v20  ;;  %v12745_v50 = vpack.c.bf16 %v5486_v14, %v5482_v44  ;;  %v5495_v58 = vld [vmem:[%s13607_s1 + $0x778] sm:$0xff]  ;;  %v12758_v9 = vpack.c.bf16 %v5493_v2, %v5489_v4  ;;  %v5488_v14 = vld [vmem:[%s13607_s1 + $0x740] sm:$0xff] }
 0xaac   :  { %7457 = vmatpush1.bf16.msra.mxu0 %v12391_v42  ;;  %7521 = vmatpush1.bf16.msra.mxu1 %v12393_v18  ;;  %13980 = vst [vmem:[#allocation27_spill] sm:$0xff] %v12731_v33  ;;  %13981 = vst [vmem:[#allocation9_spill] sm:$0xff] %v12733_v52  ;;  %v12760_v44 = vpack.c.bf16 %v5495_v58, %v5491_v26  ;;  %v5494_v4 = vld [vmem:[%s13607_s1 + $0x770] sm:$0xff]  ;;  %v5497_v2 = vld [vmem:[%s13607_s1 + $0x788] sm:$0xff] }
 0xaad   :  { %7459 = vmatprep.subr.bf16.mxu0 %v12400_v37  ;;  %7523 = vmatprep.subr.bf16.mxu1 %v12402_v61  ;;  %13982 = vst [vmem:[#allocation26_spill] sm:$0xff] %v12745_v50  ;;  %13983 = vst [vmem:[#allocation24_spill] sm:$0xff] %v12758_v9  ;;  %v5501_v26 = vld [vmem:[%s13607_s1 + $0x7a8] sm:$0xff] }
 0xaae   :  { %13984 = vst [vmem:[#allocation14_spill] sm:$0xff] %v12760_v44 }
 0xab0   :  { %7461 = vmatpush1.bf16.msra.mxu0 %v12415_v23  ;;  %7525 = vmatpush1.bf16.msra.mxu1 %v12417_v45 }
 0xab1   :  { %7463 = vmatprep.subr.bf16.mxu0 %v12432_v32  ;;  %7527 = vmatprep.subr.bf16.mxu1 %v12443_v53 }
 0xab4   :  { %7465 = vmatpush1.bf16.msra.mxu0 %v12445_v12  ;;  %7529 = vmatpush1.bf16.msra.mxu1 %v12454_v27 }
 0xab5   :  { %7467 = vmatprep.subr.bf16.mxu0 %v12468_v60  ;;  %7531 = vmatprep.subr.bf16.mxu1 %v12479_v8 }
 0xab8   :  { %7469 = vmatpush1.bf16.msra.mxu0 %v12481_v56  ;;  %7533 = vmatpush1.bf16.msra.mxu1 %v12490_v16 }
 0xab9   :  { %7471 = vmatprep.subr.bf16.mxu0 %v12504_v47  ;;  %7535 = vmatprep.subr.bf16.mxu1 %v12515_v1 }
 0xabc   :  { %7473 = vmatpush1.bf16.msra.mxu0 %v12517_v59  ;;  %7537 = vmatpush1.bf16.msra.mxu1 %v12526_v49 }
 0xabd   :  { %7475 = vmatprep.subr.bf16.mxu0 %v12540_v55  ;;  %7539 = vmatprep.subr.bf16.mxu1 %v12551_v22 }
 0xac0   :  { %7477 = vmatpush1.bf16.msra.mxu0 %v12553_v34  ;;  %7541 = vmatpush1.bf16.msra.mxu1 %v12562_v63 }
 0xac1   :  { %7479 = vmatprep.subr.bf16.mxu0 %v12576_v31  ;;  %7543 = vmatprep.subr.bf16.mxu1 %v12587_v28 }
 0xac4   :  { %7481 = vmatpush1.bf16.msra.mxu0 %v12589_v41  ;;  %7545 = vmatpush1.bf16.msra.mxu1 %v12598_v38 }
 0xac5   :  { %7483 = vmatprep.subr.bf16.mxu0 %v12612_v57  ;;  %7547 = vmatprep.subr.bf16.mxu1 %v12623_v21 }
 0xac8   :  { %7485 = vmatpush1.bf16.msra.mxu0 %v12625_v15  ;;  %7549 = vmatpush1.bf16.msra.mxu1 %v12634_v35 }
 0xac9   :  { %7487 = vmatprep.subr.bf16.mxu0 %v12648_v43  ;;  %7551 = vmatprep.subr.bf16.mxu1 %v12659_v7 }
 0xacc   :  { %7489 = vmatpush1.bf16.msra.mxu0 %v12661_v17  ;;  %7553 = vmatpush1.bf16.msra.mxu1 %v12670_v3 }
 0xacd   :  { %7491 = vmatprep.subr.bf16.mxu0 %v12684_v10  ;;  %7555 = vmatprep.subr.bf16.mxu1 %v12695_v24  ;;  %v5508_v24 = vld [vmem:[%s13607_s1 + $0x7e0] sm:$0xff] }
 0xad0   :  { %7493 = vmatpush1.bf16.msra.mxu0 %v12697_v5  ;;  %7557 = vmatpush1.bf16.msra.mxu1 %v12706_v13  ;;  %v5490_v13 = vld [vmem:[%s13607_s1 + $0x750] sm:$0xff] }
 0xad1   :  { %7495 = vmatprep.subr.bf16.mxu0 %v12720_v20  ;;  %7559 = vmatprep.subr.bf16.mxu1 %v12731_v33  ;;  %v5492_v20 = vld [vmem:[%s13607_s1 + $0x760] sm:$0xff]  ;;  %v12785_v58 = vpack.c.bf16 %v5494_v4, %v5490_v13  ;;  %v5498_v4 = vld [vmem:[%s13607_s1 + $0x790] sm:$0xff] }
 0xad2   :  { %v12772_v33 = vpack.c.bf16 %v5492_v20, %v5488_v14  ;;  %v12787_v20 = vpack.c.bf16 %v5501_v26, %v5497_v2  ;;  %v5499_v14 = vld [vmem:[%s13607_s1 + $0x798] sm:$0xff]  ;;  %v5500_v13 = vld [vmem:[%s13607_s1 + $0x7a0] sm:$0xff]  ;;  %v5502_v2 = vld [vmem:[%s13607_s1 + $0x7b0] sm:$0xff] }
 0xad3   :  { %13986 = vst [vmem:[#allocation28_spill] sm:$0xff] %v12785_v58 }
 0xad4   :  { %7497 = vmatpush1.bf16.msra.mxu0 %v12733_v52  ;;  %7561 = vmatpush1.bf16.msra.mxu1 %v12745_v50  ;;  %13985 = vst [vmem:[#allocation17_spill] sm:$0xff] %v12772_v33  ;;  %v5503_v50 = vld [vmem:[%s13607_s1 + $0x7b8] sm:$0xff]  ;;  %v5496_v52 = vld [vmem:[%s13607_s1 + $0x780] sm:$0xff] }
 0xad5   :  { %7499 = vmatprep.subr.bf16.mxu0 %v12758_v9  ;;  %7563 = vmatprep.subr.bf16.mxu1 %v12760_v44  ;;  %v12798_v5 = vpack.c.bf16 %v5503_v50, %v5499_v14  ;;  %v12810_v26 = vpack.c.bf16 %v5500_v13, %v5496_v52  ;;  %v5505_v50 = vld [vmem:[%s13607_s1 + $0x7c8] sm:$0xff]  ;;  %v5507_v44 = vld [vmem:[%s13607_s1 + $0x7d8] sm:$0xff]  ;;  %v12823_v9 = vpack.c.bf16 %v5502_v2, %v5498_v4  ;;  %v5506_v4 = vld [vmem:[%s13607_s1 + $0x7d0] sm:$0xff] }
 0xad6   :  { %v5509_v14 = vld [vmem:[%s13607_s1 + $0x7e8] sm:$0xff]  ;;  %v5511_v13 = vld [vmem:[%s13607_s1 + $0x7f8] sm:$0xff]  ;;  %v5510_v2 = vld [vmem:[%s13607_s1 + $0x7f0] sm:$0xff] }
 0xad7   :  { %13987 = vst [vmem:[#allocation12_spill] sm:$0xff] %v12798_v5  ;;  %13988 = vst [vmem:[#allocation30_spill] sm:$0xff] %v12810_v26  ;;  %v12825_v52 = vpack.c.bf16 %v5509_v14, %v5505_v50  ;;  %v12850_v14 = vpack.c.bf16 %v5510_v2, %v5506_v4 }
 0xad8   :  { %7501 = vmatpush1.bf16.msra.mxu0 %v12772_v33  ;;  %7565 = vmatpush1.bf16.msra.mxu1 %v12785_v58  ;;  %13989 = vst [vmem:[#allocation8_spill] sm:$0xff] %v12823_v9  ;;  %v5504_v33 = vld [vmem:[%s13607_s1 + $0x7c0] sm:$0xff]  ;;  %v12837_v58 = vpack.c.bf16 %v5511_v13, %v5507_v44 }
 0xad9   :  { %7503 = vmatprep.subr.bf16.mxu0 %v12787_v20  ;;  %13990 = vst [vmem:[#allocation10_spill] sm:$0xff] %v12825_v52  ;;  %7567 = vmatprep.subr.bf16.mxu1 %v12798_v5  ;;  %v12846_v50 = vpack.c.bf16 %v5508_v24, %v5504_v33  ;;  %13993 = vst [vmem:[#allocation21_spill] sm:$0xff] %v12850_v14 }
 0xada   :  { %13991 = vst [vmem:[#allocation25_spill] sm:$0xff] %v12837_v58 }
 0xadb   :  { %13992 = vst [vmem:[#allocation23_spill] sm:$0xff] %v12846_v50 }
 0xadc   :  { %7505 = vmatpush1.bf16.msra.mxu0 %v12810_v26  ;;  %7569 = vmatpush1.bf16.msra.mxu1 %v12823_v9 }
 0xadd   :  { %7507 = vmatprep.subr.bf16.mxu0 %v12825_v52  ;;  %7571 = vmatprep.subr.bf16.mxu1 %v12837_v58 }
 0xae0   :  { %7509 = vmatpush1.bf16.msra.mxu0 %v12846_v50  ;;  %7573 = vmatpush1.bf16.msra.mxu1 %v12850_v14 }
 0xae1   :  { %7575 = vmatprep.subr.bf16.mxu0 %v12278_v6  ;;  %7639 = vmatprep.subr.bf16.mxu1 %v12283_v46 }
 0xb76   :  { %v3538_v44 = vpop.f32.mrb[22].mxu0  ;;  %v3609_v13 = vpop.f32.mrb[22].mxu1 }
 0xb77   :  { %v3539_v24 = vadd.f32 %v3538_v44, %v13974_v11  ;;  %v3540_v33 = vpop.f32.mrb[23].mxu0  ;;  %v3611_v9 = vpop.f32.mrb[23].mxu1  ;;  %v3610_v14 = vadd.f32 %v3609_v13, %v11629_v25 }
 0xb78   :  { %v3541_v52 = vadd.f32 %v3540_v33, %v11618_v36  ;;  %v3612_v50 = vadd.f32 %v3611_v9, %v11624_v54 }
 0xb79   :  { %v5381_v4 = vmul.f32 -1.442695, %v3539_v24 }
 0xb7a   :  { %v5382_v2 = vmul.f32 -1.442695, %v3541_v52  ;;  %v5383_v58 = vmul.f32 -1.442695, %v3612_v50 }
 0xb7b   :  { %8135 = vpow2.f32 %v5381_v4 }
 0xb7c   :  { %8137 = vpow2.f32 %v5382_v2 }
 0xb7d   :  { %8139 = vpow2.f32 %v5383_v58 }
 0xb7e   :  { %8141 = vtanh.f32 %v3610_v14 }
 0xb85   :  { %v8136_v6 = vpop.eup %8135 }
 0xb86   :  { %v8138_v26 = vpop.eup %8137  ;;  %v3617_v46 = vadd.f32 1.0, %v8136_v6  ;;  %v5646_v6 = vld [vmem:[%s13607_s1 + $0x400] sm:$0xff] }
 0xb87   :  { %v3623_v5 = vadd.f32 1.0, %v8138_v26  ;;  %v8140_v44 = vpop.eup %8139  ;;  %v13994_v26 = vld [vmem:[#allocation16_spill] sm:$0xff] }
 0xb88   :  { %8143 = vrcp.f32 %v3617_v46  ;;  %v8142_v11 = vpop.eup %8141  ;;  %v3630_v4 = vadd.f32 1.0, %v8140_v44  ;;  %v5650_v46 = vld [vmem:[%s13607_s1 + $0x420] sm:$0xff]  ;;  %v5648_v44 = vld [vmem:[%s13607_s1 + $0x410] sm:$0xff] }
 0xb89   :  { %8145 = vrcp.f32 %v3623_v5 }
 0xb8a   :  { %8147 = vrcp.f32 %v3630_v4  ;;  %v5659_v4 = vld [vmem:[%s13607_s1 + $0x468] sm:$0xff] }
 0xb92   :  { %v8144_v33 = vpop.eup %8143 }
 0xb93   :  { %v8146_v24 = vpop.eup %8145  ;;  %v3634_v52 = vmul.f32 %v8144_v33, %v8142_v11  ;;  %v13995_v11 = vld [vmem:[#allocation6_spill] sm:$0xff]  ;;  %v5652_v33 = vld [vmem:[%s13607_s1 + $0x430] sm:$0xff] }
 0xb94   :  { %v3633_v2 = vmul.f32 %v8146_v24, %v12292_v0  ;;  %v8148_v50 = vpop.eup %8147  ;;  %v13996_v0 = vld [vmem:[#allocation7_spill] sm:$0xff]  ;;  %v5655_v24 = vld [vmem:[%s13607_s1 + $0x448] sm:$0xff] }
 0xb96   :  { %v12862_v9 = vadd.f32 %v3634_v52, %v3633_v2  ;;  %v5657_v2 = vld [vmem:[%s13607_s1 + $0x458] sm:$0xff] }
 0xb98   :  { %8149 = vtanh.f32 %v12862_v9 }
 0xba2   :  { %v8150_v13 = vpop.eup %8149 }
 0xba3   :  { %v3637_v58 = vmul.f32 %v8150_v13, %v8148_v50 }
 0xba5   :  { %3832 = vmatprep.mubr.f32.mxu0 %v3637_v58  ;;  %3903 = vmatprep.mubr.f32.mxu1 %v3637_v58  ;;  %v12979_v58 = vpack.c.bf16 %v5650_v46, %v5646_v6  ;;  %v5687_v46 = vld [vmem:[%s13607_s1 + $0x548] sm:$0xff] }
 0xba6   :  { %3833 = vmatmul.mubr.f32.vlgmr.msra.gmra.mrb[24].mxu0 %v13994_v26  ;;  %3904 = vmatmul.mubr.f32.vlgmr.msra.gmra.mrb[24].mxu1 %v13994_v26  ;;  %v12981_v26 = vpack.c.bf16 %v5652_v33, %v5648_v44  ;;  %v5691_v44 = vld [vmem:[%s13607_s1 + $0x568] sm:$0xff]  ;;  %v5689_v33 = vld [vmem:[%s13607_s1 + $0x558] sm:$0xff] }
 0xba7   :  { %7577 = vmatpush1.bf16.msra.mxu0 %v12319_v48  ;;  %7641 = vmatpush1.bf16.msra.mxu1 %v12321_v51  ;;  %v13997_v48 = vld [vmem:[#allocation13_spill] sm:$0xff]  ;;  %v13998_v51 = vld [vmem:[#allocation3_spill] sm:$0xff] }
 0xba8   :  { %7579 = vmatprep.subr.bf16.mxu0 %v12329_v40  ;;  %7643 = vmatprep.subr.bf16.mxu1 %v12331_v29  ;;  %v13999_v40 = vld [vmem:[#allocation27_spill] sm:$0xff]  ;;  %v14000_v29 = vld [vmem:[#allocation9_spill] sm:$0xff] }
 0xbab   :  { %7581 = vmatpush1.bf16.msra.mxu0 %v12355_v62  ;;  %7645 = vmatpush1.bf16.msra.mxu1 %v12357_v19  ;;  %v14001_v62 = vld [vmem:[#allocation26_spill] sm:$0xff]  ;;  %v14002_v19 = vld [vmem:[#allocation24_spill] sm:$0xff] }
 0xbac   :  { %7583 = vmatprep.subr.bf16.mxu0 %v12367_v39  ;;  %7647 = vmatprep.subr.bf16.mxu1 %v12369_v30  ;;  %v14003_v39 = vld [vmem:[#allocation14_spill] sm:$0xff]  ;;  %v14004_v30 = vld [vmem:[#allocation17_spill] sm:$0xff] }
 0xbaf   :  { %7585 = vmatpush1.bf16.msra.mxu0 %v12391_v42  ;;  %7649 = vmatpush1.bf16.msra.mxu1 %v12393_v18  ;;  %v14005_v42 = vld [vmem:[#allocation28_spill] sm:$0xff] }
 0xbb0   :  { %7587 = vmatprep.subr.bf16.mxu0 %v12400_v37  ;;  %7651 = vmatprep.subr.bf16.mxu1 %v12402_v61  ;;  %v14006_v18 = vld [vmem:[#allocation12_spill] sm:$0xff]  ;;  %v14007_v37 = vld [vmem:[#allocation30_spill] sm:$0xff] }
 0xbb1   :  { %v14008_v61 = vld [vmem:[#allocation8_spill] sm:$0xff] }
 0xbb3   :  { %7589 = vmatpush1.bf16.msra.mxu0 %v12415_v23  ;;  %7653 = vmatpush1.bf16.msra.mxu1 %v12417_v45  ;;  %v14009_v23 = vld [vmem:[#allocation10_spill] sm:$0xff]  ;;  %v14010_v45 = vld [vmem:[#allocation25_spill] sm:$0xff] }
 0xbb4   :  { %7591 = vmatprep.subr.bf16.mxu0 %v12432_v32  ;;  %7655 = vmatprep.subr.bf16.mxu1 %v12443_v53  ;;  %v14011_v32 = vld [vmem:[#allocation23_spill] sm:$0xff]  ;;  %v14012_v53 = vld [vmem:[#allocation21_spill] sm:$0xff] }
 0xbb7   :  { %7593 = vmatpush1.bf16.msra.mxu0 %v12445_v12  ;;  %7657 = vmatpush1.bf16.msra.mxu1 %v12454_v27  ;;  %v5647_v12 = vld [vmem:[%s13607_s1 + $0x408] sm:$0xff] }
 0xbb8   :  { %7595 = vmatprep.subr.bf16.mxu0 %v12468_v60  ;;  %7659 = vmatprep.subr.bf16.mxu1 %v12479_v8  ;;  %v5651_v27 = vld [vmem:[%s13607_s1 + $0x428] sm:$0xff]  ;;  %v5649_v60 = vld [vmem:[%s13607_s1 + $0x418] sm:$0xff] }
 0xbb9   :  { %v12938_v8 = vpack.c.bf16 %v5651_v27, %v5647_v12  ;;  %v5668_v12 = vld [vmem:[%s13607_s1 + $0x4b0] sm:$0xff]  ;;  %v5671_v27 = vld [vmem:[%s13607_s1 + $0x4c8] sm:$0xff] }
 0xbbb   :  { %7597 = vmatpush1.bf16.msra.mxu0 %v12481_v56  ;;  %7661 = vmatpush1.bf16.msra.mxu1 %v12490_v16  ;;  %v5653_v56 = vld [vmem:[%s13607_s1 + $0x438] sm:$0xff] }
 0xbbc   :  { %7599 = vmatprep.subr.bf16.mxu0 %v12504_v47  ;;  %7663 = vmatprep.subr.bf16.mxu1 %v12515_v1  ;;  %v12943_v16 = vpack.c.bf16 %v5653_v56, %v5649_v60  ;;  %v5675_v60 = vld [vmem:[%s13607_s1 + $0x4e8] sm:$0xff]  ;;  %v5673_v56 = vld [vmem:[%s13607_s1 + $0x4d8] sm:$0xff] }
 0xbbf   :  { %7601 = vmatpush1.bf16.msra.mxu0 %v12517_v59  ;;  %7665 = vmatpush1.bf16.msra.mxu1 %v12526_v49  ;;  %v14013_v59 = vld [vmem:[#allocation11_spill] sm:$0xff] }
 0xbc0   :  { %7603 = vmatprep.subr.bf16.mxu0 %v12540_v55  ;;  %7667 = vmatprep.subr.bf16.mxu1 %v12551_v22 }
 0xbc3   :  { %7605 = vmatpush1.bf16.msra.mxu0 %v12553_v34  ;;  %7669 = vmatpush1.bf16.msra.mxu1 %v12562_v63 }
 0xbc4   :  { %7607 = vmatprep.subr.bf16.mxu0 %v12576_v31  ;;  %7671 = vmatprep.subr.bf16.mxu1 %v12587_v28 }
 0xbc7   :  { %7609 = vmatpush1.bf16.msra.mxu0 %v12589_v41  ;;  %7673 = vmatpush1.bf16.msra.mxu1 %v12598_v38 }
 0xbc8   :  { %7611 = vmatprep.subr.bf16.mxu0 %v12612_v57  ;;  %7675 = vmatprep.subr.bf16.mxu1 %v12623_v21 }
 0xbcb   :  { %7613 = vmatpush1.bf16.msra.mxu0 %v12625_v15  ;;  %7677 = vmatpush1.bf16.msra.mxu1 %v12634_v35 }
 0xbcc   :  { %7615 = vmatprep.subr.bf16.mxu0 %v12648_v43  ;;  %7679 = vmatprep.subr.bf16.mxu1 %v12659_v7 }
 0xbcf   :  { %7617 = vmatpush1.bf16.msra.mxu0 %v12661_v17  ;;  %7681 = vmatpush1.bf16.msra.mxu1 %v12670_v3 }
 0xbd0   :  { %7619 = vmatprep.subr.bf16.mxu0 %v12684_v10  ;;  %7683 = vmatprep.subr.bf16.mxu1 %v13995_v11  ;;  %v5654_v11 = vld [vmem:[%s13607_s1 + $0x440] sm:$0xff] }
 0xbd3   :  { %7621 = vmatpush1.bf16.msra.mxu0 %v13996_v0  ;;  %7685 = vmatpush1.bf16.msra.mxu1 %v13997_v48  ;;  %v5658_v0 = vld [vmem:[%s13607_s1 + $0x460] sm:$0xff]  ;;  %v12989_v48 = vpack.c.bf16 %v5659_v4, %v5655_v24  ;;  %v13128_v24 = vpack.c.bf16 %v5691_v44, %v5687_v46  ;;  %v5717_v44 = vld [vmem:[%s13607_s1 + $0x638] sm:$0xff] }
 0xbd4   :  { %7623 = vmatprep.subr.bf16.mxu0 %v13998_v51  ;;  %7687 = vmatprep.subr.bf16.mxu1 %v13999_v40  ;;  %v5656_v40 = vld [vmem:[%s13607_s1 + $0x450] sm:$0xff]  ;;  %v5686_v4 = vld [vmem:[%s13607_s1 + $0x540] sm:$0xff] }
 0xbd7   :  { %7625 = vmatpush1.bf16.msra.mxu0 %v14000_v29  ;;  %7689 = vmatpush1.bf16.msra.mxu1 %v14001_v62  ;;  %v5660_v29 = vld [vmem:[%s13607_s1 + $0x470] sm:$0xff]  ;;  %v5663_v62 = vld [vmem:[%s13607_s1 + $0x488] sm:$0xff] }
 0xbd8   :  { %7627 = vmatprep.subr.bf16.mxu0 %v14002_v19  ;;  %7691 = vmatprep.subr.bf16.mxu1 %v14003_v39  ;;  %v5667_v19 = vld [vmem:[%s13607_s1 + $0x4a8] sm:$0xff]  ;;  %v5665_v39 = vld [vmem:[%s13607_s1 + $0x498] sm:$0xff] }
 0xbdb   :  { %7629 = vmatpush1.bf16.msra.mxu0 %v14004_v30  ;;  %7693 = vmatpush1.bf16.msra.mxu1 %v14005_v42  ;;  %v5669_v30 = vld [vmem:[%s13607_s1 + $0x4b8] sm:$0xff]  ;;  %v14014_v42 = vld [vmem:[#allocation31_spill] sm:$0xff] }
 0xbdc   :  { %7631 = vmatprep.subr.bf16.mxu0 %v12787_v20  ;;  %7695 = vmatprep.subr.bf16.mxu1 %v14006_v18  ;;  %v13015_v18 = vpack.c.bf16 %v5658_v0, %v5654_v11  ;;  %v5692_v11 = vld [vmem:[%s13607_s1 + $0x570] sm:$0xff] }
 0xbdf   :  { %7633 = vmatpush1.bf16.msra.mxu0 %v14007_v37  ;;  %7697 = vmatpush1.bf16.msra.mxu1 %v14008_v61  ;;  %v13017_v37 = vpack.c.bf16 %v5660_v29, %v5656_v40  ;;  %v5662_v61 = vld [vmem:[%s13607_s1 + $0x480] sm:$0xff]  ;;  %v5695_v40 = vld [vmem:[%s13607_s1 + $0x588] sm:$0xff] }
 0xbe0   :  { %7635 = vmatprep.subr.bf16.mxu0 %v14009_v23  ;;  %7699 = vmatprep.subr.bf16.mxu1 %v14010_v45  ;;  %v5666_v23 = vld [vmem:[%s13607_s1 + $0x4a0] sm:$0xff]  ;;  %v13027_v45 = vpack.c.bf16 %v5667_v19, %v5663_v62  ;;  %v5699_v29 = vld [vmem:[%s13607_s1 + $0x5a8] sm:$0xff]  ;;  %v5697_v62 = vld [vmem:[%s13607_s1 + $0x598] sm:$0xff] }
 0xbe1   :  { %v13164_v19 = vpack.c.bf16 %v5699_v29, %v5695_v40  ;;  %v5719_v29 = vld [vmem:[%s13607_s1 + $0x648] sm:$0xff] }
 0xbe3   :  { %7637 = vmatpush1.bf16.msra.mxu0 %v14011_v32  ;;  %7701 = vmatpush1.bf16.msra.mxu1 %v14012_v53  ;;  %v13029_v32 = vpack.c.bf16 %v5669_v30, %v5665_v39  ;;  %v5664_v53 = vld [vmem:[%s13607_s1 + $0x490] sm:$0xff]  ;;  %v5701_v39 = vld [vmem:[%s13607_s1 + $0x5b8] sm:$0xff]  ;;  %v5694_v30 = vld [vmem:[%s13607_s1 + $0x580] sm:$0xff] }
 0xbe4   :  { %7703 = vmatprep.subr.bf16.mxu0 %v12938_v8  ;;  %7767 = vmatprep.subr.bf16.mxu1 %v12943_v16 }
 0xc79   :  { %v3834_v47 = vpop.f32.mrb[24].mxu0  ;;  %v3905_v1 = vpop.f32.mrb[24].mxu1 }
 0xc7a   :  { %v3835_v49 = vadd.f32 %v3834_v47, %v14013_v59  ;;  %v3836_v55 = vpop.f32.mrb[25].mxu0  ;;  %v3907_v22 = vpop.f32.mrb[25].mxu1  ;;  %v3906_v38 = vadd.f32 %v3905_v1, %v11629_v25  ;;  %v5677_v47 = vld [vmem:[%s13607_s1 + $0x4f8] sm:$0xff]  ;;  %v13051_v1 = vpack.c.bf16 %v5666_v23, %v5662_v61  ;;  %v13175_v61 = vpack.c.bf16 %v5701_v39, %v5697_v62  ;;  %v5723_v62 = vld [vmem:[%s13607_s1 + $0x668] sm:$0xff] }
 0xc7b   :  { %v3837_v34 = vadd.f32 %v3836_v55, %v11618_v36  ;;  %v3908_v28 = vadd.f32 %v3907_v22, %v11624_v54  ;;  %v5670_v55 = vld [vmem:[%s13607_s1 + $0x4c0] sm:$0xff]  ;;  %v13060_v22 = vpack.c.bf16 %v5675_v60, %v5671_v27  ;;  %v5703_v60 = vld [vmem:[%s13607_s1 + $0x5c8] sm:$0xff]  ;;  %v5721_v39 = vld [vmem:[%s13607_s1 + $0x658] sm:$0xff] }
 0xc7c   :  { %v5512_v63 = vmul.f32 -1.442695, %v3835_v49  ;;  %v13053_v49 = vpack.c.bf16 %v5668_v12, %v5664_v53  ;;  %v5696_v53 = vld [vmem:[%s13607_s1 + $0x590] sm:$0xff] }
 0xc7d   :  { %v5513_v31 = vmul.f32 -1.442695, %v3837_v34  ;;  %v5514_v41 = vmul.f32 -1.442695, %v3908_v28  ;;  %v13062_v34 = vpack.c.bf16 %v5677_v47, %v5673_v56  ;;  %v5676_v28 = vld [vmem:[%s13607_s1 + $0x4f0] sm:$0xff]  ;;  %v5707_v56 = vld [vmem:[%s13607_s1 + $0x5e8] sm:$0xff] }
 0xc7e   :  { %8151 = vpow2.f32 %v5512_v63  ;;  %v5674_v63 = vld [vmem:[%s13607_s1 + $0x4e0] sm:$0xff]  ;;  %v5700_v12 = vld [vmem:[%s13607_s1 + $0x5b0] sm:$0xff]  ;;  %v5705_v47 = vld [vmem:[%s13607_s1 + $0x5d8] sm:$0xff] }
 0xc7f   :  { %8153 = vpow2.f32 %v5513_v31  ;;  %v5672_v31 = vld [vmem:[%s13607_s1 + $0x4d0] sm:$0xff]  ;;  %v13186_v27 = vpack.c.bf16 %v5700_v12, %v5696_v53  ;;  %v5718_v53 = vld [vmem:[%s13607_s1 + $0x640] sm:$0xff] }
 0xc80   :  { %8155 = vpow2.f32 %v5514_v41  ;;  %v13075_v41 = vpack.c.bf16 %v5674_v63, %v5670_v55  ;;  %v13200_v55 = vpack.c.bf16 %v5707_v56, %v5703_v60  ;;  %v5709_v63 = vld [vmem:[%s13607_s1 + $0x5f8] sm:$0xff]  ;;  %v5722_v12 = vld [vmem:[%s13607_s1 + $0x660] sm:$0xff] }
 0xc81   :  { %8157 = vtanh.f32 %v3906_v38  ;;  %v13077_v38 = vpack.c.bf16 %v5676_v28, %v5672_v31  ;;  %v5702_v31 = vld [vmem:[%s13607_s1 + $0x5c0] sm:$0xff]  ;;  %v13285_v56 = vpack.c.bf16 %v5722_v12, %v5718_v53  ;;  %v5741_v12 = vld [vmem:[%s13607_s1 + $0x6f8] sm:$0xff] }
 0xc82   :  { %v5706_v28 = vld [vmem:[%s13607_s1 + $0x5e0] sm:$0xff] }
 0xc88   :  { %v8152_v57 = vpop.eup %8151 }
 0xc89   :  { %v8154_v21 = vpop.eup %8153  ;;  %v3913_v15 = vadd.f32 1.0, %v8152_v57  ;;  %v5679_v57 = vld [vmem:[%s13607_s1 + $0x508] sm:$0xff] }
 0xc8a   :  { %v3919_v35 = vadd.f32 1.0, %v8154_v21  ;;  %v8156_v43 = vpop.eup %8155  ;;  %v5683_v21 = vld [vmem:[%s13607_s1 + $0x528] sm:$0xff] }
 0xc8b   :  { %8159 = vrcp.f32 %v3913_v15  ;;  %v8158_v7 = vpop.eup %8157  ;;  %v3926_v5 = vadd.f32 1.0, %v8156_v43  ;;  %v5681_v15 = vld [vmem:[%s13607_s1 + $0x518] sm:$0xff] }
 0xc8c   :  { %8161 = vrcp.f32 %v3919_v35  ;;  %v13092_v35 = vpack.c.bf16 %v5683_v21, %v5679_v57  ;;  %v5685_v43 = vld [vmem:[%s13607_s1 + $0x538] sm:$0xff]  ;;  %v13211_v57 = vpack.c.bf16 %v5709_v63, %v5705_v47  ;;  %v13213_v21 = vpack.c.bf16 %v5706_v28, %v5702_v31  ;;  %v5720_v47 = vld [vmem:[%s13607_s1 + $0x650] sm:$0xff]  ;;  %v5727_v28 = vld [vmem:[%s13607_s1 + $0x688] sm:$0xff] }
 0xc8d   :  { %8163 = vrcp.f32 %v3926_v5  ;;  %v5680_v5 = vld [vmem:[%s13607_s1 + $0x510] sm:$0xff] }
 0xc8e   :  { %v5724_v63 = vld [vmem:[%s13607_s1 + $0x670] sm:$0xff] }
 0xc8f   :  { %v13294_v31 = vpack.c.bf16 %v5724_v63, %v5720_v47  ;;  %v5734_v47 = vld [vmem:[%s13607_s1 + $0x6c0] sm:$0xff] }
 0xc90   :  { %v5738_v63 = vld [vmem:[%s13607_s1 + $0x6e0] sm:$0xff] }
 0xc95   :  { %v8160_v17 = vpop.eup %8159 }
 0xc96   :  { %v8162_v3 = vpop.eup %8161  ;;  %v3930_v10 = vmul.f32 %v8160_v17, %v8158_v7  ;;  %v5678_v7 = vld [vmem:[%s13607_s1 + $0x500] sm:$0xff] }
 0xc97   :  { %v3929_v20 = vmul.f32 %v8162_v3, %v12862_v9  ;;  %v8164_v52 = vpop.eup %8163  ;;  %v5661_v9 = vld [vmem:[%s13607_s1 + $0x478] sm:$0xff]  ;;  %v5682_v17 = vld [vmem:[%s13607_s1 + $0x520] sm:$0xff]  ;;  %v13103_v3 = vpack.c.bf16 %v5685_v43, %v5681_v15  ;;  %v5704_v15 = vld [vmem:[%s13607_s1 + $0x5d0] sm:$0xff] }
 0xc98   :  { %v12991_v51 = vpack.c.bf16 %v5661_v9, %v5657_v2  ;;  %v5690_v2 = vld [vmem:[%s13607_s1 + $0x560] sm:$0xff]  ;;  %v5708_v43 = vld [vmem:[%s13607_s1 + $0x5f0] sm:$0xff] }
 0xc99   :  { %v12952_v14 = vadd.f32 %v3930_v10, %v3929_v20  ;;  %v13105_v10 = vpack.c.bf16 %v5682_v17, %v5678_v7  ;;  %v5684_v20 = vld [vmem:[%s13607_s1 + $0x530] sm:$0xff]  ;;  %v13222_v7 = vpack.c.bf16 %v5708_v43, %v5704_v15  ;;  %v5711_v17 = vld [vmem:[%s13607_s1 + $0x608] sm:$0xff]  ;;  %v5729_v43 = vld [vmem:[%s13607_s1 + $0x698] sm:$0xff] }
 0xc9a   :  { %v13114_v6 = vpack.c.bf16 %v5684_v20, %v5680_v5  ;;  %v5715_v5 = vld [vmem:[%s13607_s1 + $0x628] sm:$0xff]  ;;  %v5713_v20 = vld [vmem:[%s13607_s1 + $0x618] sm:$0xff] }
 0xc9b   :  { %8165 = vtanh.f32 %v12952_v14  ;;  %v13236_v46 = vpack.c.bf16 %v5715_v5, %v5711_v17  ;;  %v5731_v15 = vld [vmem:[%s13607_s1 + $0x6a8] sm:$0xff]  ;;  %v5733_v5 = vld [vmem:[%s13607_s1 + $0x6b8] sm:$0xff] }
 0xc9c   :  { %v13308_v17 = vpack.c.bf16 %v5731_v15, %v5727_v28  ;;  %v13357_v15 = vpack.c.bf16 %v5738_v63, %v5734_v47 }
 0xc9e   :  { %14016 = vst [vmem:[#allocation18_spill] sm:$0xff] %v13357_v15 }
 0xca5   :  { %v8166_v50 = vpop.eup %8165 }
 0xca6   :  { %v3933_v13 = vmul.f32 %v8166_v50, %v8164_v52  ;;  %v5693_v52 = vld [vmem:[%s13607_s1 + $0x578] sm:$0xff]  ;;  %v13141_v50 = vpack.c.bf16 %v5690_v2, %v5686_v4  ;;  %v13247_v4 = vpack.c.bf16 %v5717_v44, %v5713_v20  ;;  %v5726_v20 = vld [vmem:[%s13607_s1 + $0x680] sm:$0xff] }
 0xca7   :  { %v13139_v9 = vpack.c.bf16 %v5693_v52, %v5689_v33  ;;  %v5710_v33 = vld [vmem:[%s13607_s1 + $0x600] sm:$0xff] }
 0xca8   :  { %4128 = vmatprep.mubr.f32.mxu0 %v3933_v13  ;;  %4199 = vmatprep.mubr.f32.mxu1 %v3933_v13  ;;  %v5688_v13 = vld [vmem:[%s13607_s1 + $0x550] sm:$0xff]  ;;  %v5714_v52 = vld [vmem:[%s13607_s1 + $0x620] sm:$0xff] }
 0xca9   :  { %4129 = vmatmul.mubr.f32.vlgmr.msra.gmra.mrb[26].mxu0 %v14014_v42  ;;  %4200 = vmatmul.mubr.f32.vlgmr.msra.gmra.mrb[26].mxu1 %v14014_v42  ;;  %v13150_v0 = vpack.c.bf16 %v5692_v11, %v5688_v13  ;;  %v5698_v42 = vld [vmem:[%s13607_s1 + $0x5a0] sm:$0xff]  ;;  %v13249_v2 = vpack.c.bf16 %v5714_v52, %v5710_v33  ;;  %v5712_v13 = vld [vmem:[%s13607_s1 + $0x610] sm:$0xff]  ;;  %v13319_v33 = vpack.c.bf16 %v5733_v5, %v5729_v43 }
 0xcaa   :  { %7705 = vmatpush1.bf16.msra.mxu0 %v12979_v58  ;;  %7769 = vmatpush1.bf16.msra.mxu1 %v12981_v26  ;;  %v13177_v23 = vpack.c.bf16 %v5698_v42, %v5694_v30  ;;  %v5716_v11 = vld [vmem:[%s13607_s1 + $0x630] sm:$0xff]  ;;  %v13272_v30 = vpack.c.bf16 %v5723_v62, %v5719_v29  ;;  %v5725_v42 = vld [vmem:[%s13607_s1 + $0x678] sm:$0xff]  ;;  %v5730_v44 = vld [vmem:[%s13607_s1 + $0x6a0] sm:$0xff] }
 0xcab   :  { %7707 = vmatprep.subr.bf16.mxu0 %v12989_v48  ;;  %7771 = vmatprep.subr.bf16.mxu1 %v12991_v51  ;;  %v13258_v40 = vpack.c.bf16 %v5716_v11, %v5712_v13  ;;  %v13283_v60 = vpack.c.bf16 %v5725_v42, %v5721_v39  ;;  %v13321_v52 = vpack.c.bf16 %v5730_v44, %v5726_v20  ;;  %v5728_v13 = vld [vmem:[%s13607_s1 + $0x690] sm:$0xff]  ;;  %v5735_v62 = vld [vmem:[%s13607_s1 + $0x6c8] sm:$0xff]  ;;  %v5737_v42 = vld [vmem:[%s13607_s1 + $0x6d8] sm:$0xff] }
 0xcac   :  { %v5732_v11 = vld [vmem:[%s13607_s1 + $0x6b0] sm:$0xff]  ;;  %v5739_v39 = vld [vmem:[%s13607_s1 + $0x6e8] sm:$0xff]  ;;  %v13355_v28 = vpack.c.bf16 %v5741_v12, %v5737_v42  ;;  %v5742_v42 = vld [vmem:[%s13607_s1 + $0x700] sm:$0xff] }
 0xcad   :  { %v13330_v29 = vpack.c.bf16 %v5732_v11, %v5728_v13  ;;  %v13344_v53 = vpack.c.bf16 %v5739_v39, %v5735_v62  ;;  %v5736_v43 = vld [vmem:[%s13607_s1 + $0x6d0] sm:$0xff]  ;;  %v5743_v44 = vld [vmem:[%s13607_s1 + $0x708] sm:$0xff]  ;;  %v5745_v11 = vld [vmem:[%s13607_s1 + $0x718] sm:$0xff] }
 0xcae   :  { %7709 = vmatpush1.bf16.msra.mxu0 %v13015_v18  ;;  %7773 = vmatpush1.bf16.msra.mxu1 %v13017_v37  ;;  %14015 = vst [vmem:[#allocation19_spill] sm:$0xff] %v13355_v28  ;;  %v5740_v5 = vld [vmem:[%s13607_s1 + $0x6f0] sm:$0xff]  ;;  %v5747_v13 = vld [vmem:[%s13607_s1 + $0x728] sm:$0xff]  ;;  %v5749_v39 = vld [vmem:[%s13607_s1 + $0x738] sm:$0xff] }
 0xcaf   :  { %7711 = vmatprep.subr.bf16.mxu0 %v13027_v45  ;;  %7775 = vmatprep.subr.bf16.mxu1 %v13029_v32  ;;  %v13366_v20 = vpack.c.bf16 %v5740_v5, %v5736_v43  ;;  %v13380_v62 = vpack.c.bf16 %v5747_v13, %v5743_v44  ;;  %v5746_v12 = vld [vmem:[%s13607_s1 + $0x720] sm:$0xff]  ;;  %v13391_v47 = vpack.c.bf16 %v5749_v39, %v5745_v11  ;;  %v5744_v43 = vld [vmem:[%s13607_s1 + $0x710] sm:$0xff]  ;;  %v5751_v44 = vld [vmem:[%s13607_s1 + $0x748] sm:$0xff] }
 0xcb0   :  { %v13393_v63 = vpack.c.bf16 %v5746_v12, %v5742_v42  ;;  %v5748_v5 = vld [vmem:[%s13607_s1 + $0x730] sm:$0xff]  ;;  %v5755_v11 = vld [vmem:[%s13607_s1 + $0x768] sm:$0xff]  ;;  %v5753_v39 = vld [vmem:[%s13607_s1 + $0x758] sm:$0xff] }
 0xcb1   :  { %14017 = vst [vmem:[#allocation15_spill] sm:$0xff] %v13366_v20  ;;  %14018 = vst [vmem:[#allocation22_spill] sm:$0xff] %v13380_v62  ;;  %v13405_v13 = vpack.c.bf16 %v5748_v5, %v5744_v43  ;;  %v5757_v42 = vld [vmem:[%s13607_s1 + $0x778] sm:$0xff]  ;;  %v13418_v12 = vpack.c.bf16 %v5755_v11, %v5751_v44  ;;  %v5750_v5 = vld [vmem:[%s13607_s1 + $0x740] sm:$0xff] }
 0xcb2   :  { %7713 = vmatpush1.bf16.msra.mxu0 %v13051_v1  ;;  %7777 = vmatpush1.bf16.msra.mxu1 %v13053_v49  ;;  %14019 = vst [vmem:[#allocation4_spill] sm:$0xff] %v13391_v47  ;;  %14020 = vst [vmem:[#allocation5_spill] sm:$0xff] %v13393_v63  ;;  %v13420_v43 = vpack.c.bf16 %v5757_v42, %v5753_v39  ;;  %v5756_v44 = vld [vmem:[%s13607_s1 + $0x770] sm:$0xff]  ;;  %v5759_v11 = vld [vmem:[%s13607_s1 + $0x788] sm:$0xff] }
 0xcb3   :  { %7715 = vmatprep.subr.bf16.mxu0 %v13060_v22  ;;  %7779 = vmatprep.subr.bf16.mxu1 %v13062_v34  ;;  %14021 = vst [vmem:[#allocation29_spill] sm:$0xff] %v13405_v13  ;;  %14022 = vst [vmem:[#allocation16_spill] sm:$0xff] %v13418_v12  ;;  %v5763_v39 = vld [vmem:[%s13607_s1 + $0x7a8] sm:$0xff] }
 0xcb4   :  { %14023 = vst [vmem:[#allocation6_spill] sm:$0xff] %v13420_v43 }
 0xcb6   :  { %7717 = vmatpush1.bf16.msra.mxu0 %v13075_v41  ;;  %7781 = vmatpush1.bf16.msra.mxu1 %v13077_v38 }
 0xcb7   :  { %7719 = vmatprep.subr.bf16.mxu0 %v13092_v35  ;;  %7783 = vmatprep.subr.bf16.mxu1 %v13103_v3 }
 0xcba   :  { %7721 = vmatpush1.bf16.msra.mxu0 %v13105_v10  ;;  %7785 = vmatpush1.bf16.msra.mxu1 %v13114_v6 }
 0xcbb   :  { %7723 = vmatprep.subr.bf16.mxu0 %v13128_v24  ;;  %7787 = vmatprep.subr.bf16.mxu1 %v13139_v9 }
 0xcbe   :  { %7725 = vmatpush1.bf16.msra.mxu0 %v13141_v50  ;;  %7789 = vmatpush1.bf16.msra.mxu1 %v13150_v0 }
 0xcbf   :  { %7727 = vmatprep.subr.bf16.mxu0 %v13164_v19  ;;  %7791 = vmatprep.subr.bf16.mxu1 %v13175_v61 }
 0xcc2   :  { %7729 = vmatpush1.bf16.msra.mxu0 %v13177_v23  ;;  %7793 = vmatpush1.bf16.msra.mxu1 %v13186_v27 }
 0xcc3   :  { %7731 = vmatprep.subr.bf16.mxu0 %v13200_v55  ;;  %7795 = vmatprep.subr.bf16.mxu1 %v13211_v57 }
 0xcc6   :  { %7733 = vmatpush1.bf16.msra.mxu0 %v13213_v21  ;;  %7797 = vmatpush1.bf16.msra.mxu1 %v13222_v7 }
 0xcc7   :  { %7735 = vmatprep.subr.bf16.mxu0 %v13236_v46  ;;  %7799 = vmatprep.subr.bf16.mxu1 %v13247_v4 }
 0xcca   :  { %7737 = vmatpush1.bf16.msra.mxu0 %v13249_v2  ;;  %7801 = vmatpush1.bf16.msra.mxu1 %v13258_v40 }
 0xccb   :  { %7739 = vmatprep.subr.bf16.mxu0 %v13272_v30  ;;  %7803 = vmatprep.subr.bf16.mxu1 %v13283_v60 }
 0xcce   :  { %7741 = vmatpush1.bf16.msra.mxu0 %v13285_v56  ;;  %7805 = vmatpush1.bf16.msra.mxu1 %v13294_v31 }
 0xccf   :  { %7743 = vmatprep.subr.bf16.mxu0 %v13308_v17  ;;  %7807 = vmatprep.subr.bf16.mxu1 %v13319_v33 }
 0xcd2   :  { %7745 = vmatpush1.bf16.msra.mxu0 %v13321_v52  ;;  %7809 = vmatpush1.bf16.msra.mxu1 %v13330_v29 }
 0xcd3   :  { %7747 = vmatprep.subr.bf16.mxu0 %v13344_v53  ;;  %7811 = vmatprep.subr.bf16.mxu1 %v13355_v28  ;;  %v5770_v28 = vld [vmem:[%s13607_s1 + $0x7e0] sm:$0xff] }
 0xcd6   :  { %7749 = vmatpush1.bf16.msra.mxu0 %v13357_v15  ;;  %7813 = vmatpush1.bf16.msra.mxu1 %v13366_v20  ;;  %v5752_v20 = vld [vmem:[%s13607_s1 + $0x750] sm:$0xff] }
 0xcd7   :  { %7751 = vmatprep.subr.bf16.mxu0 %v13380_v62  ;;  %7815 = vmatprep.subr.bf16.mxu1 %v13391_v47  ;;  %v5754_v62 = vld [vmem:[%s13607_s1 + $0x760] sm:$0xff]  ;;  %v13445_v42 = vpack.c.bf16 %v5756_v44, %v5752_v20  ;;  %v5760_v44 = vld [vmem:[%s13607_s1 + $0x790] sm:$0xff] }
 0xcd8   :  { %v13432_v47 = vpack.c.bf16 %v5754_v62, %v5750_v5  ;;  %v13447_v62 = vpack.c.bf16 %v5763_v39, %v5759_v11  ;;  %v5761_v5 = vld [vmem:[%s13607_s1 + $0x798] sm:$0xff]  ;;  %v5762_v20 = vld [vmem:[%s13607_s1 + $0x7a0] sm:$0xff]  ;;  %v5764_v11 = vld [vmem:[%s13607_s1 + $0x7b0] sm:$0xff] }
 0xcd9   :  { %14025 = vst [vmem:[#allocation13_spill] sm:$0xff] %v13445_v42 }
 0xcda   :  { %7753 = vmatpush1.bf16.msra.mxu0 %v13393_v63  ;;  %7817 = vmatpush1.bf16.msra.mxu1 %v13405_v13  ;;  %14024 = vst [vmem:[#allocation7_spill] sm:$0xff] %v13432_v47  ;;  %v5765_v13 = vld [vmem:[%s13607_s1 + $0x7b8] sm:$0xff]  ;;  %v5758_v63 = vld [vmem:[%s13607_s1 + $0x780] sm:$0xff] }
 0xcdb   :  { %7755 = vmatprep.subr.bf16.mxu0 %v13418_v12  ;;  %7819 = vmatprep.subr.bf16.mxu1 %v13420_v43  ;;  %v13458_v15 = vpack.c.bf16 %v5765_v13, %v5761_v5  ;;  %v13470_v39 = vpack.c.bf16 %v5762_v20, %v5758_v63  ;;  %v5767_v13 = vld [vmem:[%s13607_s1 + $0x7c8] sm:$0xff]  ;;  %v5769_v43 = vld [vmem:[%s13607_s1 + $0x7d8] sm:$0xff]  ;;  %v13483_v12 = vpack.c.bf16 %v5764_v11, %v5760_v44  ;;  %v5768_v44 = vld [vmem:[%s13607_s1 + $0x7d0] sm:$0xff] }
 0xcdc   :  { %v5771_v5 = vld [vmem:[%s13607_s1 + $0x7e8] sm:$0xff]  ;;  %v5773_v20 = vld [vmem:[%s13607_s1 + $0x7f8] sm:$0xff]  ;;  %v5772_v11 = vld [vmem:[%s13607_s1 + $0x7f0] sm:$0xff] }
 0xcdd   :  { %14026 = vst [vmem:[#allocation3_spill] sm:$0xff] %v13458_v15  ;;  %14027 = vst [vmem:[#allocation27_spill] sm:$0xff] %v13470_v39  ;;  %v13485_v63 = vpack.c.bf16 %v5771_v5, %v5767_v13  ;;  %v13510_v5 = vpack.c.bf16 %v5772_v11, %v5768_v44 }
 0xcde   :  { %7757 = vmatpush1.bf16.msra.mxu0 %v13432_v47  ;;  %7821 = vmatpush1.bf16.msra.mxu1 %v13445_v42  ;;  %14028 = vst [vmem:[#allocation9_spill] sm:$0xff] %v13483_v12  ;;  %v5766_v47 = vld [vmem:[%s13607_s1 + $0x7c0] sm:$0xff]  ;;  %v13497_v42 = vpack.c.bf16 %v5773_v20, %v5769_v43 }
 0xcdf   :  { %7759 = vmatprep.subr.bf16.mxu0 %v13447_v62  ;;  %14029 = vst [vmem:[#allocation26_spill] sm:$0xff] %v13485_v63  ;;  %7823 = vmatprep.subr.bf16.mxu1 %v13458_v15  ;;  %v13506_v13 = vpack.c.bf16 %v5770_v28, %v5766_v47  ;;  %14032 = vst [vmem:[#allocation17_spill] sm:$0xff] %v13510_v5 }
 0xce0   :  { %14030 = vst [vmem:[#allocation24_spill] sm:$0xff] %v13497_v42 }
 0xce1   :  { %14031 = vst [vmem:[#allocation14_spill] sm:$0xff] %v13506_v13 }
 0xce2   :  { %7761 = vmatpush1.bf16.msra.mxu0 %v13470_v39  ;;  %7825 = vmatpush1.bf16.msra.mxu1 %v13483_v12 }
 0xce3   :  { %7763 = vmatprep.subr.bf16.mxu0 %v13485_v63  ;;  %7827 = vmatprep.subr.bf16.mxu1 %v13497_v42 }
 0xce6   :  { %7765 = vmatpush1.bf16.msra.mxu0 %v13506_v13  ;;  %7829 = vmatpush1.bf16.msra.mxu1 %v13510_v5 }
 0xce7   :  { %7831 = vmatprep.subr.bf16.mxu0 %v12938_v8  ;;  %7895 = vmatprep.subr.bf16.mxu1 %v12943_v16 }
 0xd7c   :  { %v4130_v43 = vpop.f32.mrb[26].mxu0  ;;  %v4201_v20 = vpop.f32.mrb[26].mxu1 }
 0xd7d   :  { %v4131_v28 = vadd.f32 %v4130_v43, %v14013_v59  ;;  %v4132_v47 = vpop.f32.mrb[27].mxu0  ;;  %v4203_v12 = vpop.f32.mrb[27].mxu1  ;;  %v4202_v5 = vadd.f32 %v4201_v20, %v11629_v25 }
 0xd7e   :  { %v4133_v63 = vadd.f32 %v4132_v47, %v11618_v36  ;;  %v4204_v13 = vadd.f32 %v4203_v12, %v11624_v54 }
 0xd7f   :  { %v5643_v44 = vmul.f32 -1.442695, %v4131_v28 }
 0xd80   :  { %v5644_v11 = vmul.f32 -1.442695, %v4133_v63  ;;  %v5645_v42 = vmul.f32 -1.442695, %v4204_v13 }
 0xd81   :  { %8167 = vpow2.f32 %v5643_v44 }
 0xd82   :  { %8169 = vpow2.f32 %v5644_v11 }
 0xd83   :  { %8171 = vpow2.f32 %v5645_v42 }
 0xd84   :  { %8173 = vtanh.f32 %v4202_v5 }
 0xd8b   :  { %v8168_v8 = vpop.eup %8167 }
 0xd8c   :  { %v8170_v39 = vpop.eup %8169  ;;  %v4209_v16 = vadd.f32 1.0, %v8168_v8 }
 0xd8d   :  { %v4215_v15 = vadd.f32 1.0, %v8170_v39  ;;  %v8172_v43 = vpop.eup %8171  ;;  %v14033_v39 = vld [vmem:[#allocation20_spill] sm:$0xff] }
 0xd8e   :  { %8175 = vrcp.f32 %v4209_v16  ;;  %v8174_v59 = vpop.eup %8173  ;;  %v4222_v44 = vadd.f32 1.0, %v8172_v43 }
 0xd8f   :  { %8177 = vrcp.f32 %v4215_v15  ;;  %v8215_v15 = vld [vmem:[%s13611_s3] sm:$0xff] }
 0xd90   :  { %8179 = vrcp.f32 %v4222_v44 }
 0xd98   :  { %v8176_v47 = vpop.eup %8175 }
 0xd99   :  { %v8178_v28 = vpop.eup %8177  ;;  %v4226_v63 = vmul.f32 %v8176_v47, %v8174_v59  ;;  %v14034_v59 = vld [vmem:[#allocation19_spill] sm:$0xff] }
 0xd9a   :  { %v4225_v11 = vmul.f32 %v8178_v28, %v12952_v14  ;;  %v8180_v13 = vpop.eup %8179  ;;  %v14035_v14 = vld [vmem:[#allocation18_spill] sm:$0xff] }
 0xd9c   :  { %v13522_v12 = vadd.f32 %v4226_v63, %v4225_v11 }
 0xd9e   :  { %8181 = vtanh.f32 %v13522_v12 }
 0xda8   :  { %v8182_v20 = vpop.eup %8181 }
 0xda9   :  { %v4229_v42 = vmul.f32 %v8182_v20, %v8180_v13 }
 0xdab   :  { %4424 = vmatprep.mubr.f32.mxu0 %v4229_v42  ;;  %4495 = vmatprep.mubr.f32.mxu1 %v4229_v42 }
 0xdac   :  { %4425 = vmatmul.mubr.f32.vlgmr.msra.gmra.mrb[28].mxu0 %v14033_v39  ;;  %4496 = vmatmul.mubr.f32.vlgmr.msra.gmra.mrb[28].mxu1 %v14033_v39 }
 0xdad   :  { %7833 = vmatpush1.bf16.msra.mxu0 %v12979_v58  ;;  %7897 = vmatpush1.bf16.msra.mxu1 %v12981_v26  ;;  %v14036_v58 = vld [vmem:[#allocation15_spill] sm:$0xff]  ;;  %v14037_v26 = vld [vmem:[#allocation22_spill] sm:$0xff] }
 0xdae   :  { %7835 = vmatprep.subr.bf16.mxu0 %v12989_v48  ;;  %7899 = vmatprep.subr.bf16.mxu1 %v12991_v51  ;;  %v14038_v48 = vld [vmem:[#allocation4_spill] sm:$0xff]  ;;  %v14039_v51 = vld [vmem:[#allocation5_spill] sm:$0xff] }
 0xdb1   :  { %7837 = vmatpush1.bf16.msra.mxu0 %v13015_v18  ;;  %7901 = vmatpush1.bf16.msra.mxu1 %v13017_v37  ;;  %v14040_v18 = vld [vmem:[#allocation29_spill] sm:$0xff]  ;;  %v14041_v37 = vld [vmem:[#allocation16_spill] sm:$0xff] }
 0xdb2   :  { %7839 = vmatprep.subr.bf16.mxu0 %v13027_v45  ;;  %7903 = vmatprep.subr.bf16.mxu1 %v13029_v32  ;;  %v14042_v45 = vld [vmem:[#allocation6_spill] sm:$0xff]  ;;  %v14043_v32 = vld [vmem:[#allocation7_spill] sm:$0xff] }
 0xdb5   :  { %7841 = vmatpush1.bf16.msra.mxu0 %v13051_v1  ;;  %7905 = vmatpush1.bf16.msra.mxu1 %v13053_v49  ;;  %v14044_v1 = vld [vmem:[#allocation13_spill] sm:$0xff]  ;;  %v14045_v49 = vld [vmem:[#allocation3_spill] sm:$0xff] }
 0xdb6   :  { %7843 = vmatprep.subr.bf16.mxu0 %v13060_v22  ;;  %7907 = vmatprep.subr.bf16.mxu1 %v13062_v34  ;;  %v14046_v22 = vld [vmem:[#allocation27_spill] sm:$0xff]  ;;  %v14047_v34 = vld [vmem:[#allocation9_spill] sm:$0xff] }
 0xdb9   :  { %7845 = vmatpush1.bf16.msra.mxu0 %v13075_v41  ;;  %7909 = vmatpush1.bf16.msra.mxu1 %v13077_v38  ;;  %v14048_v41 = vld [vmem:[#allocation26_spill] sm:$0xff]  ;;  %v14049_v38 = vld [vmem:[#allocation24_spill] sm:$0xff] }
 0xdba   :  { %7847 = vmatprep.subr.bf16.mxu0 %v13092_v35  ;;  %7911 = vmatprep.subr.bf16.mxu1 %v13103_v3  ;;  %v14050_v35 = vld [vmem:[#allocation14_spill] sm:$0xff]  ;;  %v14051_v3 = vld [vmem:[#allocation17_spill] sm:$0xff] }
 0xdbd   :  { %7849 = vmatpush1.bf16.msra.mxu0 %v13105_v10  ;;  %7913 = vmatpush1.bf16.msra.mxu1 %v13114_v6 }
 0xdbe   :  { %7851 = vmatprep.subr.bf16.mxu0 %v13128_v24  ;;  %7915 = vmatprep.subr.bf16.mxu1 %v13139_v9  ;;  %v14052_v24 = vld [vmem:[#allocation11_spill] sm:$0xff] }
 0xdc1   :  { %7853 = vmatpush1.bf16.msra.mxu0 %v13141_v50  ;;  %7917 = vmatpush1.bf16.msra.mxu1 %v13150_v0 }
 0xdc2   :  { %7855 = vmatprep.subr.bf16.mxu0 %v13164_v19  ;;  %7919 = vmatprep.subr.bf16.mxu1 %v13175_v61 }
 0xdc5   :  { %7857 = vmatpush1.bf16.msra.mxu0 %v13177_v23  ;;  %7921 = vmatpush1.bf16.msra.mxu1 %v13186_v27 }
 0xdc6   :  { %7859 = vmatprep.subr.bf16.mxu0 %v13200_v55  ;;  %7923 = vmatprep.subr.bf16.mxu1 %v13211_v57 }
 0xdc9   :  { %7861 = vmatpush1.bf16.msra.mxu0 %v13213_v21  ;;  %7925 = vmatpush1.bf16.msra.mxu1 %v13222_v7 }
 0xdca   :  { %7863 = vmatprep.subr.bf16.mxu0 %v13236_v46  ;;  %7927 = vmatprep.subr.bf16.mxu1 %v13247_v4 }
 0xdcd   :  { %7865 = vmatpush1.bf16.msra.mxu0 %v13249_v2  ;;  %7929 = vmatpush1.bf16.msra.mxu1 %v13258_v40 }
 0xdce   :  { %7867 = vmatprep.subr.bf16.mxu0 %v13272_v30  ;;  %7931 = vmatprep.subr.bf16.mxu1 %v13283_v60 }
 0xdd1   :  { %7869 = vmatpush1.bf16.msra.mxu0 %v13285_v56  ;;  %7933 = vmatpush1.bf16.msra.mxu1 %v13294_v31 }
 0xdd2   :  { %7871 = vmatprep.subr.bf16.mxu0 %v13308_v17  ;;  %7935 = vmatprep.subr.bf16.mxu1 %v13319_v33 }
 0xdd5   :  { %7873 = vmatpush1.bf16.msra.mxu0 %v13321_v52  ;;  %7937 = vmatpush1.bf16.msra.mxu1 %v13330_v29 }
 0xdd6   :  { %7875 = vmatprep.subr.bf16.mxu0 %v13344_v53  ;;  %7939 = vmatprep.subr.bf16.mxu1 %v14034_v59 }
 0xdd9   :  { %7877 = vmatpush1.bf16.msra.mxu0 %v14035_v14  ;;  %7941 = vmatpush1.bf16.msra.mxu1 %v14036_v58 }
 0xdda   :  { %7879 = vmatprep.subr.bf16.mxu0 %v14037_v26  ;;  %7943 = vmatprep.subr.bf16.mxu1 %v14038_v48 }
 0xddd   :  { %7881 = vmatpush1.bf16.msra.mxu0 %v14039_v51  ;;  %7945 = vmatpush1.bf16.msra.mxu1 %v14040_v18 }
 0xdde   :  { %7883 = vmatprep.subr.bf16.mxu0 %v14041_v37  ;;  %7947 = vmatprep.subr.bf16.mxu1 %v14042_v45 }
 0xde1   :  { %7885 = vmatpush1.bf16.msra.mxu0 %v14043_v32  ;;  %7949 = vmatpush1.bf16.msra.mxu1 %v14044_v1 }
 0xde2   :  { %7887 = vmatprep.subr.bf16.mxu0 %v13447_v62  ;;  %7951 = vmatprep.subr.bf16.mxu1 %v14045_v49 }
 0xde5   :  { %7889 = vmatpush1.bf16.msra.mxu0 %v14046_v22  ;;  %7953 = vmatpush1.bf16.msra.mxu1 %v14047_v34 }
 0xde6   :  { %7891 = vmatprep.subr.bf16.mxu0 %v14048_v41  ;;  %7955 = vmatprep.subr.bf16.mxu1 %v14049_v38 }
 0xde9   :  { %7893 = vmatpush1.bf16.msra.mxu0 %v14050_v35  ;;  %7957 = vmatpush1.bf16.msra.mxu1 %v14051_v3 }
 0xe7f   :  { %v4426_v10 = vpop.f32.mrb[28].mxu0  ;;  %v4497_v6 = vpop.f32.mrb[28].mxu1 }
 0xe80   :  { %v4427_v9 = vadd.f32 %v4426_v10, %v14052_v24  ;;  %v4428_v50 = vpop.f32.mrb[29].mxu0  ;;  %v4499_v0 = vpop.f32.mrb[29].mxu1  ;;  %v4498_v57 = vadd.f32 %v4497_v6, %v11629_v25 }
 0xe81   :  { %v4429_v19 = vadd.f32 %v4428_v50, %v11618_v36  ;;  %v4500_v27 = vadd.f32 %v4499_v0, %v11624_v54 }
 0xe82   :  { %v5774_v61 = vmul.f32 -1.442695, %v4427_v9 }
 0xe83   :  { %v5775_v23 = vmul.f32 -1.442695, %v4429_v19  ;;  %v5776_v55 = vmul.f32 -1.442695, %v4500_v27 }
 0xe84   :  { %8183 = vpow2.f32 %v5774_v61 }
 0xe85   :  { %8185 = vpow2.f32 %v5775_v23 }
 0xe86   :  { %8187 = vpow2.f32 %v5776_v55 }
 0xe87   :  { %8189 = vtanh.f32 %v4498_v57 }
 0xe8e   :  { %v8184_v21 = vpop.eup %8183 }
 0xe8f   :  { %v8186_v7 = vpop.eup %8185  ;;  %v4505_v46 = vadd.f32 1.0, %v8184_v21 }
 0xe90   :  { %v4511_v4 = vadd.f32 1.0, %v8186_v7  ;;  %v8188_v2 = vpop.eup %8187 }
 0xe91   :  { %8191 = vrcp.f32 %v4505_v46  ;;  %v8190_v40 = vpop.eup %8189  ;;  %v4518_v31 = vadd.f32 1.0, %v8188_v2 }
 0xe92   :  { %8193 = vrcp.f32 %v4511_v4 }
 0xe93   :  { %8195 = vrcp.f32 %v4518_v31 }
 0xe9b   :  { %v8192_v30 = vpop.eup %8191 }
 0xe9c   :  { %v8194_v60 = vpop.eup %8193  ;;  %v4522_v56 = vmul.f32 %v8192_v30, %v8190_v40 }
 0xe9d   :  { %v4521_v17 = vmul.f32 %v8194_v60, %v13522_v12  ;;  %v8196_v52 = vpop.eup %8195 }
 0xe9f   :  { %v4523_v33 = vadd.f32 %v4522_v56, %v4521_v17 }
 0xea1   :  { %8197 = vtanh.f32 %v4523_v33 }
 0xeab   :  { %v8198_v29 = vpop.eup %8197 }
 0xeac   :  { %v4525_v53 = vmul.f32 %v8198_v29, %v8196_v52 }
 0xeae   :  { %4720 = vmatprep.mubr.f32.mxu0 %v4525_v53  ;;  %4791 = vmatprep.mubr.f32.mxu1 %v4525_v53 }
 0xeaf   :  { %4721 = vmatmul.mubr.f32.vlgmr.msra.gmra.mrb[30].mxu0 %v8215_v15  ;;  %4792 = vmatmul.mubr.f32.vlgmr.msra.gmra.mrb[30].mxu1 %v8215_v15 }
 0xf82   :  { %v4722_v62 = vpop.f32.mrb[30].mxu0  ;;  %v4793_v5 = vpop.f32.mrb[30].mxu1 }
 0xf83   :  { %v4723_v8 = vadd.f32 %v4722_v62, %v14052_v24  ;;  %v4724_v16 = vpop.f32.mrb[31].mxu0  ;;  %v4795_v43 = vpop.f32.mrb[31].mxu1  ;;  %v4794_v12 = vadd.f32 %v4793_v5, %v11629_v25 }
 0xf84   :  { %v4725_v47 = vadd.f32 %v4724_v16, %v11618_v36  ;;  %v4796_v44 = vadd.f32 %v4795_v43, %v11624_v54 }
 0xf85   :  { %v5905_v28 = vmul.f32 -1.442695, %v4723_v8 }
 0xf86   :  { %v5906_v63 = vmul.f32 -1.442695, %v4725_v47  ;;  %v5907_v11 = vmul.f32 -1.442695, %v4796_v44 }
 0xf87   :  { %8199 = vpow2.f32 %v5905_v28 }
 0xf88   :  { %8201 = vpow2.f32 %v5906_v63 }
 0xf89   :  { %8203 = vpow2.f32 %v5907_v11 }
 0xf8a   :  { %8205 = vtanh.f32 %v4794_v12 }
 0xf91   :  { %v8200_v13 = vpop.eup %8199 }
 0xf92   :  { %v8202_v20 = vpop.eup %8201  ;;  %v4801_v42 = vadd.f32 1.0, %v8200_v13 }
 0xf93   :  { %v4807_v39 = vadd.f32 1.0, %v8202_v20  ;;  %v8204_v59 = vpop.eup %8203 }
 0xf94   :  { %8207 = vrcp.f32 %v4801_v42  ;;  %v8206_v14 = vpop.eup %8205  ;;  %v4814_v48 = vadd.f32 1.0, %v8204_v59 }
 0xf95   :  { %8209 = vrcp.f32 %v4807_v39 }
 0xf96   :  { %8211 = vrcp.f32 %v4814_v48 }
 0xf9e   :  { %v8208_v36 = vpop.eup %8207 }
 0xf9f   :  { %v8210_v58 = vpop.eup %8209  ;;  %v4818_v26 = vmul.f32 %v8208_v36, %v8206_v14 }
 0xfa0   :  { %v4817_v51 = vmul.f32 %v8210_v58, %v4523_v33  ;;  %v8212_v54 = vpop.eup %8211 }
 0xfa2   :  { %v4819_v18 = vadd.f32 %v4818_v26, %v4817_v51 }
 0xfa4   :  { %8213 = vtanh.f32 %v4819_v18  ;;  %5909 = vst [vmem:[%s13610_s4 + $0x8] sm:$0xff] %v4819_v18 }
 0xfae   :  { %v8214_v25 = vpop.eup %8213 }
 0xfaf   :  { %v4821_v37 = vmul.f32 %v8214_v25, %v8212_v54 }
 0xfb1   :  { %5908 = vst [vmem:[%s13611_s3 + $0x8] sm:$0xff] %v4821_v37 }

</bundles_post_ra>
